<compile_context>
chip_gen: v7x
topology: tpu7x:2x2x1
jax: 0.10.0
libtpu: 0.0.40
codegen_flags: <defaults>
</compile_context>

<pallas_src>
import numpy as np

import jax
import jax.numpy as jnp
from jax import lax
from jax.experimental import pallas as pl
from jax.experimental.pallas import tpu as pltpu

# Small, shape-consistent dims (module defaults were 128 / 256 / 256).
INPUT_DIM = 32
HIDDEN_DIM = 32              # GRU hidden size per direction = HIDDEN_DIM // 2
OUTPUT_DIM = 32

H = HIDDEN_DIM // 2          # per-direction hidden (16)
H2 = 2 * H                   # fwd || bwd hidden width (32)
S = 128                      # lane slab width
GW = 3 * S                   # packed gate width: [ r-slab | z-slab | n-slab ]
BP = 8                       # batch padded to one sublane tile

# Row offsets inside the single packed parameter buffer (all multiples of 8).
R_W1F = 0                          # (Din, GW)  layer-1 fwd input proj
R_W1B = R_W1F + INPUT_DIM          # (Din, GW)  layer-1 bwd input proj
R_W1H = R_W1B + INPUT_DIM          # (2H, GW)   layer-1 hidden proj (block-diag)
R_W2I = R_W1H + H2                 # (4H, GW)   layer-2 input proj
R_W2H = R_W2I + 2 * H2             # (2H, GW)   layer-2 hidden proj
R_WFC = R_W2H + H2                 # (2H, GW)   fc weight (cols 0:O used)
R_BIAS = R_WFC + H2                # 8 bias rows (see _pack_params)
N_ROWS = R_BIAS + 8


# --------------------------------------------------------------------------
# Kernel
# --------------------------------------------------------------------------
def _voice_encoder_kernel(x_ref, wpk_ref, out_ref, gi1_scr, gi2_scr):
    """x_ref:   (T*BP, Din)   time-major, batch padded to BP rows per step
       wpk_ref: (N_ROWS, GW)  single packed parameter buffer
       out_ref: (BP, S)       fc output (cols 0:OUTPUT_DIM valid)
       gi1_scr: (T*BP, 2*GW)  layer-1 bulk gate inputs (fwd half | bwd half)
       gi2_scr: (T*BP, GW)    layer-2 bulk gate inputs (combined)"""
    T = x_ref.shape[0] // BP
    HI = lax.Precision.HIGHEST

    def hdot(a, b):
        # Off-chain matmuls only: full-precision passes are hidden.
        return jnp.dot(a, b, preferred_element_type=jnp.float32, precision=HI)

    # ---- layer-1 bulk gate-input projections (one x copy, off the chain) ----
    x = x_ref[...]                                               # (T*BP, Din)
    w1f = wpk_ref[R_W1F:R_W1F + INPUT_DIM, :]
    w1b = wpk_ref[R_W1B:R_W1B + INPUT_DIM, :]
    b1f = wpk_ref[R_BIAS + 0:R_BIAS + 1, :]
    b1b = wpk_ref[R_BIAS + 1:R_BIAS + 2, :]
    gi1_scr[:, 0:GW] = hdot(x, w1f) + b1f            # fwd gates, time order
    gi1_scr[:, GW:2 * GW] = hdot(x, w1b) + b1b       # bwd gates, time order

    def fused_bidir(whh_row, bhn_row, gi_of, store):
        """Fused fwd+bwd GRU over precomputed gate inputs.

        Gate layout (width GW): [ r-slab | z-slab | n-slab ], fwd at lanes 0:H,
        bwd at H:2H of each slab, padding lanes identically zero.
        h2 = [h_f || h_b || 0-pad] lives in one (BP, S) tile; iteration i
        advances forward time i and backward time T-1-i simultaneously.
        Padding lanes stay exactly 0 across steps (sigmoid(0)=.5, tanh(0)=0).
        """
        bhn = jnp.broadcast_to(wpk_ref[bhn_row:bhn_row + 1, 0:S], (BP, S))
        h2 = jnp.zeros((BP, S), jnp.float32)
        hist = []
        for i in range(T):                    # static unroll: T is small here
            gi = gi_of(i)                                         # (BP, GW)
            whh = wpk_ref[whh_row:whh_row + H2, :]                # (2H, GW)
            # On-chain matmul: default MXU precision (single pass).
            gh = jnp.dot(h2[:, 0:H2], whh,
                         preferred_element_type=jnp.float32)
            rz = jax.nn.sigmoid(gi[:, 0:2 * S] + gh[:, 0:2 * S])
            r = rz[:, 0:S]
            z = rz[:, S:2 * S]
            n = jnp.tanh(gi[:, 2 * S:3 * S] + r * (gh[:, 2 * S:3 * S] + bhn))
            h2 = n + z * (h2 - n)             # == (1-z)*n + z*h2
            hist.append(h2)
            if store is not None:
                store(i, hist)
        return h2

    # ---- layer 1 -------------------------------------------------------------
    def gi1_of(i):
        # fwd gates for time i  +  bwd gates for time T-1-i (disjoint lanes).
        gf = gi1_scr[i * BP:(i + 1) * BP, 0:GW]
        gb = gi1_scr[(T - 1 - i) * BP:(T - i) * BP, GW:2 * GW]
        return gf + gb

    def l1_store(i, hist):
        # As soon as both fused halves of time blocks {i, T-1-i} exist (second
        # half of the L1 loop), issue their layer-2 gate-input projection.
        # These matmuls are off the recurrence chain and overlap with the L1
        # tail and the start of the L2 loop.
        if 2 * i < T - 1:
            return
        w2i = wpk_ref[R_W2I:R_W2I + 2 * H2, :]                    # (4H, GW)
        b2 = wpk_ref[R_BIAS + 3:R_BIAS + 4, :]
        for blk in sorted({i, T - 1 - i}):
            # LHS cols: [h_f(blk) | h_b(T-1-blk) | h_f(T-1-blk) | h_b(blk)]
            lhs = jnp.concatenate(
                [hist[blk][:, 0:H2], hist[T - 1 - blk][:, 0:H2]], axis=1)
            gi2_scr[blk * BP:(blk + 1) * BP, :] = hdot(lhs, w2i) + b2

    fused_bidir(R_W1H, R_BIAS + 2, gi1_of, l1_store)

    # ---- layer 2 -------------------------------------------------------------
    def gi2_of(i):
        return gi2_scr[i * BP:(i + 1) * BP, :]

    h2_final = fused_bidir(R_W2H, R_BIAS + 4, gi2_of, None)   # [h_f2 || h_b2]

    # ---- fc(lasthidden) ------------------------------------------------------
    wfc = wpk_ref[R_WFC:R_WFC + H2, 0:S]                      # (2H, 128)
    bfc = wpk_ref[R_BIAS + 5:R_BIAS + 6, 0:S]                 # (1, 128)
    out_ref[...] = hdot(h2_final[:, 0:H2], wfc) + bfc


# --------------------------------------------------------------------------
# Parameter packing (wrapper-side, one-time layout prep into ONE buffer)
# --------------------------------------------------------------------------
def _pack_params(params):
    def gate_cols(w_t, lane_off):
        # w_t: (K, 3H) in gate order [r|z|n] -> (K, GW), gate g placed at
        # slab g, lanes lane_off:lane_off+H; everything else zero.
        out = np.zeros((w_t.shape[0], GW), np.float32)
        for g in range(3):
            out[:, g * S + lane_off:g * S + lane_off + H] = w_t[:, g * H:(g + 1) * H]
        return out

    def gate_row(vec, lane_off):
        out = np.zeros((GW,), np.float32)
        for g in range(3):
            out[g * S + lane_off:g * S + lane_off + H] = vec[g * H:(g + 1) * H]
        return out

    def fold_rz(b_ih, b_hh):
        # r/z hidden biases are additive with the input biases; b_hn is not
        # (it sits inside r*(W_hn h + b_hn)) and stays a per-step constant.
        v = np.array(b_ih, np.float32).copy()
        v[:2 * H] += np.asarray(b_hh, np.float32)[:2 * H]
        return v

    w1f, wh1f, b1f, bh1f = [np.asarray(a, np.float32) for a in params["l1f"]]
    w1b, wh1b, b1b, bh1b = [np.asarray(a, np.float32) for a in params["l1b"]]
    w2f, wh2f, b2f, bh2f = [np.asarray(a, np.float32) for a in params["l2f"]]
    w2b, wh2b, b2b, bh2b = [np.asarray(a, np.float32) for a in params["l2b"]]
    w_fc, b_fc = [np.asarray(a, np.float32) for a in params["fc"]]

    wpk = np.zeros((N_ROWS, GW), np.float32)
    # layer-1 input projections (fwd half / bwd half of gi1_scr)
    wpk[R_W1F:R_W1F + INPUT_DIM] = gate_cols(w1f.T, 0)
    wpk[R_W1B:R_W1B + INPUT_DIM] = gate_cols(w1b.T, H)
    # layer-1 hidden proj, block-diagonal over [h_f | h_b]
    wpk[R_W1H:R_W1H + H] = gate_cols(wh1f.T, 0)
    wpk[R_W1H + H:R_W1H + 2 * H] = gate_cols(wh1b.T, H)
    # layer-2 input proj; LHS cols [h_f(i) | h_b(T-1-i) | h_f(T-1-i) | h_b(i)]
    wt2f, wt2b = w2f.T, w2b.T                                   # (2H, 3H)
    wpk[R_W2I + 0 * H:R_W2I + 1 * H] = gate_cols(wt2f[0:H], 0)       # h_f(i)     -> fwd gates
    wpk[R_W2I + 3 * H:R_W2I + 4 * H] = gate_cols(wt2f[H:2 * H], 0)   # h_b(i)     -> fwd gates
    wpk[R_W2I + 2 * H:R_W2I + 3 * H] = gate_cols(wt2b[0:H], H)       # h_f(T-1-i) -> bwd gates
    wpk[R_W2I + 1 * H:R_W2I + 2 * H] = gate_cols(wt2b[H:2 * H], H)   # h_b(T-1-i) -> bwd gates
    # layer-2 hidden proj
    wpk[R_W2H:R_W2H + H] = gate_cols(wh2f.T, 0)
    wpk[R_W2H + H:R_W2H + 2 * H] = gate_cols(wh2b.T, H)
    # fc
    wpk[R_WFC:R_WFC + 2 * H, 0:OUTPUT_DIM] = w_fc.T
    # biases
    wpk[R_BIAS + 0] = gate_row(fold_rz(b1f, bh1f), 0)
    wpk[R_BIAS + 1] = gate_row(fold_rz(b1b, bh1b), H)
    wpk[R_BIAS + 2, 0:H] = bh1f[2 * H:3 * H]
    wpk[R_BIAS + 2, H:2 * H] = bh1b[2 * H:3 * H]
    wpk[R_BIAS + 3] = gate_row(fold_rz(b2f, bh2f), 0) + gate_row(fold_rz(b2b, bh2b), H)
    wpk[R_BIAS + 4, 0:H] = bh2f[2 * H:3 * H]
    wpk[R_BIAS + 4, H:2 * H] = bh2b[2 * H:3 * H]
    wpk[R_BIAS + 5, 0:OUTPUT_DIM] = b_fc
    return jnp.asarray(wpk)


def voice_encoder_forward(x, params):
    """x: (B, T, INPUT_DIM) float32 -> (B, OUTPUT_DIM) float32."""
    B, T, Din = x.shape
    assert Din == INPUT_DIM and B <= BP

    # Time-major, batch padded to one sublane tile (8 rows per time block) so
    # every per-step access in the kernel is a full aligned tile.
    x_tm = jnp.transpose(x, (1, 0, 2)).astype(jnp.float32)        # (T, B, Din)
    x_tm = jnp.pad(x_tm, ((0, 0), (0, BP - B), (0, 0)))           # (T, BP, Din)
    x_flat = x_tm.reshape(T * BP, Din)

    wpk = _pack_params(params)
    vmem = pl.BlockSpec(memory_space=pltpu.MemorySpace.VMEM)

    out = pl.pallas_call(
        _voice_encoder_kernel,
        out_shape=jax.ShapeDtypeStruct((BP, S), jnp.float32),
        in_specs=[vmem, vmem],
        out_specs=vmem,
        scratch_shapes=[
            pltpu.VMEM((T * BP, 2 * GW), jnp.float32),   # layer-1 gate inputs
            pltpu.VMEM((T * BP, GW), jnp.float32),       # layer-2 gate inputs
        ],
    )(x_flat, wpk)
    return out[:B, :OUTPUT_DIM]


# ---------------- deterministic parameter init (PyTorch-style uniform) ----
def init_params(key):
    ks = jax.random.split(key, 18)

    def u(k, shape, bound):
        return jax.random.uniform(k, shape, jnp.float32, -bound, bound)

    kg = 1.0 / (H ** 0.5)
    in_sizes = {"l1f": INPUT_DIM, "l1b": INPUT_DIM, "l2f": 2 * H, "l2b": 2 * H}
    params, idx = {}, 0
    for name in ("l1f", "l1b", "l2f", "l2b"):
        w_ih = u(ks[idx], (3 * H, in_sizes[name]), kg); idx += 1
        w_hh = u(ks[idx], (3 * H, H), kg); idx += 1
        b_ih = u(ks[idx], (3 * H,), kg); idx += 1
        b_hh = u(ks[idx], (3 * H,), kg); idx += 1
        params[name] = (w_ih, w_hh, b_ih, b_hh)
    kf = 1.0 / ((2 * H) ** 0.5)
    params["fc"] = (u(ks[16], (OUTPUT_DIM, 2 * H), kf),
                    u(ks[17], (OUTPUT_DIM,), kf))
    return params


# ---------------- pure-JAX reference (full f32 precision, for correctness) --
def _dot_ref(a, b):
    return jnp.dot(a, b, preferred_element_type=jnp.float32,
                   precision=lax.Precision.HIGHEST)


def _gru_dir_ref(x_tm, w_ih, w_hh, b_ih, b_hh, reverse):
    def step(h, x_t):
        gi = _dot_ref(x_t, w_ih.T) + b_ih
        gh = _dot_ref(h, w_hh.T) + b_hh
        r = jax.nn.sigmoid(gi[:, :H] + gh[:, :H])
        z = jax.nn.sigmoid(gi[:, H:2 * H] + gh[:, H:2 * H])
        n = jnp.tanh(gi[:, 2 * H:] + r * gh[:, 2 * H:])
        h_new = (1.0 - z) * n + z * h
        return h_new, h_new

    _, B, _ = x_tm.shape
    h0 = jnp.zeros((B, H), jnp.float32)
    h_last, outs = lax.scan(step, h0, x_tm, reverse=reverse)
    return outs, h_last


def voice_encoder_ref(x, params):
    x_tm = jnp.transpose(x, (1, 0, 2)).astype(jnp.float32)
    of, _ = _gru_dir_ref(x_tm, *params["l1f"], reverse=False)
    ob, _ = _gru_dir_ref(x_tm, *params["l1b"], reverse=True)
    x2 = jnp.concatenate([of, ob], axis=-1)
    _, hf2 = _gru_dir_ref(x2, *params["l2f"], reverse=False)
    _, hb2 = _gru_dir_ref(x2, *params["l2b"], reverse=True)
    last = jnp.concatenate([hf2, hb2], axis=-1)
    w_fc, b_fc = params["fc"]
    return _dot_ref(last, w_fc.T) + b_fc


if __name__ == "__main__":
    B, T = 2, 8
    key = jax.random.PRNGKey(0)
    kx, kp = jax.random.split(key)
    x = jax.random.normal(kx, (B, T, INPUT_DIM), jnp.float32)
    params = init_params(kp)

    out = voice_encoder_forward(x, params)
    out = jax.block_until_ready(out)
    assert out.shape == (B, OUTPUT_DIM)

    ref = voice_encoder_ref(x, params)
    # The on-chain per-step W_hh matmuls run at default MXU precision (the
    # off-chain projections and fc use HIGHEST), so allow a modest tolerance
    # vs. the full-f32 reference.
    if not jnp.allclose(out, ref, atol=2e-2, rtol=2e-2):
        raise AssertionError(
            f"mismatch vs reference: max abs err = {jnp.max(jnp.abs(out - ref))}")

    print("KERNEL_OK")
</pallas_src>

<mosaic_0001>
module attributes {stable_mosaic.version = 11 : i64} {
  func.func @_voice_encoder_kernel(%arg0: memref<64x32xf32, #tpu.memory_space<vmem>>, %arg1: memref<232x384xf32, #tpu.memory_space<vmem>>, %arg2: memref<8x128xf32, #tpu.memory_space<vmem>>, %arg3: memref<64x768xf32, #tpu.memory_space<vmem>>, %arg4: memref<64x384xf32, #tpu.memory_space<vmem>>) attributes {dimension_semantics = [], scalar_prefetch = 0 : i64, scratch_operands = 2 : i64, tpu.core_type = #tpu.core_type<tc>} {
    %c0 = arith.constant 0 : index
    %c0_0 = arith.constant 0 : index
    %0 = vector.load %arg0[%c0, %c0_0] : memref<64x32xf32, #tpu.memory_space<vmem>>, vector<64x32xf32>
    %c0_1 = arith.constant 0 : index
    %c0_2 = arith.constant 0 : index
    %1 = vector.load %arg1[%c0_1, %c0_2] : memref<232x384xf32, #tpu.memory_space<vmem>>, vector<32x384xf32>
    %c32 = arith.constant 32 : index
    %c0_3 = arith.constant 0 : index
    %2 = vector.load %arg1[%c32, %c0_3] : memref<232x384xf32, #tpu.memory_space<vmem>>, vector<32x384xf32>
    %c224 = arith.constant 224 : index
    %c0_4 = arith.constant 0 : index
    %3 = vector.load %arg1[%c224, %c0_4] : memref<232x384xf32, #tpu.memory_space<vmem>>, vector<1x384xf32>
    %c225 = arith.constant 225 : index
    %c0_5 = arith.constant 0 : index
    %4 = vector.load %arg1[%c225, %c0_5] : memref<232x384xf32, #tpu.memory_space<vmem>>, vector<1x384xf32>
    %cst = arith.constant dense<0.000000e+00> : vector<64x384xf32>
    %5 = tpu.matmul %0, %1, %cst {dimension_numbers = #tpu.dot_dimension_numbers<[1], [0], [0], [1], [0, 0, 1, 1], [], []>, precision = #tpu.contract_precision<fp32>} : vector<64x32xf32>, vector<32x384xf32>, vector<64x384xf32> -> vector<64x384xf32>
    %6 = vector.broadcast %3 : vector<1x384xf32> to vector<64x384xf32>
    %7 = arith.addf %5, %6 : vector<64x384xf32>
    %c0_6 = arith.constant 0 : index
    %c0_7 = arith.constant 0 : index
    %8 = vector.load %arg3[%c0_6, %c0_7] : memref<64x768xf32, #tpu.memory_space<vmem>>, vector<64x384xf32>
    tpu.vector_store %arg3[%c0_6, %c0_7], %7 {strides = array<i32>} : memref<64x768xf32, #tpu.memory_space<vmem>>, vector<64x384xf32>,
    %cst_8 = arith.constant dense<0.000000e+00> : vector<64x384xf32>
    %9 = tpu.matmul %0, %2, %cst_8 {dimension_numbers = #tpu.dot_dimension_numbers<[1], [0], [0], [1], [0, 0, 1, 1], [], []>, precision = #tpu.contract_precision<fp32>} : vector<64x32xf32>, vector<32x384xf32>, vector<64x384xf32> -> vector<64x384xf32>
    %10 = vector.broadcast %4 : vector<1x384xf32> to vector<64x384xf32>
    %11 = arith.addf %9, %10 : vector<64x384xf32>
    %c0_9 = arith.constant 0 : index
    %c384 = arith.constant 384 : index
    %12 = vector.load %arg3[%c0_9, %c384] : memref<64x768xf32, #tpu.memory_space<vmem>>, vector<64x384xf32>
    tpu.vector_store %arg3[%c0_9, %c384], %11 {strides = array<i32>} : memref<64x768xf32, #tpu.memory_space<vmem>>, vector<64x384xf32>,
    %c226 = arith.constant 226 : index
    %c0_10 = arith.constant 0 : index
    %13 = vector.load %arg1[%c226, %c0_10] : memref<232x384xf32, #tpu.memory_space<vmem>>, vector<1x128xf32>
    %14 = vector.shape_cast %13 : vector<1x128xf32> to vector<1x128xf32>
    %15 = vector.broadcast %14 : vector<1x128xf32> to vector<8x128xf32>
    %cst_11 = arith.constant 0.000000e+00 : f32
    %16 = vector.broadcast %cst_11 : f32 to vector<8x128xf32>
    %c0_12 = arith.constant 0 : index
    %c0_13 = arith.constant 0 : index
    %17 = vector.load %arg3[%c0_12, %c0_13] : memref<64x768xf32, #tpu.memory_space<vmem>>, vector<8x384xf32>
    %c56 = arith.constant 56 : index
    %c384_14 = arith.constant 384 : index
    %18 = vector.load %arg3[%c56, %c384_14] : memref<64x768xf32, #tpu.memory_space<vmem>>, vector<8x384xf32>
    %19 = arith.addf %17, %18 : vector<8x384xf32>
    %c64 = arith.constant 64 : index
    %c0_15 = arith.constant 0 : index
    %20 = vector.load %arg1[%c64, %c0_15] : memref<232x384xf32, #tpu.memory_space<vmem>>, vector<32x384xf32>
    %21 = vector.extract_strided_slice %16 {offsets = [0, 0], sizes = [8, 32], strides = [1, 1]} : vector<8x128xf32> to vector<8x32xf32>
    %cst_16 = arith.constant dense<0.000000e+00> : vector<8x384xf32>
    %22 = tpu.matmul %21, %20, %cst_16 {dimension_numbers = #tpu.dot_dimension_numbers<[1], [0], [0], [1], [0, 0, 1, 1], [], []>} : vector<8x32xf32>, vector<32x384xf32>, vector<8x384xf32> -> vector<8x384xf32>
    %23 = vector.extract_strided_slice %19 {offsets = [0, 0], sizes = [8, 256], strides = [1, 1]} : vector<8x384xf32> to vector<8x256xf32>
    %24 = vector.extract_strided_slice %22 {offsets = [0, 0], sizes = [8, 256], strides = [1, 1]} : vector<8x384xf32> to vector<8x256xf32>
    %25 = arith.addf %23, %24 : vector<8x256xf32>
    %26 = arith.negf %25 : vector<8x256xf32>
    %27 = math.exp %26 : vector<8x256xf32>
    %cst_17 = arith.constant 1.000000e+00 : f32
    %28 = vector.broadcast %cst_17 : f32 to vector<8x256xf32>
    %29 = arith.addf %28, %27 : vector<8x256xf32>
    %30 = arith.divf %28, %29 : vector<8x256xf32>
    %31 = vector.extract_strided_slice %30 {offsets = [0, 0], sizes = [8, 128], strides = [1, 1]} : vector<8x256xf32> to vector<8x128xf32>
    %32 = vector.extract_strided_slice %30 {offsets = [0, 128], sizes = [8, 128], strides = [1, 1]} : vector<8x256xf32> to vector<8x128xf32>
    %33 = vector.extract_strided_slice %19 {offsets = [0, 256], sizes = [8, 128], strides = [1, 1]} : vector<8x384xf32> to vector<8x128xf32>
    %34 = vector.extract_strided_slice %22 {offsets = [0, 256], sizes = [8, 128], strides = [1, 1]} : vector<8x384xf32> to vector<8x128xf32>
    %35 = arith.addf %34, %15 : vector<8x128xf32>
    %36 = arith.mulf %31, %35 : vector<8x128xf32>
    %37 = arith.addf %33, %36 : vector<8x128xf32>
    %38 = math.tanh %37 : vector<8x128xf32>
    %39 = arith.subf %16, %38 : vector<8x128xf32>
    %40 = arith.mulf %32, %39 : vector<8x128xf32>
    %41 = arith.addf %38, %40 : vector<8x128xf32>
    %c8 = arith.constant 8 : index
    %c0_18 = arith.constant 0 : index
    %42 = vector.load %arg3[%c8, %c0_18] : memref<64x768xf32, #tpu.memory_space<vmem>>, vector<8x384xf32>
    %c48 = arith.constant 48 : index
    %c384_19 = arith.constant 384 : index
    %43 = vector.load %arg3[%c48, %c384_19] : memref<64x768xf32, #tpu.memory_space<vmem>>, vector<8x384xf32>
    %44 = arith.addf %42, %43 : vector<8x384xf32>
    %c64_20 = arith.constant 64 : index
    %c0_21 = arith.constant 0 : index
    %45 = vector.load %arg1[%c64_20, %c0_21] : memref<232x384xf32, #tpu.memory_space<vmem>>, vector<32x384xf32>
    %46 = vector.extract_strided_slice %41 {offsets = [0, 0], sizes = [8, 32], strides = [1, 1]} : vector<8x128xf32> to vector<8x32xf32>
    %cst_22 = arith.constant dense<0.000000e+00> : vector<8x384xf32>
    %47 = tpu.matmul %46, %45, %cst_22 {dimension_numbers = #tpu.dot_dimension_numbers<[1], [0], [0], [1], [0, 0, 1, 1], [], []>} : vector<8x32xf32>, vector<32x384xf32>, vector<8x384xf32> -> vector<8x384xf32>
    %48 = vector.extract_strided_slice %44 {offsets = [0, 0], sizes = [8, 256], strides = [1, 1]} : vector<8x384xf32> to vector<8x256xf32>
    %49 = vector.extract_strided_slice %47 {offsets = [0, 0], sizes = [8, 256], strides = [1, 1]} : vector<8x384xf32> to vector<8x256xf32>
    %50 = arith.addf %48, %49 : vector<8x256xf32>
    %51 = arith.negf %50 : vector<8x256xf32>
    %52 = math.exp %51 : vector<8x256xf32>
    %cst_23 = arith.constant 1.000000e+00 : f32
    %53 = vector.broadcast %cst_23 : f32 to vector<8x256xf32>
    %54 = arith.addf %53, %52 : vector<8x256xf32>
    %55 = arith.divf %53, %54 : vector<8x256xf32>
    %56 = vector.extract_strided_slice %55 {offsets = [0, 0], sizes = [8, 128], strides = [1, 1]} : vector<8x256xf32> to vector<8x128xf32>
    %57 = vector.extract_strided_slice %55 {offsets = [0, 128], sizes = [8, 128], strides = [1, 1]} : vector<8x256xf32> to vector<8x128xf32>
    %58 = vector.extract_strided_slice %44 {offsets = [0, 256], sizes = [8, 128], strides = [1, 1]} : vector<8x384xf32> to vector<8x128xf32>
    %59 = vector.extract_strided_slice %47 {offsets = [0, 256], sizes = [8, 128], strides = [1, 1]} : vector<8x384xf32> to vector<8x128xf32>
    %60 = arith.addf %59, %15 : vector<8x128xf32>
    %61 = arith.mulf %56, %60 : vector<8x128xf32>
    %62 = arith.addf %58, %61 : vector<8x128xf32>
    %63 = math.tanh %62 : vector<8x128xf32>
    %64 = arith.subf %41, %63 : vector<8x128xf32>
    %65 = arith.mulf %57, %64 : vector<8x128xf32>
    %66 = arith.addf %63, %65 : vector<8x128xf32>
    %c16 = arith.constant 16 : index
    %c0_24 = arith.constant 0 : index
    %67 = vector.load %arg3[%c16, %c0_24] : memref<64x768xf32, #tpu.memory_space<vmem>>, vector<8x384xf32>
    %c40 = arith.constant 40 : index
    %c384_25 = arith.constant 384 : index
    %68 = vector.load %arg3[%c40, %c384_25] : memref<64x768xf32, #tpu.memory_space<vmem>>, vector<8x384xf32>
    %69 = arith.addf %67, %68 : vector<8x384xf32>
    %c64_26 = arith.constant 64 : index
    %c0_27 = arith.constant 0 : index
    %70 = vector.load %arg1[%c64_26, %c0_27] : memref<232x384xf32, #tpu.memory_space<vmem>>, vector<32x384xf32>
    %71 = vector.extract_strided_slice %66 {offsets = [0, 0], sizes = [8, 32], strides = [1, 1]} : vector<8x128xf32> to vector<8x32xf32>
    %cst_28 = arith.constant dense<0.000000e+00> : vector<8x384xf32>
    %72 = tpu.matmul %71, %70, %cst_28 {dimension_numbers = #tpu.dot_dimension_numbers<[1], [0], [0], [1], [0, 0, 1, 1], [], []>} : vector<8x32xf32>, vector<32x384xf32>, vector<8x384xf32> -> vector<8x384xf32>
    %73 = vector.extract_strided_slice %69 {offsets = [0, 0], sizes = [8, 256], strides = [1, 1]} : vector<8x384xf32> to vector<8x256xf32>
    %74 = vector.extract_strided_slice %72 {offsets = [0, 0], sizes = [8, 256], strides = [1, 1]} : vector<8x384xf32> to vector<8x256xf32>
    %75 = arith.addf %73, %74 : vector<8x256xf32>
    %76 = arith.negf %75 : vector<8x256xf32>
    %77 = math.exp %76 : vector<8x256xf32>
    %cst_29 = arith.constant 1.000000e+00 : f32
    %78 = vector.broadcast %cst_29 : f32 to vector<8x256xf32>
    %79 = arith.addf %78, %77 : vector<8x256xf32>
    %80 = arith.divf %78, %79 : vector<8x256xf32>
    %81 = vector.extract_strided_slice %80 {offsets = [0, 0], sizes = [8, 128], strides = [1, 1]} : vector<8x256xf32> to vector<8x128xf32>
    %82 = vector.extract_strided_slice %80 {offsets = [0, 128], sizes = [8, 128], strides = [1, 1]} : vector<8x256xf32> to vector<8x128xf32>
    %83 = vector.extract_strided_slice %69 {offsets = [0, 256], sizes = [8, 128], strides = [1, 1]} : vector<8x384xf32> to vector<8x128xf32>
    %84 = vector.extract_strided_slice %72 {offsets = [0, 256], sizes = [8, 128], strides = [1, 1]} : vector<8x384xf32> to vector<8x128xf32>
    %85 = arith.addf %84, %15 : vector<8x128xf32>
    %86 = arith.mulf %81, %85 : vector<8x128xf32>
    %87 = arith.addf %83, %86 : vector<8x128xf32>
    %88 = math.tanh %87 : vector<8x128xf32>
    %89 = arith.subf %66, %88 : vector<8x128xf32>
    %90 = arith.mulf %82, %89 : vector<8x128xf32>
    %91 = arith.addf %88, %90 : vector<8x128xf32>
    %c24 = arith.constant 24 : index
    %c0_30 = arith.constant 0 : index
    %92 = vector.load %arg3[%c24, %c0_30] : memref<64x768xf32, #tpu.memory_space<vmem>>, vector<8x384xf32>
    %c32_31 = arith.constant 32 : index
    %c384_32 = arith.constant 384 : index
    %93 = vector.load %arg3[%c32_31, %c384_32] : memref<64x768xf32, #tpu.memory_space<vmem>>, vector<8x384xf32>
    %94 = arith.addf %92, %93 : vector<8x384xf32>
    %c64_33 = arith.constant 64 : index
    %c0_34 = arith.constant 0 : index
    %95 = vector.load %arg1[%c64_33, %c0_34] : memref<232x384xf32, #tpu.memory_space<vmem>>, vector<32x384xf32>
    %96 = vector.extract_strided_slice %91 {offsets = [0, 0], sizes = [8, 32], strides = [1, 1]} : vector<8x128xf32> to vector<8x32xf32>
    %cst_35 = arith.constant dense<0.000000e+00> : vector<8x384xf32>
    %97 = tpu.matmul %96, %95, %cst_35 {dimension_numbers = #tpu.dot_dimension_numbers<[1], [0], [0], [1], [0, 0, 1, 1], [], []>} : vector<8x32xf32>, vector<32x384xf32>, vector<8x384xf32> -> vector<8x384xf32>
    %98 = vector.extract_strided_slice %94 {offsets = [0, 0], sizes = [8, 256], strides = [1, 1]} : vector<8x384xf32> to vector<8x256xf32>
    %99 = vector.extract_strided_slice %97 {offsets = [0, 0], sizes = [8, 256], strides = [1, 1]} : vector<8x384xf32> to vector<8x256xf32>
    %100 = arith.addf %98, %99 : vector<8x256xf32>
    %101 = arith.negf %100 : vector<8x256xf32>
    %102 = math.exp %101 : vector<8x256xf32>
    %cst_36 = arith.constant 1.000000e+00 : f32
    %103 = vector.broadcast %cst_36 : f32 to vector<8x256xf32>
    %104 = arith.addf %103, %102 : vector<8x256xf32>
    %105 = arith.divf %103, %104 : vector<8x256xf32>
    %106 = vector.extract_strided_slice %105 {offsets = [0, 0], sizes = [8, 128], strides = [1, 1]} : vector<8x256xf32> to vector<8x128xf32>
    %107 = vector.extract_strided_slice %105 {offsets = [0, 128], sizes = [8, 128], strides = [1, 1]} : vector<8x256xf32> to vector<8x128xf32>
    %108 = vector.extract_strided_slice %94 {offsets = [0, 256], sizes = [8, 128], strides = [1, 1]} : vector<8x384xf32> to vector<8x128xf32>
    %109 = vector.extract_strided_slice %97 {offsets = [0, 256], sizes = [8, 128], strides = [1, 1]} : vector<8x384xf32> to vector<8x128xf32>
    %110 = arith.addf %109, %15 : vector<8x128xf32>
    %111 = arith.mulf %106, %110 : vector<8x128xf32>
    %112 = arith.addf %108, %111 : vector<8x128xf32>
    %113 = math.tanh %112 : vector<8x128xf32>
    %114 = arith.subf %91, %113 : vector<8x128xf32>
    %115 = arith.mulf %107, %114 : vector<8x128xf32>
    %116 = arith.addf %113, %115 : vector<8x128xf32>
    %c32_37 = arith.constant 32 : index
    %c0_38 = arith.constant 0 : index
    %117 = vector.load %arg3[%c32_37, %c0_38] : memref<64x768xf32, #tpu.memory_space<vmem>>, vector<8x384xf32>
    %c24_39 = arith.constant 24 : index
    %c384_40 = arith.constant 384 : index
    %118 = vector.load %arg3[%c24_39, %c384_40] : memref<64x768xf32, #tpu.memory_space<vmem>>, vector<8x384xf32>
    %119 = arith.addf %117, %118 : vector<8x384xf32>
    %c64_41 = arith.constant 64 : index
    %c0_42 = arith.constant 0 : index
    %120 = vector.load %arg1[%c64_41, %c0_42] : memref<232x384xf32, #tpu.memory_space<vmem>>, vector<32x384xf32>
    %121 = vector.extract_strided_slice %116 {offsets = [0, 0], sizes = [8, 32], strides = [1, 1]} : vector<8x128xf32> to vector<8x32xf32>
    %cst_43 = arith.constant dense<0.000000e+00> : vector<8x384xf32>
    %122 = tpu.matmul %121, %120, %cst_43 {dimension_numbers = #tpu.dot_dimension_numbers<[1], [0], [0], [1], [0, 0, 1, 1], [], []>} : vector<8x32xf32>, vector<32x384xf32>, vector<8x384xf32> -> vector<8x384xf32>
    %123 = vector.extract_strided_slice %119 {offsets = [0, 0], sizes = [8, 256], strides = [1, 1]} : vector<8x384xf32> to vector<8x256xf32>
    %124 = vector.extract_strided_slice %122 {offsets = [0, 0], sizes = [8, 256], strides = [1, 1]} : vector<8x384xf32> to vector<8x256xf32>
    %125 = arith.addf %123, %124 : vector<8x256xf32>
    %126 = arith.negf %125 : vector<8x256xf32>
    %127 = math.exp %126 : vector<8x256xf32>
    %cst_44 = arith.constant 1.000000e+00 : f32
    %128 = vector.broadcast %cst_44 : f32 to vector<8x256xf32>
    %129 = arith.addf %128, %127 : vector<8x256xf32>
    %130 = arith.divf %128, %129 : vector<8x256xf32>
    %131 = vector.extract_strided_slice %130 {offsets = [0, 0], sizes = [8, 128], strides = [1, 1]} : vector<8x256xf32> to vector<8x128xf32>
    %132 = vector.extract_strided_slice %130 {offsets = [0, 128], sizes = [8, 128], strides = [1, 1]} : vector<8x256xf32> to vector<8x128xf32>
    %133 = vector.extract_strided_slice %119 {offsets = [0, 256], sizes = [8, 128], strides = [1, 1]} : vector<8x384xf32> to vector<8x128xf32>
    %134 = vector.extract_strided_slice %122 {offsets = [0, 256], sizes = [8, 128], strides = [1, 1]} : vector<8x384xf32> to vector<8x128xf32>
    %135 = arith.addf %134, %15 : vector<8x128xf32>
    %136 = arith.mulf %131, %135 : vector<8x128xf32>
    %137 = arith.addf %133, %136 : vector<8x128xf32>
    %138 = math.tanh %137 : vector<8x128xf32>
    %139 = arith.subf %116, %138 : vector<8x128xf32>
    %140 = arith.mulf %132, %139 : vector<8x128xf32>
    %141 = arith.addf %138, %140 : vector<8x128xf32>
    %c96 = arith.constant 96 : index
    %c0_45 = arith.constant 0 : index
    %142 = vector.load %arg1[%c96, %c0_45] : memref<232x384xf32, #tpu.memory_space<vmem>>, vector<64x384xf32>
    %c227 = arith.constant 227 : index
    %c0_46 = arith.constant 0 : index
    %143 = vector.load %arg1[%c227, %c0_46] : memref<232x384xf32, #tpu.memory_space<vmem>>, vector<1x384xf32>
    %144 = vector.extract_strided_slice %116 {offsets = [0, 0], sizes = [8, 32], strides = [1, 1]} : vector<8x128xf32> to vector<8x32xf32>
    %145 = vector.extract_strided_slice %141 {offsets = [0, 0], sizes = [8, 32], strides = [1, 1]} : vector<8x128xf32> to vector<8x32xf32>
    %146 = tpu.concatenate %144, %145 in 1 : vector<8x32xf32>, vector<8x32xf32> -> vector<8x64xf32>
    %cst_47 = arith.constant dense<0.000000e+00> : vector<8x384xf32>
    %147 = tpu.matmul %146, %142, %cst_47 {dimension_numbers = #tpu.dot_dimension_numbers<[1], [0], [0], [1], [0, 0, 1, 1], [], []>, precision = #tpu.contract_precision<fp32>} : vector<8x64xf32>, vector<64x384xf32>, vector<8x384xf32> -> vector<8x384xf32>
    %148 = vector.broadcast %143 : vector<1x384xf32> to vector<8x384xf32>
    %149 = arith.addf %147, %148 : vector<8x384xf32>
    %c24_48 = arith.constant 24 : index
    %c0_49 = arith.constant 0 : index
    %150 = vector.load %arg4[%c24_48, %c0_49] : memref<64x384xf32, #tpu.memory_space<vmem>>, vector<8x384xf32>
    tpu.vector_store %arg4[%c24_48, %c0_49], %149 {strides = array<i32>} : memref<64x384xf32, #tpu.memory_space<vmem>>, vector<8x384xf32>,
    %151 = vector.extract_strided_slice %141 {offsets = [0, 0], sizes = [8, 32], strides = [1, 1]} : vector<8x128xf32> to vector<8x32xf32>
    %152 = vector.extract_strided_slice %116 {offsets = [0, 0], sizes = [8, 32], strides = [1, 1]} : vector<8x128xf32> to vector<8x32xf32>
    %153 = tpu.concatenate %151, %152 in 1 : vector<8x32xf32>, vector<8x32xf32> -> vector<8x64xf32>
    %cst_50 = arith.constant dense<0.000000e+00> : vector<8x384xf32>
    %154 = tpu.matmul %153, %142, %cst_50 {dimension_numbers = #tpu.dot_dimension_numbers<[1], [0], [0], [1], [0, 0, 1, 1], [], []>, precision = #tpu.contract_precision<fp32>} : vector<8x64xf32>, vector<64x384xf32>, vector<8x384xf32> -> vector<8x384xf32>
    %155 = vector.broadcast %143 : vector<1x384xf32> to vector<8x384xf32>
    %156 = arith.addf %154, %155 : vector<8x384xf32>
    %c32_51 = arith.constant 32 : index
    %c0_52 = arith.constant 0 : index
    %157 = vector.load %arg4[%c32_51, %c0_52] : memref<64x384xf32, #tpu.memory_space<vmem>>, vector<8x384xf32>
    tpu.vector_store %arg4[%c32_51, %c0_52], %156 {strides = array<i32>} : memref<64x384xf32, #tpu.memory_space<vmem>>, vector<8x384xf32>,
    %c40_53 = arith.constant 40 : index
    %c0_54 = arith.constant 0 : index
    %158 = vector.load %arg3[%c40_53, %c0_54] : memref<64x768xf32, #tpu.memory_space<vmem>>, vector<8x384xf32>
    %c16_55 = arith.constant 16 : index
    %c384_56 = arith.constant 384 : index
    %159 = vector.load %arg3[%c16_55, %c384_56] : memref<64x768xf32, #tpu.memory_space<vmem>>, vector<8x384xf32>
    %160 = arith.addf %158, %159 : vector<8x384xf32>
    %c64_57 = arith.constant 64 : index
    %c0_58 = arith.constant 0 : index
    %161 = vector.load %arg1[%c64_57, %c0_58] : memref<232x384xf32, #tpu.memory_space<vmem>>, vector<32x384xf32>
    %162 = vector.extract_strided_slice %141 {offsets = [0, 0], sizes = [8, 32], strides = [1, 1]} : vector<8x128xf32> to vector<8x32xf32>
    %cst_59 = arith.constant dense<0.000000e+00> : vector<8x384xf32>
    %163 = tpu.matmul %162, %161, %cst_59 {dimension_numbers = #tpu.dot_dimension_numbers<[1], [0], [0], [1], [0, 0, 1, 1], [], []>} : vector<8x32xf32>, vector<32x384xf32>, vector<8x384xf32> -> vector<8x384xf32>
    %164 = vector.extract_strided_slice %160 {offsets = [0, 0], sizes = [8, 256], strides = [1, 1]} : vector<8x384xf32> to vector<8x256xf32>
    %165 = vector.extract_strided_slice %163 {offsets = [0, 0], sizes = [8, 256], strides = [1, 1]} : vector<8x384xf32> to vector<8x256xf32>
    %166 = arith.addf %164, %165 : vector<8x256xf32>
    %167 = arith.negf %166 : vector<8x256xf32>
    %168 = math.exp %167 : vector<8x256xf32>
    %cst_60 = arith.constant 1.000000e+00 : f32
    %169 = vector.broadcast %cst_60 : f32 to vector<8x256xf32>
    %170 = arith.addf %169, %168 : vector<8x256xf32>
    %171 = arith.divf %169, %170 : vector<8x256xf32>
    %172 = vector.extract_strided_slice %171 {offsets = [0, 0], sizes = [8, 128], strides = [1, 1]} : vector<8x256xf32> to vector<8x128xf32>
    %173 = vector.extract_strided_slice %171 {offsets = [0, 128], sizes = [8, 128], strides = [1, 1]} : vector<8x256xf32> to vector<8x128xf32>
    %174 = vector.extract_strided_slice %160 {offsets = [0, 256], sizes = [8, 128], strides = [1, 1]} : vector<8x384xf32> to vector<8x128xf32>
    %175 = vector.extract_strided_slice %163 {offsets = [0, 256], sizes = [8, 128], strides = [1, 1]} : vector<8x384xf32> to vector<8x128xf32>
    %176 = arith.addf %175, %15 : vector<8x128xf32>
    %177 = arith.mulf %172, %176 : vector<8x128xf32>
    %178 = arith.addf %174, %177 : vector<8x128xf32>
    %179 = math.tanh %178 : vector<8x128xf32>
    %180 = arith.subf %141, %179 : vector<8x128xf32>
    %181 = arith.mulf %173, %180 : vector<8x128xf32>
    %182 = arith.addf %179, %181 : vector<8x128xf32>
    %c96_61 = arith.constant 96 : index
    %c0_62 = arith.constant 0 : index
    %183 = vector.load %arg1[%c96_61, %c0_62] : memref<232x384xf32, #tpu.memory_space<vmem>>, vector<64x384xf32>
    %c227_63 = arith.constant 227 : index
    %c0_64 = arith.constant 0 : index
    %184 = vector.load %arg1[%c227_63, %c0_64] : memref<232x384xf32, #tpu.memory_space<vmem>>, vector<1x384xf32>
    %185 = vector.extract_strided_slice %91 {offsets = [0, 0], sizes = [8, 32], strides = [1, 1]} : vector<8x128xf32> to vector<8x32xf32>
    %186 = vector.extract_strided_slice %182 {offsets = [0, 0], sizes = [8, 32], strides = [1, 1]} : vector<8x128xf32> to vector<8x32xf32>
    %187 = tpu.concatenate %185, %186 in 1 : vector<8x32xf32>, vector<8x32xf32> -> vector<8x64xf32>
    %cst_65 = arith.constant dense<0.000000e+00> : vector<8x384xf32>
    %188 = tpu.matmul %187, %183, %cst_65 {dimension_numbers = #tpu.dot_dimension_numbers<[1], [0], [0], [1], [0, 0, 1, 1], [], []>, precision = #tpu.contract_precision<fp32>} : vector<8x64xf32>, vector<64x384xf32>, vector<8x384xf32> -> vector<8x384xf32>
    %189 = vector.broadcast %184 : vector<1x384xf32> to vector<8x384xf32>
    %190 = arith.addf %188, %189 : vector<8x384xf32>
    %c16_66 = arith.constant 16 : index
    %c0_67 = arith.constant 0 : index
    %191 = vector.load %arg4[%c16_66, %c0_67] : memref<64x384xf32, #tpu.memory_space<vmem>>, vector<8x384xf32>
    tpu.vector_store %arg4[%c16_66, %c0_67], %190 {strides = array<i32>} : memref<64x384xf32, #tpu.memory_space<vmem>>, vector<8x384xf32>,
    %192 = vector.extract_strided_slice %182 {offsets = [0, 0], sizes = [8, 32], strides = [1, 1]} : vector<8x128xf32> to vector<8x32xf32>
    %193 = vector.extract_strided_slice %91 {offsets = [0, 0], sizes = [8, 32], strides = [1, 1]} : vector<8x128xf32> to vector<8x32xf32>
    %194 = tpu.concatenate %192, %193 in 1 : vector<8x32xf32>, vector<8x32xf32> -> vector<8x64xf32>
    %cst_68 = arith.constant dense<0.000000e+00> : vector<8x384xf32>
    %195 = tpu.matmul %194, %183, %cst_68 {dimension_numbers = #tpu.dot_dimension_numbers<[1], [0], [0], [1], [0, 0, 1, 1], [], []>, precision = #tpu.contract_precision<fp32>} : vector<8x64xf32>, vector<64x384xf32>, vector<8x384xf32> -> vector<8x384xf32>
    %196 = vector.broadcast %184 : vector<1x384xf32> to vector<8x384xf32>
    %197 = arith.addf %195, %196 : vector<8x384xf32>
    %c40_69 = arith.constant 40 : index
    %c0_70 = arith.constant 0 : index
    %198 = vector.load %arg4[%c40_69, %c0_70] : memref<64x384xf32, #tpu.memory_space<vmem>>, vector<8x384xf32>
    tpu.vector_store %arg4[%c40_69, %c0_70], %197 {strides = array<i32>} : memref<64x384xf32, #tpu.memory_space<vmem>>, vector<8x384xf32>,
    %c48_71 = arith.constant 48 : index
    %c0_72 = arith.constant 0 : index
    %199 = vector.load %arg3[%c48_71, %c0_72] : memref<64x768xf32, #tpu.memory_space<vmem>>, vector<8x384xf32>
    %c8_73 = arith.constant 8 : index
    %c384_74 = arith.constant 384 : index
    %200 = vector.load %arg3[%c8_73, %c384_74] : memref<64x768xf32, #tpu.memory_space<vmem>>, vector<8x384xf32>
    %201 = arith.addf %199, %200 : vector<8x384xf32>
    %c64_75 = arith.constant 64 : index
    %c0_76 = arith.constant 0 : index
    %202 = vector.load %arg1[%c64_75, %c0_76] : memref<232x384xf32, #tpu.memory_space<vmem>>, vector<32x384xf32>
    %203 = vector.extract_strided_slice %182 {offsets = [0, 0], sizes = [8, 32], strides = [1, 1]} : vector<8x128xf32> to vector<8x32xf32>
    %cst_77 = arith.constant dense<0.000000e+00> : vector<8x384xf32>
    %204 = tpu.matmul %203, %202, %cst_77 {dimension_numbers = #tpu.dot_dimension_numbers<[1], [0], [0], [1], [0, 0, 1, 1], [], []>} : vector<8x32xf32>, vector<32x384xf32>, vector<8x384xf32> -> vector<8x384xf32>
    %205 = vector.extract_strided_slice %201 {offsets = [0, 0], sizes = [8, 256], strides = [1, 1]} : vector<8x384xf32> to vector<8x256xf32>
    %206 = vector.extract_strided_slice %204 {offsets = [0, 0], sizes = [8, 256], strides = [1, 1]} : vector<8x384xf32> to vector<8x256xf32>
    %207 = arith.addf %205, %206 : vector<8x256xf32>
    %208 = arith.negf %207 : vector<8x256xf32>
    %209 = math.exp %208 : vector<8x256xf32>
    %cst_78 = arith.constant 1.000000e+00 : f32
    %210 = vector.broadcast %cst_78 : f32 to vector<8x256xf32>
    %211 = arith.addf %210, %209 : vector<8x256xf32>
    %212 = arith.divf %210, %211 : vector<8x256xf32>
    %213 = vector.extract_strided_slice %212 {offsets = [0, 0], sizes = [8, 128], strides = [1, 1]} : vector<8x256xf32> to vector<8x128xf32>
    %214 = vector.extract_strided_slice %212 {offsets = [0, 128], sizes = [8, 128], strides = [1, 1]} : vector<8x256xf32> to vector<8x128xf32>
    %215 = vector.extract_strided_slice %201 {offsets = [0, 256], sizes = [8, 128], strides = [1, 1]} : vector<8x384xf32> to vector<8x128xf32>
    %216 = vector.extract_strided_slice %204 {offsets = [0, 256], sizes = [8, 128], strides = [1, 1]} : vector<8x384xf32> to vector<8x128xf32>
    %217 = arith.addf %216, %15 : vector<8x128xf32>
    %218 = arith.mulf %213, %217 : vector<8x128xf32>
    %219 = arith.addf %215, %218 : vector<8x128xf32>
    %220 = math.tanh %219 : vector<8x128xf32>
    %221 = arith.subf %182, %220 : vector<8x128xf32>
    %222 = arith.mulf %214, %221 : vector<8x128xf32>
    %223 = arith.addf %220, %222 : vector<8x128xf32>
    %c96_79 = arith.constant 96 : index
    %c0_80 = arith.constant 0 : index
    %224 = vector.load %arg1[%c96_79, %c0_80] : memref<232x384xf32, #tpu.memory_space<vmem>>, vector<64x384xf32>
    %c227_81 = arith.constant 227 : index
    %c0_82 = arith.constant 0 : index
    %225 = vector.load %arg1[%c227_81, %c0_82] : memref<232x384xf32, #tpu.memory_space<vmem>>, vector<1x384xf32>
    %226 = vector.extract_strided_slice %66 {offsets = [0, 0], sizes = [8, 32], strides = [1, 1]} : vector<8x128xf32> to vector<8x32xf32>
    %227 = vector.extract_strided_slice %223 {offsets = [0, 0], sizes = [8, 32], strides = [1, 1]} : vector<8x128xf32> to vector<8x32xf32>
    %228 = tpu.concatenate %226, %227 in 1 : vector<8x32xf32>, vector<8x32xf32> -> vector<8x64xf32>
    %cst_83 = arith.constant dense<0.000000e+00> : vector<8x384xf32>
    %229 = tpu.matmul %228, %224, %cst_83 {dimension_numbers = #tpu.dot_dimension_numbers<[1], [0], [0], [1], [0, 0, 1, 1], [], []>, precision = #tpu.contract_precision<fp32>} : vector<8x64xf32>, vector<64x384xf32>, vector<8x384xf32> -> vector<8x384xf32>
    %230 = vector.broadcast %225 : vector<1x384xf32> to vector<8x384xf32>
    %231 = arith.addf %229, %230 : vector<8x384xf32>
    %c8_84 = arith.constant 8 : index
    %c0_85 = arith.constant 0 : index
    %232 = vector.load %arg4[%c8_84, %c0_85] : memref<64x384xf32, #tpu.memory_space<vmem>>, vector<8x384xf32>
    tpu.vector_store %arg4[%c8_84, %c0_85], %231 {strides = array<i32>} : memref<64x384xf32, #tpu.memory_space<vmem>>, vector<8x384xf32>,
    %233 = vector.extract_strided_slice %223 {offsets = [0, 0], sizes = [8, 32], strides = [1, 1]} : vector<8x128xf32> to vector<8x32xf32>
    %234 = vector.extract_strided_slice %66 {offsets = [0, 0], sizes = [8, 32], strides = [1, 1]} : vector<8x128xf32> to vector<8x32xf32>
    %235 = tpu.concatenate %233, %234 in 1 : vector<8x32xf32>, vector<8x32xf32> -> vector<8x64xf32>
    %cst_86 = arith.constant dense<0.000000e+00> : vector<8x384xf32>
    %236 = tpu.matmul %235, %224, %cst_86 {dimension_numbers = #tpu.dot_dimension_numbers<[1], [0], [0], [1], [0, 0, 1, 1], [], []>, precision = #tpu.contract_precision<fp32>} : vector<8x64xf32>, vector<64x384xf32>, vector<8x384xf32> -> vector<8x384xf32>
    %237 = vector.broadcast %225 : vector<1x384xf32> to vector<8x384xf32>
    %238 = arith.addf %236, %237 : vector<8x384xf32>
    %c48_87 = arith.constant 48 : index
    %c0_88 = arith.constant 0 : index
    %239 = vector.load %arg4[%c48_87, %c0_88] : memref<64x384xf32, #tpu.memory_space<vmem>>, vector<8x384xf32>
    tpu.vector_store %arg4[%c48_87, %c0_88], %238 {strides = array<i32>} : memref<64x384xf32, #tpu.memory_space<vmem>>, vector<8x384xf32>,
    %c56_89 = arith.constant 56 : index
    %c0_90 = arith.constant 0 : index
    %240 = vector.load %arg3[%c56_89, %c0_90] : memref<64x768xf32, #tpu.memory_space<vmem>>, vector<8x384xf32>
    %c0_91 = arith.constant 0 : index
    %c384_92 = arith.constant 384 : index
    %241 = vector.load %arg3[%c0_91, %c384_92] : memref<64x768xf32, #tpu.memory_space<vmem>>, vector<8x384xf32>
    %242 = arith.addf %240, %241 : vector<8x384xf32>
    %c64_93 = arith.constant 64 : index
    %c0_94 = arith.constant 0 : index
    %243 = vector.load %arg1[%c64_93, %c0_94] : memref<232x384xf32, #tpu.memory_space<vmem>>, vector<32x384xf32>
    %244 = vector.extract_strided_slice %223 {offsets = [0, 0], sizes = [8, 32], strides = [1, 1]} : vector<8x128xf32> to vector<8x32xf32>
    %cst_95 = arith.constant dense<0.000000e+00> : vector<8x384xf32>
    %245 = tpu.matmul %244, %243, %cst_95 {dimension_numbers = #tpu.dot_dimension_numbers<[1], [0], [0], [1], [0, 0, 1, 1], [], []>} : vector<8x32xf32>, vector<32x384xf32>, vector<8x384xf32> -> vector<8x384xf32>
    %246 = vector.extract_strided_slice %242 {offsets = [0, 0], sizes = [8, 256], strides = [1, 1]} : vector<8x384xf32> to vector<8x256xf32>
    %247 = vector.extract_strided_slice %245 {offsets = [0, 0], sizes = [8, 256], strides = [1, 1]} : vector<8x384xf32> to vector<8x256xf32>
    %248 = arith.addf %246, %247 : vector<8x256xf32>
    %249 = arith.negf %248 : vector<8x256xf32>
    %250 = math.exp %249 : vector<8x256xf32>
    %cst_96 = arith.constant 1.000000e+00 : f32
    %251 = vector.broadcast %cst_96 : f32 to vector<8x256xf32>
    %252 = arith.addf %251, %250 : vector<8x256xf32>
    %253 = arith.divf %251, %252 : vector<8x256xf32>
    %254 = vector.extract_strided_slice %253 {offsets = [0, 0], sizes = [8, 128], strides = [1, 1]} : vector<8x256xf32> to vector<8x128xf32>
    %255 = vector.extract_strided_slice %253 {offsets = [0, 128], sizes = [8, 128], strides = [1, 1]} : vector<8x256xf32> to vector<8x128xf32>
    %256 = vector.extract_strided_slice %242 {offsets = [0, 256], sizes = [8, 128], strides = [1, 1]} : vector<8x384xf32> to vector<8x128xf32>
    %257 = vector.extract_strided_slice %245 {offsets = [0, 256], sizes = [8, 128], strides = [1, 1]} : vector<8x384xf32> to vector<8x128xf32>
    %258 = arith.addf %257, %15 : vector<8x128xf32>
    %259 = arith.mulf %254, %258 : vector<8x128xf32>
    %260 = arith.addf %256, %259 : vector<8x128xf32>
    %261 = math.tanh %260 : vector<8x128xf32>
    %262 = arith.subf %223, %261 : vector<8x128xf32>
    %263 = arith.mulf %255, %262 : vector<8x128xf32>
    %264 = arith.addf %261, %263 : vector<8x128xf32>
    %c96_97 = arith.constant 96 : index
    %c0_98 = arith.constant 0 : index
    %265 = vector.load %arg1[%c96_97, %c0_98] : memref<232x384xf32, #tpu.memory_space<vmem>>, vector<64x384xf32>
    %c227_99 = arith.constant 227 : index
    %c0_100 = arith.constant 0 : index
    %266 = vector.load %arg1[%c227_99, %c0_100] : memref<232x384xf32, #tpu.memory_space<vmem>>, vector<1x384xf32>
    %267 = vector.extract_strided_slice %41 {offsets = [0, 0], sizes = [8, 32], strides = [1, 1]} : vector<8x128xf32> to vector<8x32xf32>
    %268 = vector.extract_strided_slice %264 {offsets = [0, 0], sizes = [8, 32], strides = [1, 1]} : vector<8x128xf32> to vector<8x32xf32>
    %269 = tpu.concatenate %267, %268 in 1 : vector<8x32xf32>, vector<8x32xf32> -> vector<8x64xf32>
    %cst_101 = arith.constant dense<0.000000e+00> : vector<8x384xf32>
    %270 = tpu.matmul %269, %265, %cst_101 {dimension_numbers = #tpu.dot_dimension_numbers<[1], [0], [0], [1], [0, 0, 1, 1], [], []>, precision = #tpu.contract_precision<fp32>} : vector<8x64xf32>, vector<64x384xf32>, vector<8x384xf32> -> vector<8x384xf32>
    %271 = vector.broadcast %266 : vector<1x384xf32> to vector<8x384xf32>
    %272 = arith.addf %270, %271 : vector<8x384xf32>
    %c0_102 = arith.constant 0 : index
    %c0_103 = arith.constant 0 : index
    %273 = vector.load %arg4[%c0_102, %c0_103] : memref<64x384xf32, #tpu.memory_space<vmem>>, vector<8x384xf32>
    tpu.vector_store %arg4[%c0_102, %c0_103], %272 {strides = array<i32>} : memref<64x384xf32, #tpu.memory_space<vmem>>, vector<8x384xf32>,
    %274 = vector.extract_strided_slice %264 {offsets = [0, 0], sizes = [8, 32], strides = [1, 1]} : vector<8x128xf32> to vector<8x32xf32>
    %275 = vector.extract_strided_slice %41 {offsets = [0, 0], sizes = [8, 32], strides = [1, 1]} : vector<8x128xf32> to vector<8x32xf32>
    %276 = tpu.concatenate %274, %275 in 1 : vector<8x32xf32>, vector<8x32xf32> -> vector<8x64xf32>
    %cst_104 = arith.constant dense<0.000000e+00> : vector<8x384xf32>
    %277 = tpu.matmul %276, %265, %cst_104 {dimension_numbers = #tpu.dot_dimension_numbers<[1], [0], [0], [1], [0, 0, 1, 1], [], []>, precision = #tpu.contract_precision<fp32>} : vector<8x64xf32>, vector<64x384xf32>, vector<8x384xf32> -> vector<8x384xf32>
    %278 = vector.broadcast %266 : vector<1x384xf32> to vector<8x384xf32>
    %279 = arith.addf %277, %278 : vector<8x384xf32>
    %c56_105 = arith.constant 56 : index
    %c0_106 = arith.constant 0 : index
    %280 = vector.load %arg4[%c56_105, %c0_106] : memref<64x384xf32, #tpu.memory_space<vmem>>, vector<8x384xf32>
    tpu.vector_store %arg4[%c56_105, %c0_106], %279 {strides = array<i32>} : memref<64x384xf32, #tpu.memory_space<vmem>>, vector<8x384xf32>,
    %c228 = arith.constant 228 : index
    %c0_107 = arith.constant 0 : index
    %281 = vector.load %arg1[%c228, %c0_107] : memref<232x384xf32, #tpu.memory_space<vmem>>, vector<1x128xf32>
    %282 = vector.shape_cast %281 : vector<1x128xf32> to vector<1x128xf32>
    %283 = vector.broadcast %282 : vector<1x128xf32> to vector<8x128xf32>
    %cst_108 = arith.constant 0.000000e+00 : f32
    %284 = vector.broadcast %cst_108 : f32 to vector<8x128xf32>
    %c0_109 = arith.constant 0 : index
    %c0_110 = arith.constant 0 : index
    %285 = vector.load %arg4[%c0_109, %c0_110] : memref<64x384xf32, #tpu.memory_space<vmem>>, vector<8x384xf32>
    %c160 = arith.constant 160 : index
    %c0_111 = arith.constant 0 : index
    %286 = vector.load %arg1[%c160, %c0_111] : memref<232x384xf32, #tpu.memory_space<vmem>>, vector<32x384xf32>
    %287 = vector.extract_strided_slice %284 {offsets = [0, 0], sizes = [8, 32], strides = [1, 1]} : vector<8x128xf32> to vector<8x32xf32>
    %cst_112 = arith.constant dense<0.000000e+00> : vector<8x384xf32>
    %288 = tpu.matmul %287, %286, %cst_112 {dimension_numbers = #tpu.dot_dimension_numbers<[1], [0], [0], [1], [0, 0, 1, 1], [], []>} : vector<8x32xf32>, vector<32x384xf32>, vector<8x384xf32> -> vector<8x384xf32>
    %289 = vector.extract_strided_slice %285 {offsets = [0, 0], sizes = [8, 256], strides = [1, 1]} : vector<8x384xf32> to vector<8x256xf32>
    %290 = vector.extract_strided_slice %288 {offsets = [0, 0], sizes = [8, 256], strides = [1, 1]} : vector<8x384xf32> to vector<8x256xf32>
    %291 = arith.addf %289, %290 : vector<8x256xf32>
    %292 = arith.negf %291 : vector<8x256xf32>
    %293 = math.exp %292 : vector<8x256xf32>
    %cst_113 = arith.constant 1.000000e+00 : f32
    %294 = vector.broadcast %cst_113 : f32 to vector<8x256xf32>
    %295 = arith.addf %294, %293 : vector<8x256xf32>
    %296 = arith.divf %294, %295 : vector<8x256xf32>
    %297 = vector.extract_strided_slice %296 {offsets = [0, 0], sizes = [8, 128], strides = [1, 1]} : vector<8x256xf32> to vector<8x128xf32>
    %298 = vector.extract_strided_slice %296 {offsets = [0, 128], sizes = [8, 128], strides = [1, 1]} : vector<8x256xf32> to vector<8x128xf32>
    %299 = vector.extract_strided_slice %285 {offsets = [0, 256], sizes = [8, 128], strides = [1, 1]} : vector<8x384xf32> to vector<8x128xf32>
    %300 = vector.extract_strided_slice %288 {offsets = [0, 256], sizes = [8, 128], strides = [1, 1]} : vector<8x384xf32> to vector<8x128xf32>
    %301 = arith.addf %300, %283 : vector<8x128xf32>
    %302 = arith.mulf %297, %301 : vector<8x128xf32>
    %303 = arith.addf %299, %302 : vector<8x128xf32>
    %304 = math.tanh %303 : vector<8x128xf32>
    %305 = arith.subf %284, %304 : vector<8x128xf32>
    %306 = arith.mulf %298, %305 : vector<8x128xf32>
    %307 = arith.addf %304, %306 : vector<8x128xf32>
    %c8_114 = arith.constant 8 : index
    %c0_115 = arith.constant 0 : index
    %308 = vector.load %arg4[%c8_114, %c0_115] : memref<64x384xf32, #tpu.memory_space<vmem>>, vector<8x384xf32>
    %c160_116 = arith.constant 160 : index
    %c0_117 = arith.constant 0 : index
    %309 = vector.load %arg1[%c160_116, %c0_117] : memref<232x384xf32, #tpu.memory_space<vmem>>, vector<32x384xf32>
    %310 = vector.extract_strided_slice %307 {offsets = [0, 0], sizes = [8, 32], strides = [1, 1]} : vector<8x128xf32> to vector<8x32xf32>
    %cst_118 = arith.constant dense<0.000000e+00> : vector<8x384xf32>
    %311 = tpu.matmul %310, %309, %cst_118 {dimension_numbers = #tpu.dot_dimension_numbers<[1], [0], [0], [1], [0, 0, 1, 1], [], []>} : vector<8x32xf32>, vector<32x384xf32>, vector<8x384xf32> -> vector<8x384xf32>
    %312 = vector.extract_strided_slice %308 {offsets = [0, 0], sizes = [8, 256], strides = [1, 1]} : vector<8x384xf32> to vector<8x256xf32>
    %313 = vector.extract_strided_slice %311 {offsets = [0, 0], sizes = [8, 256], strides = [1, 1]} : vector<8x384xf32> to vector<8x256xf32>
    %314 = arith.addf %312, %313 : vector<8x256xf32>
    %315 = arith.negf %314 : vector<8x256xf32>
    %316 = math.exp %315 : vector<8x256xf32>
    %cst_119 = arith.constant 1.000000e+00 : f32
    %317 = vector.broadcast %cst_119 : f32 to vector<8x256xf32>
    %318 = arith.addf %317, %316 : vector<8x256xf32>
    %319 = arith.divf %317, %318 : vector<8x256xf32>
    %320 = vector.extract_strided_slice %319 {offsets = [0, 0], sizes = [8, 128], strides = [1, 1]} : vector<8x256xf32> to vector<8x128xf32>
    %321 = vector.extract_strided_slice %319 {offsets = [0, 128], sizes = [8, 128], strides = [1, 1]} : vector<8x256xf32> to vector<8x128xf32>
    %322 = vector.extract_strided_slice %308 {offsets = [0, 256], sizes = [8, 128], strides = [1, 1]} : vector<8x384xf32> to vector<8x128xf32>
    %323 = vector.extract_strided_slice %311 {offsets = [0, 256], sizes = [8, 128], strides = [1, 1]} : vector<8x384xf32> to vector<8x128xf32>
    %324 = arith.addf %323, %283 : vector<8x128xf32>
    %325 = arith.mulf %320, %324 : vector<8x128xf32>
    %326 = arith.addf %322, %325 : vector<8x128xf32>
    %327 = math.tanh %326 : vector<8x128xf32>
    %328 = arith.subf %307, %327 : vector<8x128xf32>
    %329 = arith.mulf %321, %328 : vector<8x128xf32>
    %330 = arith.addf %327, %329 : vector<8x128xf32>
    %c16_120 = arith.constant 16 : index
    %c0_121 = arith.constant 0 : index
    %331 = vector.load %arg4[%c16_120, %c0_121] : memref<64x384xf32, #tpu.memory_space<vmem>>, vector<8x384xf32>
    %c160_122 = arith.constant 160 : index
    %c0_123 = arith.constant 0 : index
    %332 = vector.load %arg1[%c160_122, %c0_123] : memref<232x384xf32, #tpu.memory_space<vmem>>, vector<32x384xf32>
    %333 = vector.extract_strided_slice %330 {offsets = [0, 0], sizes = [8, 32], strides = [1, 1]} : vector<8x128xf32> to vector<8x32xf32>
    %cst_124 = arith.constant dense<0.000000e+00> : vector<8x384xf32>
    %334 = tpu.matmul %333, %332, %cst_124 {dimension_numbers = #tpu.dot_dimension_numbers<[1], [0], [0], [1], [0, 0, 1, 1], [], []>} : vector<8x32xf32>, vector<32x384xf32>, vector<8x384xf32> -> vector<8x384xf32>
    %335 = vector.extract_strided_slice %331 {offsets = [0, 0], sizes = [8, 256], strides = [1, 1]} : vector<8x384xf32> to vector<8x256xf32>
    %336 = vector.extract_strided_slice %334 {offsets = [0, 0], sizes = [8, 256], strides = [1, 1]} : vector<8x384xf32> to vector<8x256xf32>
    %337 = arith.addf %335, %336 : vector<8x256xf32>
    %338 = arith.negf %337 : vector<8x256xf32>
    %339 = math.exp %338 : vector<8x256xf32>
    %cst_125 = arith.constant 1.000000e+00 : f32
    %340 = vector.broadcast %cst_125 : f32 to vector<8x256xf32>
    %341 = arith.addf %340, %339 : vector<8x256xf32>
    %342 = arith.divf %340, %341 : vector<8x256xf32>
    %343 = vector.extract_strided_slice %342 {offsets = [0, 0], sizes = [8, 128], strides = [1, 1]} : vector<8x256xf32> to vector<8x128xf32>
    %344 = vector.extract_strided_slice %342 {offsets = [0, 128], sizes = [8, 128], strides = [1, 1]} : vector<8x256xf32> to vector<8x128xf32>
    %345 = vector.extract_strided_slice %331 {offsets = [0, 256], sizes = [8, 128], strides = [1, 1]} : vector<8x384xf32> to vector<8x128xf32>
    %346 = vector.extract_strided_slice %334 {offsets = [0, 256], sizes = [8, 128], strides = [1, 1]} : vector<8x384xf32> to vector<8x128xf32>
    %347 = arith.addf %346, %283 : vector<8x128xf32>
    %348 = arith.mulf %343, %347 : vector<8x128xf32>
    %349 = arith.addf %345, %348 : vector<8x128xf32>
    %350 = math.tanh %349 : vector<8x128xf32>
    %351 = arith.subf %330, %350 : vector<8x128xf32>
    %352 = arith.mulf %344, %351 : vector<8x128xf32>
    %353 = arith.addf %350, %352 : vector<8x128xf32>
    %c24_126 = arith.constant 24 : index
    %c0_127 = arith.constant 0 : index
    %354 = vector.load %arg4[%c24_126, %c0_127] : memref<64x384xf32, #tpu.memory_space<vmem>>, vector<8x384xf32>
    %c160_128 = arith.constant 160 : index
    %c0_129 = arith.constant 0 : index
    %355 = vector.load %arg1[%c160_128, %c0_129] : memref<232x384xf32, #tpu.memory_space<vmem>>, vector<32x384xf32>
    %356 = vector.extract_strided_slice %353 {offsets = [0, 0], sizes = [8, 32], strides = [1, 1]} : vector<8x128xf32> to vector<8x32xf32>
    %cst_130 = arith.constant dense<0.000000e+00> : vector<8x384xf32>
    %357 = tpu.matmul %356, %355, %cst_130 {dimension_numbers = #tpu.dot_dimension_numbers<[1], [0], [0], [1], [0, 0, 1, 1], [], []>} : vector<8x32xf32>, vector<32x384xf32>, vector<8x384xf32> -> vector<8x384xf32>
    %358 = vector.extract_strided_slice %354 {offsets = [0, 0], sizes = [8, 256], strides = [1, 1]} : vector<8x384xf32> to vector<8x256xf32>
    %359 = vector.extract_strided_slice %357 {offsets = [0, 0], sizes = [8, 256], strides = [1, 1]} : vector<8x384xf32> to vector<8x256xf32>
    %360 = arith.addf %358, %359 : vector<8x256xf32>
    %361 = arith.negf %360 : vector<8x256xf32>
    %362 = math.exp %361 : vector<8x256xf32>
    %cst_131 = arith.constant 1.000000e+00 : f32
    %363 = vector.broadcast %cst_131 : f32 to vector<8x256xf32>
    %364 = arith.addf %363, %362 : vector<8x256xf32>
    %365 = arith.divf %363, %364 : vector<8x256xf32>
    %366 = vector.extract_strided_slice %365 {offsets = [0, 0], sizes = [8, 128], strides = [1, 1]} : vector<8x256xf32> to vector<8x128xf32>
    %367 = vector.extract_strided_slice %365 {offsets = [0, 128], sizes = [8, 128], strides = [1, 1]} : vector<8x256xf32> to vector<8x128xf32>
    %368 = vector.extract_strided_slice %354 {offsets = [0, 256], sizes = [8, 128], strides = [1, 1]} : vector<8x384xf32> to vector<8x128xf32>
    %369 = vector.extract_strided_slice %357 {offsets = [0, 256], sizes = [8, 128], strides = [1, 1]} : vector<8x384xf32> to vector<8x128xf32>
    %370 = arith.addf %369, %283 : vector<8x128xf32>
    %371 = arith.mulf %366, %370 : vector<8x128xf32>
    %372 = arith.addf %368, %371 : vector<8x128xf32>
    %373 = math.tanh %372 : vector<8x128xf32>
    %374 = arith.subf %353, %373 : vector<8x128xf32>
    %375 = arith.mulf %367, %374 : vector<8x128xf32>
    %376 = arith.addf %373, %375 : vector<8x128xf32>
    %c32_132 = arith.constant 32 : index
    %c0_133 = arith.constant 0 : index
    %377 = vector.load %arg4[%c32_132, %c0_133] : memref<64x384xf32, #tpu.memory_space<vmem>>, vector<8x384xf32>
    %c160_134 = arith.constant 160 : index
    %c0_135 = arith.constant 0 : index
    %378 = vector.load %arg1[%c160_134, %c0_135] : memref<232x384xf32, #tpu.memory_space<vmem>>, vector<32x384xf32>
    %379 = vector.extract_strided_slice %376 {offsets = [0, 0], sizes = [8, 32], strides = [1, 1]} : vector<8x128xf32> to vector<8x32xf32>
    %cst_136 = arith.constant dense<0.000000e+00> : vector<8x384xf32>
    %380 = tpu.matmul %379, %378, %cst_136 {dimension_numbers = #tpu.dot_dimension_numbers<[1], [0], [0], [1], [0, 0, 1, 1], [], []>} : vector<8x32xf32>, vector<32x384xf32>, vector<8x384xf32> -> vector<8x384xf32>
    %381 = vector.extract_strided_slice %377 {offsets = [0, 0], sizes = [8, 256], strides = [1, 1]} : vector<8x384xf32> to vector<8x256xf32>
    %382 = vector.extract_strided_slice %380 {offsets = [0, 0], sizes = [8, 256], strides = [1, 1]} : vector<8x384xf32> to vector<8x256xf32>
    %383 = arith.addf %381, %382 : vector<8x256xf32>
    %384 = arith.negf %383 : vector<8x256xf32>
    %385 = math.exp %384 : vector<8x256xf32>
    %cst_137 = arith.constant 1.000000e+00 : f32
    %386 = vector.broadcast %cst_137 : f32 to vector<8x256xf32>
    %387 = arith.addf %386, %385 : vector<8x256xf32>
    %388 = arith.divf %386, %387 : vector<8x256xf32>
    %389 = vector.extract_strided_slice %388 {offsets = [0, 0], sizes = [8, 128], strides = [1, 1]} : vector<8x256xf32> to vector<8x128xf32>
    %390 = vector.extract_strided_slice %388 {offsets = [0, 128], sizes = [8, 128], strides = [1, 1]} : vector<8x256xf32> to vector<8x128xf32>
    %391 = vector.extract_strided_slice %377 {offsets = [0, 256], sizes = [8, 128], strides = [1, 1]} : vector<8x384xf32> to vector<8x128xf32>
    %392 = vector.extract_strided_slice %380 {offsets = [0, 256], sizes = [8, 128], strides = [1, 1]} : vector<8x384xf32> to vector<8x128xf32>
    %393 = arith.addf %392, %283 : vector<8x128xf32>
    %394 = arith.mulf %389, %393 : vector<8x128xf32>
    %395 = arith.addf %391, %394 : vector<8x128xf32>
    %396 = math.tanh %395 : vector<8x128xf32>
    %397 = arith.subf %376, %396 : vector<8x128xf32>
    %398 = arith.mulf %390, %397 : vector<8x128xf32>
    %399 = arith.addf %396, %398 : vector<8x128xf32>
    %c40_138 = arith.constant 40 : index
    %c0_139 = arith.constant 0 : index
    %400 = vector.load %arg4[%c40_138, %c0_139] : memref<64x384xf32, #tpu.memory_space<vmem>>, vector<8x384xf32>
    %c160_140 = arith.constant 160 : index
    %c0_141 = arith.constant 0 : index
    %401 = vector.load %arg1[%c160_140, %c0_141] : memref<232x384xf32, #tpu.memory_space<vmem>>, vector<32x384xf32>
    %402 = vector.extract_strided_slice %399 {offsets = [0, 0], sizes = [8, 32], strides = [1, 1]} : vector<8x128xf32> to vector<8x32xf32>
    %cst_142 = arith.constant dense<0.000000e+00> : vector<8x384xf32>
    %403 = tpu.matmul %402, %401, %cst_142 {dimension_numbers = #tpu.dot_dimension_numbers<[1], [0], [0], [1], [0, 0, 1, 1], [], []>} : vector<8x32xf32>, vector<32x384xf32>, vector<8x384xf32> -> vector<8x384xf32>
    %404 = vector.extract_strided_slice %400 {offsets = [0, 0], sizes = [8, 256], strides = [1, 1]} : vector<8x384xf32> to vector<8x256xf32>
    %405 = vector.extract_strided_slice %403 {offsets = [0, 0], sizes = [8, 256], strides = [1, 1]} : vector<8x384xf32> to vector<8x256xf32>
    %406 = arith.addf %404, %405 : vector<8x256xf32>
    %407 = arith.negf %406 : vector<8x256xf32>
    %408 = math.exp %407 : vector<8x256xf32>
    %cst_143 = arith.constant 1.000000e+00 : f32
    %409 = vector.broadcast %cst_143 : f32 to vector<8x256xf32>
    %410 = arith.addf %409, %408 : vector<8x256xf32>
    %411 = arith.divf %409, %410 : vector<8x256xf32>
    %412 = vector.extract_strided_slice %411 {offsets = [0, 0], sizes = [8, 128], strides = [1, 1]} : vector<8x256xf32> to vector<8x128xf32>
    %413 = vector.extract_strided_slice %411 {offsets = [0, 128], sizes = [8, 128], strides = [1, 1]} : vector<8x256xf32> to vector<8x128xf32>
    %414 = vector.extract_strided_slice %400 {offsets = [0, 256], sizes = [8, 128], strides = [1, 1]} : vector<8x384xf32> to vector<8x128xf32>
    %415 = vector.extract_strided_slice %403 {offsets = [0, 256], sizes = [8, 128], strides = [1, 1]} : vector<8x384xf32> to vector<8x128xf32>
    %416 = arith.addf %415, %283 : vector<8x128xf32>
    %417 = arith.mulf %412, %416 : vector<8x128xf32>
    %418 = arith.addf %414, %417 : vector<8x128xf32>
    %419 = math.tanh %418 : vector<8x128xf32>
    %420 = arith.subf %399, %419 : vector<8x128xf32>
    %421 = arith.mulf %413, %420 : vector<8x128xf32>
    %422 = arith.addf %419, %421 : vector<8x128xf32>
    %c48_144 = arith.constant 48 : index
    %c0_145 = arith.constant 0 : index
    %423 = vector.load %arg4[%c48_144, %c0_145] : memref<64x384xf32, #tpu.memory_space<vmem>>, vector<8x384xf32>
    %c160_146 = arith.constant 160 : index
    %c0_147 = arith.constant 0 : index
    %424 = vector.load %arg1[%c160_146, %c0_147] : memref<232x384xf32, #tpu.memory_space<vmem>>, vector<32x384xf32>
    %425 = vector.extract_strided_slice %422 {offsets = [0, 0], sizes = [8, 32], strides = [1, 1]} : vector<8x128xf32> to vector<8x32xf32>
    %cst_148 = arith.constant dense<0.000000e+00> : vector<8x384xf32>
    %426 = tpu.matmul %425, %424, %cst_148 {dimension_numbers = #tpu.dot_dimension_numbers<[1], [0], [0], [1], [0, 0, 1, 1], [], []>} : vector<8x32xf32>, vector<32x384xf32>, vector<8x384xf32> -> vector<8x384xf32>
    %427 = vector.extract_strided_slice %423 {offsets = [0, 0], sizes = [8, 256], strides = [1, 1]} : vector<8x384xf32> to vector<8x256xf32>
    %428 = vector.extract_strided_slice %426 {offsets = [0, 0], sizes = [8, 256], strides = [1, 1]} : vector<8x384xf32> to vector<8x256xf32>
    %429 = arith.addf %427, %428 : vector<8x256xf32>
    %430 = arith.negf %429 : vector<8x256xf32>
    %431 = math.exp %430 : vector<8x256xf32>
    %cst_149 = arith.constant 1.000000e+00 : f32
    %432 = vector.broadcast %cst_149 : f32 to vector<8x256xf32>
    %433 = arith.addf %432, %431 : vector<8x256xf32>
    %434 = arith.divf %432, %433 : vector<8x256xf32>
    %435 = vector.extract_strided_slice %434 {offsets = [0, 0], sizes = [8, 128], strides = [1, 1]} : vector<8x256xf32> to vector<8x128xf32>
    %436 = vector.extract_strided_slice %434 {offsets = [0, 128], sizes = [8, 128], strides = [1, 1]} : vector<8x256xf32> to vector<8x128xf32>
    %437 = vector.extract_strided_slice %423 {offsets = [0, 256], sizes = [8, 128], strides = [1, 1]} : vector<8x384xf32> to vector<8x128xf32>
    %438 = vector.extract_strided_slice %426 {offsets = [0, 256], sizes = [8, 128], strides = [1, 1]} : vector<8x384xf32> to vector<8x128xf32>
    %439 = arith.addf %438, %283 : vector<8x128xf32>
    %440 = arith.mulf %435, %439 : vector<8x128xf32>
    %441 = arith.addf %437, %440 : vector<8x128xf32>
    %442 = math.tanh %441 : vector<8x128xf32>
    %443 = arith.subf %422, %442 : vector<8x128xf32>
    %444 = arith.mulf %436, %443 : vector<8x128xf32>
    %445 = arith.addf %442, %444 : vector<8x128xf32>
    %c56_150 = arith.constant 56 : index
    %c0_151 = arith.constant 0 : index
    %446 = vector.load %arg4[%c56_150, %c0_151] : memref<64x384xf32, #tpu.memory_space<vmem>>, vector<8x384xf32>
    %c160_152 = arith.constant 160 : index
    %c0_153 = arith.constant 0 : index
    %447 = vector.load %arg1[%c160_152, %c0_153] : memref<232x384xf32, #tpu.memory_space<vmem>>, vector<32x384xf32>
    %448 = vector.extract_strided_slice %445 {offsets = [0, 0], sizes = [8, 32], strides = [1, 1]} : vector<8x128xf32> to vector<8x32xf32>
    %cst_154 = arith.constant dense<0.000000e+00> : vector<8x384xf32>
    %449 = tpu.matmul %448, %447, %cst_154 {dimension_numbers = #tpu.dot_dimension_numbers<[1], [0], [0], [1], [0, 0, 1, 1], [], []>} : vector<8x32xf32>, vector<32x384xf32>, vector<8x384xf32> -> vector<8x384xf32>
    %450 = vector.extract_strided_slice %446 {offsets = [0, 0], sizes = [8, 256], strides = [1, 1]} : vector<8x384xf32> to vector<8x256xf32>
    %451 = vector.extract_strided_slice %449 {offsets = [0, 0], sizes = [8, 256], strides = [1, 1]} : vector<8x384xf32> to vector<8x256xf32>
    %452 = arith.addf %450, %451 : vector<8x256xf32>
    %453 = arith.negf %452 : vector<8x256xf32>
    %454 = math.exp %453 : vector<8x256xf32>
    %cst_155 = arith.constant 1.000000e+00 : f32
    %455 = vector.broadcast %cst_155 : f32 to vector<8x256xf32>
    %456 = arith.addf %455, %454 : vector<8x256xf32>
    %457 = arith.divf %455, %456 : vector<8x256xf32>
    %458 = vector.extract_strided_slice %457 {offsets = [0, 0], sizes = [8, 128], strides = [1, 1]} : vector<8x256xf32> to vector<8x128xf32>
    %459 = vector.extract_strided_slice %457 {offsets = [0, 128], sizes = [8, 128], strides = [1, 1]} : vector<8x256xf32> to vector<8x128xf32>
    %460 = vector.extract_strided_slice %446 {offsets = [0, 256], sizes = [8, 128], strides = [1, 1]} : vector<8x384xf32> to vector<8x128xf32>
    %461 = vector.extract_strided_slice %449 {offsets = [0, 256], sizes = [8, 128], strides = [1, 1]} : vector<8x384xf32> to vector<8x128xf32>
    %462 = arith.addf %461, %283 : vector<8x128xf32>
    %463 = arith.mulf %458, %462 : vector<8x128xf32>
    %464 = arith.addf %460, %463 : vector<8x128xf32>
    %465 = math.tanh %464 : vector<8x128xf32>
    %466 = arith.subf %445, %465 : vector<8x128xf32>
    %467 = arith.mulf %459, %466 : vector<8x128xf32>
    %468 = arith.addf %465, %467 : vector<8x128xf32>
    %c192 = arith.constant 192 : index
    %c0_156 = arith.constant 0 : index
    %469 = vector.load %arg1[%c192, %c0_156] : memref<232x384xf32, #tpu.memory_space<vmem>>, vector<32x128xf32>
    %c229 = arith.constant 229 : index
    %c0_157 = arith.constant 0 : index
    %470 = vector.load %arg1[%c229, %c0_157] : memref<232x384xf32, #tpu.memory_space<vmem>>, vector<1x128xf32>
    %471 = vector.extract_strided_slice %468 {offsets = [0, 0], sizes = [8, 32], strides = [1, 1]} : vector<8x128xf32> to vector<8x32xf32>
    %cst_158 = arith.constant dense<0.000000e+00> : vector<8x128xf32>
    %472 = tpu.matmul %471, %469, %cst_158 {dimension_numbers = #tpu.dot_dimension_numbers<[1], [0], [0], [1], [0, 0, 1, 1], [], []>, precision = #tpu.contract_precision<fp32>} : vector<8x32xf32>, vector<32x128xf32>, vector<8x128xf32> -> vector<8x128xf32>
    %473 = vector.broadcast %470 : vector<1x128xf32> to vector<8x128xf32>
    %474 = arith.addf %472, %473 : vector<8x128xf32>
    %c0_159 = arith.constant 0 : index
    %c0_160 = arith.constant 0 : index
    %475 = vector.load %arg2[%c0_159, %c0_160] : memref<8x128xf32, #tpu.memory_space<vmem>>, vector<8x128xf32>
    tpu.vector_store %arg2[%c0_159, %c0_160], %474 {strides = array<i32>} : memref<8x128xf32, #tpu.memory_space<vmem>>, vector<8x128xf32>,
    return
  }
}

</mosaic_0001>

<bundles_post_ra>
// kernel: tpu_custom_call.1
= control target key start
LH: loop header
LB: loop body
LE: loop exit
PB: predicated region body
PF: predicated region fallthrough
CT: control target
= control target key end

     0   :  { %7 = vsyncpa [#allocation5], 0  ;;  %s24721_s0 = inlined_call_operand.vmem [shape: f32[64,32], index: 0, kind: input, shape index: {}]   ;;  %s24722_s1 = inlined_call_operand.hbm [shape: f32[232,384], index: 1, kind: input, shape index: {}]   ;;  %s24723_s2 = inlined_call_operand.hbm [shape: f32[8,128], index: 2, kind: output, shape index: {}]  }
   0x1   :  { %8 = vsyncpa [#allocation6], 0  ;;  %s21138_s9 = smov [#allocation4]   ;;  %s21090_s13 = scalar_lea.hbm %s24722_s1, 11136 }
   0x2   :  { %s16_s10 = sshll.u32 %s21138_s9, 4  ;;  %p21091_p0 = scmp.ne.s32.totalorder %s24722_s1, %s21090_s13  ;;  %s17_s10 = int_to_ptr.vmem [resolvable:$true] %s16_s10 }
   0x3   :  { %p21094_p1 = scmp.lt.u32.totalorder %s21090_s13, %s24722_s1 }
   0x5   :  { %p21096_p2 = pnand %p21094_p1, %p21091_p0 }
   0x7   :  { %21099 = shalt.err (!%p21096_p2)
}
   0x8   :  { %s21100_s18 = scalar_lea.vmem %s17_s10, 11136  ;;  %p21105_p4 = scmp.lt.s32.totalorder %s17_s10, %s17_s10 }
   0x9   :  { %p21101_p3 = scmp.ne.s32.totalorder %s17_s10, %s21100_s18  ;;  %p21106_p5 = scmp.lt.s32.totalorder %s21100_s18, %s21100_s18 }
   0xb   :  { %p21107_p6 = por %p21106_p5, %p21105_p4 }
   0xd   :  { %p21108_p7 = pnand %p21107_p6, %p21101_p3 }
   0xf   :  { %21111 = shalt.err (!%p21108_p7)
}
  0x10   :  { %s21139_s19 = smov 384   ;;  %s21140_s20 = smov 24  }
  0x11   :  { %22 = dma.hbm_to_vmem [thread:$0]  %s24722_s1, 11136, %s17_s10, [#allocation5], %s21139_s19, %s21139_s19, %s21140_s20  }
  0x12   :  { %21134 = dma.done.wait [#allocation5], 11136  }
  0x13   :  { %21135 = vsyncadd [#allocation5], 4294956160  ;;  %v24742_v0 = vmov 0.0   ;;  %v35_v1 = vld [vmem:[#allocation4 + $0x8] sm:$0xff]  ;;  %v38_v2 = vld [vmem:[#allocation4 + $0x20] sm:$0xff]  ;;  %vm78_vm0 = vcmask 261120  }
  0x14   :  { %175 = vmatprep.mubr.f32.mxu0 %v24742_v0  ;;  %197 = vmatprep.mubr.f32.mxu1 %v24742_v0  ;;  %v34_v3 = vld [vmem:[#allocation4] sm:$0xff]  ;;  %v103_v4 = vand.u32 4294901760, %v35_v1  ;;  %v107_v5 = vand.u32 4294901760, %v38_v2  ;;  %v37_v6 = vld [vmem:[#allocation4 + $0x18] sm:$0xff]  ;;  %v21175_v9 = vld [vmem:[#allocation4 + $0x50] sm:$0xff]  ;;  %vm21143_vm1 = vmmov 0  }
  0x15   :  { %v105_v7 = vand.u32 4294901760, %v34_v3  ;;  %v41_v8 = vld [vmem:[#allocation4 + $0x38] sm:$0xff]  ;;  %v109_v10 = vand.u32 4294901760, %v37_v6  ;;  %v115_v12 = vand.u32 4294901760, %v21175_v9  ;;  %v40_v13 = vld [vmem:[#allocation4 + $0x30] sm:$0xff]  ;;  %v43_v14 = vld [vmem:[#allocation4 + $0x48] sm:$0xff] }
  0x16   :  { %v111_v11 = vand.u32 4294901760, %v41_v8  ;;  %v26_v15 = vld [vmem:[%s24721_s0] sm:$0xff]  ;;  %v21181_v16 = vpack.c.bf16 %v107_v5, %v103_v4  ;;  %v113_v18 = vand.u32 4294901760, %v40_v13  ;;  %v117_v19 = vand.u32 4294901760, %v43_v14  ;;  %v28_v20 = vld [vmem:[%s24721_s0 + $0x10] sm:$0xff]  ;;  %v27_v25 = vld [vmem:[%s24721_s0 + $0x8] sm:$0xff] }
  0x17   :  { %v21183_v17 = vsub.f32 %v34_v3, %v105_v7  ;;  %v21188_v21 = vpack.c.bf16 %v109_v10, %v105_v7  ;;  %v21190_v22 = vsub.f32 %v37_v6, %v109_v10  ;;  %v80_v24 = vsel %vm78_vm0, %v26_v15, 0  ;;  %v29_v34 = vld [vmem:[%s24721_s0 + $0x18] sm:$0xff]  ;;  %v30_v63 = vld [vmem:[%s24721_s0 + $0x20] sm:$0xff]  ;;  %s21145_s10 = smov [#allocation7]  }
  0x18   :  { %v21194_v23 = vpack.c.bf16 %v115_v12, %v111_v11  ;;  %18675 = vmatprep.subr.bf16.mxu0 %v21181_v16  ;;  %20470 = vmatprep.subr.bf16.mxu1 %v21181_v16  ;;  %v21202_v26 = vpack.c.bf16 %v117_v19, %v113_v18  ;;  %v21204_v27 = vsub.f32 %v40_v13, %v113_v18  ;;  %v21208_v29 = vand.u32 4294901760, %v80_v24  ;;  %s16525_s11 = sshll.u32 %s21145_s10, 4  ;;  %s16526_s11 = int_to_ptr.vmem [resolvable:$true] %s16525_s11 }
  0x19   :  { %v21206_v28 = vsub.f32 %v43_v14, %v117_v19  ;;  %18677 = vmatpush1.bf16.msra.mxu0 %v21188_v21  ;;  %20472 = vmatpush1.bf16.msra.mxu1 %v21188_v21  ;;  %v86_v30 = vsel %vm78_vm0, %v28_v20, 0  ;;  %v21213_v31 = vsub.f32 %v35_v1, %v103_v4  ;;  %v21215_v32 = vsub.f32 %v38_v2, %v107_v5  ;;  %v31_v19 = vld [vmem:[%s24721_s0 + $0x28] sm:$0xff]  ;;  %v32_v20 = vld [vmem:[%s24721_s0 + $0x30] sm:$0xff]  ;;  %s21112_s12 = scalar_lea.vmem %s16526_s11, 128  ;;  %p21117_p9 = scmp.lt.s32.totalorder %s16526_s11, %s16526_s11 }
  0x1a   :  { %v272_v33 = vand.u32 4294901760, %v21183_v17  ;;  %18679 = vmatprep.subr.bf16.mxu0 %v21194_v23  ;;  %20471 = vmatprep.subr.bf16.mxu1 %v21194_v23  ;;  %v21224_v35 = vsub.f32 %v80_v24, %v21208_v29  ;;  %v21226_v36 = vand.u32 4294901760, %v86_v30  ;;  %v284_v37 = vand.u32 4294901760, %v21190_v22  ;;  %v36_v24 = vld [vmem:[#allocation4 + $0x10] sm:$0xff]  ;;  %p21113_p8 = scmp.ne.s32.totalorder %s16526_s11, %s21112_s12  ;;  %p21118_p10 = scmp.lt.s32.totalorder %s21112_s12, %s21112_s12 }
  0x1b   :  { %v83_v38 = vsel %vm78_vm0, %v27_v25, 0  ;;  %v24725_v39 = vand.u32 4294901760, %v21213_v31  ;;  %v24724_v40 = vand.u32 4294901760, %v21215_v32  ;;  %v89_v46 = vsel %vm78_vm0, %v29_v34, 0 }
  0x1c   :  { %v273_v41 = vsub.f32 %v21183_v17, %v272_v33  ;;  %v21235_v42 = vand.u32 4294901760, %v83_v38  ;;  %v21238_v43 = vand.u32 4294901760, %v21224_v35  ;;  %v21241_v44 = vsub.f32 %v86_v30, %v21226_v36  ;;  %p21119_p11 = por %p21118_p10, %p21117_p9 }
  0x1d   :  { %v285_v45 = vsub.f32 %v21190_v22, %v284_v37  ;;  %18681 = vmatpush1.bf16.msra.mxu0 %v21202_v26  ;;  %20473 = vmatpush1.bf16.msra.mxu1 %v21202_v26  ;;  %v267_v47 = vsub.f32 %v21213_v31, %v24725_v39  ;;  %v279_v48 = vsub.f32 %v21215_v32, %v24724_v40  ;;  %v21263_v54 = vand.u32 4294901760, %v89_v46 }
  0x1e   :  { %v274_v49 = vand.u32 4294901760, %v273_v41  ;;  %v21256_v50 = vsub.f32 %v83_v38, %v21235_v42  ;;  %v179_v51 = vsub.f32 %v21224_v35, %v21238_v43  ;;  %v21261_v52 = vand.u32 4294901760, %v21241_v44  ;;  %p21120_p12 = pnand %p21119_p11, %p21113_p8 }
  0x1f   :  { %v286_v53 = vand.u32 4294901760, %v285_v45  ;;  %v268_v55 = vand.u32 4294901760, %v267_v47  ;;  %v280_v56 = vand.u32 4294901760, %v279_v48  ;;  %v21268_v58 = vsub.f32 %v41_v8, %v111_v11  ;;  %v39_v47 = vld [vmem:[#allocation4 + $0x28] sm:$0xff]  ;;  %v33_v48 = vld [vmem:[%s24721_s0 + $0x38] sm:$0xff]  ;;  %s21144_s0 = smov 32  }
  0x20   :  { %v21266_v57 = vand.u32 4294901760, %v21256_v50  ;;  %v21270_v59 = vand.u32 4294901760, %v179_v51  ;;  %v201_v60 = vsub.f32 %v21241_v44, %v21261_v52  ;;  %v21275_v62 = vsub.f32 %v89_v46, %v21263_v54 }
  0x21   :  { %v18684_v61 = vpack.c.bf16 %v286_v53, %v274_v49  ;;  %v18682_v1 = vpack.c.bf16 %v280_v56, %v268_v55  ;;  %v290_v3 = vand.u32 4294901760, %v21268_v58  ;;  %v21286_v4 = vsub.f32 %v21175_v9, %v115_v12  ;;  %v42_v49 = vld [vmem:[#allocation4 + $0x40] sm:$0xff] }
  0x22   :  { %v190_v2 = vsub.f32 %v21256_v50, %v21266_v57  ;;  %181 = vmatmul.mubr.f32.vlgmr.msra.gmra.mrb[0].mxu0 %v21270_v59  ;;  %v21289_v5 = vand.u32 4294901760, %v201_v60  ;;  %v21292_v6 = vand.u32 4294901760, %v21275_v62  ;;  %v24727_v7 = vand.u32 4294901760, %v21204_v27 }
  0x23   :  { %v24726_v8 = vand.u32 4294901760, %v21206_v28  ;;  %18683 = vmatprep.subr.bf16.mxu0 %v18682_v1  ;;  %186 = vmatprep.mubr.f32.mxu0 %v24742_v0  ;;  %v291_v9 = vsub.f32 %v21268_v58, %v290_v3  ;;  %v302_v11 = vand.u32 4294901760, %v21286_v4  ;;  %v92_v12 = vsel %vm78_vm0, %v30_v63, 0 }
  0x24   :  { %v21297_v10 = vand.u32 4294901760, %v190_v2  ;;  %203 = vmatmul.mubr.f32.vlgmr.msra.gmra.mrb[0].mxu1 %v21289_v5  ;;  %18685 = vmatpush1.bf16.msra.mxu0 %v18684_v61  ;;  %v212_v13 = vsub.f32 %v21275_v62, %v21292_v6  ;;  %v297_v14 = vsub.f32 %v21204_v27, %v24727_v7  ;;  %v21313_v18 = vand.u32 4294901760, %v92_v12  ;;  %v45_v2 = vld [vmem:[#allocation4 + $0x58] sm:$0xff] }
  0x25   :  { %v309_v15 = vsub.f32 %v21206_v28, %v24726_v8  ;;  %208 = vmatprep.mubr.f32.mxu1 %v24742_v0  ;;  %v292_v25 = vand.u32 4294901760, %v291_v9  ;;  %v303_v30 = vsub.f32 %v21286_v4, %v302_v11  ;;  %v18690_v34 = vpack.c.bf16 %v21215_v32, %v21213_v31 }
  0x26   :  { %192 = vmatmul.mubr.f32.gmra.mrb[2].mxu0 %v21297_v10  ;;  %v21328_v38 = vand.u32 4294901760, %v212_v13  ;;  %v298_v41 = vand.u32 4294901760, %v297_v14  ;;  %v21331_v46 = vsub.f32 %v92_v12, %v21313_v18  ;;  %v95_v53 = vsel %vm78_vm0, %v31_v19, 0 }
  0x27   :  { %v310_v45 = vand.u32 4294901760, %v309_v15  ;;  %v304_v51 = vand.u32 4294901760, %v303_v30  ;;  %368 = vmatprep.mubr.f32.mxu0 %v24742_v0  ;;  %v98_v55 = vsel %vm78_vm0, %v32_v20, 0  ;;  %v990_v56 = vand.u32 4294901760, %v36_v24 }
  0x28   :  { %214 = vmatmul.mubr.f32.gmra.mrb[2].mxu1 %v21328_v38  ;;  %v21341_v61 = vand.u32 4294901760, %v21331_v46  ;;  %v21343_v63 = vand.u32 4294901760, %v95_v53  ;;  %v21345_v1 = vand.u32 4294901760, %v98_v55  ;;  %v993_v12 = vand.u32 4294901760, %v39_v47 }
  0x29   :  { %v18688_v60 = vpack.c.bf16 %v310_v45, %v298_v41  ;;  %v18686_v9 = vpack.c.bf16 %v304_v51, %v292_v25  ;;  %219 = vmatprep.mubr.f32.mxu1 %v24742_v0  ;;  %v101_v13 = vsel %vm78_vm0, %v33_v48, 0  ;;  %v996_v14 = vand.u32 4294901760, %v42_v49 }
  0x2a   :  { %v223_v15 = vsub.f32 %v21331_v46, %v21341_v61  ;;  %v21352_v19 = vsub.f32 %v95_v53, %v21343_v63  ;;  %v21355_v20 = vsub.f32 %v98_v55, %v21345_v1  ;;  %v21357_v30 = vand.u32 4294901760, %v101_v13 }
  0x2b   :  { %18687 = vmatprep.subr.bf16.mxu0 %v18686_v9  ;;  %v18692_v25 = vpack.c.bf16 %v21190_v22, %v21183_v17  ;;  %v21361_v41 = vpack.c.bf16 %v993_v12, %v990_v56  ;;  %v999_v45 = vand.u32 4294901760, %v45_v2  ;;  %v18694_v48 = vpack.c.bf16 %v21286_v4, %v21268_v58 }
  0x2c   :  { %18689 = vmatpush1.bf16.msra.mxu0 %v18688_v60  ;;  %v21365_v51 = vand.u32 4294901760, %v223_v15  ;;  %v21368_v53 = vand.u32 4294901760, %v21352_v19  ;;  %v21371_v55 = vand.u32 4294901760, %v21355_v20  ;;  %v21374_v9 = vsub.f32 %v101_v13, %v21357_v30 }
  0x2d   :  { %18691 = vmatprep.subr.bf16.mxu0 %v18690_v34  ;;  %18723 = vmatprep.subr.bf16.mxu1 %v21361_v41  ;;  %v21377_v40 = vpack.c.bf16 %v999_v45, %v996_v14  ;;  %v21379_v39 = vsub.f32 %v36_v24, %v990_v56  ;;  %v21381_v8 = vsub.f32 %v39_v47, %v993_v12  ;;  %v24882_v17 = vand.u32 4294901760, %v21204_v27 }
  0x2e   :  { %24881 = vst [vmem:[#allocation10_spill] sm:$0xff] %v21374_v9  ;;  %225 = vmatmul.mubr.f32.gmra.mrb[4].mxu1 %v21365_v51  ;;  %v234_v60 = vsub.f32 %v21352_v19, %v21368_v53  ;;  %v245_v15 = vsub.f32 %v21355_v20, %v21371_v55  ;;  %v21389_v13 = vand.u32 4294901760, %v21374_v9  ;;  %v21391_v34 = vsub.f32 %v42_v49, %v996_v14 }
  0x2f   :  { %370 = vmatmul.mubr.f32.vlgmr.msra.gmra.mrb[0].mxu0 %v21208_v29  ;;  %230 = vmatprep.mubr.f32.mxu1 %v24742_v0  ;;  %v24729_v24 = vand.u32 4294901760, %v21379_v39  ;;  %v24728_v47 = vand.u32 4294901760, %v21381_v8  ;;  %v21397_v56 = vsub.f32 %v45_v2, %v999_v45  ;;  %v18696_v7 = vpack.c.bf16 %v21206_v28, %v21204_v27 }
  0x30   :  { %18693 = vmatpush1.bf16.msra.mxu0 %v18692_v25  ;;  %375 = vmatprep.mubr.f32.mxu0 %v24742_v0  ;;  %v21400_v12 = vand.u32 4294901760, %v234_v60  ;;  %v1155_v14 = vand.u32 4294901760, %v21391_v34  ;;  %v21414_v45 = vand.u32 4294901760, %v245_v15  ;;  %v256_v60 = vsub.f32 %v21374_v9, %v21389_v13 }
  0x31   :  { %18725 = vmatpush3.bf16.msra.mxu1 %v21361_v41  ;;  %18695 = vmatprep.subr.bf16.mxu0 %v18694_v48  ;;  %v1142_v49 = vsub.f32 %v21379_v39, %v24729_v24  ;;  %v1149_v2 = vsub.f32 %v21381_v8, %v24728_v47  ;;  %v1162_v25 = vand.u32 4294901760, %v21397_v56  ;;  %v21423_v48 = vpack.c.bf16 %v284_v37, %v272_v33 }
  0x32   :  { %236 = vmatmul.mubr.f32.gmra.mrb[6].mxu1 %v21400_v12  ;;  %18727 = vmatprep.subr.bf16.mxu1 %v21377_v40  ;;  %v21432_v15 = vpack.c.bf16 %v302_v11, %v290_v3  ;;  %v24883_v22 = vand.u32 4294901760, %v21206_v28  ;;  %v21449_v27 = vand.u32 4294901760, %v256_v60  ;;  %v18742_v11 = vpack.c.bf16 %v21397_v56, %v21391_v34 }
  0x33   :  { %377 = vmatmul.mubr.f32.gmra.mrb[2].mxu0 %v21235_v42  ;;  %241 = vmatprep.mubr.f32.mxu1 %v24742_v0  ;;  %v1143_v47 = vand.u32 4294901760, %v1142_v49  ;;  %v1150_v24 = vand.u32 4294901760, %v1149_v2  ;;  %v1156_v49 = vsub.f32 %v21391_v34, %v1155_v14  ;;  %v1163_v58 = vsub.f32 %v21397_v56, %v1162_v25  ;;  %v51_v34 = vld [vmem:[#allocation4 + $0x88] sm:$0xff] }
  0x34   :  { %382 = vmatprep.mubr.f32.mxu0 %v24742_v0  ;;  %18697 = vmatpush1.bf16.msra.mxu0 %v18696_v7  ;;  %v21438_v33 = vpack.c.bf16 %v24883_v22, %v24882_v17  ;;  %v18738_v7 = vpack.c.bf16 %v21381_v8, %v21379_v39  ;;  %v2705_v56 = vand.u32 4294901760, %v51_v34  ;;  %v54_v17 = vld [vmem:[#allocation4 + $0xa0] sm:$0xff]  ;;  %v57_v22 = vld [vmem:[#allocation4 + $0xb8] sm:$0xff]  ;;  %vm4441_vm2 = vcmask 523264  }
  0x35   :  { %18729 = vmatpush3.bf16.msra.mxu1 %v21377_v40  ;;  %v18730_v37 = vpack.c.bf16 %v1150_v24, %v1143_v47  ;;  %18699 = vmatprep.subr.bf16.mxu0 %v21181_v16  ;;  %v1157_v28 = vand.u32 4294901760, %v1156_v49  ;;  %v1164_v3 = vand.u32 4294901760, %v1163_v58  ;;  %v24884_v24 = vand.u32 4294901760, %v21213_v31  ;;  %v47_v58 = vld [vmem:[#allocation4 + $0x68] sm:$0xff] }
  0x36   :  { %247 = vmatmul.mubr.f32.gmra.mrb[8].mxu1 %v21414_v45  ;;  %v24885_v47 = vand.u32 4294901760, %v21215_v32  ;;  %v24886_v31 = vand.u32 4294901760, %v21379_v39  ;;  %v24887_v32 = vand.u32 4294901760, %v21381_v8  ;;  %v18758_v39 = vpack.c.bf16 %v1162_v25, %v1155_v14  ;;  %v48_v8 = vld [vmem:[#allocation4 + $0x70] sm:$0xff] }
  0x37   :  { %384 = vmatmul.mubr.f32.gmra.mrb[4].mxu0 %v21226_v36  ;;  %252 = vmatprep.mubr.f32.mxu1 %v24742_v0  ;;  %v18734_v4 = vpack.c.bf16 %v1164_v3, %v1157_v28  ;;  %v50_v28 = vld [vmem:[#allocation4 + $0x80] sm:$0xff] }
  0x38   :  { %389 = vmatprep.mubr.f32.mxu0 %v24742_v0  ;;  %18731 = vmatprep.subr.bf16.mxu1 %v18730_v37  ;;  %v18706_v2 = vpack.c.bf16 %v24885_v47, %v24884_v24  ;;  %v18754_v60 = vpack.c.bf16 %v24887_v32, %v24886_v31 }
  0x3a   :  { %258 = vmatmul.mubr.f32.gmra.mrb[10].mxu1 %v21449_v27 }
  0x3b   :  { %391 = vmatmul.mubr.f32.gmra.mrb[6].mxu0 %v21263_v54  ;;  %17288 = vmatprep.mubr.f32.mxu1 %v21270_v59 }
  0x3c   :  { %396 = vmatprep.mubr.f32.mxu0 %v24742_v0 }
  0x3e   :  { %17289 = vmatmul.mubr.f32.vlgmr.msra.gmra.mrb[12].mxu1 %v21297_v10 }
  0x3f   :  { %398 = vmatmul.mubr.f32.gmra.mrb[8].mxu0 %v21313_v18  ;;  %17291 = vmatprep.mubr.f32.mxu1 %v21289_v5 }
  0x40   :  { %403 = vmatprep.mubr.f32.mxu0 %v24742_v0  ;;  %18733 = vmatpush3.bf16.msra.mxu1 %v18730_v37 }
  0x41   :  { %18735 = vmatprep.subr.bf16.mxu1 %v18734_v4 }
  0x42   :  { %17292 = vmatmul.mubr.f32.gmra.mrb[14].mxu1 %v21328_v38 }
  0x43   :  { %405 = vmatmul.mubr.f32.gmra.mrb[10].mxu0 %v21343_v63  ;;  %17294 = vmatprep.mubr.f32.mxu1 %v21365_v51 }
  0x44   :  { %410 = vmatprep.mubr.f32.mxu0 %v24742_v0  ;;  %18737 = vmatpush3.bf16.msra.mxu1 %v18734_v4 }
  0x45   :  { %18739 = vmatprep.subr.bf16.mxu1 %v18738_v7 }
  0x46   :  { %17295 = vmatmul.mubr.f32.gmra.mrb[16].mxu1 %v21400_v12 }
  0x47   :  { %412 = vmatmul.mubr.f32.gmra.mrb[12].mxu0 %v21345_v1  ;;  %17297 = vmatprep.mubr.f32.mxu1 %v21414_v45 }
  0x48   :  { %417 = vmatprep.mubr.f32.mxu0 %v24742_v0 }
  0x4a   :  { %17298 = vmatmul.mubr.f32.gmra.mrb[18].mxu1 %v21449_v27 }
  0x4b   :  { %419 = vmatmul.mubr.f32.gmra.mrb[14].mxu0 %v21357_v30  ;;  %17308 = vmatprep.mubr.f32.mxu1 %v21208_v29 }
  0x4c   :  { %505 = vmatprep.mubr.f32.mxu0 %v24742_v0 }
  0x4e   :  { %17309 = vmatmul.mubr.f32.vlgmr.msra.gmra.mrb[12].mxu1 %v21235_v42 }
  0x4f   :  { %508 = vmatmul.mubr.f32.vlgmr.msra.gmra.mrb[0].mxu0 %v21224_v35  ;;  %17311 = vmatprep.mubr.f32.mxu1 %v21226_v36 }
  0x50   :  { %18701 = vmatpush1.bf16.msra.mxu0 %v21188_v21  ;;  %513 = vmatprep.mubr.f32.mxu0 %v24742_v0 }
  0x51   :  { %18741 = vmatpush3.bf16.msra.mxu1 %v18738_v7  ;;  %18703 = vmatprep.subr.bf16.mxu0 %v21194_v23  ;;  %v1815_v7 = vand.u32 4294901760, %v47_v58 }
  0x52   :  { %17312 = vmatmul.mubr.f32.gmra.mrb[14].mxu1 %v21263_v54  ;;  %18743 = vmatprep.subr.bf16.mxu1 %v18742_v11 }
  0x53   :  { %516 = vmatmul.mubr.f32.gmra.mrb[2].mxu0 %v21256_v50  ;;  %17314 = vmatprep.mubr.f32.mxu1 %v21313_v18 }
  0x54   :  { %521 = vmatprep.mubr.f32.mxu0 %v24742_v0  ;;  %18705 = vmatpush1.bf16.msra.mxu0 %v21202_v26 }
  0x55   :  { %18745 = vmatpush3.bf16.msra.mxu1 %v18742_v11  ;;  %18707 = vmatprep.subr.bf16.mxu0 %v18706_v2  ;;  %v1819_v11 = vand.u32 4294901760, %v50_v28 }
  0x56   :  { %17315 = vmatmul.mubr.f32.gmra.mrb[16].mxu1 %v21343_v63  ;;  %18747 = vmatprep.subr.bf16.mxu1 %v21361_v41 }
  0x57   :  { %524 = vmatmul.mubr.f32.gmra.mrb[4].mxu0 %v21241_v44  ;;  %17317 = vmatprep.mubr.f32.mxu1 %v21345_v1 }
  0x58   :  { %529 = vmatprep.mubr.f32.mxu0 %v24742_v0 }
  0x5a   :  { %17318 = vmatmul.mubr.f32.gmra.mrb[18].mxu1 %v21357_v30 }
  0x5b   :  { %532 = vmatmul.mubr.f32.gmra.mrb[6].mxu0 %v21275_v62  ;;  %17328 = vmatprep.mubr.f32.mxu1 %v21224_v35 }
  0x5c   :  { %537 = vmatprep.mubr.f32.mxu0 %v24742_v0 }
  0x5e   :  { %17329 = vmatmul.mubr.f32.vlgmr.msra.gmra.mrb[12].mxu1 %v21256_v50 }
  0x5f   :  { %540 = vmatmul.mubr.f32.gmra.mrb[8].mxu0 %v21331_v46  ;;  %17331 = vmatprep.mubr.f32.mxu1 %v21241_v44 }
  0x60   :  { %545 = vmatprep.mubr.f32.mxu0 %v24742_v0  ;;  %18749 = vmatpush3.bf16.msra.mxu1 %v21361_v41 }
  0x61   :  { %18751 = vmatprep.subr.bf16.mxu1 %v21377_v40 }
  0x62   :  { %17332 = vmatmul.mubr.f32.gmra.mrb[14].mxu1 %v21275_v62 }
  0x63   :  { %548 = vmatmul.mubr.f32.gmra.mrb[10].mxu0 %v21352_v19  ;;  %17334 = vmatprep.mubr.f32.mxu1 %v21331_v46 }
  0x64   :  { %553 = vmatprep.mubr.f32.mxu0 %v24742_v0  ;;  %18753 = vmatpush3.bf16.msra.mxu1 %v21377_v40 }
  0x65   :  { %18755 = vmatprep.subr.bf16.mxu1 %v18754_v60 }
  0x66   :  { %17335 = vmatmul.mubr.f32.gmra.mrb[16].mxu1 %v21352_v19 }
  0x67   :  { %556 = vmatmul.mubr.f32.gmra.mrb[12].mxu0 %v21355_v20  ;;  %17337 = vmatprep.mubr.f32.mxu1 %v21355_v20 }
  0x68   :  { %561 = vmatprep.mubr.f32.mxu0 %v24742_v0 }
  0x6a   :  { %17338 = vmatmul.mubr.f32.gmra.mrb[18].mxu1 %v21374_v9 }
  0x6b   :  { %564 = vmatmul.mubr.f32.gmra.mrb[14].mxu0 %v21374_v9  ;;  %17348 = vmatprep.mubr.f32.mxu1 %v21238_v43 }
  0x6c   :  { %642 = vmatprep.mubr.f32.mxu0 %v24742_v0 }
  0x6e   :  { %17349 = vmatmul.mubr.f32.vlgmr.msra.gmra.mrb[12].mxu1 %v21266_v57 }
  0x6f   :  { %646 = vmatmul.mubr.f32.vlgmr.msra.gmra.mrb[0].mxu0 %v21238_v43  ;;  %17351 = vmatprep.mubr.f32.mxu1 %v21261_v52 }
  0x70   :  { %18709 = vmatpush1.bf16.msra.mxu0 %v21423_v48  ;;  %651 = vmatprep.mubr.f32.mxu0 %v24742_v0  ;;  %v21561_v48 = vsub.f32 %v51_v34, %v2705_v56 }
  0x71   :  { %18757 = vmatpush3.bf16.msra.mxu1 %v18754_v60  ;;  %18711 = vmatprep.subr.bf16.mxu0 %v21432_v15  ;;  %v21599_v60 = vpack.c.bf16 %v1819_v11, %v1815_v7 }
  0x72   :  { %17352 = vmatmul.mubr.f32.gmra.mrb[14].mxu1 %v21292_v6  ;;  %18759 = vmatprep.subr.bf16.mxu1 %v18758_v39  ;;  %v24734_v15 = vand.u32 4294901760, %v21561_v48 }
  0x73   :  { %655 = vmatmul.mubr.f32.gmra.mrb[2].mxu0 %v21266_v57  ;;  %17354 = vmatprep.mubr.f32.mxu1 %v21341_v61 }
  0x74   :  { %660 = vmatprep.mubr.f32.mxu0 %v24742_v0  ;;  %18713 = vmatpush1.bf16.msra.mxu0 %v21438_v33  ;;  %v2708_v33 = vand.u32 4294901760, %v54_v17  ;;  %v2861_v49 = vsub.f32 %v21561_v48, %v24734_v15 }
  0x75   :  { %18761 = vmatpush3.bf16.msra.mxu1 %v18758_v39  ;;  %18715 = vmatprep.subr.bf16.mxu0 %v21181_v16  ;;  %v2702_v16 = vand.u32 4294901760, %v48_v8 }
  0x76   :  { %17355 = vmatmul.mubr.f32.gmra.mrb[16].mxu1 %v21368_v53  ;;  %18763 = vmatprep.subr.bf16.mxu1 %v21361_v41  ;;  %v21584_v3 = vsub.f32 %v54_v17, %v2708_v33  ;;  %v2862_v2 = vand.u32 4294901760, %v2861_v49  ;;  %v53_v49 = vld [vmem:[#allocation4 + $0x98] sm:$0xff] }
  0x77   :  { %664 = vmatmul.mubr.f32.gmra.mrb[4].mxu0 %v21261_v52  ;;  %17357 = vmatprep.mubr.f32.mxu1 %v21371_v55  ;;  %v21556_v14 = vpack.c.bf16 %v2705_v56, %v2702_v16  ;;  %v21559_v25 = vsub.f32 %v48_v8, %v2702_v16  ;;  %v21627_v16 = vsub.f32 %v47_v58, %v1815_v7  ;;  %v56_v58 = vld [vmem:[#allocation4 + $0xb0] sm:$0xff] }
  0x78   :  { %669 = vmatprep.mubr.f32.mxu0 %v24742_v0  ;;  %v24731_v31 = vand.u32 4294901760, %v21584_v3  ;;  %v21629_v56 = vsub.f32 %v50_v28, %v1819_v11  ;;  %v1823_v11 = vand.u32 4294901760, %v53_v49 }
  0x79   :  { %v18834_v17 = vpack.c.bf16 %v21561_v48, %v21559_v25 }
  0x7a   :  { %17358 = vmatmul.mubr.f32.gmra.mrb[18].mxu1 %v21389_v13 }
  0x7b   :  { %673 = vmatmul.mubr.f32.gmra.mrb[6].mxu0 %v21292_v6  ;;  %17368 = vmatprep.mubr.f32.mxu1 %v21208_v29 }
  0x7c   :  { %678 = vmatprep.mubr.f32.mxu0 %v24742_v0 }
  0x7e   :  { %17369 = vmatmul.mubr.f32.vlgmr.msra.gmra.mrb[12].mxu1 %v21235_v42 }
  0x7f   :  { %682 = vmatmul.mubr.f32.gmra.mrb[8].mxu0 %v21341_v61  ;;  %17371 = vmatprep.mubr.f32.mxu1 %v21226_v36 }
  0x80   :  { %687 = vmatprep.mubr.f32.mxu0 %v24742_v0  ;;  %18765 = vmatpush3.bf16.msra.mxu1 %v21361_v41  ;;  %v2853_v41 = vand.u32 4294901760, %v21559_v25 }
  0x81   :  { %18767 = vmatprep.subr.bf16.mxu1 %v21377_v40 }
  0x82   :  { %17372 = vmatmul.mubr.f32.gmra.mrb[14].mxu1 %v21263_v54  ;;  %v2854_v37 = vsub.f32 %v21559_v25, %v2853_v41 }
  0x83   :  { %691 = vmatmul.mubr.f32.gmra.mrb[10].mxu0 %v21368_v53  ;;  %17374 = vmatprep.mubr.f32.mxu1 %v21313_v18 }
  0x84   :  { %696 = vmatprep.mubr.f32.mxu0 %v24742_v0  ;;  %18769 = vmatpush3.bf16.msra.mxu1 %v21377_v40  ;;  %v2711_v40 = vand.u32 4294901760, %v57_v22  ;;  %v2855_v47 = vand.u32 4294901760, %v2854_v37  ;;  %v24733_v37 = vand.u32 4294901760, %v21629_v56 }
  0x85   :  { %18819 = vmatprep.subr.bf16.mxu1 %v21556_v14 }
  0x86   :  { %17375 = vmatmul.mubr.f32.gmra.mrb[16].mxu1 %v21343_v63  ;;  %v21586_v4 = vsub.f32 %v57_v22, %v2711_v40  ;;  %v21589_v24 = vpack.c.bf16 %v2711_v40, %v2708_v33  ;;  %v18826_v39 = vpack.c.bf16 %v2862_v2, %v2855_v47  ;;  %v46_v22 = vld [vmem:[#allocation4 + $0x60] sm:$0xff]  ;;  %v49_v33 = vld [vmem:[#allocation4 + $0x78] sm:$0xff]  ;;  %v24732_v40 = vand.u32 4294901760, %v21627_v16  ;;  %v52_v2 = vld [vmem:[#allocation4 + $0x90] sm:$0xff] }
  0x87   :  { %700 = vmatmul.mubr.f32.gmra.mrb[12].mxu0 %v21371_v55  ;;  %17377 = vmatprep.mubr.f32.mxu1 %v21345_v1  ;;  %v1817_v28 = vand.u32 4294901760, %v46_v22  ;;  %v1821_v7 = vand.u32 4294901760, %v49_v33  ;;  %v1827_v47 = vand.u32 4294901760, %v56_v58 }
  0x88   :  { %705 = vmatprep.mubr.f32.mxu0 %v24742_v0  ;;  %v24730_v32 = vand.u32 4294901760, %v21586_v4 }
  0x8a   :  { %17378 = vmatmul.mubr.f32.gmra.mrb[18].mxu1 %v21357_v30 }
  0x8b   :  { %709 = vmatmul.mubr.f32.gmra.mrb[14].mxu0 %v21389_v13  ;;  %17388 = vmatprep.mubr.f32.mxu1 %v21208_v29 }
  0x8c   :  { %803 = vmatprep.mubr.f32.mxu0 %v24742_v0 }
  0x8e   :  { %17389 = vmatmul.mubr.f32.vlgmr.msra.gmra.mrb[12].mxu1 %v21235_v42 }
  0x8f   :  { %805 = vmatmul.mubr.f32.vlgmr.msra.gmra.mrb[0].mxu0 %v21208_v29  ;;  %17391 = vmatprep.mubr.f32.mxu1 %v21226_v36 }
  0x90   :  { %18717 = vmatpush1.bf16.msra.mxu0 %v21188_v21  ;;  %810 = vmatprep.mubr.f32.mxu0 %v24742_v0  ;;  %v2868_v21 = vsub.f32 %v21584_v3, %v24731_v31 }
  0x91   :  { %18821 = vmatpush3.bf16.msra.mxu1 %v21556_v14  ;;  %18719 = vmatprep.subr.bf16.mxu0 %v21194_v23  ;;  %v2875_v23 = vsub.f32 %v21586_v4, %v24730_v32  ;;  %v21655_v32 = vpack.c.bf16 %v1827_v47, %v1823_v11 }
  0x92   :  { %17392 = vmatmul.mubr.f32.gmra.mrb[14].mxu1 %v21263_v54  ;;  %18823 = vmatprep.subr.bf16.mxu1 %v21589_v24 }
  0x93   :  { %812 = vmatmul.mubr.f32.gmra.mrb[2].mxu0 %v21235_v42  ;;  %17394 = vmatprep.mubr.f32.mxu1 %v21313_v18  ;;  %v2876_v8 = vand.u32 4294901760, %v2875_v23  ;;  %v1991_v23 = vsub.f32 %v21629_v56, %v24733_v37  ;;  %v18838_v37 = vpack.c.bf16 %v21586_v4, %v21584_v3 }
  0x94   :  { %817 = vmatprep.mubr.f32.mxu0 %v24742_v0  ;;  %18721 = vmatpush1.bf16.msra.mxu0 %v21202_v26  ;;  %v2869_v26 = vand.u32 4294901760, %v2868_v21  ;;  %v1979_v21 = vsub.f32 %v21627_v16, %v24732_v40 }
  0x95   :  { %18825 = vmatpush3.bf16.msra.mxu1 %v21589_v24  ;;  %18771 = vmatprep.subr.bf16.mxu0 %v21599_v60  ;;  %v1992_v40 = vand.u32 4294901760, %v1991_v23 }
  0x96   :  { %17395 = vmatmul.mubr.f32.gmra.mrb[16].mxu1 %v21343_v63  ;;  %18827 = vmatprep.subr.bf16.mxu1 %v18826_v39  ;;  %v18830_v34 = vpack.c.bf16 %v2876_v8, %v2869_v26  ;;  %v21653_v26 = vpack.c.bf16 %v1821_v7, %v1817_v28  ;;  %v1825_v8 = vand.u32 4294901760, %v52_v2  ;;  %v1980_v31 = vand.u32 4294901760, %v1979_v21 }
  0x97   :  { %819 = vmatmul.mubr.f32.gmra.mrb[4].mxu0 %v21226_v36  ;;  %17397 = vmatprep.mubr.f32.mxu1 %v21345_v1 }
  0x98   :  { %824 = vmatprep.mubr.f32.mxu0 %v24742_v0  ;;  %v18778_v21 = vpack.c.bf16 %v1992_v40, %v1980_v31  ;;  %v21682_v31 = vsub.f32 %v46_v22, %v1817_v28  ;;  %v21690_v40 = vsub.f32 %v53_v49, %v1823_v11  ;;  %v24888_v22 = vand.u32 4294901760, %v21561_v48 }
  0x9a   :  { %17398 = vmatmul.mubr.f32.gmra.mrb[18].mxu1 %v21357_v30  ;;  %v18850_v28 = vpack.c.bf16 %v24888_v22, %v2853_v41  ;;  %v24736_v48 = vand.u32 4294901760, %v21690_v40  ;;  %v24890_v22 = vand.u32 4294901760, %v21586_v4 }
  0x9b   :  { %826 = vmatmul.mubr.f32.gmra.mrb[6].mxu0 %v21263_v54  ;;  %17408 = vmatprep.mubr.f32.mxu1 %v21270_v59 }
  0x9c   :  { %831 = vmatprep.mubr.f32.mxu0 %v24742_v0 }
  0x9e   :  { %17409 = vmatmul.mubr.f32.vlgmr.msra.gmra.mrb[20].mxu1 %v21297_v10 }
  0x9f   :  { %833 = vmatmul.mubr.f32.gmra.mrb[8].mxu0 %v21313_v18  ;;  %17411 = vmatprep.mubr.f32.mxu1 %v21289_v5 }
  0xa0   :  { %838 = vmatprep.mubr.f32.mxu0 %v24742_v0  ;;  %18829 = vmatpush3.bf16.msra.mxu1 %v18826_v39  ;;  %v55_v39 = vld [vmem:[#allocation4 + $0xa8] sm:$0xff] }
  0xa1   :  { %18831 = vmatprep.subr.bf16.mxu1 %v18830_v34 }
  0xa2   :  { %17412 = vmatmul.mubr.f32.gmra.mrb[22].mxu1 %v21328_v38 }
  0xa3   :  { %840 = vmatmul.mubr.f32.gmra.mrb[10].mxu0 %v21343_v63  ;;  %17414 = vmatprep.mubr.f32.mxu1 %v21365_v51 }
  0xa4   :  { %845 = vmatprep.mubr.f32.mxu0 %v24742_v0  ;;  %18833 = vmatpush3.bf16.msra.mxu1 %v18830_v34  ;;  %v1829_v34 = vand.u32 4294901760, %v55_v39 }
  0xa5   :  { %18835 = vmatprep.subr.bf16.mxu1 %v18834_v17 }
  0xa6   :  { %17415 = vmatmul.mubr.f32.gmra.mrb[24].mxu1 %v21400_v12  ;;  %v21664_v15 = vpack.c.bf16 %v1829_v34, %v1825_v8  ;;  %v21705_v49 = vsub.f32 %v55_v39, %v1829_v34  ;;  %v2003_v39 = vsub.f32 %v21690_v40, %v24736_v48 }
  0xa7   :  { %847 = vmatmul.mubr.f32.gmra.mrb[12].mxu0 %v21345_v1  ;;  %17417 = vmatprep.mubr.f32.mxu1 %v21414_v45 }
  0xa8   :  { %852 = vmatprep.mubr.f32.mxu0 %v24742_v0 }
  0xaa   :  { %17418 = vmatmul.mubr.f32.gmra.mrb[26].mxu1 %v21449_v27 }
  0xab   :  { %854 = vmatmul.mubr.f32.gmra.mrb[14].mxu0 %v21357_v30  ;;  %17428 = vmatprep.mubr.f32.mxu1 %v21208_v29 }
  0xac   :  { %932 = vmatprep.mubr.f32.mxu0 %v24742_v0 }
  0xae   :  { %17429 = vmatmul.mubr.f32.vlgmr.msra.gmra.mrb[20].mxu1 %v21235_v42 }
  0xaf   :  { %934 = vmatmul.mubr.f32.vlgmr.msra.gmra.mrb[0].mxu0 %v21208_v29  ;;  %17431 = vmatprep.mubr.f32.mxu1 %v21226_v36 }
  0xb0   :  { %18773 = vmatpush1.bf16.msra.mxu0 %v21653_v26  ;;  %939 = vmatprep.mubr.f32.mxu0 %v24742_v0 }
  0xb1   :  { %18837 = vmatpush3.bf16.msra.mxu1 %v18834_v17  ;;  %18775 = vmatprep.subr.bf16.mxu0 %v21655_v32  ;;  %v21686_v17 = vsub.f32 %v49_v33, %v1821_v7  ;;  %v24738_v33 = vand.u32 4294901760, %v21682_v31  ;;  %v21703_v7 = vsub.f32 %v52_v2, %v1825_v8  ;;  %v2020_v2 = vand.u32 4294901760, %v21705_v49 }
  0xb2   :  { %17432 = vmatmul.mubr.f32.gmra.mrb[22].mxu1 %v21263_v54  ;;  %18839 = vmatprep.subr.bf16.mxu1 %v18838_v37 }
  0xb3   :  { %941 = vmatmul.mubr.f32.gmra.mrb[2].mxu0 %v21235_v42  ;;  %17434 = vmatprep.mubr.f32.mxu1 %v21313_v18  ;;  %v24735_v25 = vand.u32 4294901760, %v21686_v17 }
  0xb4   :  { %946 = vmatprep.mubr.f32.mxu0 %v24742_v0  ;;  %18777 = vmatpush1.bf16.msra.mxu0 %v21664_v15 }
  0xb5   :  { %18841 = vmatpush3.bf16.msra.mxu1 %v18838_v37  ;;  %18779 = vmatprep.subr.bf16.mxu0 %v18778_v21  ;;  %v21692_v37 = vsub.f32 %v56_v58, %v1827_v47  ;;  %v1985_v58 = vsub.f32 %v21682_v31, %v24738_v33  ;;  %v1997_v11 = vsub.f32 %v21686_v17, %v24735_v25  ;;  %v2008_v47 = vand.u32 4294901760, %v21703_v7 }
  0xb6   :  { %17435 = vmatmul.mubr.f32.gmra.mrb[24].mxu1 %v21343_v63  ;;  %18843 = vmatprep.subr.bf16.mxu1 %v21556_v14  ;;  %v24889_v21 = vand.u32 4294901760, %v21584_v3  ;;  %v2004_v33 = vand.u32 4294901760, %v2003_v39 }
  0xb7   :  { %948 = vmatmul.mubr.f32.gmra.mrb[4].mxu0 %v21226_v36  ;;  %17437 = vmatprep.mubr.f32.mxu1 %v21345_v1  ;;  %v24737_v41 = vand.u32 4294901760, %v21692_v37  ;;  %v1986_v8 = vand.u32 4294901760, %v1985_v58  ;;  %v1998_v34 = vand.u32 4294901760, %v1997_v11  ;;  %v2009_v48 = vsub.f32 %v21703_v7, %v2008_v47 }
  0xb8   :  { %953 = vmatprep.mubr.f32.mxu0 %v24742_v0  ;;  %v18854_v25 = vpack.c.bf16 %v24890_v22, %v24889_v21 }
  0xb9   :  { %v2015_v23 = vsub.f32 %v21692_v37, %v24737_v41  ;;  %v2021_v41 = vsub.f32 %v21705_v49, %v2020_v2  ;;  %v18780_v58 = vpack.c.bf16 %v1998_v34, %v1986_v8  ;;  %v2010_v3 = vand.u32 4294901760, %v2009_v48 }
  0xba   :  { %17438 = vmatmul.mubr.f32.gmra.mrb[26].mxu1 %v21357_v30 }
  0xbb   :  { %955 = vmatmul.mubr.f32.gmra.mrb[6].mxu0 %v21263_v54  ;;  %17448 = vmatprep.mubr.f32.mxu1 %v21224_v35  ;;  %v2022_v4 = vand.u32 4294901760, %v2021_v41 }
  0xbc   :  { %960 = vmatprep.mubr.f32.mxu0 %v24742_v0 }
  0xbd   :  { %v18784_v39 = vpack.c.bf16 %v2022_v4, %v2010_v3  ;;  %v24900_v4 = vand.u32 4294901760, %v21690_v40 }
  0xbe   :  { %17449 = vmatmul.mubr.f32.vlgmr.msra.gmra.mrb[20].mxu1 %v21256_v50 }
  0xbf   :  { %962 = vmatmul.mubr.f32.gmra.mrb[8].mxu0 %v21313_v18  ;;  %17451 = vmatprep.mubr.f32.mxu1 %v21241_v44 }
  0xc0   :  { %967 = vmatprep.mubr.f32.mxu0 %v24742_v0  ;;  %18845 = vmatpush3.bf16.msra.mxu1 %v21556_v14 }
  0xc1   :  { %18847 = vmatprep.subr.bf16.mxu1 %v21589_v24 }
  0xc2   :  { %17452 = vmatmul.mubr.f32.gmra.mrb[22].mxu1 %v21275_v62 }
  0xc3   :  { %969 = vmatmul.mubr.f32.gmra.mrb[10].mxu0 %v21343_v63  ;;  %17454 = vmatprep.mubr.f32.mxu1 %v21331_v46 }
  0xc4   :  { %974 = vmatprep.mubr.f32.mxu0 %v24742_v0  ;;  %18849 = vmatpush3.bf16.msra.mxu1 %v21589_v24 }
  0xc5   :  { %18851 = vmatprep.subr.bf16.mxu1 %v18850_v28 }
  0xc6   :  { %17455 = vmatmul.mubr.f32.gmra.mrb[24].mxu1 %v21352_v19 }
  0xc7   :  { %976 = vmatmul.mubr.f32.gmra.mrb[12].mxu0 %v21345_v1  ;;  %17457 = vmatprep.mubr.f32.mxu1 %v21355_v20 }
  0xc8   :  { %981 = vmatprep.mubr.f32.mxu0 %v24742_v0 }
  0xca   :  { %17458 = vmatmul.mubr.f32.gmra.mrb[26].mxu1 %v21374_v9  ;;  %v2016_v9 = vand.u32 4294901760, %v2015_v23 }
  0xcb   :  { %983 = vmatmul.mubr.f32.gmra.mrb[14].mxu0 %v21357_v30  ;;  %17468 = vmatprep.mubr.f32.mxu1 %v21238_v43 }
  0xcc   :  { %1887 = vmatprep.mubr.f32.mxu0 %v24742_v0  ;;  %v18782_v11 = vpack.c.bf16 %v2016_v9, %v2004_v33 }
  0xce   :  { %17469 = vmatmul.mubr.f32.vlgmr.msra.gmra.mrb[20].mxu1 %v21266_v57 }
  0xcf   :  { %17471 = vmatprep.mubr.f32.mxu1 %v21261_v52  ;;  %18853 = vmatpush3.bf16.msra.mxu1 %v18850_v28  ;;  %v18786_v28 = vpack.c.bf16 %v21629_v56, %v21627_v16 }
  0xd0   :  { %18855 = vmatprep.subr.bf16.mxu1 %v18854_v25 }
  0xd2   :  { %17472 = vmatmul.mubr.f32.gmra.mrb[22].mxu1 %v21292_v6 }
  0xd3   :  { %1893 = vmatmul.mubr.f32.vlgmr.msra.gmra.mrb[14].mxu0 %v21270_v59  ;;  %17474 = vmatprep.mubr.f32.mxu1 %v21341_v61  ;;  %v18788_v59 = vpack.c.bf16 %v21686_v17, %v21682_v31 }
  0xd4   :  { %18781 = vmatpush1.bf16.msra.mxu0 %v18780_v58  ;;  %1898 = vmatprep.mubr.f32.mxu0 %v24742_v0  ;;  %v24899_v58 = vand.u32 4294901760, %v21686_v17 }
  0xd5   :  { %18857 = vmatpush3.bf16.msra.mxu1 %v18854_v25  ;;  %18783 = vmatprep.subr.bf16.mxu0 %v18782_v11 }
  0xd6   :  { %17475 = vmatmul.mubr.f32.gmra.mrb[24].mxu1 %v21368_v53  ;;  %18859 = vmatprep.subr.bf16.mxu1 %v21556_v14 }
  0xd7   :  { %1904 = vmatmul.mubr.f32.gmra.mrb[12].mxu0 %v21297_v10  ;;  %17477 = vmatprep.mubr.f32.mxu1 %v21371_v55  ;;  %v18792_v10 = vpack.c.bf16 %v21705_v49, %v21703_v7 }
  0xd8   :  { %1909 = vmatprep.mubr.f32.mxu0 %v24742_v0  ;;  %18785 = vmatpush1.bf16.msra.mxu0 %v18784_v39  ;;  %v3524_v39 = vld [vmem:[#allocation4 + $0xd8] sm:$0xff] }
  0xd9   :  { %18787 = vmatprep.subr.bf16.mxu0 %v18786_v28 }
  0xda   :  { %17478 = vmatmul.mubr.f32.gmra.mrb[26].mxu1 %v21389_v13 }
  0xdb   :  { %1915 = vmatmul.mubr.f32.gmra.mrb[10].mxu0 %v21289_v5  ;;  %17488 = vmatprep.mubr.f32.mxu1 %v21208_v29  ;;  %v18790_v5 = vpack.c.bf16 %v21692_v37, %v21690_v40 }
  0xdc   :  { %1920 = vmatprep.mubr.f32.mxu0 %v24742_v0 }
  0xde   :  { %17489 = vmatmul.mubr.f32.vlgmr.msra.gmra.mrb[20].mxu1 %v21235_v42 }
  0xdf   :  { %1926 = vmatmul.mubr.f32.gmra.mrb[8].mxu0 %v21328_v38  ;;  %17491 = vmatprep.mubr.f32.mxu1 %v21226_v36  ;;  %v24891_v38 = vand.u32 4294901760, %v21627_v16  ;;  %v24740_v16 = vmov 0.0|0.0  }
  0xe0   :  { %1931 = vmatprep.mubr.f32.mxu0 %v24742_v0  ;;  %18861 = vmatpush3.bf16.msra.mxu1 %v21556_v14 }
  0xe1   :  { %18863 = vmatprep.subr.bf16.mxu1 %v21589_v24 }
  0xe2   :  { %17492 = vmatmul.mubr.f32.gmra.mrb[22].mxu1 %v21263_v54 }
  0xe3   :  { %1937 = vmatmul.mubr.f32.gmra.mrb[6].mxu0 %v21365_v51  ;;  %17494 = vmatprep.mubr.f32.mxu1 %v21313_v18  ;;  %v24892_v51 = vand.u32 4294901760, %v21629_v56 }
  0xe4   :  { %1942 = vmatprep.mubr.f32.mxu0 %v24742_v0  ;;  %18865 = vmatpush3.bf16.msra.mxu1 %v21589_v24  ;;  %v3532_v24 = vld [vmem:[#allocation4 + $0x118] sm:$0xff] }
  0xe5   :  { %v18802_v9 = vpack.c.bf16 %v24892_v51, %v24891_v38  ;;  %18874 = vmatprep.subr.bf16.mxu1 %v24740_v16 }
  0xe6   :  { %17495 = vmatmul.mubr.f32.gmra.mrb[24].mxu1 %v21343_v63 }
  0xe7   :  { %1948 = vmatmul.mubr.f32.gmra.mrb[4].mxu0 %v21400_v12  ;;  %17497 = vmatprep.mubr.f32.mxu1 %v21345_v1  ;;  %v3523_v12 = vld [vmem:[#allocation4 + $0xd0] sm:$0xff] }
  0xe8   :  { %1953 = vmatprep.mubr.f32.mxu0 %v24742_v0 }
  0xea   :  { %17498 = vmatmul.mubr.f32.gmra.mrb[26].mxu1 %v21357_v30 }
  0xeb   :  { %1959 = vmatmul.mubr.f32.gmra.mrb[2].mxu0 %v21414_v45  ;;  %17508 = vmatprep.mubr.f32.mxu1 %v21208_v29  ;;  %v3526_v45 = vld [vmem:[#allocation4 + $0xe8] sm:$0xff] }
  0xec   :  { %1964 = vmatprep.mubr.f32.mxu0 %v24742_v0 }
  0xee   :  { %17509 = vmatmul.mubr.f32.vlgmr.msra.gmra.mrb[20].mxu1 %v21235_v42 }
  0xef   :  { %1970 = vmatmul.mubr.f32.gmra.mrb[0].mxu0 %v21449_v27  ;;  %17511 = vmatprep.mubr.f32.mxu1 %v21226_v36  ;;  %v3529_v27 = vld [vmem:[#allocation4 + $0x100] sm:$0xff] }
  0xf0   :  { %2080 = vmatprep.mubr.f32.mxu0 %v24742_v0 }
  0xf2   :  { %17512 = vmatmul.mubr.f32.gmra.mrb[22].mxu1 %v21263_v54 }
  0xf3   :  { %2082 = vmatmul.mubr.f32.vlgmr.msra.gmra.mrb[14].mxu0 %v21208_v29  ;;  %17514 = vmatprep.mubr.f32.mxu1 %v21313_v18 }
  0xf4   :  { %18789 = vmatpush1.bf16.msra.mxu0 %v18788_v59  ;;  %2087 = vmatprep.mubr.f32.mxu0 %v24742_v0  ;;  %v3528_v59 = vld [vmem:[#allocation4 + $0xf8] sm:$0xff] }
  0xf5   :  { %18791 = vmatprep.subr.bf16.mxu0 %v18790_v5  ;;  %v3531_v5 = vld [vmem:[#allocation4 + $0x110] sm:$0xff] }
  0xf6   :  { %17515 = vmatmul.mubr.f32.gmra.mrb[24].mxu1 %v21343_v63 }
  0xf7   :  { %2089 = vmatmul.mubr.f32.gmra.mrb[12].mxu0 %v21235_v42  ;;  %17517 = vmatprep.mubr.f32.mxu1 %v21345_v1  ;;  %v21821_v14 = vpop.f32.mrb[0].mxu1 }
  0xf8   :  { %2094 = vmatprep.mubr.f32.mxu0 %v24742_v0  ;;  %18793 = vmatpush1.bf16.msra.mxu0 %v18792_v10  ;;  %v21827_v33 = vpop.f32.mrb[1].mxu1 }
  0xf9   :  { %18795 = vmatprep.subr.bf16.mxu0 %v21599_v60 }
  0xfa   :  { %17518 = vmatmul.mubr.f32.gmra.mrb[26].mxu1 %v21357_v30 }
  0xfb   :  { %2096 = vmatmul.mubr.f32.gmra.mrb[10].mxu0 %v21226_v36  ;;  %v21830_v56 = vpop.f32.mrb[2].mxu1  ;;  %17528 = vmatprep.mubr.msk.f32.mxu1 %vm21143_vm1, %v24742_v0 }
  0xfc   :  { %2101 = vmatprep.mubr.f32.mxu0 %v24742_v0  ;;  %v21837_v25 = vpop.f32.mrb[3].mxu1 }
  0xff   :  { %2103 = vmatmul.mubr.f32.gmra.mrb[8].mxu0 %v21263_v54 }
 0x100   :  { %2108 = vmatprep.mubr.f32.mxu0 %v24742_v0 }
 0x101   :  { %v21841_v48 = vpop.f32.mrb[4].mxu1 }
 0x102   :  { %v21844_v41 = vpop.f32.mrb[5].mxu1 }
 0x103   :  { %2110 = vmatmul.mubr.f32.gmra.mrb[6].mxu0 %v21313_v18 }
 0x104   :  { %2115 = vmatprep.mubr.f32.mxu0 %v24742_v0 }
 0x105   :  { %v21846_v23 = vpop.f32.mrb[6].mxu1 }
 0x106   :  { %v21849_v8 = vpop.f32.mrb[7].mxu1 }
 0x107   :  { %2117 = vmatmul.mubr.f32.gmra.mrb[4].mxu0 %v21343_v63 }
 0x108   :  { %2122 = vmatprep.mubr.f32.mxu0 %v24742_v0 }
 0x109   :  { %v21852_v34 = vpop.f32.mrb[8].mxu1 }
 0x10a   :  { %24893 = vst [vmem:[#allocation11_spill] sm:$0xff] %v21852_v34 }
 0x10b   :  { %2124 = vmatmul.mubr.f32.gmra.mrb[2].mxu0 %v21345_v1 }
 0x10c   :  { %2129 = vmatprep.mubr.f32.mxu0 %v24742_v0 }
 0x10f   :  { %2131 = vmatmul.mubr.f32.gmra.mrb[0].mxu0 %v21357_v30 }
 0x110   :  { %2217 = vmatprep.mubr.f32.mxu0 %v24742_v0 }
 0x113   :  { %2220 = vmatmul.mubr.f32.vlgmr.msra.gmra.mrb[14].mxu0 %v21224_v35  ;;  %v21825_v35 = vpack.c.bf16 %v3526_v45, %v3523_v12  ;;  %v21956_v12 = vpack.c.bf16 %v3531_v5, %v3528_v59  ;;  %v3527_v45 = vld [vmem:[#allocation4 + $0xf0] sm:$0xff] }
 0x114   :  { %18797 = vmatpush1.bf16.msra.mxu0 %v21653_v26  ;;  %2225 = vmatprep.mubr.f32.mxu0 %v24742_v0 }
 0x115   :  { %18799 = vmatprep.subr.bf16.mxu0 %v21655_v32  ;;  %18876 = vmatpush3.bf16.msra.mxu1 %v21825_v35 }
 0x116   :  { %18877 = vmatprep.subr.bf16.mxu1 %v24740_v16 }
 0x117   :  { %2228 = vmatmul.mubr.f32.gmra.mrb[12].mxu0 %v21256_v50  ;;  %v21833_v50 = vpack.c.bf16 %v3532_v24, %v3529_v27  ;;  %v3530_v27 = vld [vmem:[#allocation4 + $0x108] sm:$0xff] }
 0x118   :  { %2233 = vmatprep.mubr.f32.mxu0 %v24742_v0  ;;  %18801 = vmatpush1.bf16.msra.mxu0 %v21664_v15  ;;  %v21961_v24 = vpack.c.bf16 %v3530_v27, %v3527_v45 }
 0x119   :  { %18803 = vmatprep.subr.bf16.mxu0 %v18802_v9  ;;  %18879 = vmatpush3.bf16.msra.mxu1 %v21833_v50 }
 0x11a   :  { %18888 = vmatprep.subr.bf16.mxu1 %v24740_v16 }
 0x11b   :  { %2236 = vmatmul.mubr.f32.gmra.mrb[10].mxu0 %v21241_v44  ;;  %v21855_v44 = vpop.f32.mrb[9].mxu1 }
 0x11c   :  { %2241 = vmatprep.mubr.f32.mxu0 %v24742_v0  ;;  %24894 = vst [vmem:[#allocation12_spill] sm:$0xff] %v21855_v44  ;;  %17529 = vmatmul.mubr.f32.vlgmr.msra.gmra.mrb[28].mxu1 %v24742_v0  ;;  %v21858_v21 = vpop.f32.mrb[10].mxu1 }
 0x11d   :  { %24895 = vst [vmem:[#allocation13_spill] sm:$0xff] %v21858_v21  ;;  %v21861_v22 = vpop.f32.mrb[11].mxu1  ;;  %18890 = vmatpush3.bf16.msra.mxu1 %v21825_v35  ;;  %17539 = vmatprep.mubr.msk.f32.mxu1 %vm21143_vm1, %v24742_v0 }
 0x11e   :  { %24896 = vst [vmem:[#allocation14_spill] sm:$0xff] %v21861_v22  ;;  %18891 = vmatprep.subr.bf16.mxu1 %v24740_v16 }
 0x11f   :  { %2244 = vmatmul.mubr.f32.gmra.mrb[8].mxu0 %v21275_v62  ;;  %v24897_v62 = vld [vmem:[#allocation10_spill] sm:$0xff] }
 0x120   :  { %2249 = vmatprep.mubr.f32.mxu0 %v24742_v0 }
 0x121   :  { %18893 = vmatpush3.bf16.msra.mxu1 %v21833_v50 }
 0x122   :  { %18902 = vmatprep.subr.bf16.mxu1 %v24740_v16 }
 0x123   :  { %2252 = vmatmul.mubr.f32.gmra.mrb[6].mxu0 %v21331_v46  ;;  %v24898_v46 = vand.u32 4294901760, %v21682_v31 }
 0x124   :  { %2257 = vmatprep.mubr.f32.mxu0 %v24742_v0 }
 0x125   :  { %v18804_v3 = vpack.c.bf16 %v24899_v58, %v24898_v46 }
 0x127   :  { %2260 = vmatmul.mubr.f32.gmra.mrb[4].mxu0 %v21352_v19  ;;  %v24901_v19 = vand.u32 4294901760, %v21692_v37 }
 0x128   :  { %2265 = vmatprep.mubr.f32.mxu0 %v24742_v0 }
 0x129   :  { %v18806_v11 = vpack.c.bf16 %v24901_v19, %v24900_v4 }
 0x12b   :  { %2268 = vmatmul.mubr.f32.gmra.mrb[2].mxu0 %v21355_v20  ;;  %v18808_v20 = vpack.c.bf16 %v2020_v2, %v2008_v47  ;;  %v3521_v2 = vld [vmem:[#allocation4 + $0xc0] sm:$0xff] }
 0x12c   :  { %2273 = vmatprep.mubr.f32.mxu0 %v24742_v0  ;;  %v21954_v9 = vpack.c.bf16 %v3524_v39, %v3521_v2 }
 0x12f   :  { %2276 = vmatmul.mubr.f32.gmra.mrb[0].mxu0 %v24897_v62 }
 0x130   :  { %2354 = vmatprep.mubr.f32.mxu0 %v24742_v0 }
 0x133   :  { %2358 = vmatmul.mubr.f32.vlgmr.msra.gmra.mrb[14].mxu0 %v21238_v43  ;;  %v3522_v43 = vld [vmem:[#allocation4 + $0xc8] sm:$0xff] }
 0x134   :  { %18805 = vmatpush1.bf16.msra.mxu0 %v18804_v3  ;;  %2363 = vmatprep.mubr.f32.mxu0 %v24742_v0 }
 0x135   :  { %18807 = vmatprep.subr.bf16.mxu0 %v18806_v11 }
 0x137   :  { %2367 = vmatmul.mubr.f32.gmra.mrb[12].mxu0 %v21266_v57  ;;  %v63_v57 = vlaneseq }
 0x138   :  { %2372 = vmatprep.mubr.f32.mxu0 %v24742_v0  ;;  %18809 = vmatpush1.bf16.msra.mxu0 %v18808_v20 }
 0x139   :  { %18811 = vmatprep.subr.bf16.mxu0 %v21599_v60 }
 0x13b   :  { %2376 = vmatmul.mubr.f32.gmra.mrb[10].mxu0 %v21261_v52  ;;  %v3525_v52 = vld [vmem:[#allocation4 + $0xe0] sm:$0xff] }
 0x13c   :  { %2381 = vmatprep.mubr.f32.mxu0 %v24742_v0 }
 0x13f   :  { %2385 = vmatmul.mubr.f32.gmra.mrb[8].mxu0 %v21292_v6  ;;  %v21910_v6 = vpack.c.bf16 %v3525_v52, %v3522_v43 }
 0x140   :  { %2390 = vmatprep.mubr.f32.mxu0 %v24742_v0 }
 0x143   :  { %2394 = vmatmul.mubr.f32.gmra.mrb[6].mxu0 %v21341_v61  ;;  %v21915_v61 = vshrl.u32 %v63_v57, 7 }
 0x144   :  { %2399 = vmatprep.mubr.f32.mxu0 %v24742_v0 }
 0x145   :  { %v22007_v59 = vsub.s32 0, %v21915_v61 }
 0x147   :  { %2403 = vmatmul.mubr.f32.gmra.mrb[4].mxu0 %v21368_v53  ;;  %v21919_v53 = vsub.s32 2, %v21915_v61  ;;  %24906 = vst [vmem:[#allocation18_spill] sm:$0xff] %v22007_v59 }
 0x148   :  { %2408 = vmatprep.mubr.f32.mxu0 %v24742_v0 }
 0x149   :  { %24902 = vst [vmem:[#allocation10_spill] sm:$0xff] %v21919_v53 }
 0x14b   :  { %2412 = vmatmul.mubr.f32.gmra.mrb[2].mxu0 %v21371_v55  ;;  %v21923_v55 = vld [vmem:[#allocation4 + $0x2a0] ss:$8 sm:$0x7] }
 0x14c   :  { %2417 = vmatprep.mubr.f32.mxu0 %v24742_v0 }
 0x14f   :  { %2421 = vmatmul.mubr.f32.gmra.mrb[0].mxu0 %v21389_v13  ;;  %v21927_v13 = vrot.slane %v21923_v55, %v21919_v53 }
 0x150   :  { %2515 = vmatprep.mubr.f32.mxu0 %v24742_v0 }
 0x153   :  { %2517 = vmatmul.mubr.f32.vlgmr.msra.gmra.mrb[14].mxu0 %v21208_v29 }
 0x154   :  { %18813 = vmatpush1.bf16.msra.mxu0 %v21653_v26  ;;  %2522 = vmatprep.mubr.f32.mxu0 %v24742_v0 }
 0x155   :  { %18815 = vmatprep.subr.bf16.mxu0 %v21655_v32 }
 0x157   :  { %2524 = vmatmul.mubr.f32.gmra.mrb[12].mxu0 %v21235_v42 }
 0x158   :  { %2529 = vmatprep.mubr.f32.mxu0 %v24742_v0  ;;  %18817 = vmatpush1.bf16.msra.mxu0 %v21664_v15 }
 0x159   :  { %18867 = vmatprep.subr.bf16.mxu0 %v21910_v6 }
 0x15b   :  { %2531 = vmatmul.mubr.f32.gmra.mrb[10].mxu0 %v21226_v36 }
 0x15c   :  { %2536 = vmatprep.mubr.f32.mxu0 %v24742_v0 }
 0x15f   :  { %2538 = vmatmul.mubr.f32.gmra.mrb[8].mxu0 %v21263_v54 }
 0x160   :  { %2543 = vmatprep.mubr.f32.mxu0 %v24742_v0 }
 0x161   :  { %v17390_v15 = vpop.f32.mrb[12].mxu1 }
 0x162   :  { %v21932_v32 = vadd.f32 %v17390_v15, %v21927_v13  ;;  %v21934_v60 = vpop.f32.mrb[13].mxu1 }
 0x163   :  { %2545 = vmatmul.mubr.f32.gmra.mrb[6].mxu0 %v21313_v18 }
 0x164   :  { %2550 = vmatprep.mubr.f32.mxu0 %v24742_v0 }
 0x165   :  { %v17393_v26 = vpop.f32.mrb[14].mxu1 }
 0x166   :  { %v21939_v31 = vadd.f32 %v17393_v26, %v21927_v13  ;;  %v1741_v17 = vpop.f32.mrb[15].mxu1 }
 0x167   :  { %2552 = vmatmul.mubr.f32.gmra.mrb[4].mxu0 %v21343_v63  ;;  %v21943_v40 = vadd.f32 %v1741_v17, %v21927_v13  ;;  %v20519_v17 = vadd.f32 %v21934_v60, %v21927_v13  ;;  %v22019_v60 = vsub.s32 1, %v21915_v61 }
 0x168   :  { %2557 = vmatprep.mubr.f32.mxu0 %v24742_v0 }
 0x169   :  { %v17396_v37 = vpop.f32.mrb[16].mxu1  ;;  %24909 = vst [vmem:[#allocation21_spill] sm:$0xff] %v22019_v60 }
 0x16a   :  { %v20522_v7 = vadd.f32 %v17396_v37, %v21927_v13  ;;  %v1753_v49 = vpop.f32.mrb[17].mxu1 }
 0x16b   :  { %2559 = vmatmul.mubr.f32.gmra.mrb[2].mxu0 %v21345_v1  ;;  %v20523_v47 = vadd.f32 %v1753_v49, %v21927_v13 }
 0x16c   :  { %2564 = vmatprep.mubr.f32.mxu0 %v24742_v0 }
 0x16d   :  { %v17399_v28 = vpop.f32.mrb[18].mxu1 }
 0x16e   :  { %v20524_v10 = vadd.f32 %v17399_v28, %v21927_v13  ;;  %v1765_v38 = vpop.f32.mrb[19].mxu1 }
 0x16f   :  { %2566 = vmatmul.mubr.f32.gmra.mrb[0].mxu0 %v21357_v30  ;;  %v20525_v51 = vadd.f32 %v1765_v38, %v21927_v13  ;;  %v22023_v38 = vrot.slane %v21923_v55, %v22019_v60 }
 0x170   :  { %2644 = vmatprep.mubr.f32.mxu0 %v24742_v0 }
 0x171   :  { %24910 = vst [vmem:[#allocation22_spill] sm:$0xff] %v22023_v38 }
 0x173   :  { %2646 = vmatmul.mubr.f32.vlgmr.msra.gmra.mrb[14].mxu0 %v21208_v29  ;;  %v61_v29 = vld [vmem:[#allocation4 + $0x2a1] ss:$8 sm:$0x7] }
 0x174   :  { %18869 = vmatpush1.bf16.msra.mxu0 %v21954_v9  ;;  %2651 = vmatprep.mubr.f32.mxu0 %v24742_v0  ;;  %v22026_v45 = vrot.slane %v61_v29, %v22019_v60 }
 0x175   :  { %18871 = vmatprep.subr.bf16.mxu0 %v21956_v12 }
 0x176   :  { %24911 = vst [vmem:[#allocation23_spill] sm:$0xff] %v22026_v45  ;;  %v20476_v27 = vadd.f32 %v22026_v45, %v22023_v38 }
 0x177   :  { %2653 = vmatmul.mubr.f32.gmra.mrb[12].mxu0 %v21235_v42 }
 0x178   :  { %2658 = vmatprep.mubr.f32.mxu0 %v24742_v0  ;;  %18873 = vmatpush1.bf16.msra.mxu0 %v21961_v24 }
 0x179   :  { %18881 = vmatprep.subr.bf16.mxu0 %v21910_v6 }
 0x17b   :  { %2660 = vmatmul.mubr.f32.gmra.mrb[10].mxu0 %v21226_v36  ;;  %v1811_v36 = vrot.slane %v61_v29, %v21919_v53 }
 0x17c   :  { %2665 = vmatprep.mubr.f32.mxu0 %v24742_v0 }
 0x17f   :  { %2667 = vmatmul.mubr.f32.gmra.mrb[8].mxu0 %v21263_v54 }
 0x180   :  { %2672 = vmatprep.mubr.f32.mxu0 %v24742_v0 }
 0x183   :  { %2674 = vmatmul.mubr.f32.gmra.mrb[6].mxu0 %v21313_v18 }
 0x184   :  { %2679 = vmatprep.mubr.f32.mxu0 %v24742_v0 }
 0x187   :  { %2681 = vmatmul.mubr.f32.gmra.mrb[4].mxu0 %v21343_v63 }
 0x188   :  { %2686 = vmatprep.mubr.f32.mxu0 %v24742_v0 }
 0x18b   :  { %2688 = vmatmul.mubr.f32.gmra.mrb[2].mxu0 %v21345_v1 }
 0x18c   :  { %2693 = vmatprep.mubr.f32.mxu0 %v24742_v0 }
 0x18f   :  { %2695 = vmatmul.mubr.f32.gmra.mrb[0].mxu0 %v21357_v30 }
 0x190   :  { %3600 = vmatprep.mubr.f32.mxu0 %v24742_v0 }
 0x197   :  { %3601 = vmatmul.mubr.f32.vlgmr.msra.gmra.mrb[0].mxu0 %v24742_v0 }
 0x198   :  { %18883 = vmatpush1.bf16.msra.mxu0 %v21954_v9  ;;  %3774 = vmatprep.mubr.f32.mxu0 %v24742_v0 }
 0x199   :  { %18885 = vmatprep.subr.bf16.mxu0 %v21956_v12 }
 0x19c   :  { %18887 = vmatpush1.bf16.msra.mxu0 %v21961_v24 }
 0x19d   :  { %18895 = vmatprep.subr.bf16.mxu0 %v21910_v6 }
 0x1c1   :  { %v17510_v42 = vpop.f32.mrb[20].mxu1 }
 0x1c2   :  { %v20526_v54 = vadd.f32 %v17510_v42, %v1811_v36  ;;  %v3441_v18 = vpop.f32.mrb[21].mxu1 }
 0x1c3   :  { %v20527_v63 = vadd.f32 %v3441_v18, %v1811_v36  ;;  %v22030_v18 = vld [vmem:[#allocation4 + $0x2a2] ss:$0 sm:$0xff] }
 0x1c4   :  { %v21987_v1 = vadd.f32 %v20526_v54, %v20525_v51 }
 0x1c5   :  { %v21989_v30 = vadd.f32 %v20527_v63, %v20524_v10  ;;  %v17513_v62 = vpop.f32.mrb[22].mxu1 }
 0x1c6   :  { %24903 = vst [vmem:[#allocation15_spill] sm:$0xff] %v21987_v1  ;;  %v20528_v46 = vadd.f32 %v17513_v62, %v1811_v36  ;;  %v3453_v58 = vpop.f32.mrb[23].mxu1 }
 0x1c7   :  { %24904 = vst [vmem:[#allocation16_spill] sm:$0xff] %v21989_v30  ;;  %v20529_v3 = vadd.f32 %v3453_v58, %v1811_v36 }
 0x1c8   :  { %v21991_v4 = vadd.f32 %v20528_v46, %v20523_v47 }
 0x1c9   :  { %v21993_v19 = vadd.f32 %v20529_v3, %v20522_v7  ;;  %v17516_v11 = vpop.f32.mrb[24].mxu1 }
 0x1ca   :  { %v20530_v20 = vadd.f32 %v17516_v11, %v1811_v36  ;;  %v3465_v43 = vpop.f32.mrb[25].mxu1 }
 0x1cb   :  { %24905 = vst [vmem:[#allocation17_spill] sm:$0xff] %v21993_v19  ;;  %v20531_v52 = vadd.f32 %v3465_v43, %v1811_v36 }
 0x1cc   :  { %v21996_v57 = vadd.f32 %v20530_v20, %v21943_v40  ;;  %v22014_v40 = vrot.slane %v61_v29, %v22007_v59 }
 0x1cd   :  { %v21999_v15 = vadd.f32 %v20531_v52, %v21939_v31  ;;  %v17519_v26 = vpop.f32.mrb[26].mxu1  ;;  %v22011_v31 = vrot.slane %v21923_v55, %v22007_v59 }
 0x1ce   :  { %v20532_v37 = vadd.f32 %v17519_v26, %v1811_v36  ;;  %v3477_v49 = vpop.f32.mrb[27].mxu1  ;;  %24908 = vst [vmem:[#allocation20_spill] sm:$0xff] %v22014_v40 }
 0x1cf   :  { %v20533_v47 = vadd.f32 %v3477_v49, %v1811_v36  ;;  %24907 = vst [vmem:[#allocation19_spill] sm:$0xff] %v22011_v31  ;;  %v20474_v13 = vadd.f32 %v22014_v40, %v22011_v31 }
 0x1d0   :  { %v3520_v2 = vadd.f32 %v20532_v37, %v20519_v17 }
 0x1d1   :  { %v22004_v7 = vadd.f32 %v20533_v47, %v21932_v32 }
 0x1ef   :  { %v3673_v39 = vpop.f32.mrb[28].mxu1 }
 0x1f0   :  { %v17530_v28 = vpop.f32.mrb[29].mxu1  ;;  %v3691_v63 = vadd.f32 %v3673_v39, %v22030_v18 }
 0x26a   :  { %v3602_v32 = vpop.f32.mrb[0].mxu0 }
 0x26b   :  { %v20475_v5 = vadd.f32 %v20474_v13, %v3602_v32  ;;  %v3604_v10 = vpop.f32.mrb[1].mxu0 }
 0x26c   :  { %v20477_v36 = vadd.f32 %v20476_v27, %v3604_v10 }
 0x26d   :  { %v16534_v51 = vmul.f32 -1.442695, %v20475_v5 }
 0x26e   :  { %v16535_v42 = vmul.f32 -1.442695, %v20477_v36 }
 0x26f   :  { %20925 = vpow2.f32 %v16534_v51 }
 0x270   :  { %20927 = vpow2.f32 %v16535_v42 }
 0x279   :  { %v20926_v54 = vpop.eup %20925 }
 0x27a   :  { %v3685_v61 = vadd.f32 1.0, %v20926_v54  ;;  %v20928_v55 = vpop.eup %20927 }
 0x27b   :  { %v3686_v58 = vadd.f32 1.0, %v20928_v55 }
 0x27c   :  { %20929 = vrcp.f32 %v3685_v61 }
 0x286   :  { %v20930_v62 = vpop.eup %20929 }
 0x287   :  { %v3692_v46 = vmul.f32 %v20930_v62, %v3691_v63 }
 0x289   :  { %v3693_v29 = vadd.f32 %v3692_v46, %v3520_v2  ;;  %v207_v46 = vadd.f32 %v21827_v33, %v22023_v38 }
 0x28b   :  { %20931 = vtanh.f32 %v3693_v29 }
 0x28c   :  { %20933 = vrcp.f32 %v3686_v58 }
 0x295   :  { %v20932_v3 = vpop.eup %20931 }
 0x296   :  { %v3695_v11 = vsub.f32 0.0, %v20932_v3  ;;  %v20934_v20 = vpop.eup %20933 }
 0x298   :  { %v3696_v43 = vmul.f32 %v20934_v20, %v3695_v11  ;;  %v20486_v11 = vadd.f32 %v22026_v45, %v207_v46 }
 0x29a   :  { %v22033_v52 = vadd.f32 %v20932_v3, %v3696_v43 }
 0x29c   :  { %24912 = vst [vmem:[#allocation24_spill] sm:$0xff] %v22033_v52  ;;  %16536 = vmatmul.mubr.msk.f32.vlgmr.msra.gmra.mrb[2].mxu0 %vm78_vm0, %v22033_v52  ;;  %17540 = vmatmul.mubr.msk.f32.vlgmr.msra.gmra.mrb[30].mxu1 %vm78_vm0, %v22033_v52 }
 0x29d   :  { %18897 = vmatpush1.bf16.msra.mxu0 %v21954_v9  ;;  %18904 = vmatpush3.bf16.msra.mxu1 %v21825_v35 }
 0x29e   :  { %18899 = vmatprep.subr.bf16.mxu0 %v21956_v12  ;;  %18905 = vmatprep.subr.bf16.mxu1 %v24740_v16 }
 0x29f   :  { %3948 = vmatprep.mubr.f32.mxu0 %v24742_v0  ;;  %17550 = vmatprep.mubr.msk.f32.mxu1 %vm21143_vm1, %v24742_v0 }
 0x2a1   :  { %18901 = vmatpush1.bf16.msra.mxu0 %v21961_v24  ;;  %18907 = vmatpush3.bf16.msra.mxu1 %v21833_v50 }
 0x2a2   :  { %18909 = vmatprep.subr.bf16.mxu0 %v21910_v6  ;;  %18916 = vmatprep.subr.bf16.mxu1 %v24740_v16 }
 0x36f   :  { %v3776_v26 = vpop.f32.mrb[2].mxu0  ;;  %v3847_v17 = vpop.f32.mrb[30].mxu1 }
 0x370   :  { %v20479_v37 = vadd.f32 %v20474_v13, %v3776_v26  ;;  %v3778_v49 = vpop.f32.mrb[3].mxu0  ;;  %v17541_v47 = vpop.f32.mrb[31].mxu1  ;;  %v3865_v51 = vadd.f32 %v3847_v17, %v22030_v18 }
 0x371   :  { %v20481_v39 = vadd.f32 %v20476_v27, %v3778_v49 }
 0x372   :  { %v16538_v2 = vmul.f32 -1.442695, %v20479_v37 }
 0x373   :  { %v16539_v28 = vmul.f32 -1.442695, %v20481_v39 }
 0x374   :  { %20935 = vpow2.f32 %v16538_v2 }
 0x375   :  { %20937 = vpow2.f32 %v16539_v28 }
 0x37e   :  { %v20936_v32 = vpop.eup %20935 }
 0x37f   :  { %v3859_v5 = vadd.f32 1.0, %v20936_v32  ;;  %v20938_v10 = vpop.eup %20937 }
 0x380   :  { %v3860_v61 = vadd.f32 1.0, %v20938_v10 }
 0x381   :  { %20939 = vrcp.f32 %v3859_v5 }
 0x38b   :  { %v20940_v36 = vpop.eup %20939 }
 0x38c   :  { %v3866_v42 = vmul.f32 %v20940_v36, %v3865_v51 }
 0x38e   :  { %v3867_v54 = vadd.f32 %v3866_v42, %v22004_v7  ;;  %v205_v7 = vadd.f32 %v21821_v14, %v22011_v31 }
 0x390   :  { %20941 = vtanh.f32 %v3867_v54  ;;  %v20483_v58 = vadd.f32 %v22014_v40, %v205_v7 }
 0x391   :  { %20943 = vrcp.f32 %v3860_v61 }
 0x39a   :  { %v20942_v13 = vpop.eup %20941 }
 0x39b   :  { %v3869_v63 = vsub.f32 %v22033_v52, %v20942_v13  ;;  %v20944_v55 = vpop.eup %20943 }
 0x39d   :  { %v3870_v27 = vmul.f32 %v20944_v55, %v3869_v63 }
 0x39f   :  { %v22053_v62 = vadd.f32 %v20942_v13, %v3870_v27 }
 0x3a1   :  { %24913 = vst [vmem:[#allocation25_spill] sm:$0xff] %v22053_v62  ;;  %16540 = vmatmul.mubr.msk.f32.vlgmr.msra.gmra.mrb[4].mxu0 %vm78_vm0, %v22053_v62  ;;  %17551 = vmatmul.mubr.msk.f32.vlgmr.msra.gmra.mrb[32].mxu1 %vm78_vm0, %v22053_v62 }
 0x3a2   :  { %18911 = vmatpush1.bf16.msra.mxu0 %v21954_v9  ;;  %18918 = vmatpush3.bf16.msra.mxu1 %v21825_v35 }
 0x3a3   :  { %18913 = vmatprep.subr.bf16.mxu0 %v21956_v12  ;;  %18919 = vmatprep.subr.bf16.mxu1 %v24740_v16 }
 0x3a4   :  { %4122 = vmatprep.mubr.f32.mxu0 %v24742_v0  ;;  %17561 = vmatprep.mubr.msk.f32.mxu1 %vm21143_vm1, %v24742_v0 }
 0x3a6   :  { %18915 = vmatpush1.bf16.msra.mxu0 %v21961_v24  ;;  %18921 = vmatpush3.bf16.msra.mxu1 %v21833_v50 }
 0x3a7   :  { %18923 = vmatprep.subr.bf16.mxu0 %v21910_v6  ;;  %18930 = vmatprep.subr.bf16.mxu1 %v24740_v16 }
 0x474   :  { %v3950_v29 = vpop.f32.mrb[4].mxu0  ;;  %v4021_v3 = vpop.f32.mrb[32].mxu1 }
 0x475   :  { %v20484_v20 = vadd.f32 %v20483_v58, %v3950_v29  ;;  %v3952_v43 = vpop.f32.mrb[5].mxu0  ;;  %v17552_v26 = vpop.f32.mrb[33].mxu1  ;;  %v4039_v33 = vadd.f32 %v4021_v3, %v22030_v18 }
 0x476   :  { %v20487_v17 = vadd.f32 %v20486_v11, %v3952_v43 }
 0x477   :  { %v16542_v37 = vmul.f32 -1.442695, %v20484_v20 }
 0x478   :  { %v16543_v6 = vmul.f32 -1.442695, %v20487_v17 }
 0x479   :  { %20945 = vpow2.f32 %v16542_v37 }
 0x47a   :  { %20947 = vpow2.f32 %v16543_v6  ;;  %v4398_v6 = vld [vmem:[#allocation4 + $0x140] sm:$0xff] }
 0x483   :  { %v20946_v49 = vpop.eup %20945 }
 0x484   :  { %v4033_v47 = vadd.f32 1.0, %v20946_v49  ;;  %v20948_v14 = vpop.eup %20947  ;;  %v22111_v49 = vld [vmem:[#allocation4 + $0x120] sm:$0xff] }
 0x485   :  { %v4034_v32 = vadd.f32 1.0, %v20948_v14  ;;  %v4449_v14 = vand.u32 4294901760, %v4398_v6 }
 0x486   :  { %20949 = vrcp.f32 %v4033_v47 }
 0x490   :  { %v20950_v2 = vpop.eup %20949 }
 0x491   :  { %v4040_v39 = vmul.f32 %v20950_v2, %v4039_v33  ;;  %v22113_v33 = vld [vmem:[#allocation4 + $0x138] sm:$0xff]  ;;  %v24747_v2 = vand.u32 4294901760, %v22111_v49 }
 0x493   :  { %v4041_v28 = vadd.f32 %v4040_v39, %v21996_v57  ;;  %v216_v57 = vadd.f32 %v21830_v56, %v22011_v31  ;;  %v22116_v39 = vld [vmem:[#allocation4 + $0x158] sm:$0xff] }
 0x495   :  { %20951 = vtanh.f32 %v4041_v28  ;;  %v22118_v28 = vld [vmem:[#allocation4 + $0x170] sm:$0xff] }
 0x496   :  { %20953 = vrcp.f32 %v4034_v32  ;;  %v24746_v32 = vand.u32 4294901760, %v22113_v33 }
 0x49f   :  { %v20952_v5 = vpop.eup %20951 }
 0x4a0   :  { %v4043_v10 = vsub.f32 %v22053_v62, %v20952_v5  ;;  %v20954_v51 = vpop.eup %20953 }
 0x4a2   :  { %v4044_v36 = vmul.f32 %v20954_v51, %v4043_v10  ;;  %v24744_v10 = vand.u32 4294901760, %v22118_v28 }
 0x4a4   :  { %v22079_v42 = vadd.f32 %v20952_v5, %v4044_v36  ;;  %v24745_v5 = vand.u32 4294901760, %v22116_v39  ;;  %v22129_v36 = vpack.c.bf16 %v24746_v32, %v24747_v2 }
 0x4a6   :  { %24914 = vst [vmem:[#allocation26_spill] sm:$0xff] %v22079_v42  ;;  %16544 = vmatmul.mubr.msk.f32.vlgmr.msra.gmra.mrb[6].mxu0 %vm78_vm0, %v22079_v42  ;;  %17562 = vmatmul.mubr.msk.f32.vlgmr.msra.gmra.mrb[34].mxu1 %vm78_vm0, %v22079_v42 }
 0x4a7   :  { %18925 = vmatpush1.bf16.msra.mxu0 %v21954_v9  ;;  %18932 = vmatpush3.bf16.msra.mxu1 %v21825_v35  ;;  %v218_v9 = vadd.f32 %v21837_v25, %v22023_v38  ;;  %v20489_v35 = vadd.f32 %v22014_v40, %v216_v57  ;;  %v22135_v57 = vpack.c.bf16 %v24744_v10, %v24745_v5 }
 0x4a8   :  { %18927 = vmatprep.subr.bf16.mxu0 %v21956_v12  ;;  %18933 = vmatprep.subr.bf16.mxu1 %v24740_v16 }
 0x4a9   :  { %4296 = vmatprep.mubr.f32.mxu0 %v24742_v0  ;;  %17572 = vmatprep.mubr.msk.f32.mxu1 %vm21143_vm1, %v24742_v0  ;;  %v20492_v61 = vadd.f32 %v22026_v45, %v218_v9  ;;  %v227_v9 = vadd.f32 %v21841_v48, %v22011_v31 }
 0x4ab   :  { %18929 = vmatpush1.bf16.msra.mxu0 %v21961_v24  ;;  %18935 = vmatpush3.bf16.msra.mxu1 %v21833_v50 }
 0x579   :  { %v4124_v12 = vpop.f32.mrb[6].mxu0  ;;  %v4195_v54 = vpop.f32.mrb[34].mxu1 }
 0x57a   :  { %v20490_v13 = vadd.f32 %v20489_v35, %v4124_v12  ;;  %v4126_v63 = vpop.f32.mrb[7].mxu0  ;;  %v17563_v55 = vpop.f32.mrb[35].mxu1  ;;  %v4213_v25 = vadd.f32 %v4195_v54, %v22030_v18  ;;  %v229_v35 = vadd.f32 %v21844_v41, %v22023_v38  ;;  %v20495_v12 = vadd.f32 %v22014_v40, %v227_v9  ;;  %v4407_v9 = vld [vmem:[#allocation4 + $0x188] sm:$0xff] }
 0x57b   :  { %v20493_v27 = vadd.f32 %v20492_v61, %v4126_v63 }
 0x57c   :  { %v16546_v7 = vmul.f32 -1.442695, %v20490_v13  ;;  %v20498_v13 = vadd.f32 %v22026_v45, %v229_v35  ;;  %v4410_v35 = vld [vmem:[#allocation4 + $0x1a0] sm:$0xff] }
 0x57d   :  { %v16547_v24 = vmul.f32 -1.442695, %v20493_v27 }
 0x57e   :  { %20955 = vpow2.f32 %v16546_v7 }
 0x57f   :  { %20957 = vpow2.f32 %v16547_v24 }
 0x588   :  { %v20956_v50 = vpop.eup %20955 }
 0x589   :  { %v4207_v46 = vadd.f32 1.0, %v20956_v50  ;;  %v20958_v56 = vpop.eup %20957 }
 0x58a   :  { %v4208_v11 = vadd.f32 1.0, %v20958_v56 }
 0x58b   :  { %20959 = vrcp.f32 %v4207_v46 }
 0x595   :  { %v20960_v58 = vpop.eup %20959 }
 0x596   :  { %v4214_v29 = vmul.f32 %v20960_v58, %v4213_v25 }
 0x598   :  { %v4215_v3 = vadd.f32 %v4214_v29, %v21999_v15  ;;  %v4395_v15 = vld [vmem:[#allocation4 + $0x128] sm:$0xff] }
 0x599   :  { %v4445_v47 = vand.u32 4294901760, %v4395_v15 }
 0x59a   :  { %20961 = vtanh.f32 %v4215_v3 }
 0x59b   :  { %20963 = vrcp.f32 %v4208_v11  ;;  %v22123_v51 = vpack.c.bf16 %v4449_v14, %v4445_v47  ;;  %v4400_v11 = vld [vmem:[#allocation4 + $0x150] sm:$0xff] }
 0x59d   :  { %18937 = vmatprep.subr.bf16.mxu1 %v22123_v51  ;;  %19105 = vmatprep.subr.bf16.mxu0 %v22123_v51 }
 0x5a4   :  { %v20962_v20 = vpop.eup %20961 }
 0x5a5   :  { %v4217_v43 = vsub.f32 %v22079_v42, %v20962_v20  ;;  %v20964_v26 = vpop.eup %20963 }
 0x5a7   :  { %v4218_v17 = vmul.f32 %v20964_v26, %v4217_v43  ;;  %v4455_v43 = vand.u32 4294901760, %v4400_v11 }
 0x5a9   :  { %v22103_v37 = vadd.f32 %v20962_v20, %v4218_v17  ;;  %v4403_v20 = vld [vmem:[#allocation4 + $0x168] sm:$0xff]  ;;  %v4568_v2 = vsub.f32 %v4400_v11, %v4455_v43 }
 0x5aa   :  { %v4459_v26 = vand.u32 4294901760, %v4403_v20 }
 0x5ab   :  { %16548 = vmatmul.mubr.msk.f32.vlgmr.msra.gmra.mrb[8].mxu0 %vm78_vm0, %v22103_v37  ;;  %17573 = vmatmul.mubr.msk.f32.vlgmr.msra.gmra.mrb[36].mxu1 %vm78_vm0, %v22103_v37  ;;  %v4569_v59 = vand.u32 4294901760, %v4568_v2 }
 0x5ac   :  { %4525 = vmatprep.mubr.f32.mxu1 %v24742_v0  ;;  %5719 = vmatprep.mubr.f32.mxu0 %v24742_v0  ;;  %v22151_v17 = vpack.c.bf16 %v4459_v26, %v4455_v43 }
 0x5ad   :  { %18939 = vmatpush1.bf16.msra.mxu1 %v22129_v36  ;;  %19107 = vmatpush1.bf16.msra.mxu0 %v22129_v36 }
 0x5ae   :  { %18941 = vmatprep.subr.bf16.mxu1 %v22135_v57  ;;  %19109 = vmatprep.subr.bf16.mxu0 %v22135_v57 }
 0x5b1   :  { %18943 = vmatpush1.bf16.msra.mxu1 %v22151_v17  ;;  %19111 = vmatpush1.bf16.msra.mxu0 %v22151_v17 }
 0x67e   :  { %v4298_v54 = vpop.f32.mrb[8].mxu0  ;;  %v4369_v61 = vpop.f32.mrb[36].mxu1 }
 0x67f   :  { %v20496_v63 = vadd.f32 %v20495_v12, %v4298_v54  ;;  %v4300_v55 = vpop.f32.mrb[9].mxu0  ;;  %v17574_v27 = vpop.f32.mrb[37].mxu1  ;;  %v4387_v41 = vadd.f32 %v4369_v61, %v22030_v18  ;;  %v4461_v12 = vand.u32 4294901760, %v4407_v9  ;;  %v4465_v54 = vand.u32 4294901760, %v4410_v35 }
 0x680   :  { %v20499_v7 = vadd.f32 %v20498_v13, %v4300_v55  ;;  %v4406_v13 = vld [vmem:[#allocation4 + $0x180] sm:$0xff]  ;;  %v22157_v55 = vsub.f32 %v4395_v15, %v4445_v47  ;;  %v22159_v27 = vsub.f32 %v4398_v6, %v4449_v14 }
 0x681   :  { %v16550_v24 = vmul.f32 -1.442695, %v20496_v63  ;;  %v4409_v63 = vld [vmem:[#allocation4 + $0x198] sm:$0xff]  ;;  %v4463_v18 = vand.u32 4294901760, %v4406_v13  ;;  %v4586_v30 = vsub.f32 %v4407_v9, %v4461_v12 }
 0x682   :  { %v16551_v50 = vmul.f32 -1.442695, %v20499_v7  ;;  %v4467_v61 = vand.u32 4294901760, %v4409_v63 }
 0x683   :  { %20965 = vpow2.f32 %v16550_v24  ;;  %v4413_v24 = vld [vmem:[#allocation4 + $0x1b8] sm:$0xff]  ;;  %v4587_v1 = vand.u32 4294901760, %v4586_v30  ;;  %v4592_v44 = vsub.f32 %v4406_v13, %v4463_v18 }
 0x684   :  { %20967 = vpow2.f32 %v16551_v50  ;;  %v22161_v7 = vpack.c.bf16 %v4467_v61, %v4463_v18  ;;  %v4416_v50 = vld [vmem:[#allocation4 + $0x1d0] sm:$0xff] }
 0x68d   :  { %v20966_v46 = vpop.eup %20965 }
 0x68e   :  { %v4381_v56 = vadd.f32 1.0, %v20966_v46  ;;  %v20968_v48 = vpop.eup %20967  ;;  %v4469_v46 = vand.u32 4294901760, %v4413_v24 }
 0x68f   :  { %v4382_v3 = vadd.f32 1.0, %v20968_v48  ;;  %v4412_v48 = vld [vmem:[#allocation4 + $0x1b0] sm:$0xff] }
 0x690   :  { %20969 = vrcp.f32 %v4381_v56  ;;  %v4473_v56 = vand.u32 4294901760, %v4416_v50  ;;  %v4471_v15 = vand.u32 4294901760, %v4412_v48 }
 0x692   :  { %v22169_v47 = vpack.c.bf16 %v4473_v56, %v4469_v46 }
 0x69a   :  { %v20970_v25 = vpop.eup %20969 }
 0x69b   :  { %v4388_v58 = vmul.f32 %v20970_v25, %v4387_v41  ;;  %v4415_v41 = vld [vmem:[#allocation4 + $0x1c8] sm:$0xff]  ;;  %v24748_v25 = vand.u32 4294901760, %v22157_v55 }
 0x69c   :  { %v4475_v6 = vand.u32 4294901760, %v4415_v41 }
 0x69d   :  { %v4389_v29 = vadd.f32 %v4388_v58, %v21991_v4  ;;  %v22155_v4 = vpack.c.bf16 %v4465_v54, %v4461_v12  ;;  %v24751_v58 = vand.u32 4294901760, %v22159_v27  ;;  %v4540_v14 = vsub.f32 %v22157_v55, %v24748_v25 }
 0x69e   :  { %v22177_v16 = vpack.c.bf16 %v4475_v6, %v4471_v15  ;;  %v4628_v52 = vsub.f32 %v4415_v41, %v4475_v6  ;;  %v22202_v41 = vpack.c.bf16 %v22159_v27, %v22157_v55 }
 0x69f   :  { %20971 = vtanh.f32 %v4389_v29  ;;  %18945 = vmatprep.subr.bf16.mxu1 %v22155_v4  ;;  %19113 = vmatprep.subr.bf16.mxu0 %v22155_v4  ;;  %v4552_v29 = vsub.f32 %v22159_v27, %v24751_v58  ;;  %v4541_v10 = vand.u32 4294901760, %v4540_v14  ;;  %v4580_v58 = vsub.f32 %v4403_v20, %v4459_v26 }
 0x6a0   :  { %20973 = vrcp.f32 %v4382_v3  ;;  %18947 = vmatpush1.bf16.msra.mxu1 %v22161_v7  ;;  %19115 = vmatpush1.bf16.msra.mxu0 %v22161_v7  ;;  %v4598_v14 = vsub.f32 %v4410_v35, %v4465_v54  ;;  %v4610_v20 = vsub.f32 %v4413_v24, %v4469_v46  ;;  %v4622_v54 = vsub.f32 %v4416_v50, %v4473_v56 }
 0x6a1   :  { %18949 = vmatprep.subr.bf16.mxu1 %v22169_v47  ;;  %v4553_v5 = vand.u32 4294901760, %v4552_v29  ;;  %19117 = vmatprep.subr.bf16.mxu0 %v22169_v47  ;;  %v4581_v21 = vand.u32 4294901760, %v4580_v58  ;;  %v4570_v29 = vsub.f32 %v4568_v2, %v4569_v59  ;;  %v4629_v42 = vand.u32 4294901760, %v4628_v52 }
 0x6a2   :  { %v4599_v11 = vand.u32 4294901760, %v4598_v14  ;;  %v4611_v35 = vand.u32 4294901760, %v4610_v20  ;;  %v22204_v6 = vpack.c.bf16 %v4580_v58, %v4568_v2 }
 0x6a3   :  { %v18952_v60 = vpack.c.bf16 %v4553_v5, %v4541_v10  ;;  %v4582_v34 = vsub.f32 %v4580_v58, %v4581_v21  ;;  %v4588_v5 = vsub.f32 %v4586_v30, %v4587_v1  ;;  %v4593_v10 = vand.u32 4294901760, %v4592_v44 }
 0x6a4   :  { %18951 = vmatpush1.bf16.msra.mxu1 %v22177_v16  ;;  %19119 = vmatpush1.bf16.msra.mxu0 %v22177_v16  ;;  %v4600_v26 = vsub.f32 %v4598_v14, %v4599_v11  ;;  %v24917_v58 = vand.u32 4294901760, %v22111_v49 }
 0x6a5   :  { %18953 = vmatprep.subr.bf16.mxu1 %v18952_v60  ;;  %19121 = vmatprep.subr.bf16.mxu0 %v18952_v60  ;;  %v4583_v43 = vand.u32 4294901760, %v4582_v34  ;;  %v4589_v60 = vand.u32 4294901760, %v4588_v5  ;;  %v4594_v12 = vsub.f32 %v4592_v44, %v4593_v10 }
 0x6a6   :  { %v4601_v18 = vand.u32 4294901760, %v4600_v26 }
 0x6a8   :  { %v22192_v24 = vpack.c.bf16 %v4601_v18, %v4589_v60  ;;  %v22206_v60 = vpack.c.bf16 %v4598_v14, %v4586_v30  ;;  %v22210_v18 = vpack.c.bf16 %v4622_v54, %v4610_v20 }
 0x6a9   :  { %v20972_v3 = vpop.eup %20971 }
 0x6aa   :  { %v4391_v0 = vsub.f32 %v22103_v37, %v20972_v3  ;;  %v20974_v32 = vpop.eup %20973 }
 0x6ac   :  { %v4392_v25 = vmul.f32 %v20974_v32, %v4391_v0  ;;  %v4604_v0 = vsub.f32 %v4409_v63, %v4467_v61  ;;  %v4571_v32 = vand.u32 4294901760, %v4570_v29  ;;  %v4595_v63 = vand.u32 4294901760, %v4594_v12 }
 0x6ad   :  { %v4612_v61 = vsub.f32 %v4610_v20, %v4611_v35  ;;  %v4623_v29 = vand.u32 4294901760, %v4622_v54 }
 0x6ae   :  { %v22184_v22 = vadd.f32 %v20972_v3, %v4392_v25  ;;  %v4605_v9 = vand.u32 4294901760, %v4604_v0  ;;  %v22190_v13 = vpack.c.bf16 %v4583_v43, %v4571_v32  ;;  %v4616_v3 = vsub.f32 %v4412_v48, %v4471_v15 }
 0x6af   :  { %v4613_v5 = vand.u32 4294901760, %v4612_v61  ;;  %v4624_v62 = vsub.f32 %v4622_v54, %v4623_v29  ;;  %v4630_v32 = vsub.f32 %v4628_v52, %v4629_v42  ;;  %v22208_v12 = vpack.c.bf16 %v4604_v0, %v4592_v44 }
 0x6b0   :  { %4421 = vrot.lane.b32.xlu0 %v22184_v22, %s21144_s0  ;;  %v4606_v25 = vsub.f32 %v4604_v0, %v4605_v9  ;;  %v4617_v46 = vand.u32 4294901760, %v4616_v3  ;;  %v22220_v61 = vpack.c.bf16 %v4581_v21, %v4569_v59  ;;  %v22224_v2 = vpack.c.bf16 %v4605_v9, %v4593_v10 }
 0x6b1   :  { %v4625_v19 = vand.u32 4294901760, %v4624_v62  ;;  %v4631_v48 = vand.u32 4294901760, %v4630_v32  ;;  %v22212_v62 = vpack.c.bf16 %v4628_v52, %v4616_v3  ;;  %v22226_v30 = vpack.c.bf16 %v4623_v29, %v4611_v35 }
 0x6b2   :  { %v4607_v34 = vand.u32 4294901760, %v4606_v25  ;;  %v4618_v56 = vsub.f32 %v4616_v3, %v4617_v46  ;;  %v24916_v25 = vand.u32 4294901760, %v22159_v27  ;;  %v22228_v44 = vpack.c.bf16 %v4629_v42, %v4617_v46 }
 0x6b3   :  { %v22196_v26 = vpack.c.bf16 %v4625_v19, %v4613_v5  ;;  %v24915_v19 = vand.u32 4294901760, %v22157_v55  ;;  %v22233_v52 = vsub.f32 %v22111_v49, %v24917_v58  ;;  %v24918_v55 = vand.u32 4294901760, %v22113_v33 }
 0x6b4   :  { %5632 = vrot.lane.b32.xlu0 %v22103_v37, %s21144_s0  ;;  %v22194_v50 = vpack.c.bf16 %v4607_v34, %v4595_v63  ;;  %v4619_v43 = vand.u32 4294901760, %v4618_v56  ;;  %v22222_v34 = vpack.c.bf16 %v4599_v11, %v4587_v1  ;;  %v24919_v21 = vand.u32 4294901760, %v22116_v39 }
 0x6b5   :  { %v22218_v63 = vpack.c.bf16 %v24916_v25, %v24915_v19  ;;  %v22238_v27 = vsub.f32 %v22113_v33, %v24918_v55  ;;  %v24920_v59 = vand.u32 4294901760, %v22118_v28  ;;  %v4545_v14 = vand.u32 4294901760, %v22233_v52 }
 0x6b6   :  { %v22198_v15 = vpack.c.bf16 %v4631_v48, %v4619_v43  ;;  %v22243_v1 = vsub.f32 %v22116_v39, %v24919_v21 }
 0x6b7   :  { %v22248_v42 = vsub.f32 %v22118_v28, %v24920_v59  ;;  %v4557_v49 = vand.u32 4294901760, %v22238_v27  ;;  %v4546_v28 = vsub.f32 %v22233_v52, %v4545_v14 }
 0x6b8   :  { %v4563_v11 = vand.u32 4294901760, %v22243_v1 }
 0x6b9   :  { %v4575_v33 = vand.u32 4294901760, %v22248_v42  ;;  %v4558_v20 = vsub.f32 %v22238_v27, %v4557_v49  ;;  %v4547_v5 = vand.u32 4294901760, %v4546_v28 }
 0x6ba   :  { %v4564_v35 = vsub.f32 %v22243_v1, %v4563_v11 }
 0x6bb   :  { %v4559_v56 = vand.u32 4294901760, %v4558_v20  ;;  %v18970_v20 = vpack.c.bf16 %v22238_v27, %v22233_v52  ;;  %v6845_v52 = vld [vmem:[#allocation4 + $0x110] sm:$0xff] }
 0x6bc   :  { %v4565_v48 = vand.u32 4294901760, %v4564_v35  ;;  %v18972_v35 = vpack.c.bf16 %v22248_v42, %v22243_v1 }
 0x6bd   :  { %v18954_v55 = vpack.c.bf16 %v4559_v56, %v4547_v5 }
 0x722   :  { %v4422_v0 = vpop.permute.xlu0 %4421 }
 0x723   :  { %v4424_v10 = vsel %vm78_vm0, %v22103_v37, %v4422_v0  ;;  %v4576_v37 = vsub.f32 %v22248_v42, %v4575_v33  ;;  %v4414_v42 = vld [vmem:[#allocation4 + $0x1c0] sm:$0xff] }
 0x724   :  { %v4443_v39 = vsel %vm4441_vm2, %v4424_v10, 0  ;;  %v5111_v56 = vand.u32 4294901760, %v4414_v42 }
 0x725   :  { %v22263_v9 = vand.u32 4294901760, %v4443_v39  ;;  %v4577_v19 = vand.u32 4294901760, %v4576_v37 }
 0x726   :  { %v5633_v54 = vpop.permute.xlu0 %5632 }
 0x727   :  { %v22272_v3 = vsub.f32 %v4443_v39, %v22263_v9  ;;  %v5635_v29 = vsel %vm78_vm0, %v22184_v22, %v5633_v54  ;;  %v18956_v0 = vpack.c.bf16 %v4577_v19, %v4565_v48  ;;  %v24921_v39 = vmov 0.0  }
 0x728   :  { %v5637_v46 = vsel %vm4441_vm2, %v5635_v29, 0  ;;  %v6841_v29 = vld [vmem:[#allocation4 + $0xf0] sm:$0xff] }
 0x729   :  { %v22278_v32 = vand.u32 4294901760, %v22272_v3  ;;  %v22280_v43 = vand.u32 4294901760, %v5637_v46 }
 0x72b   :  { %v22283_v25 = vsub.f32 %v5637_v46, %v22280_v43  ;;  %v4529_v58 = vsub.f32 %v22272_v3, %v22278_v32  ;;  %v6844_v46 = vld [vmem:[#allocation4 + $0x108] sm:$0xff] }
 0x72d   :  { %v22288_v21 = vand.u32 4294901760, %v22283_v25  ;;  %v22290_v59 = vand.u32 4294901760, %v4529_v58 }
 0x72f   :  { %4531 = vmatmul.mubr.f32.vlgmr.msra.gmra.mrb[38].mxu1 %v22290_v59  ;;  %v5723_v10 = vsub.f32 %v22283_v25, %v22288_v21 }
 0x730   :  { %18955 = vmatpush1.bf16.msra.mxu1 %v18954_v55  ;;  %4681 = vmatprep.mubr.f32.mxu1 %v24921_v39 }
 0x731   :  { %18957 = vmatprep.subr.bf16.mxu1 %v18956_v0  ;;  %v22296_v28 = vand.u32 4294901760, %v5723_v10 }
 0x733   :  { %5725 = vmatmul.mubr.f32.vlgmr.msra.gmra.mrb[16].mxu0 %v22296_v28 }
 0x734   :  { %18959 = vmatpush1.bf16.msra.mxu1 %v22190_v13  ;;  %19123 = vmatpush1.bf16.msra.mxu0 %v18954_v55 }
 0x735   :  { %18961 = vmatprep.subr.bf16.mxu1 %v22192_v24  ;;  %19125 = vmatprep.subr.bf16.mxu0 %v18956_v0  ;;  %v19278_v0 = vpack.c.bf16 %v6844_v46, %v6841_v29 }
 0x736   :  { %5875 = vmatprep.mubr.f32.mxu0 %v24921_v39 }
 0x738   :  { %18963 = vmatpush1.bf16.msra.mxu1 %v22194_v50  ;;  %19127 = vmatpush1.bf16.msra.mxu0 %v22190_v13  ;;  %v19002_v13 = vpack.c.bf16 %v4557_v49, %v4545_v14  ;;  %v4417_v14 = vld [vmem:[#allocation4 + $0x1d8] sm:$0xff] }
 0x739   :  { %18965 = vmatprep.subr.bf16.mxu1 %v22196_v26  ;;  %19129 = vmatprep.subr.bf16.mxu0 %v22192_v24  ;;  %v19004_v24 = vpack.c.bf16 %v4575_v33, %v4563_v11  ;;  %v5114_v48 = vand.u32 4294901760, %v4417_v14 }
 0x73c   :  { %18967 = vmatpush1.bf16.msra.mxu1 %v22198_v15  ;;  %19131 = vmatpush1.bf16.msra.mxu0 %v22194_v50  ;;  %v4396_v50 = vld [vmem:[#allocation4 + $0x130] sm:$0xff] }
 0x73d   :  { %18969 = vmatprep.subr.bf16.mxu1 %v22202_v41  ;;  %19133 = vmatprep.subr.bf16.mxu0 %v22196_v26  ;;  %v4399_v26 = vld [vmem:[#allocation4 + $0x148] sm:$0xff] }
 0x73f   :  { %4683 = vmatmul.mubr.f32.vlgmr.msra.gmra.mrb[38].mxu1 %v22263_v9 }
 0x740   :  { %18971 = vmatpush1.bf16.msra.mxu1 %v18970_v20  ;;  %19135 = vmatpush1.bf16.msra.mxu0 %v22198_v15  ;;  %v5096_v15 = vand.u32 4294901760, %v4399_v26 }
 0x741   :  { %18973 = vmatprep.subr.bf16.mxu1 %v18972_v35  ;;  %19137 = vmatprep.subr.bf16.mxu0 %v22202_v41  ;;  %v4402_v41 = vld [vmem:[#allocation4 + $0x160] sm:$0xff] }
 0x742   :  { %4785 = vmatprep.mubr.f32.mxu1 %v24921_v39 }
 0x743   :  { %5877 = vmatmul.mubr.f32.vlgmr.msra.gmra.mrb[16].mxu0 %v22280_v43 }
 0x744   :  { %18975 = vmatpush1.bf16.msra.mxu1 %v22204_v6  ;;  %19139 = vmatpush1.bf16.msra.mxu0 %v18970_v20 }
 0x745   :  { %18977 = vmatprep.subr.bf16.mxu1 %v22206_v60  ;;  %19141 = vmatprep.subr.bf16.mxu0 %v18972_v35  ;;  %v22432_v35 = vpack.c.bf16 %v5114_v48, %v5111_v56 }
 0x746   :  { %5979 = vmatprep.mubr.f32.mxu0 %v24921_v39 }
 0x747   :  { %24924 = vst [vmem:[#allocation28_spill] sm:$0xff] %v22432_v35 }
 0x748   :  { %18979 = vmatpush1.bf16.msra.mxu1 %v22208_v12  ;;  %19143 = vmatpush1.bf16.msra.mxu0 %v22204_v6  ;;  %v6836_v6 = vld [vmem:[#allocation4 + $0xc8] sm:$0xff] }
 0x749   :  { %18981 = vmatprep.subr.bf16.mxu1 %v22210_v18  ;;  %19145 = vmatprep.subr.bf16.mxu0 %v22206_v60  ;;  %v6839_v60 = vld [vmem:[#allocation4 + $0xe0] sm:$0xff] }
 0x74c   :  { %18983 = vmatpush1.bf16.msra.mxu1 %v22212_v62  ;;  %19147 = vmatpush1.bf16.msra.mxu0 %v22208_v12  ;;  %v4408_v12 = vld [vmem:[#allocation4 + $0x190] sm:$0xff] }
 0x74d   :  { %18985 = vmatprep.subr.bf16.mxu1 %v22123_v51  ;;  %19149 = vmatprep.subr.bf16.mxu0 %v22210_v18  ;;  %v5105_v27 = vand.u32 4294901760, %v4408_v12 }
 0x74f   :  { %4788 = vmatmul.mubr.f32.vlgmr.msra.gmra.mrb[38].mxu1 %v22272_v3  ;;  %v22426_v10 = vsub.f32 %v4408_v12, %v5105_v27 }
 0x750   :  { %18987 = vmatpush1.bf16.msra.mxu1 %v22129_v36  ;;  %19151 = vmatpush1.bf16.msra.mxu0 %v22212_v62  ;;  %v22392_v62 = vsub.f32 %v4399_v26, %v5096_v15 }
 0x751   :  { %18989 = vmatprep.subr.bf16.mxu1 %v22135_v57  ;;  %19153 = vmatprep.subr.bf16.mxu0 %v22123_v51 }
 0x752   :  { %4874 = vmatprep.mubr.f32.mxu1 %v24921_v39  ;;  %v5185_v49 = vand.u32 4294901760, %v22392_v62 }
 0x753   :  { %5982 = vmatmul.mubr.f32.vlgmr.msra.gmra.mrb[16].mxu0 %v22283_v25 }
 0x754   :  { %18991 = vmatpush1.bf16.msra.mxu1 %v22151_v17  ;;  %19155 = vmatpush1.bf16.msra.mxu0 %v22129_v36  ;;  %v5186_v19 = vsub.f32 %v22392_v62, %v5185_v49 }
 0x755   :  { %18993 = vmatprep.subr.bf16.mxu1 %v22155_v4  ;;  %19157 = vmatprep.subr.bf16.mxu0 %v22135_v57 }
 0x756   :  { %6068 = vmatprep.mubr.f32.mxu0 %v24921_v39 }
 0x758   :  { %18995 = vmatpush1.bf16.msra.mxu1 %v22161_v7  ;;  %19159 = vmatpush1.bf16.msra.mxu0 %v22151_v17 }
 0x759   :  { %18997 = vmatprep.subr.bf16.mxu1 %v22169_v47  ;;  %19161 = vmatprep.subr.bf16.mxu0 %v22155_v4 }
 0x75c   :  { %18999 = vmatpush1.bf16.msra.mxu1 %v22177_v16  ;;  %19163 = vmatpush1.bf16.msra.mxu0 %v22161_v7 }
 0x75d   :  { %19001 = vmatprep.subr.bf16.mxu1 %v22218_v63  ;;  %19165 = vmatprep.subr.bf16.mxu0 %v22169_v47 }
 0x75f   :  { %4878 = vmatmul.mubr.f32.vlgmr.msra.gmra.mrb[38].mxu1 %v22278_v32 }
 0x760   :  { %19003 = vmatpush1.bf16.msra.mxu1 %v19002_v13  ;;  %19167 = vmatpush1.bf16.msra.mxu0 %v22177_v16 }
 0x761   :  { %19005 = vmatprep.subr.bf16.mxu1 %v19004_v24  ;;  %19169 = vmatprep.subr.bf16.mxu0 %v22218_v63  ;;  %v5099_v63 = vand.u32 4294901760, %v4402_v41 }
 0x762   :  { %4996 = vmatprep.mubr.f32.mxu1 %v24921_v39 }
 0x763   :  { %6072 = vmatmul.mubr.f32.vlgmr.msra.gmra.mrb[16].mxu0 %v22288_v21  ;;  %v22403_v11 = vsub.f32 %v4402_v41, %v5099_v63  ;;  %v22443_v41 = vsub.f32 %v4414_v42, %v5111_v56 }
 0x764   :  { %19007 = vmatpush1.bf16.msra.mxu1 %v22220_v61  ;;  %19171 = vmatpush1.bf16.msra.mxu0 %v19002_v13 }
 0x765   :  { %19009 = vmatprep.subr.bf16.mxu1 %v22222_v34  ;;  %19173 = vmatprep.subr.bf16.mxu0 %v19004_v24  ;;  %v5192_v58 = vand.u32 4294901760, %v22403_v11  ;;  %v5187_v24 = vand.u32 4294901760, %v5186_v19 }
 0x766   :  { %6190 = vmatprep.mubr.f32.mxu0 %v24921_v39 }
 0x768   :  { %19011 = vmatpush1.bf16.msra.mxu1 %v22224_v2  ;;  %19175 = vmatpush1.bf16.msra.mxu0 %v22220_v61 }
 0x769   :  { %19013 = vmatprep.subr.bf16.mxu1 %v22226_v30  ;;  %19177 = vmatprep.subr.bf16.mxu0 %v22222_v34  ;;  %v24922_v34 = vmov 0.0|0.0  }
 0x76c   :  { %19015 = vmatpush1.bf16.msra.mxu1 %v22228_v44  ;;  %19179 = vmatpush1.bf16.msra.mxu0 %v22224_v2  ;;  %v6835_v2 = vld [vmem:[#allocation4 + $0xc0] sm:$0xff] }
 0x76d   :  { %19017 = vmatprep.subr.bf16.mxu1 %v22123_v51  ;;  %19181 = vmatprep.subr.bf16.mxu0 %v22226_v30  ;;  %v6838_v30 = vld [vmem:[#allocation4 + $0xd8] sm:$0xff] }
 0x76e   :  { %v19274_v37 = vpack.c.bf16 %v6838_v30, %v6835_v2 }
 0x76f   :  { %4998 = vmatmul.mubr.f32.vlgmr.msra.gmra.mrb[38].mxu1 %v22263_v9 }
 0x770   :  { %19019 = vmatpush1.bf16.msra.mxu1 %v22129_v36  ;;  %19183 = vmatpush1.bf16.msra.mxu0 %v22228_v44  ;;  %v6842_v44 = vld [vmem:[#allocation4 + $0xf8] sm:$0xff] }
 0x771   :  { %19021 = vmatprep.subr.bf16.mxu1 %v22135_v57  ;;  %19185 = vmatprep.subr.bf16.mxu0 %v22123_v51  ;;  %v5093_v51 = vand.u32 4294901760, %v4396_v50  ;;  %v19276_v54 = vpack.c.bf16 %v6845_v52, %v6842_v44 }
 0x772   :  { %5084 = vmatprep.mubr.f32.mxu1 %v24921_v39 }
 0x773   :  { %6192 = vmatmul.mubr.f32.vlgmr.msra.gmra.mrb[16].mxu0 %v22280_v43  ;;  %v22390_v18 = vsub.f32 %v4396_v50, %v5093_v51  ;;  %v5193_v50 = vsub.f32 %v22403_v11, %v5192_v58 }
 0x774   :  { %19023 = vmatpush1.bf16.msra.mxu1 %v22151_v17  ;;  %19187 = vmatpush1.bf16.msra.mxu0 %v22129_v36  ;;  %v4405_v36 = vld [vmem:[#allocation4 + $0x178] sm:$0xff] }
 0x775   :  { %19025 = vmatprep.subr.bf16.mxu1 %v22155_v4  ;;  %19189 = vmatprep.subr.bf16.mxu0 %v22135_v57  ;;  %v4411_v57 = vld [vmem:[#allocation4 + $0x1a8] sm:$0xff]  ;;  %v5102_v61 = vand.u32 4294901760, %v4405_v36 }
 0x776   :  { %6278 = vmatprep.mubr.f32.mxu0 %v24921_v39  ;;  %v5108_v1 = vand.u32 4294901760, %v4411_v57 }
 0x777   :  { %v22405_v33 = vsub.f32 %v4405_v36, %v5102_v61  ;;  %v22445_v36 = vsub.f32 %v4417_v14, %v5114_v48 }
 0x778   :  { %19027 = vmatpush1.bf16.msra.mxu1 %v22161_v7  ;;  %19191 = vmatpush1.bf16.msra.mxu0 %v22151_v17  ;;  %v22396_v17 = vpack.c.bf16 %v5096_v15, %v5093_v51  ;;  %v22412_v5 = vpack.c.bf16 %v5108_v1, %v5105_v27  ;;  %v22428_v20 = vsub.f32 %v4411_v57, %v5108_v1  ;;  %v5206_v51 = vand.u32 4294901760, %v22426_v10 }
 0x779   :  { %19029 = vmatprep.subr.bf16.mxu1 %v22169_v47  ;;  %19193 = vmatprep.subr.bf16.mxu0 %v22155_v4  ;;  %v19272_v4 = vpack.c.bf16 %v6839_v60, %v6836_v6  ;;  %v5199_v55 = vand.u32 4294901760, %v22405_v33  ;;  %v5194_v60 = vand.u32 4294901760, %v5193_v50  ;;  %v22504_v46 = vpack.c.bf16 %v22445_v36, %v22443_v41 }
 0x77a   :  { %24923 = vst [vmem:[#allocation27_spill] sm:$0xff] %v22412_v5  ;;  %v5213_v15 = vand.u32 4294901760, %v22428_v20  ;;  %v5207_v57 = vsub.f32 %v22426_v10, %v5206_v51  ;;  %v22498_v29 = vpack.c.bf16 %v22428_v20, %v22426_v10  ;;  %v4419_v10 = vld [vmem:[#allocation4 + $0x2a3] ss:$8 sm:$0x7] }
 0x77b   :  { %v5200_v26 = vsub.f32 %v22405_v33, %v5199_v55  ;;  %v22532_v56 = vpack.c.bf16 %v5199_v55, %v5192_v58 }
 0x77c   :  { %19031 = vmatpush1.bf16.msra.mxu1 %v22177_v16  ;;  %19195 = vmatpush1.bf16.msra.mxu0 %v22161_v7  ;;  %v5178_v7 = vand.u32 4294901760, %v22390_v18  ;;  %v5208_v30 = vand.u32 4294901760, %v5207_v57 }
 0x77d   :  { %19032 = vmatprep.subr.bf16.mxu1 %v24922_v34  ;;  %19197 = vmatprep.subr.bf16.mxu0 %v22169_v47  ;;  %v22409_v47 = vpack.c.bf16 %v5102_v61, %v5099_v63  ;;  %v5201_v12 = vand.u32 4294901760, %v5200_v26  ;;  %v5214_v63 = vsub.f32 %v22428_v20, %v5213_v15  ;;  %v5220_v61 = vand.u32 4294901760, %v22443_v41  ;;  %24926 = vst [vmem:[#allocation30_spill] sm:$0xff] %v22532_v56 }
 0x77e   :  { %v4437_v20 = vrot.slane %v4419_v10, %v21919_v53 }
 0x77f   :  { %5086 = vmatmul.mubr.f32.vlgmr.msra.gmra.mrb[38].mxu1 %v22263_v9  ;;  %v22464_v2 = vpack.c.bf16 %v5201_v12, %v5194_v60  ;;  %v5215_v44 = vand.u32 4294901760, %v5214_v63  ;;  %v5221_v52 = vsub.f32 %v22443_v41, %v5220_v61 }
 0x780   :  { %19034 = vmatpush3.bf16.msra.mxu1 %v22396_v17  ;;  %19199 = vmatpush1.bf16.msra.mxu0 %v22177_v16  ;;  %v5179_v16 = vsub.f32 %v22390_v18, %v5178_v7 }
 0x781   :  { %19035 = vmatprep.subr.bf16.mxu1 %v24922_v34  ;;  %19273 = vmatprep.subr.bf16.mxu0 %v19272_v4  ;;  %v5227_v4 = vand.u32 4294901760, %v22445_v36  ;;  %v22473_v1 = vpack.c.bf16 %v5215_v44, %v5208_v30  ;;  %v22654_v30 = vld [vmem:[#allocation4 + $0x128] sm:$0xff]  ;;  %v22656_v44 = vld [vmem:[#allocation4 + $0x140] sm:$0xff] }
 0x782   :  { %17591 = vmatprep.mubr.msk.f32.mxu1 %vm21143_vm1, %v24921_v39  ;;  %v5180_v13 = vand.u32 4294901760, %v5179_v16 }
 0x783   :  { %6280 = vmatmul.mubr.f32.vlgmr.msra.gmra.mrb[16].mxu0 %v22280_v43  ;;  %v5228_v27 = vsub.f32 %v22445_v36, %v5227_v4 }
 0x784   :  { %19037 = vmatpush3.bf16.msra.mxu1 %v22409_v47  ;;  %19275 = vmatpush1.bf16.msra.mxu0 %v19274_v37  ;;  %v22450_v6 = vpack.c.bf16 %v5187_v24, %v5180_v13  ;;  %v22483_v37 = vpack.c.bf16 %v22392_v62, %v22390_v18  ;;  %v22546_v18 = vpack.c.bf16 %v5227_v4, %v5220_v61  ;;  %v6846_v62 = vld [vmem:[#allocation4 + $0x118] sm:$0xff] }
 0x785   :  { %19038 = vmatprep.subr.bf16.mxu1 %v24922_v34  ;;  %19277 = vmatprep.subr.bf16.mxu0 %v19276_v54  ;;  %v5229_v42 = vand.u32 4294901760, %v5228_v27  ;;  %v22490_v54 = vpack.c.bf16 %v22405_v33, %v22403_v11  ;;  %v7060_v27 = vand.u32 4294901760, %v22654_v30 }
 0x786   :  { %6913 = vmatprep.mubr.f32.mxu0 %v24921_v39  ;;  %24928 = vst [vmem:[#allocation32_spill] sm:$0xff] %v22546_v18 }
 0x788   :  { %19040 = vmatpush3.bf16.msra.mxu1 %v22412_v5  ;;  %19279 = vmatpush1.bf16.msra.mxu0 %v19278_v0 }
 0x789   :  { %19041 = vmatprep.subr.bf16.mxu1 %v24922_v34 }
 0x78b   :  { %16552 = vmatmul.mubr.msk.f32.vlgmr.msra.gmra.mrb[10].mxu0 %vm78_vm0, %v22184_v22 }
 0x78c   :  { %19043 = vmatpush3.bf16.msra.mxu1 %v22432_v35  ;;  %7140 = vmatprep.mubr.f32.mxu0 %v24921_v39 }
 0x78d   :  { %19044 = vmatprep.subr.bf16.mxu1 %v24922_v34 }
 0x78f   :  { %17592 = vmatmul.mubr.f32.vlgmr.msra.gmra.mrb[40].mxu1 %v22290_v59  ;;  %v5222_v59 = vand.u32 4294901760, %v5221_v52  ;;  %v22658_v52 = vld [vmem:[#allocation4 + $0x120] sm:$0xff] }
 0x790   :  { %19046 = vmatpush3.bf16.msra.mxu1 %v22450_v6  ;;  %17610 = vmatprep.mubr.msk.f32.mxu1 %vm21143_vm1, %v24921_v39 }
 0x791   :  { %19047 = vmatprep.subr.bf16.mxu1 %v24922_v34  ;;  %v22477_v14 = vpack.c.bf16 %v5229_v42, %v5222_v59  ;;  %v7064_v59 = vand.u32 4294901760, %v22656_v44  ;;  %v22662_v42 = vld [vmem:[#allocation4 + $0x138] sm:$0xff] }
 0x794   :  { %19049 = vmatpush3.bf16.msra.mxu1 %v22464_v2 }
 0x795   :  { %19050 = vmatprep.subr.bf16.mxu1 %v24922_v34 }
 0x798   :  { %19052 = vmatpush3.bf16.msra.mxu1 %v22473_v1 }
 0x799   :  { %19053 = vmatprep.subr.bf16.mxu1 %v24922_v34 }
 0x79c   :  { %19055 = vmatpush3.bf16.msra.mxu1 %v22477_v14 }
 0x79d   :  { %19056 = vmatprep.subr.bf16.mxu1 %v24922_v34 }
 0x79f   :  { %17611 = vmatmul.mubr.f32.vlgmr.msra.gmra.mrb[42].mxu1 %v22263_v9 }
 0x7a0   :  { %19058 = vmatpush3.bf16.msra.mxu1 %v22483_v37  ;;  %17629 = vmatprep.mubr.msk.f32.mxu1 %vm21143_vm1, %v24921_v39 }
 0x7a1   :  { %19059 = vmatprep.subr.bf16.mxu1 %v24922_v34 }
 0x7a4   :  { %19061 = vmatpush3.bf16.msra.mxu1 %v22490_v54 }
 0x7a5   :  { %19062 = vmatprep.subr.bf16.mxu1 %v24922_v34 }
 0x7a8   :  { %19064 = vmatpush3.bf16.msra.mxu1 %v22498_v29 }
 0x7a9   :  { %19065 = vmatprep.subr.bf16.mxu1 %v24922_v34 }
 0x7ac   :  { %19067 = vmatpush3.bf16.msra.mxu1 %v22504_v46 }
 0x7ad   :  { %19068 = vmatprep.subr.bf16.mxu1 %v24922_v34 }
 0x7af   :  { %17630 = vmatmul.mubr.f32.vlgmr.msra.gmra.mrb[44].mxu1 %v22272_v3  ;;  %v22523_v3 = vpack.c.bf16 %v5185_v49, %v5178_v7  ;;  %v240_v49 = vadd.f32 %v21849_v8, %v22023_v38 }
 0x7b0   :  { %19070 = vmatpush3.bf16.msra.mxu1 %v22396_v17  ;;  %17648 = vmatprep.mubr.msk.f32.mxu1 %vm21143_vm1, %v24921_v39 }
 0x7b1   :  { %19071 = vmatprep.subr.bf16.mxu1 %v24922_v34  ;;  %24925 = vst [vmem:[#allocation29_spill] sm:$0xff] %v22523_v3  ;;  %v20504_v48 = vadd.f32 %v22026_v45, %v240_v49 }
 0x7b4   :  { %19073 = vmatpush3.bf16.msra.mxu1 %v22409_v47 }
 0x7b5   :  { %19074 = vmatprep.subr.bf16.mxu1 %v24922_v34 }
 0x7b8   :  { %19076 = vmatpush3.bf16.msra.mxu1 %v22412_v5 }
 0x7b9   :  { %19077 = vmatprep.subr.bf16.mxu1 %v24922_v34 }
 0x7bc   :  { %19079 = vmatpush3.bf16.msra.mxu1 %v22432_v35 }
 0x7bd   :  { %19080 = vmatprep.subr.bf16.mxu1 %v24922_v34 }
 0x7bf   :  { %17649 = vmatmul.mubr.f32.vlgmr.msra.gmra.mrb[46].mxu1 %v22278_v32  ;;  %v22542_v32 = vpack.c.bf16 %v5213_v15, %v5206_v51 }
 0x7c0   :  { %19082 = vmatpush3.bf16.msra.mxu1 %v22523_v3  ;;  %17667 = vmatprep.mubr.msk.f32.mxu1 %vm21143_vm1, %v24921_v39 }
 0x7c1   :  { %19083 = vmatprep.subr.bf16.mxu1 %v24922_v34  ;;  %24927 = vst [vmem:[#allocation31_spill] sm:$0xff] %v22542_v32 }
 0x7c4   :  { %19085 = vmatpush3.bf16.msra.mxu1 %v22532_v56 }
 0x7c5   :  { %19086 = vmatprep.subr.bf16.mxu1 %v24922_v34 }
 0x7c8   :  { %19088 = vmatpush3.bf16.msra.mxu1 %v22542_v32 }
 0x7c9   :  { %19089 = vmatprep.subr.bf16.mxu1 %v24922_v34 }
 0x7cc   :  { %19091 = vmatpush3.bf16.msra.mxu1 %v22546_v18 }
 0x7cd   :  { %19092 = vmatprep.subr.bf16.mxu1 %v24922_v34 }
 0x7cf   :  { %17668 = vmatmul.mubr.f32.vlgmr.msra.gmra.mrb[48].mxu1 %v22263_v9 }
 0x7d0   :  { %19094 = vmatpush3.bf16.msra.mxu1 %v22396_v17  ;;  %17686 = vmatprep.mubr.msk.f32.mxu1 %vm21143_vm1, %v24921_v39 }
 0x7d1   :  { %19095 = vmatprep.subr.bf16.mxu1 %v24922_v34 }
 0x7d4   :  { %19097 = vmatpush3.bf16.msra.mxu1 %v22409_v47 }
 0x7d5   :  { %19098 = vmatprep.subr.bf16.mxu1 %v24922_v34 }
 0x7d8   :  { %19100 = vmatpush3.bf16.msra.mxu1 %v22412_v5 }
 0x7d9   :  { %19101 = vmatprep.subr.bf16.mxu1 %v24922_v34 }
 0x7dc   :  { %19103 = vmatpush3.bf16.msra.mxu1 %v22432_v35 }
 0x7dd   :  { %19200 = vmatprep.subr.bf16.mxu1 %v24922_v34 }
 0x7df   :  { %17687 = vmatmul.mubr.f32.vlgmr.msra.gmra.mrb[50].mxu1 %v22263_v9  ;;  %v6837_v9 = vld [vmem:[#allocation4 + $0xd0] sm:$0xff] }
 0x7e0   :  { %19202 = vmatpush3.bf16.msra.mxu1 %v22396_v17  ;;  %17705 = vmatprep.mubr.msk.f32.mxu1 %vm21143_vm1, %v24921_v39 }
 0x7e1   :  { %19203 = vmatprep.subr.bf16.mxu1 %v24922_v34 }
 0x7e4   :  { %19205 = vmatpush3.bf16.msra.mxu1 %v22409_v47 }
 0x7e5   :  { %19206 = vmatprep.subr.bf16.mxu1 %v24922_v34 }
 0x7e8   :  { %19208 = vmatpush3.bf16.msra.mxu1 %v22412_v5 }
 0x7e9   :  { %19209 = vmatprep.subr.bf16.mxu1 %v24922_v34 }
 0x7ec   :  { %19211 = vmatpush3.bf16.msra.mxu1 %v22432_v35 }
 0x7ed   :  { %19212 = vmatprep.subr.bf16.mxu1 %v24922_v34 }
 0x7ef   :  { %17706 = vmatmul.mubr.f32.vlgmr.msra.gmra.mrb[52].mxu1 %v22296_v28  ;;  %v6843_v28 = vld [vmem:[#allocation4 + $0x100] sm:$0xff] }
 0x7f0   :  { %19214 = vmatpush3.bf16.msra.mxu1 %v22450_v6  ;;  %17724 = vmatprep.mubr.msk.f32.mxu1 %vm21143_vm1, %v24921_v39  ;;  %v19284_v7 = vpack.c.bf16 %v6846_v62, %v6843_v28  ;;  %v24762_v28 = vand.u32 4294901760, %v22662_v42 }
 0x7f1   :  { %19215 = vmatprep.subr.bf16.mxu1 %v24922_v34 }
 0x7f4   :  { %19217 = vmatpush3.bf16.msra.mxu1 %v22464_v2 }
 0x7f5   :  { %19218 = vmatprep.subr.bf16.mxu1 %v24922_v34 }
 0x7f8   :  { %19220 = vmatpush3.bf16.msra.mxu1 %v22473_v1 }
 0x7f9   :  { %19221 = vmatprep.subr.bf16.mxu1 %v24922_v34 }
 0x7fc   :  { %19223 = vmatpush3.bf16.msra.mxu1 %v22477_v14 }
 0x7fd   :  { %19224 = vmatprep.subr.bf16.mxu1 %v24922_v34 }
 0x7ff   :  { %17725 = vmatmul.mubr.f32.vlgmr.msra.gmra.mrb[54].mxu1 %v22280_v43 }
 0x800   :  { %19226 = vmatpush3.bf16.msra.mxu1 %v22483_v37  ;;  %17743 = vmatprep.mubr.msk.f32.mxu1 %vm21143_vm1, %v24921_v39 }
 0x801   :  { %19227 = vmatprep.subr.bf16.mxu1 %v24922_v34 }
 0x804   :  { %19229 = vmatpush3.bf16.msra.mxu1 %v22490_v54 }
 0x805   :  { %19230 = vmatprep.subr.bf16.mxu1 %v24922_v34 }
 0x808   :  { %19232 = vmatpush3.bf16.msra.mxu1 %v22498_v29 }
 0x809   :  { %19233 = vmatprep.subr.bf16.mxu1 %v24922_v34 }
 0x80c   :  { %19235 = vmatpush3.bf16.msra.mxu1 %v22504_v46 }
 0x80d   :  { %19236 = vmatprep.subr.bf16.mxu1 %v24922_v34 }
 0x80f   :  { %17744 = vmatmul.mubr.f32.vlgmr.msra.gmra.mrb[56].mxu1 %v22283_v25  ;;  %v6840_v25 = vld [vmem:[#allocation4 + $0xe8] sm:$0xff] }
 0x810   :  { %19238 = vmatpush3.bf16.msra.mxu1 %v22396_v17  ;;  %17762 = vmatprep.mubr.msk.f32.mxu1 %vm21143_vm1, %v24921_v39 }
 0x811   :  { %19239 = vmatprep.subr.bf16.mxu1 %v24922_v34 }
 0x814   :  { %19241 = vmatpush3.bf16.msra.mxu1 %v22409_v47 }
 0x815   :  { %19242 = vmatprep.subr.bf16.mxu1 %v24922_v34 }
 0x818   :  { %19244 = vmatpush3.bf16.msra.mxu1 %v22412_v5 }
 0x819   :  { %19245 = vmatprep.subr.bf16.mxu1 %v24922_v34 }
 0x81c   :  { %19247 = vmatpush3.bf16.msra.mxu1 %v22432_v35 }
 0x81d   :  { %19248 = vmatprep.subr.bf16.mxu1 %v24922_v34 }
 0x81f   :  { %17763 = vmatmul.mubr.f32.vlgmr.msra.gmra.mrb[58].mxu1 %v22288_v21  ;;  %v19281_v21 = vpack.c.bf16 %v6840_v25, %v6837_v9  ;;  %v24763_v9 = vand.u32 4294901760, %v22658_v52  ;;  %v22665_v25 = vld [vmem:[#allocation4 + $0x158] sm:$0xff] }
 0x820   :  { %19250 = vmatpush3.bf16.msra.mxu1 %v22523_v3  ;;  %17781 = vmatprep.mubr.msk.f32.mxu1 %vm21143_vm1, %v24921_v39  ;;  %v24761_v62 = vand.u32 4294901760, %v22665_v25 }
 0x821   :  { %19251 = vmatprep.subr.bf16.mxu1 %v24922_v34 }
 0x824   :  { %19253 = vmatpush3.bf16.msra.mxu1 %v22532_v56 }
 0x825   :  { %19254 = vmatprep.subr.bf16.mxu1 %v24922_v34 }
 0x828   :  { %19256 = vmatpush3.bf16.msra.mxu1 %v22542_v32 }
 0x829   :  { %19257 = vmatprep.subr.bf16.mxu1 %v24922_v34 }
 0x82c   :  { %19259 = vmatpush3.bf16.msra.mxu1 %v22546_v18 }
 0x82d   :  { %19260 = vmatprep.subr.bf16.mxu1 %v24922_v34 }
 0x82f   :  { %17782 = vmatmul.mubr.f32.vlgmr.msra.gmra.mrb[60].mxu1 %v22280_v43 }
 0x830   :  { %19262 = vmatpush3.bf16.msra.mxu1 %v22396_v17  ;;  %17800 = vmatprep.mubr.msk.f32.mxu1 %vm21143_vm1, %v24921_v39 }
 0x831   :  { %19263 = vmatprep.subr.bf16.mxu1 %v24922_v34 }
 0x834   :  { %19265 = vmatpush3.bf16.msra.mxu1 %v22409_v47 }
 0x835   :  { %19266 = vmatprep.subr.bf16.mxu1 %v24922_v34 }
 0x838   :  { %19268 = vmatpush3.bf16.msra.mxu1 %v22412_v5 }
 0x839   :  { %19269 = vmatprep.subr.bf16.mxu1 %v24922_v34 }
 0x83c   :  { %19271 = vmatpush3.bf16.msra.mxu1 %v22432_v35 }
 0x83d   :  { %19280 = vmatprep.subr.bf16.mxu1 %v24922_v34 }
 0x83f   :  { %17801 = vmatmul.mubr.f32.vlgmr.msra.gmra.mrb[62].mxu1 %v22280_v43  ;;  %v238_v43 = vadd.f32 %v21846_v23, %v22011_v31 }
 0x840   :  { %19282 = vmatpush3.bf16.msra.mxu1 %v19281_v21  ;;  %17811 = vmatprep.mubr.msk.f32.mxu1 %vm21143_vm1, %v24921_v39  ;;  %v22667_v21 = vld [vmem:[#allocation4 + $0x170] sm:$0xff] }
 0x841   :  { %19283 = vmatprep.subr.bf16.mxu1 %v24922_v34  ;;  %v20501_v11 = vadd.f32 %v22014_v40, %v238_v43  ;;  %v22676_v43 = vpack.c.bf16 %v7064_v59, %v7060_v27 }
 0x843   :  { %19287 = vmatprep.subr.bf16.mxu0 %v22676_v43 }
 0x844   :  { %19285 = vmatpush3.bf16.msra.mxu1 %v19284_v7  ;;  %v24760_v7 = vand.u32 4294901760, %v22667_v21 }
 0x845   :  { %19382 = vmatprep.subr.bf16.mxu1 %v24922_v34 }
 0x847   :  { %17812 = vmatmul.mubr.msk.f32.vlgmr.msra.gmra.mrb[64].mxu1 %vm78_vm0, %v22184_v22 }
 0x848   :  { %19384 = vmatpush3.bf16.msra.mxu1 %v22396_v17  ;;  %17830 = vmatprep.mubr.msk.f32.mxu1 %vm21143_vm1, %v24921_v39 }
 0x849   :  { %19385 = vmatprep.subr.bf16.mxu1 %v24922_v34 }
 0x84c   :  { %19387 = vmatpush3.bf16.msra.mxu1 %v22409_v47 }
 0x84d   :  { %19388 = vmatprep.subr.bf16.mxu1 %v24922_v34 }
 0x850   :  { %19390 = vmatpush3.bf16.msra.mxu1 %v22412_v5 }
 0x851   :  { %19391 = vmatprep.subr.bf16.mxu1 %v24922_v34 }
 0x854   :  { %19393 = vmatpush3.bf16.msra.mxu1 %v22432_v35 }
 0x855   :  { %19394 = vmatprep.subr.bf16.mxu1 %v24922_v34 }
 0x85e   :  { %v6915_v33 = vpop.f32.mrb[10].mxu0 }
 0x85f   :  { %v20502_v16 = vadd.f32 %v20501_v11, %v6915_v33  ;;  %v6917_v19 = vpop.f32.mrb[11].mxu0  ;;  %v22682_v11 = vpack.c.bf16 %v24762_v28, %v24763_v9  ;;  %v22688_v33 = vpack.c.bf16 %v24760_v7, %v24761_v62  ;;  %v7032_v7 = vld [vmem:[#allocation4 + $0x1c8] sm:$0xff] }
 0x860   :  { %v20505_v58 = vadd.f32 %v20504_v48, %v6917_v19  ;;  %v7090_v28 = vand.u32 4294901760, %v7032_v7 }
 0x861   :  { %19289 = vmatpush1.bf16.msra.mxu0 %v22682_v11 }
 0x862   :  { %v5171_v55 = vpop.f32.mrb[40].mxu1  ;;  %19291 = vmatprep.subr.bf16.mxu0 %v22688_v33 }
 0x863   :  { %v17593_v0 = vpop.f32.mrb[41].mxu1  ;;  %v5172_v13 = vadd.f32 %v5171_v55, %v4437_v20 }
 0x872   :  { %v5282_v24 = vpop.f32.mrb[42].mxu1 }
 0x873   :  { %v5283_v50 = vadd.f32 %v5282_v24, %v5172_v13  ;;  %v17612_v23 = vpop.f32.mrb[43].mxu1 }
 0x882   :  { %v5370_v26 = vpop.f32.mrb[44].mxu1 }
 0x883   :  { %v5371_v51 = vadd.f32 %v5370_v26, %v5283_v50  ;;  %v17631_v8 = vpop.f32.mrb[45].mxu1 }
 0x884   :  { %v16554_v8 = vmul.f32 -1.442695, %v20502_v16 }
 0x886   :  { %20975 = vpow2.f32 %v16554_v8 }
 0x892   :  { %v5451_v15 = vpop.f32.mrb[46].mxu1 }
 0x893   :  { %v5452_v41 = vadd.f32 %v5451_v15, %v5371_v51  ;;  %v17650_v36 = vpop.f32.mrb[47].mxu1 }
 0x8a2   :  { %v5546_v60 = vpop.f32.mrb[48].mxu1 }
 0x8a3   :  { %v5547_v12 = vadd.f32 %v5546_v60, %v5452_v41  ;;  %v17669_v57 = vpop.f32.mrb[49].mxu1  ;;  %v20976_v60 = vpop.eup %20975 }
 0x8a4   :  { %v6998_v57 = vadd.f32 1.0, %v20976_v60 }
 0x8b2   :  { %v5625_v63 = vpop.f32.mrb[50].mxu1 }
 0x8b3   :  { %v22652_v61 = vadd.f32 %v5625_v63, %v5547_v12  ;;  %v17688_v4 = vpop.f32.mrb[51].mxu1  ;;  %v16555_v12 = vmul.f32 -1.442695, %v20505_v58  ;;  %v7017_v58 = vld [vmem:[#allocation4 + $0x150] sm:$0xff] }
 0x8b5   :  { %24929 = vst [vmem:[#allocation33_spill] sm:$0xff] %v22652_v61  ;;  %20977 = vpow2.f32 %v16555_v12  ;;  %v7023_v12 = vld [vmem:[#allocation4 + $0x180] sm:$0xff] }
 0x8b6   :  { %20979 = vrcp.f32 %v6998_v57  ;;  %v7026_v57 = vld [vmem:[#allocation4 + $0x198] sm:$0xff] }
 0x8c2   :  { %v6365_v49 = vpop.f32.mrb[52].mxu1 }
 0x8c3   :  { %v17707_v48 = vpop.f32.mrb[53].mxu1  ;;  %v6366_v19 = vadd.f32 %v6365_v49, %v4437_v20 }
 0x8c4   :  { %v20978_v48 = vpop.eup %20977 }
 0x8d2   :  { %v6476_v55 = vpop.f32.mrb[54].mxu1 }
 0x8d3   :  { %v6477_v0 = vadd.f32 %v6476_v55, %v6366_v19  ;;  %v17726_v10 = vpop.f32.mrb[55].mxu1  ;;  %v22695_v19 = vld [vmem:[#allocation4 + $0x2a2] ss:$0 sm:$0xff] }
 0x8d4   :  { %24931 = vst [vmem:[#allocation35_spill] sm:$0xff] %v22695_v19 }
 0x8e2   :  { %v6564_v13 = vpop.f32.mrb[56].mxu1 }
 0x8e3   :  { %v6565_v24 = vadd.f32 %v6564_v13, %v6477_v0  ;;  %v17745_v50 = vpop.f32.mrb[57].mxu1  ;;  %v20980_v0 = vpop.eup %20979  ;;  %v6999_v13 = vadd.f32 1.0, %v20978_v48  ;;  %v22707_v48 = vsub.f32 %v22654_v30, %v7060_v27 }
 0x8e5   :  { %v24777_v62 = vand.u32 4294901760, %v22707_v48 }
 0x8f2   :  { %v6645_v23 = vpop.f32.mrb[58].mxu1 }
 0x8f3   :  { %v6646_v26 = vadd.f32 %v6645_v23, %v6565_v24  ;;  %v17764_v51 = vpop.f32.mrb[59].mxu1  ;;  %v24932_v24 = vld [vmem:[#allocation17_spill] sm:$0xff]  ;;  %v7020_v23 = vld [vmem:[#allocation4 + $0x168] sm:$0xff] }
 0x8f4   :  { %v7074_v51 = vand.u32 4294901760, %v7020_v23 }
 0x902   :  { %v6740_v15 = vpop.f32.mrb[60].mxu1 }
 0x903   :  { %v6741_v41 = vadd.f32 %v6740_v15, %v6646_v26  ;;  %v17783_v36 = vpop.f32.mrb[61].mxu1  ;;  %v7070_v26 = vand.u32 4294901760, %v7017_v58  ;;  %v7024_v15 = vld [vmem:[#allocation4 + $0x188] sm:$0xff] }
 0x904   :  { %v7076_v36 = vand.u32 4294901760, %v7024_v15 }
 0x905   :  { %v22699_v8 = vpack.c.bf16 %v7074_v51, %v7070_v26  ;;  %v7183_v31 = vsub.f32 %v7017_v58, %v7070_v26 }
 0x906   :  { %v7201_v56 = vsub.f32 %v7024_v15, %v7076_v36 }
 0x907   :  { %19293 = vmatpush1.bf16.msra.mxu0 %v22699_v8  ;;  %v7184_v32 = vand.u32 4294901760, %v7183_v31 }
 0x909   :  { %v7185_v35 = vsub.f32 %v7183_v31, %v7184_v32 }
 0x912   :  { %v6819_v20 = vpop.f32.mrb[62].mxu1 }
 0x913   :  { %v22693_v63 = vadd.f32 %v6819_v20, %v6741_v41  ;;  %v17802_v4 = vpop.f32.mrb[63].mxu1  ;;  %v7027_v41 = vld [vmem:[#allocation4 + $0x1a0] sm:$0xff]  ;;  %v7078_v20 = vand.u32 4294901760, %v7023_v12 }
 0x914   :  { %v7080_v60 = vand.u32 4294901760, %v7027_v41  ;;  %v7082_v4 = vand.u32 4294901760, %v7026_v57 }
 0x915   :  { %24930 = vst [vmem:[#allocation34_spill] sm:$0xff] %v22693_v63 }
 0x91a   :  { %v6986_v49 = vpop.f32.mrb[64].mxu1 }
 0x91b   :  { %v7004_v55 = vadd.f32 %v22695_v19, %v6986_v49  ;;  %v17813_v16 = vpop.f32.mrb[65].mxu1  ;;  %v22702_v49 = vpack.c.bf16 %v7080_v60, %v7076_v36 }
 0x91c   :  { %v22714_v16 = vpack.c.bf16 %v7082_v4, %v7078_v20 }
 0x91d   :  { %v7005_v10 = vmul.f32 %v20980_v0, %v7004_v55  ;;  %v22712_v55 = vsub.f32 %v22656_v44, %v7064_v59  ;;  %v7030_v0 = vld [vmem:[#allocation4 + $0x1b8] sm:$0xff]  ;;  %19295 = vmatprep.subr.bf16.mxu0 %v22702_v49  ;;  %v7155_v59 = vsub.f32 %v22707_v48, %v24777_v62  ;;  %v7195_v62 = vsub.f32 %v7020_v23, %v7074_v51 }
 0x91e   :  { %24933 = vst [vmem:[#allocation17_spill] sm:$0xff] %v22714_v16  ;;  %19297 = vmatpush1.bf16.msra.mxu0 %v22714_v16 }
 0x91f   :  { %v7006_v50 = vadd.f32 %v7005_v10, %v24932_v24  ;;  %v7033_v10 = vld [vmem:[#allocation4 + $0x1d0] sm:$0xff]  ;;  %v24782_v30 = vand.u32 4294901760, %v22712_v55  ;;  %v7156_v45 = vand.u32 4294901760, %v7155_v59  ;;  %v7196_v3 = vand.u32 4294901760, %v7195_v62 }
 0x920   :  { %v7088_v24 = vand.u32 4294901760, %v7033_v10  ;;  %v7207_v59 = vsub.f32 %v7023_v12, %v7078_v20 }
 0x921   :  { %20981 = vtanh.f32 %v7006_v50  ;;  %v7029_v50 = vld [vmem:[#allocation4 + $0x1b0] sm:$0xff]  ;;  %v7167_v9 = vsub.f32 %v22712_v55, %v24782_v30 }
 0x922   :  { %20983 = vrcp.f32 %v6999_v13  ;;  %v7084_v13 = vand.u32 4294901760, %v7030_v0  ;;  %v7086_v27 = vand.u32 4294901760, %v7029_v50 }
 0x923   :  { %v7168_v40 = vand.u32 4294901760, %v7167_v9  ;;  %v7197_v9 = vsub.f32 %v7195_v62, %v7196_v3 }
 0x924   :  { %v22720_v44 = vpack.c.bf16 %v7088_v24, %v7084_v13  ;;  %v22728_v61 = vpack.c.bf16 %v7090_v28, %v7086_v27  ;;  %v7225_v23 = vsub.f32 %v7030_v0, %v7084_v13 }
 0x925   :  { %v22733_v18 = vpack.c.bf16 %v7168_v40, %v7156_v45  ;;  %v7186_v40 = vand.u32 4294901760, %v7185_v35  ;;  %v7198_v26 = vand.u32 4294901760, %v7197_v9 }
 0x926   :  { %24934 = vst [vmem:[#allocation36_spill] sm:$0xff] %v22720_v44  ;;  %24935 = vst [vmem:[#allocation37_spill] sm:$0xff] %v22728_v61  ;;  %19299 = vmatprep.subr.bf16.mxu0 %v22720_v44  ;;  %v7202_v44 = vand.u32 4294901760, %v7201_v56  ;;  %v7226_v36 = vand.u32 4294901760, %v7225_v23 }
 0x927   :  { %19301 = vmatpush1.bf16.msra.mxu0 %v22728_v61  ;;  %24936 = vst [vmem:[#allocation38_spill] sm:$0xff] %v22733_v18  ;;  %v22742_v12 = vpack.c.bf16 %v7198_v26, %v7186_v40  ;;  %v7243_v61 = vsub.f32 %v7032_v7, %v7090_v28  ;;  %v24940_v28 = vld [vmem:[#allocation24_spill] sm:$0xff]  ;;  %v22758_v7 = vpack.c.bf16 %v22712_v55, %v22707_v48 }
 0x928   :  { %19303 = vmatprep.subr.bf16.mxu0 %v22733_v18  ;;  %v7203_v45 = vsub.f32 %v7201_v56, %v7202_v44  ;;  %v7227_v35 = vsub.f32 %v7225_v23, %v7226_v36 }
 0x929   :  { %v7244_v16 = vand.u32 4294901760, %v7243_v61 }
 0x92a   :  { %v7204_v51 = vand.u32 4294901760, %v7203_v45  ;;  %v7228_v45 = vand.u32 4294901760, %v7227_v35 }
 0x92b   :  { %v20982_v63 = vpop.eup %20981 }
 0x92c   :  { %v7008_v19 = vsub.f32 %v22184_v22, %v20982_v63  ;;  %v20984_v38 = vpop.eup %20983  ;;  %v7213_v22 = vsub.f32 %v7027_v41, %v7080_v60  ;;  %v7237_v41 = vsub.f32 %v7033_v10, %v7088_v24  ;;  %v24938_v60 = vld [vmem:[#allocation26_spill] sm:$0xff]  ;;  %v24939_v10 = vld [vmem:[#allocation25_spill] sm:$0xff] }
 0x92e   :  { %v7009_v53 = vmul.f32 %v20984_v38, %v7008_v19  ;;  %v7214_v58 = vand.u32 4294901760, %v7213_v22  ;;  %v7219_v38 = vsub.f32 %v7026_v57, %v7082_v4  ;;  %v7208_v19 = vand.u32 4294901760, %v7207_v59 }
 0x92f   :  { %v7238_v4 = vand.u32 4294901760, %v7237_v41 }
 0x930   :  { %v22735_v30 = vadd.f32 %v20982_v63, %v7009_v53  ;;  %v7215_v53 = vsub.f32 %v7213_v22, %v7214_v58  ;;  %v7220_v63 = vand.u32 4294901760, %v7219_v38  ;;  %v7209_v15 = vsub.f32 %v7207_v59, %v7208_v19 }
 0x931   :  { %v7239_v5 = vsub.f32 %v7237_v41, %v7238_v4 }
 0x932   :  { %24937 = vst [vmem:[#allocation39_spill] sm:$0xff] %v22735_v30  ;;  %7037 = vrot.lane.b32.xlu1 %v22735_v30, %s21144_s0  ;;  %v7216_v20 = vand.u32 4294901760, %v7215_v53  ;;  %v7221_v18 = vsub.f32 %v7219_v38, %v7220_v63  ;;  %v7231_v30 = vsub.f32 %v7029_v50, %v7086_v27  ;;  %v7210_v57 = vand.u32 4294901760, %v7209_v15 }
 0x933   :  { %v7240_v26 = vand.u32 4294901760, %v7239_v5  ;;  %v7245_v53 = vsub.f32 %v7243_v61, %v7244_v16  ;;  %v22766_v5 = vpack.c.bf16 %v7237_v41, %v7225_v23 }
 0x934   :  { %v22744_v0 = vpack.c.bf16 %v7216_v20, %v7204_v51  ;;  %v7222_v13 = vand.u32 4294901760, %v7221_v18  ;;  %v7232_v9 = vand.u32 4294901760, %v7231_v30  ;;  %v22760_v51 = vpack.c.bf16 %v7195_v62, %v7183_v31 }
 0x935   :  { %v22750_v27 = vpack.c.bf16 %v7240_v26, %v7228_v45  ;;  %v7246_v15 = vand.u32 4294901760, %v7245_v53  ;;  %v22762_v20 = vpack.c.bf16 %v7213_v22, %v7201_v56  ;;  %v22768_v35 = vpack.c.bf16 %v7243_v61, %v7231_v30 }
 0x936   :  { %8247 = vrot.lane.b32.xlu1 %v24938_v60, %s21144_s0  ;;  %v22748_v24 = vpack.c.bf16 %v7222_v13, %v7210_v57  ;;  %v7233_v40 = vsub.f32 %v7231_v30, %v7232_v9  ;;  %v22764_v57 = vpack.c.bf16 %v7219_v38, %v7207_v59  ;;  %v24941_v13 = vand.u32 4294901760, %v22707_v48 }
 0x937   :  { %v24942_v45 = vand.u32 4294901760, %v22712_v55  ;;  %v22776_v26 = vpack.c.bf16 %v7196_v3, %v7184_v32  ;;  %v22778_v53 = vpack.c.bf16 %v7214_v58, %v7202_v44  ;;  %v22780_v31 = vpack.c.bf16 %v7220_v63, %v7208_v19 }
 0x938   :  { %v7234_v50 = vand.u32 4294901760, %v7233_v40  ;;  %v22782_v56 = vpack.c.bf16 %v7238_v4, %v7226_v36  ;;  %v22784_v62 = vpack.c.bf16 %v7244_v16, %v7232_v9  ;;  %v24943_v22 = vand.u32 4294901760, %v22658_v52 }
 0x939   :  { %v22774_v40 = vpack.c.bf16 %v24942_v45, %v24941_v13  ;;  %v24944_v48 = vand.u32 4294901760, %v22662_v42  ;;  %v24945_v3 = vand.u32 4294901760, %v22665_v25  ;;  %v24946_v30 = vand.u32 4294901760, %v22667_v21 }
 0x93a   :  { %10862 = vrot.lane.b32.xlu1 %v24939_v10, %s21144_s0  ;;  %v22754_v18 = vpack.c.bf16 %v7246_v15, %v7234_v50  ;;  %v22789_v61 = vsub.f32 %v22658_v52, %v24943_v22 }
 0x93b   :  { %v22794_v55 = vsub.f32 %v22662_v42, %v24944_v48  ;;  %v22799_v32 = vsub.f32 %v22665_v25, %v24945_v3  ;;  %v22804_v16 = vsub.f32 %v22667_v21, %v24946_v30 }
 0x93c   :  { %v7160_v44 = vand.u32 4294901760, %v22789_v61 }
 0x93d   :  { %v7172_v52 = vand.u32 4294901760, %v22794_v55  ;;  %v7178_v59 = vand.u32 4294901760, %v22799_v32  ;;  %v7190_v58 = vand.u32 4294901760, %v22804_v16  ;;  %v22854_v3 = vpack.c.bf16 %v22794_v55, %v22789_v61 }
 0x93e   :  { %13477 = vrot.lane.b32.xlu1 %v24940_v28, %s21144_s0  ;;  %v7161_v19 = vsub.f32 %v22789_v61, %v7160_v44  ;;  %v22860_v30 = vpack.c.bf16 %v22804_v16, %v22799_v32  ;;  %v24952_v61 = vld [vmem:[#allocation29_spill] sm:$0xff] }
 0x93f   :  { %v7173_v21 = vsub.f32 %v22794_v55, %v7172_v52  ;;  %v7179_v63 = vsub.f32 %v22799_v32, %v7178_v59  ;;  %v7191_v36 = vsub.f32 %v22804_v16, %v7190_v58  ;;  %v24953_v55 = vld [vmem:[#allocation30_spill] sm:$0xff]  ;;  %v24954_v32 = vld [vmem:[#allocation31_spill] sm:$0xff]  ;;  %v24955_v16 = vld [vmem:[#allocation32_spill] sm:$0xff] }
 0x941   :  { %v7174_v4 = vand.u32 4294901760, %v7173_v21  ;;  %v7180_v50 = vand.u32 4294901760, %v7179_v63  ;;  %v7192_v15 = vand.u32 4294901760, %v7191_v36  ;;  %v24951_v21 = vld [vmem:[#allocation28_spill] sm:$0xff]  ;;  %v22904_v63 = vpack.c.bf16 %v7172_v52, %v7160_v44  ;;  %v24956_v52 = vld [vmem:[#allocation39_spill] sm:$0xff] }
 0x942   :  { %v22912_v36 = vpack.c.bf16 %v7190_v58, %v7178_v59 }
 0x943   :  { %v22833_v48 = vpack.c.bf16 %v7192_v15, %v7180_v50  ;;  %v24957_v50 = vld [vmem:[#allocation38_spill] sm:$0xff] }
 0x9a4   :  { %v7038_v42 = vpop.permute.xlu1 %7037 }
 0x9a5   :  { %v7040_v38 = vsel %vm78_vm0, %v24938_v60, %v7038_v42  ;;  %v7162_v60 = vand.u32 4294901760, %v7161_v19  ;;  %v24947_v42 = vld [vmem:[#allocation17_spill] sm:$0xff] }
 0x9a6   :  { %v7058_v25 = vsel %vm4441_vm2, %v7040_v38, 0  ;;  %v24948_v38 = vld [vmem:[#allocation27_spill] sm:$0xff]  ;;  %v24950_v19 = vld [vmem:[#allocation37_spill] sm:$0xff] }
 0x9a7   :  { %v22819_v23 = vand.u32 4294901760, %v7058_v25  ;;  %v22831_v45 = vpack.c.bf16 %v7174_v4, %v7162_v60 }
 0x9a8   :  { %v8248_v44 = vpop.permute.xlu1 %8247 }
 0x9a9   :  { %v7142_v41 = vsub.f32 %v7058_v25, %v22819_v23  ;;  %v24949_v25 = vld [vmem:[#allocation36_spill] sm:$0xff]  ;;  %v8250_v59 = vsel %vm78_vm0, %v24956_v52, %v8248_v44 }
 0x9aa   :  { %v8252_v58 = vsel %vm4441_vm2, %v8250_v59, 0 }
 0x9ab   :  { %v22828_v9 = vand.u32 4294901760, %v7142_v41 }
 0x9ad   :  { %v7144_v13 = vsub.f32 %v7142_v41, %v22828_v9 }
 0x9af   :  { %v7145_v22 = vand.u32 4294901760, %v7144_v13 }
 0x9b1   :  { %7146 = vmatmul.mubr.f32.vlgmr.msra.gmra.mrb[18].mxu0 %v7145_v22  ;;  %17831 = vmatmul.mubr.f32.vlgmr.msra.gmra.mrb[66].mxu1 %v7145_v22 }
 0x9b2   :  { %19305 = vmatpush1.bf16.msra.mxu0 %v22831_v45  ;;  %19396 = vmatpush3.bf16.msra.mxu1 %v22450_v6 }
 0x9b3   :  { %19307 = vmatprep.subr.bf16.mxu0 %v22833_v48  ;;  %19397 = vmatprep.subr.bf16.mxu1 %v24922_v34 }
 0x9b4   :  { %7296 = vmatprep.mubr.f32.mxu0 %v24921_v39  ;;  %17849 = vmatprep.mubr.msk.f32.mxu1 %vm21143_vm1, %v24921_v39 }
 0x9b6   :  { %19309 = vmatpush1.bf16.msra.mxu0 %v22742_v12  ;;  %19399 = vmatpush3.bf16.msra.mxu1 %v22464_v2 }
 0x9b7   :  { %19311 = vmatprep.subr.bf16.mxu0 %v22744_v0  ;;  %19400 = vmatprep.subr.bf16.mxu1 %v24922_v34 }
 0x9ba   :  { %19313 = vmatpush1.bf16.msra.mxu0 %v22748_v24  ;;  %19402 = vmatpush3.bf16.msra.mxu1 %v22473_v1 }
 0x9bb   :  { %19315 = vmatprep.subr.bf16.mxu0 %v22750_v27  ;;  %19403 = vmatprep.subr.bf16.mxu1 %v24922_v34 }
 0x9be   :  { %19317 = vmatpush1.bf16.msra.mxu0 %v22754_v18  ;;  %19405 = vmatpush3.bf16.msra.mxu1 %v22477_v14 }
 0x9bf   :  { %19319 = vmatprep.subr.bf16.mxu0 %v22758_v7  ;;  %19406 = vmatprep.subr.bf16.mxu1 %v24922_v34 }
 0x9c1   :  { %7298 = vmatmul.mubr.f32.vlgmr.msra.gmra.mrb[18].mxu0 %v22819_v23  ;;  %17850 = vmatmul.mubr.f32.vlgmr.msra.gmra.mrb[68].mxu1 %v22819_v23 }
 0x9c2   :  { %19321 = vmatpush1.bf16.msra.mxu0 %v22854_v3  ;;  %19408 = vmatpush3.bf16.msra.mxu1 %v22483_v37 }
 0x9c3   :  { %19323 = vmatprep.subr.bf16.mxu0 %v22860_v30  ;;  %19409 = vmatprep.subr.bf16.mxu1 %v24922_v34 }
 0x9c4   :  { %7400 = vmatprep.mubr.f32.mxu0 %v24921_v39  ;;  %17868 = vmatprep.mubr.msk.f32.mxu1 %vm21143_vm1, %v24921_v39 }
 0x9c6   :  { %19325 = vmatpush1.bf16.msra.mxu0 %v22760_v51  ;;  %19411 = vmatpush3.bf16.msra.mxu1 %v22490_v54 }
 0x9c7   :  { %19327 = vmatprep.subr.bf16.mxu0 %v22762_v20  ;;  %19412 = vmatprep.subr.bf16.mxu1 %v24922_v34 }
 0x9ca   :  { %19329 = vmatpush1.bf16.msra.mxu0 %v22764_v57  ;;  %19414 = vmatpush3.bf16.msra.mxu1 %v22498_v29 }
 0x9cb   :  { %19331 = vmatprep.subr.bf16.mxu0 %v22766_v5  ;;  %19415 = vmatprep.subr.bf16.mxu1 %v24922_v34 }
 0x9ce   :  { %19333 = vmatpush1.bf16.msra.mxu0 %v22768_v35  ;;  %19417 = vmatpush3.bf16.msra.mxu1 %v22504_v46 }
 0x9cf   :  { %19335 = vmatprep.subr.bf16.mxu0 %v22676_v43  ;;  %19418 = vmatprep.subr.bf16.mxu1 %v24922_v34 }
 0x9d1   :  { %7403 = vmatmul.mubr.f32.vlgmr.msra.gmra.mrb[18].mxu0 %v7142_v41  ;;  %17869 = vmatmul.mubr.f32.vlgmr.msra.gmra.mrb[70].mxu1 %v7142_v41  ;;  %v22957_v41 = vand.u32 4294901760, %v8252_v58 }
 0x9d2   :  { %19337 = vmatpush1.bf16.msra.mxu0 %v22682_v11  ;;  %19420 = vmatpush3.bf16.msra.mxu1 %v22396_v17 }
 0x9d3   :  { %19339 = vmatprep.subr.bf16.mxu0 %v22688_v33  ;;  %19421 = vmatprep.subr.bf16.mxu1 %v24922_v34  ;;  %v8336_v60 = vsub.f32 %v8252_v58, %v22957_v41 }
 0x9d4   :  { %7489 = vmatprep.mubr.f32.mxu0 %v24921_v39  ;;  %17887 = vmatprep.mubr.msk.f32.mxu1 %vm21143_vm1, %v24921_v39 }
 0x9d6   :  { %19341 = vmatpush1.bf16.msra.mxu0 %v22699_v8  ;;  %19423 = vmatpush3.bf16.msra.mxu1 %v22409_v47 }
 0x9d7   :  { %19343 = vmatprep.subr.bf16.mxu0 %v22702_v49  ;;  %19424 = vmatprep.subr.bf16.mxu1 %v24922_v34 }
 0x9da   :  { %19345 = vmatpush1.bf16.msra.mxu0 %v24947_v42  ;;  %19426 = vmatpush3.bf16.msra.mxu1 %v24948_v38 }
 0x9db   :  { %19347 = vmatprep.subr.bf16.mxu0 %v24949_v25  ;;  %19427 = vmatprep.subr.bf16.mxu1 %v24922_v34 }
 0x9de   :  { %19349 = vmatpush1.bf16.msra.mxu0 %v24950_v19  ;;  %19429 = vmatpush3.bf16.msra.mxu1 %v24951_v21 }
 0x9df   :  { %19351 = vmatprep.subr.bf16.mxu0 %v22774_v40  ;;  %19430 = vmatprep.subr.bf16.mxu1 %v24922_v34 }
 0x9e1   :  { %7493 = vmatmul.mubr.f32.vlgmr.msra.gmra.mrb[18].mxu0 %v22828_v9  ;;  %17888 = vmatmul.mubr.f32.vlgmr.msra.gmra.mrb[72].mxu1 %v22828_v9 }
 0x9e2   :  { %19353 = vmatpush1.bf16.msra.mxu0 %v22904_v63  ;;  %19432 = vmatpush3.bf16.msra.mxu1 %v24952_v61 }
 0x9e3   :  { %19355 = vmatprep.subr.bf16.mxu0 %v22912_v36  ;;  %19433 = vmatprep.subr.bf16.mxu1 %v24922_v34 }
 0x9e4   :  { %7611 = vmatprep.mubr.f32.mxu0 %v24921_v39  ;;  %17906 = vmatprep.mubr.msk.f32.mxu1 %vm21143_vm1, %v24921_v39 }
 0x9e6   :  { %19357 = vmatpush1.bf16.msra.mxu0 %v22776_v26  ;;  %19435 = vmatpush3.bf16.msra.mxu1 %v24953_v55 }
 0x9e7   :  { %19359 = vmatprep.subr.bf16.mxu0 %v22778_v53  ;;  %19436 = vmatprep.subr.bf16.mxu1 %v24922_v34 }
 0x9ea   :  { %19361 = vmatpush1.bf16.msra.mxu0 %v22780_v31  ;;  %19438 = vmatpush3.bf16.msra.mxu1 %v24954_v32 }
 0x9eb   :  { %19363 = vmatprep.subr.bf16.mxu0 %v22782_v56  ;;  %19439 = vmatprep.subr.bf16.mxu1 %v24922_v34 }
 0x9ee   :  { %19365 = vmatpush1.bf16.msra.mxu0 %v22784_v62  ;;  %19441 = vmatpush3.bf16.msra.mxu1 %v24955_v16 }
 0x9ef   :  { %19367 = vmatprep.subr.bf16.mxu0 %v22676_v43  ;;  %19442 = vmatprep.subr.bf16.mxu1 %v24922_v34 }
 0x9f1   :  { %7613 = vmatmul.mubr.f32.vlgmr.msra.gmra.mrb[18].mxu0 %v22819_v23  ;;  %17907 = vmatmul.mubr.f32.vlgmr.msra.gmra.mrb[74].mxu1 %v22819_v23 }
 0x9f2   :  { %19369 = vmatpush1.bf16.msra.mxu0 %v22682_v11  ;;  %19444 = vmatpush3.bf16.msra.mxu1 %v22396_v17 }
 0x9f3   :  { %19371 = vmatprep.subr.bf16.mxu0 %v22688_v33  ;;  %19445 = vmatprep.subr.bf16.mxu1 %v24922_v34 }
 0x9f4   :  { %7699 = vmatprep.mubr.f32.mxu0 %v24921_v39  ;;  %17925 = vmatprep.mubr.msk.f32.mxu1 %vm21143_vm1, %v24921_v39 }
 0x9f6   :  { %19373 = vmatpush1.bf16.msra.mxu0 %v22699_v8  ;;  %19447 = vmatpush3.bf16.msra.mxu1 %v22409_v47 }
 0x9f7   :  { %19375 = vmatprep.subr.bf16.mxu0 %v22702_v49  ;;  %19448 = vmatprep.subr.bf16.mxu1 %v24922_v34 }
 0x9fa   :  { %19377 = vmatpush1.bf16.msra.mxu0 %v24947_v42  ;;  %19450 = vmatpush3.bf16.msra.mxu1 %v24948_v38 }
 0x9fb   :  { %19379 = vmatprep.subr.bf16.mxu0 %v24949_v25  ;;  %19451 = vmatprep.subr.bf16.mxu1 %v24922_v34 }
 0x9fe   :  { %19381 = vmatpush1.bf16.msra.mxu0 %v24950_v19  ;;  %19453 = vmatpush3.bf16.msra.mxu1 %v24951_v21 }
 0x9ff   :  { %19455 = vmatprep.subr.bf16.mxu0 %v22676_v43  ;;  %19550 = vmatprep.subr.bf16.mxu1 %v24922_v34 }
 0xa01   :  { %7701 = vmatmul.mubr.f32.vlgmr.msra.gmra.mrb[18].mxu0 %v22819_v23  ;;  %17926 = vmatmul.mubr.f32.vlgmr.msra.gmra.mrb[76].mxu1 %v22819_v23  ;;  %v22973_v23 = vand.u32 4294901760, %v8336_v60 }
 0xa02   :  { %19457 = vmatpush1.bf16.msra.mxu0 %v22682_v11  ;;  %19552 = vmatpush3.bf16.msra.mxu1 %v22396_v17 }
 0xa03   :  { %19459 = vmatprep.subr.bf16.mxu0 %v22688_v33  ;;  %19553 = vmatprep.subr.bf16.mxu1 %v24922_v34  ;;  %v8338_v4 = vsub.f32 %v8336_v60, %v22973_v23 }
 0xa04   :  { %8334 = vmatprep.mubr.f32.mxu0 %v24921_v39  ;;  %17944 = vmatprep.mubr.msk.f32.mxu1 %vm21143_vm1, %v24921_v39 }
 0xa05   :  { %v8339_v9 = vand.u32 4294901760, %v8338_v4 }
 0xa06   :  { %19461 = vmatpush1.bf16.msra.mxu0 %v22699_v8  ;;  %19555 = vmatpush3.bf16.msra.mxu1 %v22409_v47 }
 0xa07   :  { %19463 = vmatprep.subr.bf16.mxu0 %v22702_v49  ;;  %19556 = vmatprep.subr.bf16.mxu1 %v24922_v34 }
 0xa0a   :  { %19465 = vmatpush1.bf16.msra.mxu0 %v24947_v42  ;;  %19558 = vmatpush3.bf16.msra.mxu1 %v24948_v38 }
 0xa0b   :  { %19467 = vmatprep.subr.bf16.mxu0 %v24949_v25  ;;  %19559 = vmatprep.subr.bf16.mxu1 %v24922_v34 }
 0xa0e   :  { %19469 = vmatpush1.bf16.msra.mxu0 %v24950_v19  ;;  %19561 = vmatpush3.bf16.msra.mxu1 %v24951_v21 }
 0xa0f   :  { %19471 = vmatprep.subr.bf16.mxu0 %v24957_v50  ;;  %19562 = vmatprep.subr.bf16.mxu1 %v24922_v34 }
 0xa11   :  { %8340 = vmatmul.mubr.f32.vlgmr.msra.gmra.mrb[20].mxu0 %v8339_v9  ;;  %17945 = vmatmul.mubr.f32.vlgmr.msra.gmra.mrb[78].mxu1 %v8339_v9 }
 0xa12   :  { %19473 = vmatpush1.bf16.msra.mxu0 %v22831_v45  ;;  %19564 = vmatpush3.bf16.msra.mxu1 %v22450_v6  ;;  %v9451_v6 = vld [vmem:[#allocation4 + $0xc8] sm:$0xff] }
 0xa13   :  { %19475 = vmatprep.subr.bf16.mxu0 %v22833_v48  ;;  %19565 = vmatprep.subr.bf16.mxu1 %v24922_v34 }
 0xa14   :  { %8490 = vmatprep.mubr.f32.mxu0 %v24921_v39  ;;  %17963 = vmatprep.mubr.msk.f32.mxu1 %vm21143_vm1, %v24921_v39 }
 0xa16   :  { %19477 = vmatpush1.bf16.msra.mxu0 %v22742_v12  ;;  %19567 = vmatpush3.bf16.msra.mxu1 %v22464_v2  ;;  %v9454_v2 = vld [vmem:[#allocation4 + $0xe0] sm:$0xff]  ;;  %v9461_v12 = vld [vmem:[#allocation4 + $0x118] sm:$0xff] }
 0xa17   :  { %19479 = vmatprep.subr.bf16.mxu0 %v22744_v0  ;;  %19568 = vmatprep.subr.bf16.mxu1 %v24922_v34 }
 0xa1a   :  { %19481 = vmatpush1.bf16.msra.mxu0 %v22748_v24  ;;  %19570 = vmatpush3.bf16.msra.mxu1 %v22473_v1  ;;  %v19622_v1 = vpack.c.bf16 %v9454_v2, %v9451_v6 }
 0xa1b   :  { %19483 = vmatprep.subr.bf16.mxu0 %v22750_v27  ;;  %19571 = vmatprep.subr.bf16.mxu1 %v24922_v34 }
 0xa1e   :  { %19485 = vmatpush1.bf16.msra.mxu0 %v22754_v18  ;;  %19573 = vmatpush3.bf16.msra.mxu1 %v22477_v14  ;;  %v9453_v14 = vld [vmem:[#allocation4 + $0xd8] sm:$0xff] }
 0xa1f   :  { %19487 = vmatprep.subr.bf16.mxu0 %v22758_v7  ;;  %19574 = vmatprep.subr.bf16.mxu1 %v24922_v34  ;;  %v7035_v7 = vld [vmem:[#allocation4 + $0x2a3] ss:$8 sm:$0x7] }
 0xa21   :  { %8492 = vmatmul.mubr.f32.vlgmr.msra.gmra.mrb[20].mxu0 %v22957_v41  ;;  %17964 = vmatmul.mubr.f32.vlgmr.msra.gmra.mrb[80].mxu1 %v22957_v41 }
 0xa22   :  { %19489 = vmatpush1.bf16.msra.mxu0 %v22854_v3  ;;  %19576 = vmatpush3.bf16.msra.mxu1 %v22483_v37  ;;  %v9452_v37 = vld [vmem:[#allocation4 + $0xd0] sm:$0xff] }
 0xa23   :  { %19491 = vmatprep.subr.bf16.mxu0 %v22860_v30  ;;  %19577 = vmatprep.subr.bf16.mxu1 %v24922_v34 }
 0xa24   :  { %8594 = vmatprep.mubr.f32.mxu0 %v24921_v39  ;;  %17982 = vmatprep.mubr.msk.f32.mxu1 %vm21143_vm1, %v24921_v39 }
 0xa26   :  { %19493 = vmatpush1.bf16.msra.mxu0 %v22760_v51  ;;  %19579 = vmatpush3.bf16.msra.mxu1 %v22490_v54  ;;  %v9455_v54 = vld [vmem:[#allocation4 + $0xe8] sm:$0xff]  ;;  %v24958_v51 = vld [vmem:[#allocation10_spill] sm:$0xff] }
 0xa27   :  { %19495 = vmatprep.subr.bf16.mxu0 %v22762_v20  ;;  %19580 = vmatprep.subr.bf16.mxu1 %v24922_v34  ;;  %v7053_v20 = vrot.slane %v7035_v7, %v24958_v51 }
 0xa2a   :  { %19497 = vmatpush1.bf16.msra.mxu0 %v22764_v57  ;;  %19582 = vmatpush3.bf16.msra.mxu1 %v22498_v29  ;;  %v9460_v29 = vld [vmem:[#allocation4 + $0x110] sm:$0xff] }
 0xa2b   :  { %19499 = vmatprep.subr.bf16.mxu0 %v22766_v5  ;;  %19583 = vmatprep.subr.bf16.mxu1 %v24922_v34 }
 0xa2e   :  { %19501 = vmatpush1.bf16.msra.mxu0 %v22768_v35  ;;  %19585 = vmatpush3.bf16.msra.mxu1 %v22504_v46 }
 0xa2f   :  { %19503 = vmatprep.subr.bf16.mxu0 %v22676_v43  ;;  %19586 = vmatprep.subr.bf16.mxu1 %v24922_v34 }
 0xa31   :  { %8597 = vmatmul.mubr.f32.vlgmr.msra.gmra.mrb[20].mxu0 %v8336_v60  ;;  %17983 = vmatmul.mubr.f32.vlgmr.msra.gmra.mrb[82].mxu1 %v8336_v60  ;;  %v23123_v60 = vld [vmem:[#allocation4 + $0x170] sm:$0xff] }
 0xa32   :  { %19505 = vmatpush1.bf16.msra.mxu0 %v22682_v11  ;;  %19588 = vmatpush3.bf16.msra.mxu1 %v22396_v17  ;;  %v24798_v9 = vand.u32 4294901760, %v23123_v60 }
 0xa33   :  { %19507 = vmatprep.subr.bf16.mxu0 %v22688_v33  ;;  %19589 = vmatprep.subr.bf16.mxu1 %v24922_v34 }
 0xa34   :  { %8683 = vmatprep.mubr.f32.mxu0 %v24921_v39  ;;  %18001 = vmatprep.mubr.msk.f32.mxu1 %vm21143_vm1, %v24921_v39 }
 0xa36   :  { %19509 = vmatpush1.bf16.msra.mxu0 %v22699_v8  ;;  %19591 = vmatpush3.bf16.msra.mxu1 %v22409_v47 }
 0xa37   :  { %19511 = vmatprep.subr.bf16.mxu0 %v22702_v49  ;;  %19592 = vmatprep.subr.bf16.mxu1 %v24922_v34 }
 0xa3a   :  { %19513 = vmatpush1.bf16.msra.mxu0 %v24947_v42  ;;  %19594 = vmatpush3.bf16.msra.mxu1 %v24948_v38 }
 0xa3b   :  { %19515 = vmatprep.subr.bf16.mxu0 %v24949_v25  ;;  %19595 = vmatprep.subr.bf16.mxu1 %v24922_v34 }
 0xa3e   :  { %19517 = vmatpush1.bf16.msra.mxu0 %v24950_v19  ;;  %19597 = vmatpush3.bf16.msra.mxu1 %v24951_v21 }
 0xa3f   :  { %19519 = vmatprep.subr.bf16.mxu0 %v22774_v40  ;;  %19598 = vmatprep.subr.bf16.mxu1 %v24922_v34 }
 0xa41   :  { %8687 = vmatmul.mubr.f32.vlgmr.msra.gmra.mrb[20].mxu0 %v22973_v23  ;;  %18002 = vmatmul.mubr.f32.vlgmr.msra.gmra.mrb[84].mxu1 %v22973_v23 }
 0xa42   :  { %19521 = vmatpush1.bf16.msra.mxu0 %v22904_v63  ;;  %19600 = vmatpush3.bf16.msra.mxu1 %v24952_v61  ;;  %v23111_v61 = vld [vmem:[#allocation4 + $0x138] sm:$0xff] }
 0xa43   :  { %19523 = vmatprep.subr.bf16.mxu0 %v22912_v36  ;;  %19601 = vmatprep.subr.bf16.mxu1 %v24922_v34  ;;  %v24802_v44 = vand.u32 4294901760, %v23111_v61 }
 0xa44   :  { %8805 = vmatprep.mubr.f32.mxu0 %v24921_v39  ;;  %18020 = vmatprep.mubr.msk.f32.mxu1 %vm21143_vm1, %v24921_v39 }
 0xa46   :  { %19525 = vmatpush1.bf16.msra.mxu0 %v22776_v26  ;;  %19603 = vmatpush3.bf16.msra.mxu1 %v24953_v55 }
 0xa47   :  { %19527 = vmatprep.subr.bf16.mxu0 %v22778_v53  ;;  %19604 = vmatprep.subr.bf16.mxu1 %v24922_v34 }
 0xa4a   :  { %19529 = vmatpush1.bf16.msra.mxu0 %v22780_v31  ;;  %19606 = vmatpush3.bf16.msra.mxu1 %v24954_v32  ;;  %v23114_v32 = vld [vmem:[#allocation4 + $0x130] sm:$0xff] }
 0xa4b   :  { %19531 = vmatprep.subr.bf16.mxu0 %v22782_v56  ;;  %19607 = vmatprep.subr.bf16.mxu1 %v24922_v34  ;;  %v24801_v59 = vand.u32 4294901760, %v23114_v32 }
 0xa4e   :  { %19533 = vmatpush1.bf16.msra.mxu0 %v22784_v62  ;;  %19609 = vmatpush3.bf16.msra.mxu1 %v24955_v16  ;;  %v23116_v16 = vld [vmem:[#allocation4 + $0x148] sm:$0xff] }
 0xa4f   :  { %19535 = vmatprep.subr.bf16.mxu0 %v22676_v43  ;;  %19610 = vmatprep.subr.bf16.mxu1 %v24922_v34  ;;  %v19631_v43 = vpack.c.bf16 %v9455_v54, %v9452_v37  ;;  %v24800_v58 = vand.u32 4294901760, %v23116_v16 }
 0xa51   :  { %8807 = vmatmul.mubr.f32.vlgmr.msra.gmra.mrb[20].mxu0 %v22957_v41  ;;  %18021 = vmatmul.mubr.f32.vlgmr.msra.gmra.mrb[86].mxu1 %v22957_v41  ;;  %v23143_v6 = vpack.c.bf16 %v24800_v58, %v24801_v59 }
 0xa52   :  { %19537 = vmatpush1.bf16.msra.mxu0 %v22682_v11  ;;  %19612 = vmatpush3.bf16.msra.mxu1 %v22396_v17  ;;  %v9450_v17 = vld [vmem:[#allocation4 + $0xc0] sm:$0xff]  ;;  %v9456_v11 = vld [vmem:[#allocation4 + $0xf0] sm:$0xff] }
 0xa53   :  { %19539 = vmatprep.subr.bf16.mxu0 %v22688_v33  ;;  %19613 = vmatprep.subr.bf16.mxu1 %v24922_v34  ;;  %v19624_v46 = vpack.c.bf16 %v9453_v14, %v9450_v17 }
 0xa54   :  { %8893 = vmatprep.mubr.f32.mxu0 %v24921_v39  ;;  %18039 = vmatprep.mubr.msk.f32.mxu1 %vm21143_vm1, %v24921_v39 }
 0xa56   :  { %19541 = vmatpush1.bf16.msra.mxu0 %v22699_v8  ;;  %19615 = vmatpush3.bf16.msra.mxu1 %v22409_v47  ;;  %v9457_v47 = vld [vmem:[#allocation4 + $0xf8] sm:$0xff]  ;;  %v9459_v8 = vld [vmem:[#allocation4 + $0x108] sm:$0xff] }
 0xa57   :  { %19543 = vmatprep.subr.bf16.mxu0 %v22702_v49  ;;  %19616 = vmatprep.subr.bf16.mxu1 %v24922_v34  ;;  %v19626_v33 = vpack.c.bf16 %v9460_v29, %v9457_v47  ;;  %v9458_v49 = vld [vmem:[#allocation4 + $0x100] sm:$0xff]  ;;  %v19628_v0 = vpack.c.bf16 %v9459_v8, %v9456_v11 }
 0xa58   :  { %v19634_v24 = vpack.c.bf16 %v9461_v12, %v9458_v49 }
 0xa5a   :  { %19545 = vmatpush1.bf16.msra.mxu0 %v24947_v42  ;;  %19618 = vmatpush3.bf16.msra.mxu1 %v24948_v38 }
 0xa5b   :  { %19547 = vmatprep.subr.bf16.mxu0 %v24949_v25  ;;  %19619 = vmatprep.subr.bf16.mxu1 %v24922_v34  ;;  %v23103_v25 = vld [vmem:[#allocation4 + $0x128] sm:$0xff] }
 0xa5c   :  { %v9675_v63 = vand.u32 4294901760, %v23103_v25 }
 0xa5e   :  { %19549 = vmatpush1.bf16.msra.mxu0 %v24950_v19  ;;  %19621 = vmatpush3.bf16.msra.mxu1 %v24951_v21  ;;  %v23105_v19 = vld [vmem:[#allocation4 + $0x140] sm:$0xff] }
 0xa5f   :  { %19623 = vmatprep.subr.bf16.mxu0 %v19622_v1  ;;  %19630 = vmatprep.subr.bf16.mxu1 %v24922_v34  ;;  %v23107_v21 = vld [vmem:[#allocation4 + $0x120] sm:$0xff]  ;;  %v9679_v36 = vand.u32 4294901760, %v23105_v19 }
 0xa60   :  { %v24803_v55 = vand.u32 4294901760, %v23107_v21 }
 0xa61   :  { %8895 = vmatmul.mubr.f32.vlgmr.msra.gmra.mrb[20].mxu0 %v22957_v41  ;;  %18040 = vmatmul.mubr.f32.vlgmr.msra.gmra.mrb[88].mxu1 %v22957_v41  ;;  %v23121_v41 = vld [vmem:[#allocation4 + $0x158] sm:$0xff]  ;;  %v23129_v23 = vpack.c.bf16 %v9679_v36, %v9675_v63 }
 0xa62   :  { %19625 = vmatpush1.bf16.msra.mxu0 %v19624_v46  ;;  %19632 = vmatpush3.bf16.msra.mxu1 %v19631_v43  ;;  %v24799_v4 = vand.u32 4294901760, %v23121_v41  ;;  %v23137_v50 = vpack.c.bf16 %v24802_v44, %v24803_v55 }
 0xa63   :  { %19627 = vmatprep.subr.bf16.mxu0 %v19626_v33  ;;  %19633 = vmatprep.subr.bf16.mxu1 %v24922_v34 }
 0xa64   :  { %9528 = vmatprep.mubr.f32.mxu0 %v24921_v39  ;;  %18050 = vmatprep.mubr.msk.f32.mxu1 %vm21143_vm1, %v24921_v39  ;;  %v23150_v17 = vpack.c.bf16 %v24798_v9, %v24799_v4  ;;  %v23254_v4 = vld [vmem:[#allocation4 + $0x1d8] sm:$0xff] }
 0xa65   :  { %v24819_v55 = vand.u32 4294901760, %v23254_v4 }
 0xa66   :  { %19629 = vmatpush1.bf16.msra.mxu0 %v19628_v0  ;;  %19635 = vmatpush3.bf16.msra.mxu1 %v19634_v24 }
 0xa67   :  { %19732 = vmatprep.subr.bf16.mxu1 %v24922_v34  ;;  %19637 = vmatprep.subr.bf16.mxu0 %v23129_v23 }
 0xa69   :  { %16556 = vmatmul.mubr.msk.f32.vlgmr.msra.gmra.mrb[12].mxu0 %vm78_vm0, %v24956_v52  ;;  %18051 = vmatmul.mubr.msk.f32.vlgmr.msra.gmra.mrb[90].mxu1 %vm78_vm0, %v24956_v52 }
 0xa6a   :  { %9755 = vmatprep.mubr.f32.mxu0 %v24921_v39  ;;  %18069 = vmatprep.mubr.msk.f32.mxu1 %vm21143_vm1, %v24921_v39 }
 0xa6b   :  { %19639 = vmatpush1.bf16.msra.mxu0 %v23137_v50  ;;  %19734 = vmatpush3.bf16.msra.mxu1 %v23143_v6 }
 0xa6c   :  { %19641 = vmatprep.subr.bf16.mxu0 %v23150_v17  ;;  %19735 = vmatprep.subr.bf16.mxu1 %v24922_v34 }
 0xa84   :  { %v7786_v27 = vpop.f32.mrb[66].mxu1 }
 0xa85   :  { %v17832_v18 = vpop.f32.mrb[67].mxu1  ;;  %v7787_v57 = vadd.f32 %v7786_v27, %v7053_v20  ;;  %v24961_v27 = vld [vmem:[#allocation19_spill] sm:$0xff] }
 0xa86   :  { %v24962_v18 = vld [vmem:[#allocation11_spill] sm:$0xff] }
 0xa87   :  { %v249_v7 = vadd.f32 %v24962_v18, %v24961_v27 }
 0xa94   :  { %v7897_v5 = vpop.f32.mrb[68].mxu1 }
 0xa95   :  { %v7898_v35 = vadd.f32 %v7897_v5, %v7787_v57  ;;  %v17851_v40 = vpop.f32.mrb[69].mxu1  ;;  %v24964_v57 = vld [vmem:[#allocation12_spill] sm:$0xff] }
 0xaa4   :  { %v7985_v26 = vpop.f32.mrb[70].mxu1 }
 0xaa5   :  { %v7986_v53 = vadd.f32 %v7985_v26, %v7898_v35  ;;  %v17870_v31 = vpop.f32.mrb[71].mxu1  ;;  %v24965_v35 = vld [vmem:[#allocation20_spill] sm:$0xff] }
 0xaa6   :  { %v20507_v40 = vadd.f32 %v24965_v35, %v249_v7  ;;  %v24966_v31 = vld [vmem:[#allocation23_spill] sm:$0xff] }
 0xaa7   :  { %v23184_v7 = vld [vmem:[#allocation4 + $0x188] sm:$0xff] }
 0xab4   :  { %v8066_v56 = vpop.f32.mrb[72].mxu1 }
 0xab5   :  { %v8067_v62 = vadd.f32 %v8066_v56, %v7986_v53  ;;  %v17889_v15 = vpop.f32.mrb[73].mxu1 }
 0xac4   :  { %v8161_v13 = vpop.f32.mrb[74].mxu1 }
 0xac5   :  { %v8162_v45 = vadd.f32 %v8161_v13, %v8067_v62  ;;  %v17908_v22 = vpop.f32.mrb[75].mxu1 }
 0xad4   :  { %v8240_v48 = vpop.f32.mrb[76].mxu1 }
 0xad5   :  { %v23101_v3 = vadd.f32 %v8240_v48, %v8162_v45  ;;  %v17927_v30 = vpop.f32.mrb[77].mxu1 }
 0xad7   :  { %24959 = vst [vmem:[#allocation26_spill] sm:$0xff] %v23101_v3 }
 0xae4   :  { %v8980_v42 = vpop.f32.mrb[78].mxu1 }
 0xae5   :  { %v17946_v38 = vpop.f32.mrb[79].mxu1  ;;  %v8981_v2 = vadd.f32 %v8980_v42, %v7053_v20  ;;  %v24963_v20 = vld [vmem:[#allocation22_spill] sm:$0xff] }
 0xae6   :  { %v251_v5 = vadd.f32 %v24964_v57, %v24963_v20  ;;  %v23186_v57 = vld [vmem:[#allocation4 + $0x1a0] sm:$0xff] }
 0xae8   :  { %v20510_v56 = vadd.f32 %v24966_v31, %v251_v5 }
 0xaf4   :  { %v9091_v1 = vpop.f32.mrb[80].mxu1 }
 0xaf5   :  { %v9092_v14 = vadd.f32 %v9091_v1, %v8981_v2  ;;  %v17965_v37 = vpop.f32.mrb[81].mxu1  ;;  %v24967_v2 = vld [vmem:[#allocation35_spill] sm:$0xff] }
 0xb04   :  { %v9179_v54 = vpop.f32.mrb[82].mxu1 }
 0xb05   :  { %v9180_v47 = vadd.f32 %v9179_v54, %v9092_v14  ;;  %v17984_v29 = vpop.f32.mrb[83].mxu1  ;;  %v24968_v54 = vld [vmem:[#allocation15_spill] sm:$0xff] }
 0xb14   :  { %v9260_v46 = vpop.f32.mrb[84].mxu1 }
 0xb15   :  { %v9261_v43 = vadd.f32 %v9260_v46, %v9180_v47  ;;  %v18003_v11 = vpop.f32.mrb[85].mxu1  ;;  %v23166_v46 = vld [vmem:[#allocation4 + $0x150] sm:$0xff] }
 0xb16   :  { %v23170_v11 = vld [vmem:[#allocation4 + $0x160] sm:$0xff] }
 0xb24   :  { %v9355_v33 = vpop.f32.mrb[86].mxu1 }
 0xb25   :  { %v9356_v8 = vadd.f32 %v9355_v33, %v9261_v43  ;;  %v18022_v49 = vpop.f32.mrb[87].mxu1  ;;  %v23168_v43 = vld [vmem:[#allocation4 + $0x168] sm:$0xff]  ;;  %v9685_v33 = vand.u32 4294901760, %v23166_v46 }
 0xb26   :  { %v23174_v49 = vld [vmem:[#allocation4 + $0x178] sm:$0xff] }
 0xb34   :  { %v9434_v12 = vpop.f32.mrb[88].mxu1 }
 0xb35   :  { %v23156_v0 = vadd.f32 %v9434_v12, %v9356_v8  ;;  %v18041_v24 = vpop.f32.mrb[89].mxu1  ;;  %v9689_v8 = vand.u32 4294901760, %v23168_v43  ;;  %v10329_v12 = vand.u32 4294901760, %v23170_v11 }
 0xb36   :  { %v24814_v24 = vand.u32 4294901760, %v23174_v49 }
 0xb37   :  { %24960 = vst [vmem:[#allocation25_spill] sm:$0xff] %v23156_v0  ;;  %v23182_v18 = vpack.c.bf16 %v9689_v8, %v9685_v33 }
 0xb38   :  { %v23192_v5 = vpack.c.bf16 %v24814_v24, %v10329_v12 }
 0xb39   :  { %19643 = vmatpush1.bf16.msra.mxu0 %v23182_v18 }
 0xb3a   :  { %24969 = vst [vmem:[#allocation17_spill] sm:$0xff] %v23192_v5  ;;  %19737 = vmatpush3.bf16.msra.mxu1 %v23192_v5 }
 0xb3b   :  { %19738 = vmatprep.subr.bf16.mxu1 %v24922_v34 }
 0xb3c   :  { %v9530_v26 = vpop.f32.mrb[12].mxu0  ;;  %v9601_v53 = vpop.f32.mrb[90].mxu1 }
 0xb3d   :  { %v20508_v62 = vadd.f32 %v20507_v40, %v9530_v26  ;;  %v9532_v15 = vpop.f32.mrb[13].mxu0  ;;  %v18052_v13 = vpop.f32.mrb[91].mxu1  ;;  %v9619_v1 = vadd.f32 %v24967_v2, %v9601_v53  ;;  %v9691_v40 = vand.u32 4294901760, %v23184_v7  ;;  %v24811_v26 = vand.u32 4294901760, %v23186_v57  ;;  %v23196_v53 = vld [vmem:[#allocation4 + $0x180] sm:$0xff] }
 0xb3e   :  { %v20511_v45 = vadd.f32 %v20510_v56, %v9532_v15  ;;  %v23198_v56 = vld [vmem:[#allocation4 + $0x198] sm:$0xff]  ;;  %v24810_v15 = vand.u32 4294901760, %v23196_v53 }
 0xb3f   :  { %v16558_v22 = vmul.f32 -1.442695, %v20508_v62  ;;  %v23200_v62 = vld [vmem:[#allocation4 + $0x190] sm:$0xff]  ;;  %v24806_v13 = vand.u32 4294901760, %v23198_v56 }
 0xb40   :  { %v16559_v48 = vmul.f32 -1.442695, %v20511_v45  ;;  %v23205_v45 = vld [vmem:[#allocation4 + $0x1a8] sm:$0xff] }
 0xb41   :  { %20985 = vpow2.f32 %v16558_v22  ;;  %v24805_v22 = vand.u32 4294901760, %v23200_v62  ;;  %v23229_v2 = vpack.c.bf16 %v24806_v13, %v24810_v15 }
 0xb42   :  { %20987 = vpow2.f32 %v16559_v48  ;;  %v23211_v48 = vpack.c.bf16 %v24811_v26, %v9691_v40 }
 0xb43   :  { %24971 = vst [vmem:[#allocation36_spill] sm:$0xff] %v23229_v2 }
 0xb44   :  { %24970 = vst [vmem:[#allocation27_spill] sm:$0xff] %v23211_v48  ;;  %19645 = vmatprep.subr.bf16.mxu0 %v23211_v48 }
 0xb45   :  { %19647 = vmatpush1.bf16.msra.mxu0 %v23229_v2 }
 0xb4b   :  { %v20986_v30 = vpop.eup %20985 }
 0xb4c   :  { %v9613_v42 = vadd.f32 1.0, %v20986_v30  ;;  %v20988_v38 = vpop.eup %20987  ;;  %v24804_v30 = vand.u32 4294901760, %v23205_v45 }
 0xb4d   :  { %v9614_v29 = vadd.f32 1.0, %v20988_v38  ;;  %v23222_v38 = vsub.f32 %v23105_v19, %v9679_v36  ;;  %v23244_v36 = vld [vmem:[#allocation4 + $0x1b0] sm:$0xff] }
 0xb4e   :  { %20989 = vrcp.f32 %v9613_v42  ;;  %v23217_v42 = vsub.f32 %v23103_v25, %v9675_v63  ;;  %v23240_v25 = vpack.c.bf16 %v24804_v30, %v24805_v22 }
 0xb4f   :  { %v24815_v59 = vand.u32 4294901760, %v23222_v38 }
 0xb50   :  { %24972 = vst [vmem:[#allocation37_spill] sm:$0xff] %v23240_v25  ;;  %19740 = vmatpush3.bf16.msra.mxu1 %v23240_v25 }
 0xb51   :  { %19741 = vmatprep.subr.bf16.mxu1 %v24922_v34 }
 0xb58   :  { %v20990_v14 = vpop.eup %20989 }
 0xb59   :  { %v9620_v37 = vmul.f32 %v20990_v14, %v9619_v1  ;;  %v23231_v1 = vld [vmem:[#allocation4 + $0x1b8] sm:$0xff]  ;;  %v23233_v14 = vld [vmem:[#allocation4 + $0x1d0] sm:$0xff] }
 0xb5a   :  { %v24808_v19 = vand.u32 4294901760, %v23231_v1  ;;  %v24807_v63 = vand.u32 4294901760, %v23233_v14 }
 0xb5b   :  { %v9621_v47 = vadd.f32 %v9620_v37, %v24968_v54  ;;  %v23246_v37 = vld [vmem:[#allocation4 + $0x1c8] sm:$0xff]  ;;  %v23248_v54 = vld [vmem:[#allocation4 + $0x1c0] sm:$0xff] }
 0xb5c   :  { %v24812_v9 = vand.u32 4294901760, %v23246_v37  ;;  %v24821_v58 = vand.u32 4294901760, %v23248_v54  ;;  %v23263_v44 = vpack.c.bf16 %v24807_v63, %v24808_v19  ;;  %v9782_v63 = vsub.f32 %v23222_v38, %v24815_v59 }
 0xb5d   :  { %20991 = vtanh.f32 %v9621_v47  ;;  %v24809_v47 = vand.u32 4294901760, %v23217_v42  ;;  %v23297_v59 = vsub.f32 %v23166_v46, %v9685_v33  ;;  %v24978_v33 = vand.u32 4294901760, %v23174_v49 }
 0xb5e   :  { %20993 = vrcp.f32 %v9614_v29  ;;  %v24813_v29 = vand.u32 4294901760, %v23244_v36  ;;  %24973 = vst [vmem:[#allocation28_spill] sm:$0xff] %v23263_v44  ;;  %19649 = vmatprep.subr.bf16.mxu0 %v23263_v44 }
 0xb5f   :  { %v9770_v30 = vsub.f32 %v23217_v42, %v24809_v47  ;;  %v23285_v47 = vpack.c.bf16 %v24819_v55, %v24821_v58 }
 0xb60   :  { %v23274_v13 = vpack.c.bf16 %v24812_v9, %v24813_v29  ;;  %v9783_v9 = vand.u32 4294901760, %v9782_v63 }
 0xb61   :  { %24975 = vst [vmem:[#allocation30_spill] sm:$0xff] %v23285_v47  ;;  %v9771_v15 = vand.u32 4294901760, %v9770_v30  ;;  %19743 = vmatpush3.bf16.msra.mxu1 %v23285_v47  ;;  %v23303_v30 = vsub.f32 %v23168_v43, %v9689_v8  ;;  %v23320_v43 = vsub.f32 %v23184_v7, %v9691_v40  ;;  %v24979_v7 = vand.u32 4294901760, %v23186_v57 }
 0xb62   :  { %24974 = vst [vmem:[#allocation29_spill] sm:$0xff] %v23274_v13  ;;  %19651 = vmatpush1.bf16.msra.mxu0 %v23274_v13  ;;  %19744 = vmatprep.subr.bf16.mxu1 %v24922_v34  ;;  %v24988_v13 = vand.u32 4294901760, %v23248_v54 }
 0xb63   :  { %v23289_v24 = vpack.c.bf16 %v9783_v9, %v9771_v15  ;;  %v24817_v9 = vand.u32 4294901760, %v23297_v59  ;;  %v24816_v46 = vand.u32 4294901760, %v23303_v30  ;;  %v23317_v15 = vsub.f32 %v23174_v49, %v24978_v33 }
 0xb64   :  { %v23337_v40 = vsub.f32 %v23186_v57, %v24979_v7  ;;  %v24981_v57 = vand.u32 4294901760, %v23198_v56  ;;  %v24982_v7 = vand.u32 4294901760, %v23200_v62  ;;  %v10449_v44 = vsub.f32 %v23248_v54, %v24988_v13 }
 0xb65   :  { %24976 = vst [vmem:[#allocation31_spill] sm:$0xff] %v23289_v24  ;;  %19653 = vmatprep.subr.bf16.mxu0 %v23289_v24  ;;  %v9800_v8 = vsub.f32 %v23297_v59, %v24817_v9 }
 0xb66   :  { %v24823_v55 = vand.u32 4294901760, %v23337_v40  ;;  %v10450_v2 = vand.u32 4294901760, %v10449_v44 }
 0xb67   :  { %v20992_v22 = vpop.eup %20991  ;;  %v9801_v63 = vand.u32 4294901760, %v9800_v8  ;;  %v24980_v8 = vand.u32 4294901760, %v23196_v53 }
 0xb68   :  { %v9623_v19 = vsub.f32 %v24956_v52, %v20992_v22  ;;  %v20994_v26 = vpop.eup %20993  ;;  %v10451_v54 = vsub.f32 %v10449_v44, %v10450_v2 }
 0xb69   :  { %v23348_v9 = vsub.f32 %v23196_v53, %v24980_v8 }
 0xb6a   :  { %v9624_v29 = vmul.f32 %v20994_v26, %v9623_v19  ;;  %v23311_v26 = vsub.f32 %v23170_v11, %v10329_v12  ;;  %v9812_v11 = vsub.f32 %v23303_v30, %v24816_v46  ;;  %v24820_v12 = vand.u32 4294901760, %v23317_v15 }
 0xb6b   :  { %v24822_v19 = vand.u32 4294901760, %v23320_v43  ;;  %v9823_v53 = vand.u32 4294901760, %v23348_v9 }
 0xb6c   :  { %v23292_v52 = vadd.f32 %v20992_v22, %v9624_v29  ;;  %v24818_v22 = vand.u32 4294901760, %v23311_v26  ;;  %v9813_v29 = vand.u32 4294901760, %v9812_v11  ;;  %v10430_v33 = vsub.f32 %v23317_v15, %v24820_v12 }
 0xb6d   :  { %v9818_v46 = vsub.f32 %v23320_v43, %v24822_v19  ;;  %v23354_v11 = vsub.f32 %v23198_v56, %v24981_v57  ;;  %v23359_v12 = vsub.f32 %v23200_v62, %v24982_v7  ;;  %v24983_v57 = vand.u32 4294901760, %v23205_v45 }
 0xb6e   :  { %24977 = vst [vmem:[#allocation32_spill] sm:$0xff] %v23292_v52  ;;  %9652 = vrot.lane.b32.xlu0 %v23292_v52, %s21144_s0  ;;  %v10423_v49 = vsub.f32 %v23311_v26, %v24818_v22  ;;  %v23361_v58 = vpack.c.bf16 %v9813_v29, %v9801_v63  ;;  %v10431_v19 = vand.u32 4294901760, %v10430_v33  ;;  %v9824_v63 = vsub.f32 %v23348_v9, %v9823_v53 }
 0xb6f   :  { %v9819_v0 = vand.u32 4294901760, %v9818_v46  ;;  %v9835_v8 = vand.u32 4294901760, %v23354_v11  ;;  %v10436_v56 = vand.u32 4294901760, %v23359_v12  ;;  %v10442_v3 = vsub.f32 %v23205_v45, %v24983_v57 }
 0xb70   :  { %v10424_v22 = vand.u32 4294901760, %v10423_v49  ;;  %v9830_v49 = vsub.f32 %v23337_v40, %v24823_v55  ;;  %v24984_v46 = vand.u32 4294901760, %v23231_v1  ;;  %v24985_v33 = vand.u32 4294901760, %v23233_v14 }
 0xb71   :  { %v9836_v28 = vsub.f32 %v23354_v11, %v9835_v8  ;;  %v10437_v31 = vsub.f32 %v23359_v12, %v10436_v56  ;;  %v10443_v35 = vand.u32 4294901760, %v10442_v3  ;;  %v9825_v20 = vand.u32 4294901760, %v9824_v63 }
 0xb72   :  { %v23372_v62 = vpack.c.bf16 %v10431_v19, %v10424_v22  ;;  %v9840_v29 = vsub.f32 %v23231_v1, %v24984_v46  ;;  %v9852_v7 = vsub.f32 %v23233_v14, %v24985_v33  ;;  %v9831_v55 = vand.u32 4294901760, %v9830_v49 }
 0xb73   :  { %v24986_v19 = vand.u32 4294901760, %v23244_v36  ;;  %v9837_v1 = vand.u32 4294901760, %v9836_v28  ;;  %v10438_v46 = vand.u32 4294901760, %v10437_v31  ;;  %v10444_v51 = vsub.f32 %v10442_v3, %v10443_v35 }
 0xb74   :  { %v9841_v45 = vand.u32 4294901760, %v9840_v29  ;;  %v9853_v22 = vand.u32 4294901760, %v9852_v7  ;;  %v23386_v27 = vpack.c.bf16 %v9831_v55, %v9819_v0  ;;  %v24987_v33 = vand.u32 4294901760, %v23246_v37 }
 0xb75   :  { %v9846_v57 = vsub.f32 %v23244_v36, %v24986_v19  ;;  %v23391_v47 = vpack.c.bf16 %v9837_v1, %v9825_v20  ;;  %v10445_v63 = vand.u32 4294901760, %v10444_v51  ;;  %v24989_v55 = vand.u32 4294901760, %v23254_v4 }
 0xb76   :  { %v9842_v24 = vsub.f32 %v9840_v29, %v9841_v45  ;;  %v9854_v14 = vsub.f32 %v9852_v7, %v9853_v22  ;;  %v9858_v52 = vsub.f32 %v23246_v37, %v24987_v33  ;;  %v23403_v20 = vpack.c.bf16 %v23222_v38, %v23217_v42 }
 0xb77   :  { %v9847_v49 = vand.u32 4294901760, %v9846_v57  ;;  %v10456_v28 = vsub.f32 %v23254_v4, %v24989_v55  ;;  %v23399_v25 = vpack.c.bf16 %v10445_v63, %v10438_v46  ;;  %v23409_v4 = vpack.c.bf16 %v23303_v30, %v23297_v59 }
 0xb78   :  { %v9843_v0 = vand.u32 4294901760, %v9842_v24  ;;  %v9855_v31 = vand.u32 4294901760, %v9854_v14  ;;  %v9859_v19 = vand.u32 4294901760, %v9858_v52  ;;  %v23413_v24 = vpack.c.bf16 %v23317_v15, %v23311_v26 }
 0xb79   :  { %v9848_v36 = vsub.f32 %v9846_v57, %v9847_v49  ;;  %v10457_v48 = vand.u32 4294901760, %v10456_v28  ;;  %v10452_v46 = vand.u32 4294901760, %v10451_v54  ;;  %v23417_v63 = vpack.c.bf16 %v23337_v40, %v23320_v43 }
 0xb7a   :  { %v23405_v51 = vpack.c.bf16 %v9855_v31, %v9843_v0  ;;  %v9860_v13 = vsub.f32 %v9858_v52, %v9859_v19  ;;  %v23423_v0 = vpack.c.bf16 %v23354_v11, %v23348_v9  ;;  %v23432_v5 = vpack.c.bf16 %v9858_v52, %v9846_v57 }
 0xb7b   :  { %v9849_v37 = vand.u32 4294901760, %v9848_v36  ;;  %v10458_v1 = vsub.f32 %v10456_v28, %v10457_v48  ;;  %v23428_v36 = vpack.c.bf16 %v10442_v3, %v23359_v12  ;;  %v23434_v54 = vpack.c.bf16 %v10456_v28, %v10449_v44 }
 0xb7c   :  { %v9861_v33 = vand.u32 4294901760, %v9860_v13  ;;  %v23430_v13 = vpack.c.bf16 %v9852_v7, %v9840_v29  ;;  %v24992_v9 = vand.u32 4294901760, %v23297_v59  ;;  %v24993_v11 = vand.u32 4294901760, %v23303_v30 }
 0xb7d   :  { %v10459_v14 = vand.u32 4294901760, %v10458_v1  ;;  %v24990_v1 = vand.u32 4294901760, %v23217_v42  ;;  %v24994_v3 = vand.u32 4294901760, %v23311_v26  ;;  %v24995_v12 = vand.u32 4294901760, %v23317_v15 }
 0xb7e   :  { %v23419_v55 = vpack.c.bf16 %v9861_v33, %v9849_v37  ;;  %v24991_v37 = vand.u32 4294901760, %v23222_v38  ;;  %v24996_v44 = vand.u32 4294901760, %v23320_v43  ;;  %v24997_v42 = vand.u32 4294901760, %v23337_v40 }
 0xb7f   :  { %v23425_v31 = vpack.c.bf16 %v10459_v14, %v10452_v46  ;;  %v23446_v46 = vpack.c.bf16 %v24993_v11, %v24992_v9  ;;  %v23452_v52 = vpack.c.bf16 %v24995_v12, %v24994_v3  ;;  %v23460_v38 = vpack.c.bf16 %v9835_v8, %v9823_v53 }
 0xb80   :  { %v23440_v33 = vpack.c.bf16 %v24991_v37, %v24990_v1  ;;  %v23458_v29 = vpack.c.bf16 %v24997_v42, %v24996_v44  ;;  %v23462_v7 = vpack.c.bf16 %v10443_v35, %v10436_v56  ;;  %v23464_v59 = vpack.c.bf16 %v9853_v22, %v9841_v45 }
 0xb81   :  { %v23466_v30 = vpack.c.bf16 %v9859_v19, %v9847_v49  ;;  %v23468_v57 = vpack.c.bf16 %v10457_v48, %v10450_v2  ;;  %v24998_v26 = vand.u32 4294901760, %v23107_v21  ;;  %v24999_v43 = vand.u32 4294901760, %v23111_v61 }
 0xb82   :  { %v25000_v53 = vand.u32 4294901760, %v23114_v32  ;;  %v25001_v8 = vand.u32 4294901760, %v23116_v16  ;;  %v25002_v2 = vand.u32 4294901760, %v23121_v41  ;;  %v25003_v56 = vand.u32 4294901760, %v23123_v60 }
 0xb83   :  { %v23473_v15 = vsub.f32 %v23107_v21, %v24998_v26  ;;  %v23478_v40 = vsub.f32 %v23111_v61, %v24999_v43 }
 0xb84   :  { %v23483_v35 = vsub.f32 %v23114_v32, %v25000_v53  ;;  %v23488_v48 = vsub.f32 %v23116_v16, %v25001_v8  ;;  %v23493_v21 = vsub.f32 %v23121_v41, %v25002_v2  ;;  %v23498_v61 = vsub.f32 %v23123_v60, %v25003_v56 }
 0xb85   :  { %v9775_v45 = vand.u32 4294901760, %v23473_v15  ;;  %v9787_v32 = vand.u32 4294901760, %v23478_v40 }
 0xb86   :  { %v10408_v22 = vand.u32 4294901760, %v23483_v35  ;;  %v24842_v49 = vand.u32 4294901760, %v23488_v48  ;;  %v24841_v16 = vand.u32 4294901760, %v23493_v21  ;;  %v9805_v28 = vand.u32 4294901760, %v23498_v61 }
 0xb87   :  { %v9776_v60 = vsub.f32 %v23473_v15, %v9775_v45  ;;  %v9788_v1 = vsub.f32 %v23478_v40, %v9787_v32 }
 0xb88   :  { %v10409_v37 = vsub.f32 %v23483_v35, %v10408_v22  ;;  %v10416_v9 = vsub.f32 %v23488_v48, %v24842_v49  ;;  %v9806_v3 = vsub.f32 %v23498_v61, %v9805_v28 }
 0xb89   :  { %v9777_v44 = vand.u32 4294901760, %v9776_v60  ;;  %v9789_v42 = vand.u32 4294901760, %v9788_v1  ;;  %v23562_v60 = vpack.c.bf16 %v23488_v48, %v23483_v35  ;;  %v25004_v1 = vld [vmem:[#allocation17_spill] sm:$0xff] }
 0xb8a   :  { %v10410_v26 = vand.u32 4294901760, %v10409_v37  ;;  %v10417_v43 = vand.u32 4294901760, %v10416_v9  ;;  %v9807_v2 = vand.u32 4294901760, %v9806_v3  ;;  %v25005_v37 = vld [vmem:[#allocation27_spill] sm:$0xff]  ;;  %v25006_v9 = vld [vmem:[#allocation36_spill] sm:$0xff] }
 0xb8b   :  { %v25008_v3 = vld [vmem:[#allocation28_spill] sm:$0xff] }
 0xbe0   :  { %v9653_v19 = vpop.permute.xlu0 %9652 }
 0xbe1   :  { %v9655_v41 = vsel %vm78_vm0, %v24939_v10, %v9653_v19  ;;  %v9794_v10 = vsub.f32 %v23493_v21, %v24841_v16  ;;  %v23533_v19 = vpack.c.bf16 %v9789_v42, %v9777_v44  ;;  %v25010_v44 = vld [vmem:[#allocation30_spill] sm:$0xff]  ;;  %v23612_v42 = vpack.c.bf16 %v9787_v32, %v9775_v45 }
 0xbe2   :  { %v9673_v14 = vsel %vm4441_vm2, %v9655_v41, 0  ;;  %v23535_v41 = vpack.c.bf16 %v10417_v43, %v10410_v26  ;;  %v25011_v26 = vand.u32 4294901760, %v23488_v48 }
 0xbe3   :  { %v23521_v11 = vand.u32 4294901760, %v9673_v14  ;;  %v9795_v8 = vand.u32 4294901760, %v9794_v10  ;;  %v25007_v10 = vld [vmem:[#allocation37_spill] sm:$0xff] }
 0xbe4   :  { %v23618_v43 = vpack.c.bf16 %v25011_v26, %v10408_v22 }
 0xbe5   :  { %v9757_v12 = vsub.f32 %v9673_v14, %v23521_v11  ;;  %v23537_v49 = vpack.c.bf16 %v9807_v2, %v9795_v8  ;;  %v23568_v14 = vpack.c.bf16 %v23498_v61, %v23493_v21  ;;  %v25012_v8 = vand.u32 4294901760, %v23493_v21 }
 0xbe7   :  { %v23530_v53 = vand.u32 4294901760, %v9757_v12  ;;  %v23626_v2 = vpack.c.bf16 %v9805_v28, %v25012_v8  ;;  %v25014_v28 = vld [vmem:[#allocation31_spill] sm:$0xff] }
 0xbe8   :  { %v23830_v8 = vld [vmem:[#allocation4 + $0x148] sm:$0xff] }
 0xbe9   :  { %v9759_v56 = vsub.f32 %v9757_v12, %v23530_v53 }
 0xbeb   :  { %v9760_v16 = vand.u32 4294901760, %v9759_v56 }
 0xbed   :  { %9761 = vmatmul.mubr.f32.vlgmr.msra.gmra.mrb[22].mxu0 %v9760_v16  ;;  %18070 = vmatmul.mubr.f32.vlgmr.msra.gmra.mrb[92].mxu1 %v9760_v16  ;;  %v23558_v16 = vpack.c.bf16 %v23478_v40, %v23473_v15  ;;  %v10863_v15 = vpop.permute.xlu1 %10862  ;;  %v25013_v40 = vld [vmem:[#allocation32_spill] sm:$0xff] }
 0xbee   :  { %19655 = vmatpush1.bf16.msra.mxu0 %v23533_v19  ;;  %19746 = vmatpush3.bf16.msra.mxu1 %v23535_v41  ;;  %v10865_v35 = vsel %vm78_vm0, %v25013_v40, %v10863_v15 }
 0xbef   :  { %19657 = vmatprep.subr.bf16.mxu0 %v23537_v49  ;;  %19747 = vmatprep.subr.bf16.mxu1 %v24922_v34  ;;  %v10867_v48 = vsel %vm4441_vm2, %v10865_v35, 0 }
 0xbf0   :  { %9911 = vmatprep.mubr.f32.mxu0 %v24921_v39  ;;  %18088 = vmatprep.mubr.msk.f32.mxu1 %vm21143_vm1, %v24921_v39  ;;  %v23673_v21 = vand.u32 4294901760, %v10867_v48 }
 0xbf2   :  { %19659 = vmatpush1.bf16.msra.mxu0 %v23361_v58  ;;  %19749 = vmatpush3.bf16.msra.mxu1 %v23372_v62  ;;  %v10951_v61 = vsub.f32 %v10867_v48, %v23673_v21  ;;  %v24845_v48 = vand.u32 4294901760, %v23830_v8 }
 0xbf3   :  { %19661 = vmatprep.subr.bf16.mxu0 %v23386_v27  ;;  %19750 = vmatprep.subr.bf16.mxu1 %v24922_v34 }
 0xbf4   :  { %v23689_v45 = vand.u32 4294901760, %v10951_v61 }
 0xbf6   :  { %19663 = vmatpush1.bf16.msra.mxu0 %v23391_v47  ;;  %19752 = vmatpush3.bf16.msra.mxu1 %v23399_v25  ;;  %v10953_v32 = vsub.f32 %v10951_v61, %v23689_v45 }
 0xbf7   :  { %19665 = vmatprep.subr.bf16.mxu0 %v23405_v51  ;;  %19753 = vmatprep.subr.bf16.mxu1 %v24922_v34 }
 0xbf8   :  { %v10954_v22 = vand.u32 4294901760, %v10953_v32 }
 0xbfa   :  { %19667 = vmatpush1.bf16.msra.mxu0 %v23419_v55  ;;  %19755 = vmatpush3.bf16.msra.mxu1 %v23425_v31 }
 0xbfb   :  { %19669 = vmatprep.subr.bf16.mxu0 %v23403_v20  ;;  %19756 = vmatprep.subr.bf16.mxu1 %v24922_v34 }
 0xbfd   :  { %9913 = vmatmul.mubr.f32.vlgmr.msra.gmra.mrb[22].mxu0 %v23521_v11  ;;  %18089 = vmatmul.mubr.f32.vlgmr.msra.gmra.mrb[94].mxu1 %v23521_v11 }
 0xbfe   :  { %19671 = vmatpush1.bf16.msra.mxu0 %v23558_v16  ;;  %19758 = vmatpush3.bf16.msra.mxu1 %v23562_v60 }
 0xbff   :  { %19673 = vmatprep.subr.bf16.mxu0 %v23568_v14  ;;  %19759 = vmatprep.subr.bf16.mxu1 %v24922_v34 }
 0xc00   :  { %10015 = vmatprep.mubr.f32.mxu0 %v24921_v39  ;;  %18107 = vmatprep.mubr.msk.f32.mxu1 %vm21143_vm1, %v24921_v39 }
 0xc02   :  { %19675 = vmatpush1.bf16.msra.mxu0 %v23409_v4  ;;  %19761 = vmatpush3.bf16.msra.mxu1 %v23413_v24 }
 0xc03   :  { %19677 = vmatprep.subr.bf16.mxu0 %v23417_v63  ;;  %19762 = vmatprep.subr.bf16.mxu1 %v24922_v34 }
 0xc06   :  { %19679 = vmatpush1.bf16.msra.mxu0 %v23423_v0  ;;  %19764 = vmatpush3.bf16.msra.mxu1 %v23428_v36 }
 0xc07   :  { %19681 = vmatprep.subr.bf16.mxu0 %v23430_v13  ;;  %19765 = vmatprep.subr.bf16.mxu1 %v24922_v34 }
 0xc0a   :  { %19683 = vmatpush1.bf16.msra.mxu0 %v23432_v5  ;;  %19767 = vmatpush3.bf16.msra.mxu1 %v23434_v54 }
 0xc0b   :  { %19685 = vmatprep.subr.bf16.mxu0 %v23129_v23  ;;  %19768 = vmatprep.subr.bf16.mxu1 %v24922_v34 }
 0xc0d   :  { %10018 = vmatmul.mubr.f32.vlgmr.msra.gmra.mrb[22].mxu0 %v9757_v12  ;;  %18108 = vmatmul.mubr.f32.vlgmr.msra.gmra.mrb[96].mxu1 %v9757_v12  ;;  %v25009_v12 = vld [vmem:[#allocation29_spill] sm:$0xff] }
 0xc0e   :  { %19687 = vmatpush1.bf16.msra.mxu0 %v23137_v50  ;;  %19770 = vmatpush3.bf16.msra.mxu1 %v23143_v6 }
 0xc0f   :  { %19689 = vmatprep.subr.bf16.mxu0 %v23150_v17  ;;  %19771 = vmatprep.subr.bf16.mxu1 %v24922_v34 }
 0xc10   :  { %10104 = vmatprep.mubr.f32.mxu0 %v24921_v39  ;;  %18126 = vmatprep.mubr.msk.f32.mxu1 %vm21143_vm1, %v24921_v39 }
 0xc12   :  { %19691 = vmatpush1.bf16.msra.mxu0 %v23182_v18  ;;  %19773 = vmatpush3.bf16.msra.mxu1 %v25004_v1 }
 0xc13   :  { %19693 = vmatprep.subr.bf16.mxu0 %v25005_v37  ;;  %19774 = vmatprep.subr.bf16.mxu1 %v24922_v34 }
 0xc16   :  { %19695 = vmatpush1.bf16.msra.mxu0 %v25006_v9  ;;  %19776 = vmatpush3.bf16.msra.mxu1 %v25007_v10 }
 0xc17   :  { %19697 = vmatprep.subr.bf16.mxu0 %v25008_v3  ;;  %19777 = vmatprep.subr.bf16.mxu1 %v24922_v34 }
 0xc1a   :  { %19699 = vmatpush1.bf16.msra.mxu0 %v25009_v12  ;;  %19779 = vmatpush3.bf16.msra.mxu1 %v25010_v44 }
 0xc1b   :  { %19701 = vmatprep.subr.bf16.mxu0 %v23440_v33  ;;  %19780 = vmatprep.subr.bf16.mxu1 %v24922_v34 }
 0xc1d   :  { %10108 = vmatmul.mubr.f32.vlgmr.msra.gmra.mrb[22].mxu0 %v23530_v53  ;;  %18127 = vmatmul.mubr.f32.vlgmr.msra.gmra.mrb[98].mxu1 %v23530_v53 }
 0xc1e   :  { %19703 = vmatpush1.bf16.msra.mxu0 %v23612_v42  ;;  %19782 = vmatpush3.bf16.msra.mxu1 %v23618_v43 }
 0xc1f   :  { %19705 = vmatprep.subr.bf16.mxu0 %v23626_v2  ;;  %19783 = vmatprep.subr.bf16.mxu1 %v24922_v34 }
 0xc20   :  { %10226 = vmatprep.mubr.f32.mxu0 %v24921_v39  ;;  %18145 = vmatprep.mubr.msk.f32.mxu1 %vm21143_vm1, %v24921_v39 }
 0xc22   :  { %19707 = vmatpush1.bf16.msra.mxu0 %v23446_v46  ;;  %19785 = vmatpush3.bf16.msra.mxu1 %v23452_v52 }
 0xc23   :  { %19709 = vmatprep.subr.bf16.mxu0 %v23458_v29  ;;  %19786 = vmatprep.subr.bf16.mxu1 %v24922_v34 }
 0xc26   :  { %19711 = vmatpush1.bf16.msra.mxu0 %v23460_v38  ;;  %19788 = vmatpush3.bf16.msra.mxu1 %v23462_v7 }
 0xc27   :  { %19713 = vmatprep.subr.bf16.mxu0 %v23464_v59  ;;  %19789 = vmatprep.subr.bf16.mxu1 %v24922_v34 }
 0xc2a   :  { %19715 = vmatpush1.bf16.msra.mxu0 %v23466_v30  ;;  %19791 = vmatpush3.bf16.msra.mxu1 %v23468_v57 }
 0xc2b   :  { %19717 = vmatprep.subr.bf16.mxu0 %v23129_v23  ;;  %19792 = vmatprep.subr.bf16.mxu1 %v24922_v34 }
 0xc2d   :  { %10228 = vmatmul.mubr.f32.vlgmr.msra.gmra.mrb[22].mxu0 %v23521_v11  ;;  %18146 = vmatmul.mubr.f32.vlgmr.msra.gmra.mrb[100].mxu1 %v23521_v11 }
 0xc2e   :  { %19719 = vmatpush1.bf16.msra.mxu0 %v23137_v50  ;;  %19794 = vmatpush3.bf16.msra.mxu1 %v23143_v6 }
 0xc2f   :  { %19721 = vmatprep.subr.bf16.mxu0 %v23150_v17  ;;  %19795 = vmatprep.subr.bf16.mxu1 %v24922_v34 }
 0xc30   :  { %10314 = vmatprep.mubr.f32.mxu0 %v24921_v39  ;;  %18164 = vmatprep.mubr.msk.f32.mxu1 %vm21143_vm1, %v24921_v39 }
 0xc32   :  { %19723 = vmatpush1.bf16.msra.mxu0 %v23182_v18  ;;  %19797 = vmatpush3.bf16.msra.mxu1 %v25004_v1 }
 0xc33   :  { %19725 = vmatprep.subr.bf16.mxu0 %v25005_v37  ;;  %19798 = vmatprep.subr.bf16.mxu1 %v24922_v34 }
 0xc36   :  { %19727 = vmatpush1.bf16.msra.mxu0 %v25006_v9  ;;  %19800 = vmatpush3.bf16.msra.mxu1 %v25007_v10 }
 0xc37   :  { %19729 = vmatprep.subr.bf16.mxu0 %v25008_v3  ;;  %19801 = vmatprep.subr.bf16.mxu1 %v24922_v34 }
 0xc3a   :  { %19731 = vmatpush1.bf16.msra.mxu0 %v25009_v12  ;;  %19803 = vmatpush3.bf16.msra.mxu1 %v25010_v44 }
 0xc3b   :  { %19805 = vmatprep.subr.bf16.mxu0 %v23129_v23  ;;  %19900 = vmatprep.subr.bf16.mxu1 %v24922_v34 }
 0xc3d   :  { %10316 = vmatmul.mubr.f32.vlgmr.msra.gmra.mrb[22].mxu0 %v23521_v11  ;;  %18165 = vmatmul.mubr.f32.vlgmr.msra.gmra.mrb[102].mxu1 %v23521_v11 }
 0xc3e   :  { %19807 = vmatpush1.bf16.msra.mxu0 %v23137_v50  ;;  %19902 = vmatpush3.bf16.msra.mxu1 %v23143_v6 }
 0xc3f   :  { %19809 = vmatprep.subr.bf16.mxu0 %v23150_v17  ;;  %19903 = vmatprep.subr.bf16.mxu1 %v24922_v34 }
 0xc40   :  { %10949 = vmatprep.mubr.f32.mxu0 %v24921_v39  ;;  %18183 = vmatprep.mubr.msk.f32.mxu1 %vm21143_vm1, %v24921_v39 }
 0xc42   :  { %19811 = vmatpush1.bf16.msra.mxu0 %v23182_v18  ;;  %19905 = vmatpush3.bf16.msra.mxu1 %v25004_v1 }
 0xc43   :  { %19813 = vmatprep.subr.bf16.mxu0 %v25005_v37  ;;  %19906 = vmatprep.subr.bf16.mxu1 %v24922_v34 }
 0xc46   :  { %19815 = vmatpush1.bf16.msra.mxu0 %v25006_v9  ;;  %19908 = vmatpush3.bf16.msra.mxu1 %v25007_v10 }
 0xc47   :  { %19817 = vmatprep.subr.bf16.mxu0 %v25008_v3  ;;  %19909 = vmatprep.subr.bf16.mxu1 %v24922_v34 }
 0xc4a   :  { %19819 = vmatpush1.bf16.msra.mxu0 %v25009_v12  ;;  %19911 = vmatpush3.bf16.msra.mxu1 %v25010_v44 }
 0xc4b   :  { %19821 = vmatprep.subr.bf16.mxu0 %v25014_v28  ;;  %19912 = vmatprep.subr.bf16.mxu1 %v24922_v34 }
 0xc4d   :  { %10955 = vmatmul.mubr.f32.vlgmr.msra.gmra.mrb[24].mxu0 %v10954_v22  ;;  %18184 = vmatmul.mubr.f32.vlgmr.msra.gmra.mrb[104].mxu1 %v10954_v22 }
 0xc4e   :  { %19823 = vmatpush1.bf16.msra.mxu0 %v23533_v19  ;;  %19914 = vmatpush3.bf16.msra.mxu1 %v23535_v41 }
 0xc4f   :  { %19825 = vmatprep.subr.bf16.mxu0 %v23537_v49  ;;  %19915 = vmatprep.subr.bf16.mxu1 %v24922_v34 }
 0xc50   :  { %11105 = vmatprep.mubr.f32.mxu0 %v24921_v39  ;;  %18202 = vmatprep.mubr.msk.f32.mxu1 %vm21143_vm1, %v24921_v39 }
 0xc52   :  { %19827 = vmatpush1.bf16.msra.mxu0 %v23361_v58  ;;  %19917 = vmatpush3.bf16.msra.mxu1 %v23372_v62  ;;  %v12066_v58 = vld [vmem:[#allocation4 + $0xc8] sm:$0xff] }
 0xc53   :  { %19829 = vmatprep.subr.bf16.mxu0 %v23386_v27  ;;  %19918 = vmatprep.subr.bf16.mxu1 %v24922_v34  ;;  %v12067_v27 = vld [vmem:[#allocation4 + $0xd0] sm:$0xff] }
 0xc56   :  { %19831 = vmatpush1.bf16.msra.mxu0 %v23391_v47  ;;  %19920 = vmatpush3.bf16.msra.mxu1 %v23399_v25  ;;  %v12075_v25 = vld [vmem:[#allocation4 + $0x110] sm:$0xff] }
 0xc57   :  { %19833 = vmatprep.subr.bf16.mxu0 %v23405_v51  ;;  %19921 = vmatprep.subr.bf16.mxu1 %v24922_v34 }
 0xc5a   :  { %19835 = vmatpush1.bf16.msra.mxu0 %v23419_v55  ;;  %19923 = vmatpush3.bf16.msra.mxu1 %v23425_v31 }
 0xc5b   :  { %19837 = vmatprep.subr.bf16.mxu0 %v23403_v20  ;;  %19924 = vmatprep.subr.bf16.mxu1 %v24922_v34  ;;  %v12071_v20 = vld [vmem:[#allocation4 + $0xf0] sm:$0xff] }
 0xc5d   :  { %11107 = vmatmul.mubr.f32.vlgmr.msra.gmra.mrb[24].mxu0 %v23673_v21  ;;  %18203 = vmatmul.mubr.f32.vlgmr.msra.gmra.mrb[106].mxu1 %v23673_v21 }
 0xc5e   :  { %19839 = vmatpush1.bf16.msra.mxu0 %v23558_v16  ;;  %19926 = vmatpush3.bf16.msra.mxu1 %v23562_v60 }
 0xc5f   :  { %19841 = vmatprep.subr.bf16.mxu0 %v23568_v14  ;;  %19927 = vmatprep.subr.bf16.mxu1 %v24922_v34 }
 0xc60   :  { %11209 = vmatprep.mubr.f32.mxu0 %v24921_v39  ;;  %18221 = vmatprep.mubr.msk.f32.mxu1 %vm21143_vm1, %v24921_v39 }
 0xc62   :  { %19843 = vmatpush1.bf16.msra.mxu0 %v23409_v4  ;;  %19929 = vmatpush3.bf16.msra.mxu1 %v23413_v24  ;;  %v12074_v4 = vld [vmem:[#allocation4 + $0x108] sm:$0xff]  ;;  %v12073_v24 = vld [vmem:[#allocation4 + $0x100] sm:$0xff] }
 0xc63   :  { %19845 = vmatprep.subr.bf16.mxu0 %v23417_v63  ;;  %19930 = vmatprep.subr.bf16.mxu1 %v24922_v34  ;;  %v12076_v63 = vld [vmem:[#allocation4 + $0x118] sm:$0xff]  ;;  %v19978_v55 = vpack.c.bf16 %v12074_v4, %v12071_v20 }
 0xc66   :  { %19847 = vmatpush1.bf16.msra.mxu0 %v23423_v0  ;;  %19932 = vmatpush3.bf16.msra.mxu1 %v23428_v36  ;;  %v19984_v0 = vpack.c.bf16 %v12076_v63, %v12073_v24 }
 0xc67   :  { %19849 = vmatprep.subr.bf16.mxu0 %v23430_v13  ;;  %19933 = vmatprep.subr.bf16.mxu1 %v24922_v34  ;;  %v9650_v13 = vld [vmem:[#allocation4 + $0x2a3] ss:$8 sm:$0x7] }
 0xc6a   :  { %19851 = vmatpush1.bf16.msra.mxu0 %v23432_v5  ;;  %19935 = vmatpush3.bf16.msra.mxu1 %v23434_v54  ;;  %v12072_v5 = vld [vmem:[#allocation4 + $0xf8] sm:$0xff]  ;;  %v25015_v54 = vld [vmem:[#allocation10_spill] sm:$0xff] }
 0xc6b   :  { %19853 = vmatprep.subr.bf16.mxu0 %v23129_v23  ;;  %19936 = vmatprep.subr.bf16.mxu1 %v24922_v34  ;;  %v19976_v51 = vpack.c.bf16 %v12075_v25, %v12072_v5 }
 0xc6d   :  { %11212 = vmatmul.mubr.f32.vlgmr.msra.gmra.mrb[24].mxu0 %v10951_v61  ;;  %18222 = vmatmul.mubr.f32.vlgmr.msra.gmra.mrb[108].mxu1 %v10951_v61  ;;  %v23837_v61 = vld [vmem:[#allocation4 + $0x170] sm:$0xff] }
 0xc6e   :  { %19855 = vmatpush1.bf16.msra.mxu0 %v23137_v50  ;;  %19938 = vmatpush3.bf16.msra.mxu1 %v23143_v6 }
 0xc6f   :  { %19857 = vmatprep.subr.bf16.mxu0 %v23150_v17  ;;  %19939 = vmatprep.subr.bf16.mxu1 %v24922_v34 }
 0xc70   :  { %11298 = vmatprep.mubr.f32.mxu0 %v24921_v39  ;;  %18240 = vmatprep.mubr.msk.f32.mxu1 %vm21143_vm1, %v24921_v39 }
 0xc72   :  { %19859 = vmatpush1.bf16.msra.mxu0 %v23182_v18  ;;  %19941 = vmatpush3.bf16.msra.mxu1 %v25004_v1 }
 0xc73   :  { %19861 = vmatprep.subr.bf16.mxu0 %v25005_v37  ;;  %19942 = vmatprep.subr.bf16.mxu1 %v24922_v34 }
 0xc76   :  { %19863 = vmatpush1.bf16.msra.mxu0 %v25006_v9  ;;  %19944 = vmatpush3.bf16.msra.mxu1 %v25007_v10 }
 0xc77   :  { %19865 = vmatprep.subr.bf16.mxu0 %v25008_v3  ;;  %19945 = vmatprep.subr.bf16.mxu1 %v24922_v34 }
 0xc7a   :  { %19867 = vmatpush1.bf16.msra.mxu0 %v25009_v12  ;;  %19947 = vmatpush3.bf16.msra.mxu1 %v25010_v44 }
 0xc7b   :  { %19869 = vmatprep.subr.bf16.mxu0 %v23440_v33  ;;  %19948 = vmatprep.subr.bf16.mxu1 %v24922_v34  ;;  %v9668_v33 = vrot.slane %v9650_v13, %v25015_v54  ;;  %v25021_v13 = vld [vmem:[#allocation14_spill] sm:$0xff] }
 0xc7d   :  { %11302 = vmatmul.mubr.f32.vlgmr.msra.gmra.mrb[24].mxu0 %v23689_v45  ;;  %18241 = vmatmul.mubr.f32.vlgmr.msra.gmra.mrb[110].mxu1 %v23689_v45 }
 0xc7e   :  { %19871 = vmatpush1.bf16.msra.mxu0 %v23612_v42  ;;  %19950 = vmatpush3.bf16.msra.mxu1 %v23618_v43  ;;  %v23825_v42 = vld [vmem:[#allocation4 + $0x138] sm:$0xff]  ;;  %v23828_v43 = vld [vmem:[#allocation4 + $0x130] sm:$0xff] }
 0xc7f   :  { %19873 = vmatprep.subr.bf16.mxu0 %v23626_v2  ;;  %19951 = vmatprep.subr.bf16.mxu1 %v24922_v34  ;;  %v24847_v15 = vand.u32 4294901760, %v23825_v42  ;;  %v24846_v35 = vand.u32 4294901760, %v23828_v43 }
 0xc80   :  { %11420 = vmatprep.mubr.f32.mxu0 %v24921_v39  ;;  %18259 = vmatprep.mubr.msk.f32.mxu1 %vm21143_vm1, %v24921_v39 }
 0xc82   :  { %19875 = vmatpush1.bf16.msra.mxu0 %v23446_v46  ;;  %19953 = vmatpush3.bf16.msra.mxu1 %v23452_v52 }
 0xc83   :  { %19877 = vmatprep.subr.bf16.mxu0 %v23458_v29  ;;  %19954 = vmatprep.subr.bf16.mxu1 %v24922_v34 }
 0xc86   :  { %19879 = vmatpush1.bf16.msra.mxu0 %v23460_v38  ;;  %19956 = vmatpush3.bf16.msra.mxu1 %v23462_v7 }
 0xc87   :  { %19881 = vmatprep.subr.bf16.mxu0 %v23464_v59  ;;  %19957 = vmatprep.subr.bf16.mxu1 %v24922_v34 }
 0xc8a   :  { %19883 = vmatpush1.bf16.msra.mxu0 %v23466_v30  ;;  %19959 = vmatpush3.bf16.msra.mxu1 %v23468_v57 }
 0xc8b   :  { %19885 = vmatprep.subr.bf16.mxu0 %v23129_v23  ;;  %19960 = vmatprep.subr.bf16.mxu1 %v24922_v34  ;;  %v12069_v23 = vld [vmem:[#allocation4 + $0xe0] sm:$0xff] }
 0xc8d   :  { %11422 = vmatmul.mubr.f32.vlgmr.msra.gmra.mrb[24].mxu0 %v23673_v21  ;;  %18260 = vmatmul.mubr.f32.vlgmr.msra.gmra.mrb[112].mxu1 %v23673_v21 }
 0xc8e   :  { %19887 = vmatpush1.bf16.msra.mxu0 %v23137_v50  ;;  %19962 = vmatpush3.bf16.msra.mxu1 %v23143_v6  ;;  %v12065_v50 = vld [vmem:[#allocation4 + $0xc0] sm:$0xff]  ;;  %v19972_v6 = vpack.c.bf16 %v12069_v23, %v12066_v58  ;;  %v24843_v58 = vand.u32 4294901760, %v23837_v61 }
 0xc8f   :  { %19889 = vmatprep.subr.bf16.mxu0 %v23150_v17  ;;  %19963 = vmatprep.subr.bf16.mxu1 %v24922_v34  ;;  %v12068_v17 = vld [vmem:[#allocation4 + $0xd8] sm:$0xff] }
 0xc90   :  { %11508 = vmatprep.mubr.f32.mxu0 %v24921_v39  ;;  %18278 = vmatprep.mubr.msk.f32.mxu1 %vm21143_vm1, %v24921_v39  ;;  %v19974_v47 = vpack.c.bf16 %v12068_v17, %v12065_v50  ;;  %v23857_v50 = vpack.c.bf16 %v24845_v48, %v24846_v35 }
 0xc92   :  { %19891 = vmatpush1.bf16.msra.mxu0 %v23182_v18  ;;  %19965 = vmatpush3.bf16.msra.mxu1 %v25004_v1  ;;  %v12070_v18 = vld [vmem:[#allocation4 + $0xe8] sm:$0xff] }
 0xc93   :  { %19893 = vmatprep.subr.bf16.mxu0 %v25005_v37  ;;  %19966 = vmatprep.subr.bf16.mxu1 %v24922_v34  ;;  %v19981_v62 = vpack.c.bf16 %v12070_v18, %v12067_v27  ;;  %v23817_v37 = vld [vmem:[#allocation4 + $0x128] sm:$0xff] }
 0xc96   :  { %19895 = vmatpush1.bf16.msra.mxu0 %v25006_v9  ;;  %19968 = vmatpush3.bf16.msra.mxu1 %v25007_v10  ;;  %v23819_v9 = vld [vmem:[#allocation4 + $0x140] sm:$0xff] }
 0xc97   :  { %19897 = vmatprep.subr.bf16.mxu0 %v25008_v3  ;;  %19969 = vmatprep.subr.bf16.mxu1 %v24922_v34  ;;  %v23821_v10 = vld [vmem:[#allocation4 + $0x120] sm:$0xff] }
 0xc98   :  { %v24848_v26 = vand.u32 4294901760, %v23821_v10 }
 0xc9a   :  { %19899 = vmatpush1.bf16.msra.mxu0 %v25009_v12  ;;  %19971 = vmatpush3.bf16.msra.mxu1 %v25010_v44  ;;  %v12290_v12 = vand.u32 4294901760, %v23817_v37  ;;  %v12294_v44 = vand.u32 4294901760, %v23819_v9  ;;  %v23851_v23 = vpack.c.bf16 %v24847_v15, %v24848_v26 }
 0xc9b   :  { %19973 = vmatprep.subr.bf16.mxu0 %v19972_v6  ;;  %19980 = vmatprep.subr.bf16.mxu1 %v24922_v34 }
 0xc9c   :  { %v23843_v22 = vpack.c.bf16 %v12294_v44, %v12290_v12 }
 0xc9d   :  { %11510 = vmatmul.mubr.f32.vlgmr.msra.gmra.mrb[24].mxu0 %v23673_v21  ;;  %18279 = vmatmul.mubr.f32.vlgmr.msra.gmra.mrb[114].mxu1 %v23673_v21  ;;  %v23835_v21 = vld [vmem:[#allocation4 + $0x158] sm:$0xff] }
 0xc9e   :  { %19975 = vmatpush1.bf16.msra.mxu0 %v19974_v47  ;;  %19982 = vmatpush3.bf16.msra.mxu1 %v19981_v62  ;;  %v24844_v28 = vand.u32 4294901760, %v23835_v21 }
 0xc9f   :  { %19977 = vmatprep.subr.bf16.mxu0 %v19976_v51  ;;  %19983 = vmatprep.subr.bf16.mxu1 %v24922_v34 }
 0xca0   :  { %12143 = vmatprep.mubr.f32.mxu0 %v24921_v39  ;;  %18289 = vmatprep.mubr.msk.f32.mxu1 %vm21143_vm1, %v24921_v39  ;;  %v23864_v6 = vpack.c.bf16 %v24843_v58, %v24844_v28 }
 0xca2   :  { %19979 = vmatpush1.bf16.msra.mxu0 %v19978_v55  ;;  %19985 = vmatpush3.bf16.msra.mxu1 %v19984_v0  ;;  %v25018_v55 = vld [vmem:[#allocation19_spill] sm:$0xff]  ;;  %v25019_v0 = vld [vmem:[#allocation13_spill] sm:$0xff] }
 0xca3   :  { %20082 = vmatprep.subr.bf16.mxu1 %v24922_v34  ;;  %19987 = vmatprep.subr.bf16.mxu0 %v23843_v22 }
 0xca5   :  { %16560 = vmatmul.mubr.msk.f32.vlgmr.msra.gmra.mrb[14].mxu0 %vm78_vm0, %v25013_v40  ;;  %18290 = vmatmul.mubr.msk.f32.vlgmr.msra.gmra.mrb[116].mxu1 %vm78_vm0, %v25013_v40 }
 0xca6   :  { %12370 = vmatprep.mubr.f32.mxu0 %v24921_v39  ;;  %18308 = vmatprep.mubr.msk.f32.mxu1 %vm21143_vm1, %v24921_v39 }
 0xca7   :  { %19989 = vmatpush1.bf16.msra.mxu0 %v23851_v23  ;;  %20084 = vmatpush3.bf16.msra.mxu1 %v23857_v50 }
 0xca8   :  { %19991 = vmatprep.subr.bf16.mxu0 %v23864_v6  ;;  %20085 = vmatprep.subr.bf16.mxu1 %v24922_v34 }
 0xcc0   :  { %v10401_v31 = vpop.f32.mrb[92].mxu1 }
 0xcc1   :  { %v18071_v36 = vpop.f32.mrb[93].mxu1  ;;  %v10402_v46 = vadd.f32 %v10401_v31, %v9668_v33  ;;  %v260_v31 = vadd.f32 %v25019_v0, %v25018_v55  ;;  %v23893_v55 = vld [vmem:[#allocation4 + $0x188] sm:$0xff]  ;;  %v23895_v0 = vld [vmem:[#allocation4 + $0x1a0] sm:$0xff] }
 0xcc2   :  { %v25020_v36 = vld [vmem:[#allocation22_spill] sm:$0xff] }
 0xcd0   :  { %v10512_v52 = vpop.f32.mrb[94].mxu1 }
 0xcd1   :  { %v10513_v29 = vadd.f32 %v10512_v52, %v10402_v46  ;;  %v18090_v38 = vpop.f32.mrb[95].mxu1  ;;  %v25022_v46 = vld [vmem:[#allocation20_spill] sm:$0xff] }
 0xcd2   :  { %v20513_v52 = vadd.f32 %v25022_v46, %v260_v31  ;;  %v23909_v46 = vsub.f32 %v23819_v9, %v12294_v44 }
 0xce0   :  { %v10600_v7 = vpop.f32.mrb[96].mxu1 }
 0xce1   :  { %v10601_v59 = vadd.f32 %v10600_v7, %v10513_v29  ;;  %v18109_v30 = vpop.f32.mrb[97].mxu1  ;;  %v25023_v7 = vld [vmem:[#allocation23_spill] sm:$0xff] }
 0xcf0   :  { %v10681_v57 = vpop.f32.mrb[98].mxu1 }
 0xcf1   :  { %v10682_v49 = vadd.f32 %v10681_v57, %v10601_v59  ;;  %v18128_v11 = vpop.f32.mrb[99].mxu1 }
 0xd00   :  { %v10776_v53 = vpop.f32.mrb[100].mxu1 }
 0xd01   :  { %v10777_v56 = vadd.f32 %v10776_v53, %v10682_v49  ;;  %v18147_v19 = vpop.f32.mrb[101].mxu1 }
 0xd10   :  { %v10855_v41 = vpop.f32.mrb[102].mxu1 }
 0xd11   :  { %v23815_v16 = vadd.f32 %v10855_v41, %v10777_v56  ;;  %v18166_v60 = vpop.f32.mrb[103].mxu1 }
 0xd13   :  { %25016 = vst [vmem:[#allocation39_spill] sm:$0xff] %v23815_v16 }
 0xd20   :  { %v11595_v14 = vpop.f32.mrb[104].mxu1 }
 0xd21   :  { %v18185_v1 = vpop.f32.mrb[105].mxu1  ;;  %v11596_v3 = vadd.f32 %v11595_v14, %v9668_v33  ;;  %v262_v33 = vadd.f32 %v25021_v13, %v25020_v36  ;;  %v21086_v14 = vld [vmem:[#allocation4 + $0x2a2] ss:$0 sm:$0xff]  ;;  %v12306_v13 = vand.u32 4294901760, %v23893_v55 }
 0xd23   :  { %v20516_v59 = vadd.f32 %v25023_v7, %v262_v33  ;;  %v23904_v33 = vld [vmem:[#allocation4 + $0x190] sm:$0xff] }
 0xd24   :  { %v12950_v9 = vand.u32 4294901760, %v23904_v33 }
 0xd30   :  { %v11706_v2 = vpop.f32.mrb[106].mxu1 }
 0xd31   :  { %v11707_v45 = vadd.f32 %v11706_v2, %v11596_v3  ;;  %v18204_v32 = vpop.f32.mrb[107].mxu1 }
 0xd40   :  { %v11794_v17 = vpop.f32.mrb[108].mxu1 }
 0xd41   :  { %v11795_v27 = vadd.f32 %v11794_v17, %v11707_v45  ;;  %v18223_v18 = vpop.f32.mrb[109].mxu1  ;;  %v25024_v45 = vld [vmem:[#allocation16_spill] sm:$0xff] }
 0xd42   :  { %v12247_v18 = vld [vmem:[#allocation4 + $0x150] sm:$0xff] }
 0xd50   :  { %v11875_v5 = vpop.f32.mrb[110].mxu1 }
 0xd51   :  { %v11876_v25 = vadd.f32 %v11875_v5, %v11795_v27  ;;  %v18242_v47 = vpop.f32.mrb[111].mxu1  ;;  %v23879_v5 = vld [vmem:[#allocation4 + $0x168] sm:$0xff] }
 0xd52   :  { %v23886_v47 = vsub.f32 %v23817_v37, %v12290_v12  ;;  %v12310_v37 = vand.u32 4294901760, %v23895_v0  ;;  %v23900_v12 = vld [vmem:[#allocation4 + $0x180] sm:$0xff] }
 0xd60   :  { %v11970_v62 = vpop.f32.mrb[112].mxu1 }
 0xd61   :  { %v11971_v20 = vadd.f32 %v11970_v62, %v11876_v25  ;;  %v18261_v51 = vpop.f32.mrb[113].mxu1  ;;  %v23881_v25 = vld [vmem:[#allocation4 + $0x160] sm:$0xff] }
 0xd62   :  { %v12304_v51 = vand.u32 4294901760, %v23879_v5 }
 0xd70   :  { %v12049_v4 = vpop.f32.mrb[114].mxu1 }
 0xd71   :  { %v23870_v24 = vadd.f32 %v12049_v4, %v11971_v20  ;;  %v18280_v63 = vpop.f32.mrb[115].mxu1  ;;  %v12300_v20 = vand.u32 4294901760, %v12247_v18  ;;  %v23890_v4 = vld [vmem:[#allocation4 + $0x178] sm:$0xff] }
 0xd72   :  { %v12944_v63 = vand.u32 4294901760, %v23881_v25  ;;  %v12947_v36 = vand.u32 4294901760, %v23890_v4 }
 0xd73   :  { %25017 = vst [vmem:[#allocation38_spill] sm:$0xff] %v23870_v24 }
 0xd78   :  { %v12145_v29 = vpop.f32.mrb[14].mxu0  ;;  %v12216_v38 = vpop.f32.mrb[116].mxu1 }
 0xd79   :  { %v20514_v30 = vadd.f32 %v20513_v52, %v12145_v29  ;;  %v12147_v57 = vpop.f32.mrb[15].mxu0  ;;  %v18291_v49 = vpop.f32.mrb[117].mxu1  ;;  %v12234_v1 = vadd.f32 %v21086_v14, %v12216_v38  ;;  %v23911_v29 = vpack.c.bf16 %v12304_v51, %v12300_v20  ;;  %v12308_v38 = vand.u32 4294901760, %v23900_v12 }
 0xd7a   :  { %v20517_v11 = vadd.f32 %v20516_v59, %v12147_v57  ;;  %v23915_v59 = vld [vmem:[#allocation4 + $0x1a8] sm:$0xff]  ;;  %v23919_v57 = vld [vmem:[#allocation4 + $0x1d0] sm:$0xff]  ;;  %v23921_v49 = vpack.c.bf16 %v12947_v36, %v12944_v63 }
 0xd7b   :  { %v16562_v53 = vmul.f32 -1.442695, %v20514_v30  ;;  %v23917_v30 = vld [vmem:[#allocation4 + $0x1b8] sm:$0xff]  ;;  %v12953_v44 = vand.u32 4294901760, %v23915_v59  ;;  %19993 = vmatpush1.bf16.msra.mxu0 %v23911_v29  ;;  %v25034_v24 = vand.u32 4294901760, %v23919_v57 }
 0xd7c   :  { %v16563_v56 = vmul.f32 -1.442695, %v20517_v11  ;;  %v23923_v11 = vpack.c.bf16 %v12310_v37, %v12306_v13  ;;  %v24862_v14 = vand.u32 4294901760, %v23917_v30  ;;  %20087 = vmatpush3.bf16.msra.mxu1 %v23921_v49 }
 0xd7d   :  { %20995 = vpow2.f32 %v16562_v53  ;;  %v23927_v53 = vld [vmem:[#allocation4 + $0x1b0] sm:$0xff]  ;;  %20088 = vmatprep.subr.bf16.mxu1 %v24922_v34 }
 0xd7e   :  { %20997 = vpow2.f32 %v16563_v56  ;;  %25025 = vst [vmem:[#allocation11_spill] sm:$0xff] %v23923_v11  ;;  %v23929_v56 = vld [vmem:[#allocation4 + $0x1c8] sm:$0xff]  ;;  %19995 = vmatprep.subr.bf16.mxu0 %v23923_v11 }
 0xd87   :  { %v20996_v19 = vpop.eup %20995 }
 0xd88   :  { %v12228_v41 = vadd.f32 1.0, %v20996_v19  ;;  %v20998_v60 = vpop.eup %20997  ;;  %v23931_v19 = vld [vmem:[#allocation4 + $0x1c0] sm:$0xff] }
 0xd89   :  { %v12229_v17 = vadd.f32 1.0, %v20998_v60 }
 0xd8a   :  { %20999 = vrcp.f32 %v12228_v41 }
 0xd94   :  { %v21000_v3 = vpop.eup %20999 }
 0xd95   :  { %v12235_v2 = vmul.f32 %v21000_v3, %v12234_v1  ;;  %v24861_v1 = vand.u32 4294901760, %v23919_v57  ;;  %v23940_v3 = vld [vmem:[#allocation4 + $0x1d8] sm:$0xff] }
 0xd97   :  { %v12236_v32 = vadd.f32 %v12235_v2, %v25024_v45  ;;  %v23948_v2 = vpack.c.bf16 %v12953_v44, %v12950_v9  ;;  %v24860_v45 = vand.u32 4294901760, %v23927_v53 }
 0xd99   :  { %21001 = vtanh.f32 %v12236_v32  ;;  %25028 = vst [vmem:[#allocation15_spill] sm:$0xff] %v23948_v2  ;;  %v24850_v32 = vand.u32 4294901760, %v23929_v56  ;;  %20090 = vmatpush3.bf16.msra.mxu1 %v23948_v2 }
 0xd9a   :  { %21003 = vrcp.f32 %v12229_v17  ;;  %v24853_v17 = vand.u32 4294901760, %v23931_v19  ;;  %20091 = vmatprep.subr.bf16.mxu1 %v24922_v34 }
 0xd9b   :  { %v23970_v58 = vpack.c.bf16 %v24850_v32, %v24860_v45 }
 0xd9d   :  { %25030 = vst [vmem:[#allocation27_spill] sm:$0xff] %v23970_v58 }
 0xda3   :  { %v21002_v27 = vpop.eup %21001 }
 0xda4   :  { %v12238_v62 = vsub.f32 %v25013_v40, %v21002_v27  ;;  %v21004_v31 = vpop.eup %21003  ;;  %v23902_v40 = vld [vmem:[#allocation4 + $0x198] sm:$0xff] }
 0xda5   :  { %v12312_v7 = vand.u32 4294901760, %v23902_v40 }
 0xda6   :  { %v12239_v52 = vmul.f32 %v21004_v31, %v12238_v62  ;;  %v24851_v62 = vand.u32 4294901760, %v23940_v3  ;;  %v24849_v31 = vand.u32 4294901760, %v23886_v47 }
 0xda7   :  { %v23936_v60 = vpack.c.bf16 %v12312_v7, %v12308_v38 }
 0xda8   :  { %v23933_v41 = vadd.f32 %v21002_v27, %v12239_v52  ;;  %v23960_v27 = vpack.c.bf16 %v24861_v1, %v24862_v14  ;;  %v24852_v52 = vand.u32 4294901760, %v23909_v46  ;;  %v12385_v28 = vsub.f32 %v23886_v47, %v24849_v31 }
 0xda9   :  { %25027 = vst [vmem:[#allocation35_spill] sm:$0xff] %v23936_v60  ;;  %19997 = vmatpush1.bf16.msra.mxu0 %v23936_v60  ;;  %v23981_v48 = vpack.c.bf16 %v24851_v62, %v24853_v17  ;;  %v23988_v31 = vsub.f32 %v12247_v18, %v12300_v20  ;;  %v24011_v17 = vsub.f32 %v23893_v55, %v12306_v13 }
 0xdaa   :  { %25026 = vst [vmem:[#allocation12_spill] sm:$0xff] %v23933_v41  ;;  %12267 = vrot.lane.b32.xlu0 %v23933_v41, %s21144_s0  ;;  %25029 = vst [vmem:[#allocation17_spill] sm:$0xff] %v23960_v27  ;;  %19999 = vmatprep.subr.bf16.mxu0 %v23960_v27  ;;  %v12397_v35 = vsub.f32 %v23909_v46, %v24852_v52  ;;  %v12386_v15 = vand.u32 4294901760, %v12385_v28  ;;  %v23997_v52 = vsub.f32 %v23879_v5, %v12304_v51 }
 0xdab   :  { %25031 = vst [vmem:[#allocation36_spill] sm:$0xff] %v23981_v48  ;;  %20093 = vmatpush3.bf16.msra.mxu1 %v23981_v48  ;;  %v24858_v62 = vand.u32 4294901760, %v23988_v31  ;;  %v24000_v28 = vsub.f32 %v23881_v25, %v12944_v63  ;;  %v24014_v5 = vsub.f32 %v23895_v0, %v12310_v37  ;;  %v24029_v0 = vsub.f32 %v23902_v40, %v12312_v7 }
 0xdac   :  { %v12398_v26 = vand.u32 4294901760, %v12397_v35  ;;  %20094 = vmatprep.subr.bf16.mxu1 %v24922_v34  ;;  %v24855_v18 = vand.u32 4294901760, %v23997_v52  ;;  %v13050_v40 = vsub.f32 %v23904_v33, %v12950_v9  ;;  %v25033_v9 = vand.u32 4294901760, %v23917_v30 }
 0xdad   :  { %20001 = vmatpush1.bf16.msra.mxu0 %v23970_v58  ;;  %v12415_v35 = vsub.f32 %v23988_v31, %v24858_v62  ;;  %v24859_v55 = vand.u32 4294901760, %v24014_v5 }
 0xdae   :  { %v23991_v32 = vpack.c.bf16 %v12398_v26, %v12386_v15  ;;  %v24854_v26 = vand.u32 4294901760, %v24000_v28  ;;  %v24008_v15 = vsub.f32 %v23890_v4, %v12947_v36  ;;  %v12427_v25 = vsub.f32 %v23997_v52, %v24855_v18 }
 0xdaf   :  { %v12416_v20 = vand.u32 4294901760, %v12415_v35  ;;  %v24024_v4 = vsub.f32 %v23900_v12, %v12308_v38  ;;  %v24856_v36 = vand.u32 4294901760, %v24011_v17  ;;  %v12445_v38 = vsub.f32 %v24014_v5, %v24859_v55 }
 0xdb0   :  { %25032 = vst [vmem:[#allocation37_spill] sm:$0xff] %v23991_v32  ;;  %20003 = vmatprep.subr.bf16.mxu0 %v23991_v32  ;;  %v13038_v51 = vsub.f32 %v24000_v28, %v24854_v26  ;;  %v24857_v63 = vand.u32 4294901760, %v24008_v15  ;;  %v12428_v13 = vand.u32 4294901760, %v12427_v25  ;;  %v12450_v18 = vand.u32 4294901760, %v24029_v0 }
 0xdb1   :  { %v24863_v26 = vand.u32 4294901760, %v24024_v4  ;;  %v12433_v12 = vsub.f32 %v24011_v17, %v24856_v36  ;;  %v13057_v36 = vsub.f32 %v23915_v59, %v12953_v44  ;;  %v12446_v62 = vand.u32 4294901760, %v12445_v38 }
 0xdb2   :  { %v13039_v37 = vand.u32 4294901760, %v13038_v51  ;;  %v13045_v35 = vsub.f32 %v24008_v15, %v24857_v63  ;;  %v24045_v7 = vpack.c.bf16 %v12428_v13, %v12416_v20  ;;  %v12451_v55 = vsub.f32 %v24029_v0, %v12450_v18 }
 0xdb3   :  { %v12439_v51 = vsub.f32 %v24024_v4, %v24863_v26  ;;  %v12434_v63 = vand.u32 4294901760, %v12433_v12  ;;  %v13051_v45 = vand.u32 4294901760, %v13050_v40  ;;  %v13058_v33 = vand.u32 4294901760, %v13057_v36 }
 0xdb4   :  { %v13046_v25 = vand.u32 4294901760, %v13045_v35  ;;  %v12455_v20 = vsub.f32 %v23917_v30, %v25033_v9  ;;  %v12452_v35 = vand.u32 4294901760, %v12451_v55  ;;  %v12467_v59 = vsub.f32 %v23919_v57, %v25034_v24 }
 0xdb5   :  { %v12440_v14 = vand.u32 4294901760, %v12439_v51  ;;  %v24059_v13 = vpack.c.bf16 %v12446_v62, %v12434_v63  ;;  %v13052_v26 = vsub.f32 %v13050_v40, %v13051_v45  ;;  %v13059_v44 = vsub.f32 %v13057_v36, %v13058_v33 }
 0xdb6   :  { %v24054_v1 = vpack.c.bf16 %v13046_v25, %v13039_v37  ;;  %v12456_v12 = vand.u32 4294901760, %v12455_v20  ;;  %v25035_v38 = vand.u32 4294901760, %v23927_v53  ;;  %v25036_v25 = vand.u32 4294901760, %v23929_v56 }
 0xdb7   :  { %v24070_v16 = vpack.c.bf16 %v12452_v35, %v12440_v14  ;;  %v13053_v30 = vand.u32 4294901760, %v13052_v26  ;;  %v12468_v62 = vand.u32 4294901760, %v12467_v59  ;;  %v25037_v63 = vand.u32 4294901760, %v23931_v19 }
 0xdb8   :  { %v12461_v37 = vsub.f32 %v23927_v53, %v25035_v38  ;;  %v12473_v51 = vsub.f32 %v23929_v56, %v25036_v25  ;;  %v13060_v9 = vand.u32 4294901760, %v13059_v44  ;;  %v12457_v24 = vsub.f32 %v12455_v20, %v12456_v12 }
 0xdb9   :  { %v13064_v55 = vsub.f32 %v23931_v19, %v25037_v63  ;;  %v12469_v32 = vsub.f32 %v12467_v59, %v12468_v62  ;;  %v25038_v53 = vand.u32 4294901760, %v23940_v3  ;;  %v24080_v56 = vpack.c.bf16 %v23909_v46, %v23886_v47 }
 0xdba   :  { %v12462_v57 = vand.u32 4294901760, %v12461_v37  ;;  %v12474_v54 = vand.u32 4294901760, %v12473_v51  ;;  %v24082_v14 = vpack.c.bf16 %v13060_v9, %v13053_v30  ;;  %v12458_v26 = vand.u32 4294901760, %v12457_v24 }
 0xdbb   :  { %v13065_v41 = vand.u32 4294901760, %v13064_v55  ;;  %v13071_v38 = vsub.f32 %v23940_v3, %v25038_v53  ;;  %v12470_v19 = vand.u32 4294901760, %v12469_v32  ;;  %v24088_v3 = vpack.c.bf16 %v23997_v52, %v23988_v31 }
 0xdbc   :  { %v12463_v35 = vsub.f32 %v12461_v37, %v12462_v57  ;;  %v12475_v25 = vsub.f32 %v12473_v51, %v12474_v54  ;;  %v24094_v30 = vpack.c.bf16 %v24008_v15, %v24000_v28  ;;  %v24098_v32 = vpack.c.bf16 %v24014_v5, %v24011_v17 }
 0xdbd   :  { %v13066_v44 = vsub.f32 %v13064_v55, %v13065_v41  ;;  %v13072_v63 = vand.u32 4294901760, %v13071_v38  ;;  %v24084_v27 = vpack.c.bf16 %v12470_v19, %v12458_v26  ;;  %v24102_v9 = vpack.c.bf16 %v24029_v0, %v24024_v4 }
 0xdbe   :  { %v12464_v48 = vand.u32 4294901760, %v12463_v35  ;;  %v12476_v58 = vand.u32 4294901760, %v12475_v25  ;;  %v24104_v26 = vpack.c.bf16 %v13057_v36, %v13050_v40  ;;  %v24106_v35 = vpack.c.bf16 %v12467_v59, %v12455_v20 }
 0xdbf   :  { %v13067_v2 = vand.u32 4294901760, %v13066_v44  ;;  %v13073_v60 = vsub.f32 %v13071_v38, %v13072_v63  ;;  %v24108_v25 = vpack.c.bf16 %v12473_v51, %v12461_v37  ;;  %v25039_v19 = vand.u32 4294901760, %v23886_v47 }
 0xdc0   :  { %v24090_v53 = vpack.c.bf16 %v12476_v58, %v12464_v48  ;;  %v24110_v48 = vpack.c.bf16 %v13071_v38, %v13064_v55  ;;  %v25040_v44 = vand.u32 4294901760, %v23909_v46  ;;  %v25041_v0 = vand.u32 4294901760, %v23988_v31 }
 0xdc1   :  { %v13074_v24 = vand.u32 4294901760, %v13073_v60  ;;  %v25042_v60 = vand.u32 4294901760, %v23997_v52  ;;  %v25043_v40 = vand.u32 4294901760, %v24000_v28  ;;  %v25044_v20 = vand.u32 4294901760, %v24008_v15 }
 0xdc2   :  { %v24118_v11 = vpack.c.bf16 %v25040_v44, %v25039_v19  ;;  %v25046_v47 = vand.u32 4294901760, %v24014_v5  ;;  %v25047_v46 = vand.u32 4294901760, %v24024_v4  ;;  %v24142_v31 = vpack.c.bf16 %v13058_v33, %v13051_v45 }
 0xdc3   :  { %v24112_v58 = vpack.c.bf16 %v13074_v24, %v13067_v2  ;;  %v24124_v36 = vpack.c.bf16 %v25042_v60, %v25041_v0  ;;  %v24130_v59 = vpack.c.bf16 %v25044_v20, %v25043_v40  ;;  %v25045_v2 = vand.u32 4294901760, %v24011_v17 }
 0xdc4   :  { %v24140_v51 = vpack.c.bf16 %v12450_v18, %v25047_v46  ;;  %v24144_v52 = vpack.c.bf16 %v12468_v62, %v12456_v12  ;;  %v24146_v55 = vpack.c.bf16 %v12474_v54, %v12462_v57  ;;  %v24148_v28 = vpack.c.bf16 %v13072_v63, %v13065_v41 }
 0xdc5   :  { %v24136_v37 = vpack.c.bf16 %v25046_v47, %v25045_v2  ;;  %v25048_v15 = vand.u32 4294901760, %v23821_v10  ;;  %v25049_v5 = vand.u32 4294901760, %v23825_v42  ;;  %v25050_v18 = vand.u32 4294901760, %v23828_v43 }
 0xdc6   :  { %v25051_v54 = vand.u32 4294901760, %v23830_v8  ;;  %v25052_v4 = vand.u32 4294901760, %v23835_v21  ;;  %v25053_v33 = vand.u32 4294901760, %v23837_v61 }
 0xdc7   :  { %v24153_v17 = vsub.f32 %v23821_v10, %v25048_v15  ;;  %v24158_v38 = vsub.f32 %v23825_v42, %v25049_v5  ;;  %v24163_v45 = vsub.f32 %v23828_v43, %v25050_v18 }
 0xdc8   :  { %v24168_v41 = vsub.f32 %v23830_v8, %v25051_v54  ;;  %v24173_v10 = vsub.f32 %v23835_v21, %v25052_v4  ;;  %v24178_v42 = vsub.f32 %v23837_v61, %v25053_v33  ;;  %v25054_v21 = vld [vmem:[#allocation24_spill] sm:$0xff] }
 0xdc9   :  { %v12390_v12 = vand.u32 4294901760, %v24153_v17  ;;  %v12402_v43 = vand.u32 4294901760, %v24158_v38  ;;  %v24880_v62 = vand.u32 4294901760, %v24163_v45 }
 0xdca   :  { %v24878_v57 = vand.u32 4294901760, %v24168_v41  ;;  %v24879_v8 = vand.u32 4294901760, %v24173_v10  ;;  %v12420_v63 = vand.u32 4294901760, %v24178_v42 }
 0xdcb   :  { %v12391_v61 = vsub.f32 %v24153_v17, %v12390_v12  ;;  %v12403_v0 = vsub.f32 %v24158_v38, %v12402_v43  ;;  %v13024_v60 = vsub.f32 %v24163_v45, %v24880_v62 }
 0xdcc   :  { %v13031_v40 = vsub.f32 %v24168_v41, %v24878_v57  ;;  %v12409_v2 = vsub.f32 %v24173_v10, %v24879_v8  ;;  %v12421_v47 = vsub.f32 %v24178_v42, %v12420_v63 }
 0xdcd   :  { %v12392_v15 = vand.u32 4294901760, %v12391_v61  ;;  %v12404_v5 = vand.u32 4294901760, %v12403_v0  ;;  %v13025_v18 = vand.u32 4294901760, %v13024_v60  ;;  %v24242_v61 = vpack.c.bf16 %v24168_v41, %v24163_v45  ;;  %v25055_v0 = vld [vmem:[#allocation11_spill] sm:$0xff] }
 0xdce   :  { %v13032_v54 = vand.u32 4294901760, %v13031_v40  ;;  %v12410_v33 = vand.u32 4294901760, %v12409_v2  ;;  %v25056_v60 = vld [vmem:[#allocation35_spill] sm:$0xff]  ;;  %v25058_v2 = vld [vmem:[#allocation17_spill] sm:$0xff] }
 0xdcf   :  { %v25057_v40 = vld [vmem:[#allocation15_spill] sm:$0xff] }
 0xdd0   :  { %v24215_v57 = vpack.c.bf16 %v13032_v54, %v13025_v18  ;;  %v25062_v18 = vand.u32 4294901760, %v24168_v41 }
 0xe1c   :  { %v12268_v24 = vpop.permute.xlu0 %12267 }
 0xe1d   :  { %v12270_v19 = vsel %vm78_vm0, %v25054_v21, %v12268_v24  ;;  %v12422_v24 = vand.u32 4294901760, %v12421_v47  ;;  %v25059_v47 = vld [vmem:[#allocation27_spill] sm:$0xff] }
 0xe1e   :  { %v12288_v44 = vsel %vm4441_vm2, %v12270_v19, 0  ;;  %v24213_v19 = vpack.c.bf16 %v12404_v5, %v12392_v15  ;;  %v24292_v15 = vpack.c.bf16 %v12402_v43, %v12390_v12  ;;  %v25061_v5 = vand.u32 4294901760, %v24163_v45 }
 0xe1f   :  { %v24201_v20 = vand.u32 4294901760, %v12288_v44  ;;  %v24217_v62 = vpack.c.bf16 %v12422_v24, %v12410_v33  ;;  %v25063_v33 = vand.u32 4294901760, %v24173_v10 }
 0xe20   :  { %v24298_v54 = vpack.c.bf16 %v25062_v18, %v25061_v5 }
 0xe21   :  { %v12372_v46 = vsub.f32 %v12288_v44, %v24201_v20  ;;  %v24248_v44 = vpack.c.bf16 %v24178_v42, %v24173_v10  ;;  %v24306_v24 = vpack.c.bf16 %v12420_v63, %v25063_v33 }
 0xe23   :  { %v24210_v4 = vand.u32 4294901760, %v12372_v46 }
 0xe25   :  { %v12374_v21 = vsub.f32 %v12372_v46, %v24210_v4 }
 0xe27   :  { %v12375_v8 = vand.u32 4294901760, %v12374_v21 }
 0xe29   :  { %12376 = vmatmul.mubr.f32.vlgmr.msra.gmra.mrb[26].mxu0 %v12375_v8  ;;  %18309 = vmatmul.mubr.f32.vlgmr.msra.gmra.mrb[118].mxu1 %v12375_v8  ;;  %v24238_v8 = vpack.c.bf16 %v24158_v38, %v24153_v17  ;;  %v13478_v17 = vpop.permute.xlu1 %13477  ;;  %v25064_v38 = vld [vmem:[#allocation12_spill] sm:$0xff] }
 0xe2a   :  { %20005 = vmatpush1.bf16.msra.mxu0 %v24213_v19  ;;  %20096 = vmatpush3.bf16.msra.mxu1 %v24215_v57  ;;  %v13480_v45 = vsel %vm78_vm0, %v25064_v38, %v13478_v17 }
 0xe2b   :  { %20007 = vmatprep.subr.bf16.mxu0 %v24217_v62  ;;  %20097 = vmatprep.subr.bf16.mxu1 %v24922_v34  ;;  %v13482_v41 = vsel %vm4441_vm2, %v13480_v45, 0 }
 0xe2c   :  { %12526 = vmatprep.mubr.f32.mxu0 %v24921_v39  ;;  %18327 = vmatprep.mubr.msk.f32.mxu1 %vm21143_vm1, %v24921_v39  ;;  %v24351_v10 = vand.u32 4294901760, %v13482_v41 }
 0xe2e   :  { %20009 = vmatpush1.bf16.msra.mxu0 %v24045_v7  ;;  %20099 = vmatpush3.bf16.msra.mxu1 %v24054_v1  ;;  %v13566_v42 = vsub.f32 %v13482_v41, %v24351_v10 }
 0xe2f   :  { %20011 = vmatprep.subr.bf16.mxu0 %v24059_v13  ;;  %20100 = vmatprep.subr.bf16.mxu1 %v24922_v34 }
 0xe30   :  { %v24369_v12 = vand.u32 4294901760, %v13566_v42 }
 0xe32   :  { %20013 = vmatpush1.bf16.msra.mxu0 %v24070_v16  ;;  %20102 = vmatpush3.bf16.msra.mxu1 %v24082_v14  ;;  %v13568_v43 = vsub.f32 %v13566_v42, %v24369_v12 }
 0xe33   :  { %20015 = vmatprep.subr.bf16.mxu0 %v24084_v27  ;;  %20103 = vmatprep.subr.bf16.mxu1 %v24922_v34 }
 0xe34   :  { %v13569_v63 = vand.u32 4294901760, %v13568_v43 }
 0xe36   :  { %20017 = vmatpush1.bf16.msra.mxu0 %v24090_v53  ;;  %20105 = vmatpush3.bf16.msra.mxu1 %v24112_v58 }
 0xe37   :  { %20019 = vmatprep.subr.bf16.mxu0 %v24080_v56  ;;  %20106 = vmatprep.subr.bf16.mxu1 %v24922_v34 }
 0xe39   :  { %12528 = vmatmul.mubr.f32.vlgmr.msra.gmra.mrb[26].mxu0 %v24201_v20  ;;  %18328 = vmatmul.mubr.f32.vlgmr.msra.gmra.mrb[120].mxu1 %v24201_v20 }
 0xe3a   :  { %20021 = vmatpush1.bf16.msra.mxu0 %v24238_v8  ;;  %20108 = vmatpush3.bf16.msra.mxu1 %v24242_v61 }
 0xe3b   :  { %20023 = vmatprep.subr.bf16.mxu0 %v24248_v44  ;;  %20109 = vmatprep.subr.bf16.mxu1 %v24922_v34 }
 0xe3c   :  { %12630 = vmatprep.mubr.f32.mxu0 %v24921_v39  ;;  %18346 = vmatprep.mubr.msk.f32.mxu1 %vm21143_vm1, %v24921_v39 }
 0xe3e   :  { %20025 = vmatpush1.bf16.msra.mxu0 %v24088_v3  ;;  %20111 = vmatpush3.bf16.msra.mxu1 %v24094_v30 }
 0xe3f   :  { %20027 = vmatprep.subr.bf16.mxu0 %v24098_v32  ;;  %20112 = vmatprep.subr.bf16.mxu1 %v24922_v34 }
 0xe42   :  { %20029 = vmatpush1.bf16.msra.mxu0 %v24102_v9  ;;  %20114 = vmatpush3.bf16.msra.mxu1 %v24104_v26 }
 0xe43   :  { %20031 = vmatprep.subr.bf16.mxu0 %v24106_v35  ;;  %20115 = vmatprep.subr.bf16.mxu1 %v24922_v34 }
 0xe46   :  { %20033 = vmatpush1.bf16.msra.mxu0 %v24108_v25  ;;  %20117 = vmatpush3.bf16.msra.mxu1 %v24110_v48 }
 0xe47   :  { %20035 = vmatprep.subr.bf16.mxu0 %v23843_v22  ;;  %20118 = vmatprep.subr.bf16.mxu1 %v24922_v34 }
 0xe49   :  { %12633 = vmatmul.mubr.f32.vlgmr.msra.gmra.mrb[26].mxu0 %v12372_v46  ;;  %18347 = vmatmul.mubr.f32.vlgmr.msra.gmra.mrb[122].mxu1 %v12372_v46  ;;  %v25060_v46 = vld [vmem:[#allocation36_spill] sm:$0xff] }
 0xe4a   :  { %20037 = vmatpush1.bf16.msra.mxu0 %v23851_v23  ;;  %20120 = vmatpush3.bf16.msra.mxu1 %v23857_v50 }
 0xe4b   :  { %20039 = vmatprep.subr.bf16.mxu0 %v23864_v6  ;;  %20121 = vmatprep.subr.bf16.mxu1 %v24922_v34 }
 0xe4c   :  { %12719 = vmatprep.mubr.f32.mxu0 %v24921_v39  ;;  %18365 = vmatprep.mubr.msk.f32.mxu1 %vm21143_vm1, %v24921_v39 }
 0xe4e   :  { %20041 = vmatpush1.bf16.msra.mxu0 %v23911_v29  ;;  %20123 = vmatpush3.bf16.msra.mxu1 %v23921_v49 }
 0xe4f   :  { %20043 = vmatprep.subr.bf16.mxu0 %v25055_v0  ;;  %20124 = vmatprep.subr.bf16.mxu1 %v24922_v34 }
 0xe52   :  { %20045 = vmatpush1.bf16.msra.mxu0 %v25056_v60  ;;  %20126 = vmatpush3.bf16.msra.mxu1 %v25057_v40 }
 0xe53   :  { %20047 = vmatprep.subr.bf16.mxu0 %v25058_v2  ;;  %20127 = vmatprep.subr.bf16.mxu1 %v24922_v34 }
 0xe56   :  { %20049 = vmatpush1.bf16.msra.mxu0 %v25059_v47  ;;  %20129 = vmatpush3.bf16.msra.mxu1 %v25060_v46 }
 0xe57   :  { %20051 = vmatprep.subr.bf16.mxu0 %v24118_v11  ;;  %20130 = vmatprep.subr.bf16.mxu1 %v24922_v34 }
 0xe59   :  { %12723 = vmatmul.mubr.f32.vlgmr.msra.gmra.mrb[26].mxu0 %v24210_v4  ;;  %18366 = vmatmul.mubr.f32.vlgmr.msra.gmra.mrb[124].mxu1 %v24210_v4 }
 0xe5a   :  { %20053 = vmatpush1.bf16.msra.mxu0 %v24292_v15  ;;  %20132 = vmatpush3.bf16.msra.mxu1 %v24298_v54 }
 0xe5b   :  { %20055 = vmatprep.subr.bf16.mxu0 %v24306_v24  ;;  %20133 = vmatprep.subr.bf16.mxu1 %v24922_v34 }
 0xe5c   :  { %12841 = vmatprep.mubr.f32.mxu0 %v24921_v39  ;;  %18384 = vmatprep.mubr.msk.f32.mxu1 %vm21143_vm1, %v24921_v39 }
 0xe5e   :  { %20057 = vmatpush1.bf16.msra.mxu0 %v24124_v36  ;;  %20135 = vmatpush3.bf16.msra.mxu1 %v24130_v59 }
 0xe5f   :  { %20059 = vmatprep.subr.bf16.mxu0 %v24136_v37  ;;  %20136 = vmatprep.subr.bf16.mxu1 %v24922_v34 }
 0xe62   :  { %20061 = vmatpush1.bf16.msra.mxu0 %v24140_v51  ;;  %20138 = vmatpush3.bf16.msra.mxu1 %v24142_v31 }
 0xe63   :  { %20063 = vmatprep.subr.bf16.mxu0 %v24144_v52  ;;  %20139 = vmatprep.subr.bf16.mxu1 %v24922_v34 }
 0xe66   :  { %20065 = vmatpush1.bf16.msra.mxu0 %v24146_v55  ;;  %20141 = vmatpush3.bf16.msra.mxu1 %v24148_v28 }
 0xe67   :  { %20067 = vmatprep.subr.bf16.mxu0 %v23843_v22  ;;  %20142 = vmatprep.subr.bf16.mxu1 %v24922_v34 }
 0xe69   :  { %12843 = vmatmul.mubr.f32.vlgmr.msra.gmra.mrb[26].mxu0 %v24201_v20  ;;  %18385 = vmatmul.mubr.f32.vlgmr.msra.gmra.mrb[126].mxu1 %v24201_v20 }
 0xe6a   :  { %20069 = vmatpush1.bf16.msra.mxu0 %v23851_v23  ;;  %20144 = vmatpush3.bf16.msra.mxu1 %v23857_v50 }
 0xe6b   :  { %20071 = vmatprep.subr.bf16.mxu0 %v23864_v6  ;;  %20145 = vmatprep.subr.bf16.mxu1 %v24922_v34 }
 0xe6c   :  { %12929 = vmatprep.mubr.f32.mxu0 %v24921_v39  ;;  %18403 = vmatprep.mubr.msk.f32.mxu1 %vm21143_vm1, %v24921_v39 }
 0xe6e   :  { %20073 = vmatpush1.bf16.msra.mxu0 %v23911_v29  ;;  %20147 = vmatpush3.bf16.msra.mxu1 %v23921_v49 }
 0xe6f   :  { %20075 = vmatprep.subr.bf16.mxu0 %v25055_v0  ;;  %20148 = vmatprep.subr.bf16.mxu1 %v24922_v34 }
 0xe72   :  { %20077 = vmatpush1.bf16.msra.mxu0 %v25056_v60  ;;  %20150 = vmatpush3.bf16.msra.mxu1 %v25057_v40 }
 0xe73   :  { %20079 = vmatprep.subr.bf16.mxu0 %v25058_v2  ;;  %20151 = vmatprep.subr.bf16.mxu1 %v24922_v34 }
 0xe76   :  { %20081 = vmatpush1.bf16.msra.mxu0 %v25059_v47  ;;  %20153 = vmatpush3.bf16.msra.mxu1 %v25060_v46 }
 0xe77   :  { %20155 = vmatprep.subr.bf16.mxu0 %v23843_v22  ;;  %20250 = vmatprep.subr.bf16.mxu1 %v24922_v34 }
 0xe79   :  { %12931 = vmatmul.mubr.f32.vlgmr.msra.gmra.mrb[26].mxu0 %v24201_v20  ;;  %18404 = vmatmul.mubr.f32.vlgmr.msra.gmra.mrb[128].mxu1 %v24201_v20  ;;  %v25065_v20 = vld [vmem:[#allocation37_spill] sm:$0xff] }
 0xe7a   :  { %20157 = vmatpush1.bf16.msra.mxu0 %v23851_v23  ;;  %20252 = vmatpush3.bf16.msra.mxu1 %v23857_v50 }
 0xe7b   :  { %20159 = vmatprep.subr.bf16.mxu0 %v23864_v6  ;;  %20253 = vmatprep.subr.bf16.mxu1 %v24922_v34 }
 0xe7c   :  { %13564 = vmatprep.mubr.f32.mxu0 %v24921_v39  ;;  %18422 = vmatprep.mubr.msk.f32.mxu1 %vm21143_vm1, %v24921_v39 }
 0xe7e   :  { %20161 = vmatpush1.bf16.msra.mxu0 %v23911_v29  ;;  %20255 = vmatpush3.bf16.msra.mxu1 %v23921_v49 }
 0xe7f   :  { %20163 = vmatprep.subr.bf16.mxu0 %v25055_v0  ;;  %20256 = vmatprep.subr.bf16.mxu1 %v24922_v34 }
 0xe82   :  { %20165 = vmatpush1.bf16.msra.mxu0 %v25056_v60  ;;  %20258 = vmatpush3.bf16.msra.mxu1 %v25057_v40 }
 0xe83   :  { %20167 = vmatprep.subr.bf16.mxu0 %v25058_v2  ;;  %20259 = vmatprep.subr.bf16.mxu1 %v24922_v34 }
 0xe86   :  { %20169 = vmatpush1.bf16.msra.mxu0 %v25059_v47  ;;  %20261 = vmatpush3.bf16.msra.mxu1 %v25060_v46 }
 0xe87   :  { %20171 = vmatprep.subr.bf16.mxu0 %v25065_v20  ;;  %20262 = vmatprep.subr.bf16.mxu1 %v24922_v34 }
 0xe89   :  { %13570 = vmatmul.mubr.f32.vlgmr.msra.gmra.mrb[28].mxu0 %v13569_v63  ;;  %18423 = vmatmul.mubr.f32.vlgmr.msra.gmra.mrb[130].mxu1 %v13569_v63 }
 0xe8a   :  { %20173 = vmatpush1.bf16.msra.mxu0 %v24213_v19  ;;  %20264 = vmatpush3.bf16.msra.mxu1 %v24215_v57 }
 0xe8b   :  { %20175 = vmatprep.subr.bf16.mxu0 %v24217_v62  ;;  %20265 = vmatprep.subr.bf16.mxu1 %v24922_v34 }
 0xe8c   :  { %13720 = vmatprep.mubr.f32.mxu0 %v24921_v39  ;;  %18441 = vmatprep.mubr.msk.f32.mxu1 %vm21143_vm1, %v24921_v39 }
 0xe8e   :  { %20177 = vmatpush1.bf16.msra.mxu0 %v24045_v7  ;;  %20267 = vmatpush3.bf16.msra.mxu1 %v24054_v1  ;;  %v14680_v1 = vld [vmem:[#allocation4 + $0x208] sm:$0xff] }
 0xe8f   :  { %20179 = vmatprep.subr.bf16.mxu0 %v24059_v13  ;;  %20268 = vmatprep.subr.bf16.mxu1 %v24922_v34  ;;  %v14681_v13 = vld [vmem:[#allocation4 + $0x210] sm:$0xff] }
 0xe92   :  { %20181 = vmatpush1.bf16.msra.mxu0 %v24070_v16  ;;  %20270 = vmatpush3.bf16.msra.mxu1 %v24082_v14  ;;  %v14676_v16 = vld [vmem:[#allocation4 + $0x1e8] sm:$0xff] }
 0xe93   :  { %20183 = vmatprep.subr.bf16.mxu0 %v24084_v27  ;;  %20271 = vmatprep.subr.bf16.mxu1 %v24922_v34 }
 0xe96   :  { %20185 = vmatpush1.bf16.msra.mxu0 %v24090_v53  ;;  %20273 = vmatpush3.bf16.msra.mxu1 %v24112_v58  ;;  %v14686_v53 = vld [vmem:[#allocation4 + $0x238] sm:$0xff] }
 0xe97   :  { %20187 = vmatprep.subr.bf16.mxu0 %v24080_v56  ;;  %20274 = vmatprep.subr.bf16.mxu1 %v24922_v34  ;;  %v14684_v56 = vld [vmem:[#allocation4 + $0x228] sm:$0xff] }
 0xe99   :  { %13722 = vmatmul.mubr.f32.vlgmr.msra.gmra.mrb[28].mxu0 %v24351_v10  ;;  %18442 = vmatmul.mubr.f32.vlgmr.msra.gmra.mrb[132].mxu1 %v24351_v10 }
 0xe9a   :  { %20189 = vmatpush1.bf16.msra.mxu0 %v24238_v8  ;;  %20276 = vmatpush3.bf16.msra.mxu1 %v24242_v61 }
 0xe9b   :  { %20191 = vmatprep.subr.bf16.mxu0 %v24248_v44  ;;  %20277 = vmatprep.subr.bf16.mxu1 %v24922_v34 }
 0xe9c   :  { %13824 = vmatprep.mubr.f32.mxu0 %v24921_v39  ;;  %18460 = vmatprep.mubr.msk.f32.mxu1 %vm21143_vm1, %v24921_v39 }
 0xe9e   :  { %20193 = vmatpush1.bf16.msra.mxu0 %v24088_v3  ;;  %20279 = vmatpush3.bf16.msra.mxu1 %v24094_v30  ;;  %v14683_v3 = vld [vmem:[#allocation4 + $0x220] sm:$0xff]  ;;  %v24492_v30 = vpack.c.bf16 %v14684_v56, %v14681_v13 }
 0xe9f   :  { %20195 = vmatprep.subr.bf16.mxu0 %v24098_v32  ;;  %20280 = vmatprep.subr.bf16.mxu1 %v24922_v34  ;;  %v24497_v32 = vpack.c.bf16 %v14686_v53, %v14683_v3  ;;  %v24530_v56 = vld [vmem:[#allocation4 + $0x2a4] ss:$0 sm:$0xff] }
 0xea2   :  { %20197 = vmatpush1.bf16.msra.mxu0 %v24102_v9  ;;  %20282 = vmatpush3.bf16.msra.mxu1 %v24104_v26 }
 0xea3   :  { %20199 = vmatprep.subr.bf16.mxu0 %v24106_v35  ;;  %20283 = vmatprep.subr.bf16.mxu1 %v24922_v34  ;;  %v12265_v35 = vld [vmem:[#allocation4 + $0x2a3] ss:$8 sm:$0x7] }
 0xea6   :  { %20201 = vmatpush1.bf16.msra.mxu0 %v24108_v25  ;;  %20285 = vmatpush3.bf16.msra.mxu1 %v24110_v48  ;;  %v25066_v25 = vld [vmem:[#allocation10_spill] sm:$0xff] }
 0xea7   :  { %20203 = vmatprep.subr.bf16.mxu0 %v23843_v22  ;;  %20286 = vmatprep.subr.bf16.mxu1 %v24922_v34  ;;  %v12283_v48 = vrot.slane %v12265_v35, %v25066_v25 }
 0xea9   :  { %13827 = vmatmul.mubr.f32.vlgmr.msra.gmra.mrb[28].mxu0 %v13566_v42  ;;  %18461 = vmatmul.mubr.f32.vlgmr.msra.gmra.mrb[134].mxu1 %v13566_v42  ;;  %v25067_v42 = vld [vmem:[#allocation18_spill] sm:$0xff] }
 0xeaa   :  { %20205 = vmatpush1.bf16.msra.mxu0 %v23851_v23  ;;  %20288 = vmatpush3.bf16.msra.mxu1 %v23857_v50 }
 0xeab   :  { %20207 = vmatprep.subr.bf16.mxu0 %v23864_v6  ;;  %20289 = vmatprep.subr.bf16.mxu1 %v24922_v34 }
 0xeac   :  { %13913 = vmatprep.mubr.f32.mxu0 %v24921_v39  ;;  %18479 = vmatprep.mubr.msk.f32.mxu1 %vm21143_vm1, %v24921_v39 }
 0xeae   :  { %20209 = vmatpush1.bf16.msra.mxu0 %v23911_v29  ;;  %20291 = vmatpush3.bf16.msra.mxu1 %v23921_v49 }
 0xeaf   :  { %20211 = vmatprep.subr.bf16.mxu0 %v25055_v0  ;;  %20292 = vmatprep.subr.bf16.mxu1 %v24922_v34 }
 0xeb2   :  { %20213 = vmatpush1.bf16.msra.mxu0 %v25056_v60  ;;  %20294 = vmatpush3.bf16.msra.mxu1 %v25057_v40 }
 0xeb3   :  { %20215 = vmatprep.subr.bf16.mxu0 %v25058_v2  ;;  %20295 = vmatprep.subr.bf16.mxu1 %v24922_v34 }
 0xeb6   :  { %20217 = vmatpush1.bf16.msra.mxu0 %v25059_v47  ;;  %20297 = vmatpush3.bf16.msra.mxu1 %v25060_v46 }
 0xeb7   :  { %20219 = vmatprep.subr.bf16.mxu0 %v24118_v11  ;;  %20298 = vmatprep.subr.bf16.mxu1 %v24922_v34  ;;  %v14677_v11 = vld [vmem:[#allocation4 + $0x1f0] sm:$0xff] }
 0xeb8   :  { %v24487_v14 = vpack.c.bf16 %v14680_v1, %v14677_v11 }
 0xeb9   :  { %13917 = vmatmul.mubr.f32.vlgmr.msra.gmra.mrb[28].mxu0 %v24369_v12  ;;  %18480 = vmatmul.mubr.f32.vlgmr.msra.gmra.mrb[136].mxu1 %v24369_v12  ;;  %v24523_v12 = vrot.slane %v12265_v35, %v25067_v42 }
 0xeba   :  { %20221 = vmatpush1.bf16.msra.mxu0 %v24292_v15  ;;  %20300 = vmatpush3.bf16.msra.mxu1 %v24298_v54 }
 0xebb   :  { %20223 = vmatprep.subr.bf16.mxu0 %v24306_v24  ;;  %20301 = vmatprep.subr.bf16.mxu1 %v24922_v34 }
 0xebc   :  { %14035 = vmatprep.mubr.f32.mxu0 %v24921_v39  ;;  %18498 = vmatprep.mubr.msk.f32.mxu1 %vm21143_vm1, %v24921_v39 }
 0xebe   :  { %20225 = vmatpush1.bf16.msra.mxu0 %v24124_v36  ;;  %20303 = vmatpush3.bf16.msra.mxu1 %v24130_v59 }
 0xebf   :  { %20227 = vmatprep.subr.bf16.mxu0 %v24136_v37  ;;  %20304 = vmatprep.subr.bf16.mxu1 %v24922_v34 }
 0xec2   :  { %20229 = vmatpush1.bf16.msra.mxu0 %v24140_v51  ;;  %20306 = vmatpush3.bf16.msra.mxu1 %v24142_v31 }
 0xec3   :  { %20231 = vmatprep.subr.bf16.mxu0 %v24144_v52  ;;  %20307 = vmatprep.subr.bf16.mxu1 %v24922_v34 }
 0xec6   :  { %20233 = vmatpush1.bf16.msra.mxu0 %v24146_v55  ;;  %20309 = vmatpush3.bf16.msra.mxu1 %v24148_v28 }
 0xec7   :  { %20235 = vmatprep.subr.bf16.mxu0 %v23843_v22  ;;  %20310 = vmatprep.subr.bf16.mxu1 %v24922_v34  ;;  %v14679_v22 = vld [vmem:[#allocation4 + $0x200] sm:$0xff] }
 0xec9   :  { %14037 = vmatmul.mubr.f32.vlgmr.msra.gmra.mrb[28].mxu0 %v24351_v10  ;;  %18499 = vmatmul.mubr.f32.vlgmr.msra.gmra.mrb[138].mxu1 %v24351_v10 }
 0xeca   :  { %20237 = vmatpush1.bf16.msra.mxu0 %v23851_v23  ;;  %20312 = vmatpush3.bf16.msra.mxu1 %v23857_v50  ;;  %v24477_v23 = vpack.c.bf16 %v14679_v22, %v14676_v16  ;;  %v14675_v50 = vld [vmem:[#allocation4 + $0x1e0] sm:$0xff] }
 0xecb   :  { %20239 = vmatprep.subr.bf16.mxu0 %v23864_v6  ;;  %20313 = vmatprep.subr.bf16.mxu1 %v24922_v34  ;;  %v14678_v6 = vld [vmem:[#allocation4 + $0x1f8] sm:$0xff] }
 0xecc   :  { %14123 = vmatprep.mubr.f32.mxu0 %v24921_v39  ;;  %18517 = vmatprep.mubr.msk.f32.mxu1 %vm21143_vm1, %v24921_v39  ;;  %v24481_v27 = vpack.c.bf16 %v14678_v6, %v14675_v50  ;;  %v25068_v6 = vld [vmem:[#allocation21_spill] sm:$0xff] }
 0xece   :  { %20241 = vmatpush1.bf16.msra.mxu0 %v23911_v29  ;;  %20315 = vmatpush3.bf16.msra.mxu1 %v23921_v49  ;;  %v14682_v29 = vld [vmem:[#allocation4 + $0x218] sm:$0xff]  ;;  %v14685_v49 = vld [vmem:[#allocation4 + $0x230] sm:$0xff] }
 0xecf   :  { %20243 = vmatprep.subr.bf16.mxu0 %v25055_v0  ;;  %20316 = vmatprep.subr.bf16.mxu1 %v24922_v34  ;;  %v24484_v7 = vpack.c.bf16 %v14685_v49, %v14682_v29  ;;  %v24527_v29 = vrot.slane %v12265_v35, %v25068_v6 }
 0xed2   :  { %20245 = vmatpush1.bf16.msra.mxu0 %v25056_v60  ;;  %20318 = vmatpush3.bf16.msra.mxu1 %v25057_v40 }
 0xed3   :  { %20247 = vmatprep.subr.bf16.mxu0 %v25058_v2  ;;  %20319 = vmatprep.subr.bf16.mxu1 %v24922_v34 }
 0xed6   :  { %20249 = vmatpush1.bf16.msra.mxu0 %v25059_v47  ;;  %20321 = vmatpush3.bf16.msra.mxu1 %v25060_v46 }
 0xed7   :  { %20323 = vmatprep.subr.bf16.mxu0 %v24477_v23  ;;  %20330 = vmatprep.subr.bf16.mxu1 %v24922_v34 }
 0xed9   :  { %14125 = vmatmul.mubr.f32.vlgmr.msra.gmra.mrb[28].mxu0 %v24351_v10  ;;  %18518 = vmatmul.mubr.f32.vlgmr.msra.gmra.mrb[140].mxu1 %v24351_v10 }
 0xeda   :  { %20325 = vmatpush1.bf16.msra.mxu0 %v24481_v27  ;;  %14751 = vmatprep.mubr.f32.mxu0 %v24921_v39 }
 0xedb   :  { %20327 = vmatprep.subr.bf16.mxu0 %v24484_v7  ;;  %20332 = vmatpush3.bf16.msra.mxu1 %v24487_v14 }
 0xedc   :  { %20333 = vmatprep.subr.bf16.mxu1 %v24922_v34  ;;  %18528 = vmatprep.mubr.msk.f32.mxu1 %vm21143_vm1, %v24921_v39 }
 0xede   :  { %20329 = vmatpush1.bf16.msra.mxu0 %v24492_v30 }
 0xedf   :  { %20335 = vmatpush3.bf16.msra.mxu1 %v24497_v32  ;;  %20337 = vmatprep.subr.bf16.mxu0 %v24477_v23 }
 0xee0   :  { %20344 = vmatprep.subr.bf16.mxu1 %v24922_v34 }
 0xee1   :  { %14752 = vmatmul.mubr.f32.vlgmr.msra.gmra.mrb[26].mxu0 %v24921_v39 }
 0xee2   :  { %18529 = vmatmul.mubr.f32.vlgmr.msra.gmra.mrb[142].mxu1 %v24921_v39  ;;  %20339 = vmatpush1.bf16.msra.mxu0 %v24481_v27 }
 0xee3   :  { %20346 = vmatpush3.bf16.msra.mxu1 %v24487_v14  ;;  %20341 = vmatprep.subr.bf16.mxu0 %v24484_v7 }
 0xee4   :  { %20347 = vmatprep.subr.bf16.mxu1 %v24922_v34  ;;  %14919 = vmatprep.mubr.f32.mxu0 %v24921_v39 }
 0xee5   :  { %18539 = vmatprep.mubr.msk.f32.mxu1 %vm21143_vm1, %v24921_v39 }
 0xee6   :  { %20343 = vmatpush1.bf16.msra.mxu0 %v24492_v30 }
 0xee7   :  { %20349 = vmatpush3.bf16.msra.mxu1 %v24497_v32  ;;  %20351 = vmatprep.subr.bf16.mxu0 %v24477_v23 }
 0xee8   :  { %20358 = vmatprep.subr.bf16.mxu1 %v24922_v34 }
 0xefc   :  { %v13016_v9 = vpop.f32.mrb[118].mxu1 }
 0xefd   :  { %v18310_v26 = vpop.f32.mrb[119].mxu1  ;;  %v13017_v58 = vadd.f32 %v13016_v9, %v12283_v48 }
 0xf0c   :  { %v13127_v36 = vpop.f32.mrb[120].mxu1 }
 0xf0d   :  { %v13128_v59 = vadd.f32 %v13127_v36, %v13017_v58  ;;  %v18329_v37 = vpop.f32.mrb[121].mxu1 }
 0xf1c   :  { %v13215_v51 = vpop.f32.mrb[122].mxu1 }
 0xf1d   :  { %v13216_v31 = vadd.f32 %v13215_v51, %v13128_v59  ;;  %v18348_v52 = vpop.f32.mrb[123].mxu1  ;;  %v21087_v51 = vld [vmem:[#allocation4 + $0x2a3] ss:$8 sm:$0x7] }
 0xf2c   :  { %v13296_v55 = vpop.f32.mrb[124].mxu1 }
 0xf2d   :  { %v13297_v28 = vadd.f32 %v13296_v55, %v13216_v31  ;;  %v18367_v62 = vpop.f32.mrb[125].mxu1  ;;  %v24547_v31 = vrot.slane %v21087_v51, %v25067_v42 }
 0xf3c   :  { %v13391_v57 = vpop.f32.mrb[126].mxu1 }
 0xf3d   :  { %v13392_v4 = vadd.f32 %v13391_v57, %v13297_v28  ;;  %v18386_v21 = vpop.f32.mrb[127].mxu1 }
 0xf3e   :  { %v24551_v21 = vrot.slane %v21087_v51, %v25068_v6  ;;  %v21089_v51 = vld [vmem:[#allocation4 + $0x2a3] ss:$8 sm:$0x7] }
 0xf4c   :  { %v13470_v19 = vpop.f32.mrb[128].mxu1 }
 0xf4d   :  { %v13471_v8 = vadd.f32 %v13470_v19, %v13392_v4  ;;  %v18405_v61 = vpop.f32.mrb[129].mxu1 }
 0xf5c   :  { %v14210_v44 = vpop.f32.mrb[130].mxu1 }
 0xf5d   :  { %v18424_v0 = vpop.f32.mrb[131].mxu1  ;;  %v14211_v60 = vadd.f32 %v14210_v44, %v12283_v48 }
 0xf6c   :  { %v14321_v40 = vpop.f32.mrb[132].mxu1 }
 0xf6d   :  { %v14322_v2 = vadd.f32 %v14321_v40, %v14211_v60  ;;  %v18443_v47 = vpop.f32.mrb[133].mxu1 }
 0xf6e   :  { %v25069_v47 = vld [vmem:[#allocation39_spill] sm:$0xff] }
 0xf7c   :  { %v14409_v46 = vpop.f32.mrb[134].mxu1 }
 0xf7d   :  { %v14410_v15 = vadd.f32 %v14409_v46, %v14322_v2  ;;  %v18462_v5 = vpop.f32.mrb[135].mxu1 }
 0xf8c   :  { %v14490_v18 = vpop.f32.mrb[136].mxu1 }
 0xf8d   :  { %v14491_v54 = vadd.f32 %v14490_v18, %v14410_v15  ;;  %v18481_v33 = vpop.f32.mrb[137].mxu1 }
 0xf9c   :  { %v14585_v24 = vpop.f32.mrb[138].mxu1 }
 0xf9d   :  { %v14586_v17 = vadd.f32 %v14585_v24, %v14491_v54  ;;  %v18500_v38 = vpop.f32.mrb[139].mxu1 }
 0xfac   :  { %v14664_v45 = vpop.f32.mrb[140].mxu1 }
 0xfad   :  { %v24520_v41 = vadd.f32 %v14664_v45, %v14586_v17  ;;  %v18519_v10 = vpop.f32.mrb[141].mxu1  ;;  %v21088_v17 = vld [vmem:[#allocation4 + $0x2a3] ss:$8 sm:$0x7] }
 0xfae   :  { %v24570_v38 = vrot.slane %v21088_v17, %v25067_v42 }
 0xfb4   :  { %v14753_v43 = vpop.f32.mrb[26].mxu0 }
 0xfb5   :  { %v20546_v63 = vadd.f32 %v14753_v43, %v24523_v12  ;;  %v14755_v20 = vpop.f32.mrb[27].mxu0  ;;  %v14824_v16 = vpop.f32.mrb[142].mxu1 }
 0xfb6   :  { %v18530_v22 = vpop.f32.mrb[143].mxu1  ;;  %v20547_v49 = vadd.f32 %v14755_v20, %v24527_v29  ;;  %v14842_v3 = vadd.f32 %v14824_v16, %v24530_v56 }
 0xfb7   :  { %v16564_v50 = vmul.f32 -1.442695, %v20546_v63  ;;  %v24574_v22 = vrot.slane %v21088_v17, %v25068_v6 }
 0xfb8   :  { %v16565_v11 = vmul.f32 -1.442695, %v20547_v49 }
 0xfb9   :  { %21005 = vpow2.f32 %v16564_v50 }
 0xfba   :  { %21007 = vpow2.f32 %v16565_v11 }
 0xfc3   :  { %v21006_v1 = vpop.eup %21005 }
 0xfc4   :  { %v14836_v13 = vadd.f32 1.0, %v21006_v1  ;;  %v21008_v53 = vpop.eup %21007 }
 0xfc5   :  { %v14837_v25 = vadd.f32 1.0, %v21008_v53 }
 0xfc6   :  { %21009 = vrcp.f32 %v14836_v13 }
 0xfd0   :  { %v21010_v9 = vpop.eup %21009 }
 0xfd1   :  { %v14843_v26 = vmul.f32 %v21010_v9, %v14842_v3 }
 0xfd3   :  { %v14844_v48 = vadd.f32 %v14843_v26, %v13471_v8  ;;  %v25070_v26 = vld [vmem:[#allocation26_spill] sm:$0xff] }
 0xfd5   :  { %21011 = vtanh.f32 %v14844_v48 }
 0xfd6   :  { %21013 = vrcp.f32 %v14837_v25 }
 0xfdf   :  { %v21012_v35 = vpop.eup %21011 }
 0xfe0   :  { %v14846_v58 = vsub.f32 0.0, %v21012_v35  ;;  %v21014_v36 = vpop.eup %21013 }
 0xfe2   :  { %v14847_v59 = vmul.f32 %v21014_v36, %v14846_v58 }
 0xfe4   :  { %v14848_v37 = vadd.f32 %v21012_v35, %v14847_v59 }
 0xfe6   :  { %16566 = vmatmul.mubr.msk.f32.vlgmr.msra.gmra.mrb[22].mxu0 %vm78_vm0, %v14848_v37  ;;  %18540 = vmatmul.mubr.msk.f32.vlgmr.msra.gmra.mrb[144].mxu1 %vm78_vm0, %v14848_v37 }
 0xfe7   :  { %20353 = vmatpush1.bf16.msra.mxu0 %v24481_v27  ;;  %20360 = vmatpush3.bf16.msra.mxu1 %v24487_v14 }
 0xfe8   :  { %20355 = vmatprep.subr.bf16.mxu0 %v24484_v7  ;;  %20361 = vmatprep.subr.bf16.mxu1 %v24922_v34 }
 0xfe9   :  { %15087 = vmatprep.mubr.f32.mxu0 %v24921_v39  ;;  %18550 = vmatprep.mubr.msk.f32.mxu1 %vm21143_vm1, %v24921_v39 }
 0xfeb   :  { %20357 = vmatpush1.bf16.msra.mxu0 %v24492_v30  ;;  %20363 = vmatpush3.bf16.msra.mxu1 %v24497_v32 }
 0xfec   :  { %20365 = vmatprep.subr.bf16.mxu1 %v24477_v23  ;;  %20372 = vmatprep.subr.bf16.mxu0 %v24922_v34 }
0x10b9   :  { %v14921_v52 = vpop.f32.mrb[22].mxu0  ;;  %v14992_v55 = vpop.f32.mrb[144].mxu1 }
0x10ba   :  { %v20542_v28 = vadd.f32 %v14921_v52, %v24547_v31  ;;  %v14923_v62 = vpop.f32.mrb[23].mxu0  ;;  %v18541_v57 = vpop.f32.mrb[145].mxu1  ;;  %v15010_v60 = vadd.f32 %v14992_v55, %v24530_v56  ;;  %v4429_v52 = vrot.slane %v21089_v51, %v25067_v42 }
0x10bb   :  { %v20543_v19 = vadd.f32 %v14923_v62, %v24551_v21 }
0x10bc   :  { %v16568_v4 = vmul.f32 -1.442695, %v20542_v28 }
0x10bd   :  { %v16569_v8 = vmul.f32 -1.442695, %v20543_v19 }
0x10be   :  { %21015 = vpow2.f32 %v16568_v4 }
0x10bf   :  { %21017 = vpow2.f32 %v16569_v8  ;;  %v4433_v8 = vrot.slane %v21089_v51, %v25068_v6 }
0x10c8   :  { %v21016_v61 = vpop.eup %21015 }
0x10c9   :  { %v15004_v44 = vadd.f32 1.0, %v21016_v61  ;;  %v21018_v0 = vpop.eup %21017 }
0x10ca   :  { %v15005_v15 = vadd.f32 1.0, %v21018_v0 }
0x10cb   :  { %21019 = vrcp.f32 %v15004_v44 }
0x10d5   :  { %v21020_v40 = vpop.eup %21019 }
0x10d6   :  { %v15011_v2 = vmul.f32 %v21020_v40, %v15010_v60 }
0x10d8   :  { %v15012_v46 = vadd.f32 %v15011_v2, %v25069_v47 }
0x10da   :  { %21021 = vtanh.f32 %v15012_v46  ;;  %v25071_v46 = vld [vmem:[#allocation33_spill] sm:$0xff] }
0x10db   :  { %21023 = vrcp.f32 %v15005_v15 }
0x10e4   :  { %v21022_v5 = vpop.eup %21021 }
0x10e5   :  { %v15014_v18 = vsub.f32 %v14848_v37, %v21022_v5  ;;  %v21024_v54 = vpop.eup %21023 }
0x10e7   :  { %v15015_v33 = vmul.f32 %v21024_v54, %v15014_v18 }
0x10e9   :  { %v15016_v24 = vadd.f32 %v21022_v5, %v15015_v33 }
0x10eb   :  { %16570 = vmatmul.mubr.msk.f32.vlgmr.msra.gmra.mrb[18].mxu0 %vm78_vm0, %v15016_v24  ;;  %18551 = vmatmul.mubr.msk.f32.vlgmr.msra.gmra.mrb[146].mxu1 %vm78_vm0, %v15016_v24 }
0x10ec   :  { %20367 = vmatpush1.bf16.msra.mxu1 %v24481_v27  ;;  %20374 = vmatpush3.bf16.msra.mxu0 %v24487_v14 }
0x10ed   :  { %20369 = vmatprep.subr.bf16.mxu1 %v24484_v7  ;;  %20375 = vmatprep.subr.bf16.mxu0 %v24922_v34 }
0x10ee   :  { %15255 = vmatprep.mubr.f32.mxu1 %v24921_v39  ;;  %18561 = vmatprep.mubr.msk.f32.mxu0 %vm21143_vm1, %v24921_v39 }
0x10f0   :  { %20371 = vmatpush1.bf16.msra.mxu1 %v24492_v30  ;;  %20377 = vmatpush3.bf16.msra.mxu0 %v24497_v32 }
0x10f1   :  { %20379 = vmatprep.subr.bf16.mxu0 %v24477_v23  ;;  %20386 = vmatprep.subr.bf16.mxu1 %v24922_v34 }
0x11be   :  { %v15089_v45 = vpop.f32.mrb[18].mxu0  ;;  %v15160_v10 = vpop.f32.mrb[146].mxu1 }
0x11bf   :  { %v20538_v43 = vadd.f32 %v15089_v45, %v24570_v38  ;;  %v15091_v63 = vpop.f32.mrb[19].mxu0  ;;  %v18552_v20 = vpop.f32.mrb[147].mxu1  ;;  %v15178_v3 = vadd.f32 %v15160_v10, %v24530_v56 }
0x11c0   :  { %v20539_v50 = vadd.f32 %v15091_v63, %v24574_v22 }
0x11c1   :  { %v16572_v16 = vmul.f32 -1.442695, %v20538_v43 }
0x11c2   :  { %v16573_v49 = vmul.f32 -1.442695, %v20539_v50 }
0x11c3   :  { %21025 = vpow2.f32 %v16572_v16 }
0x11c4   :  { %21027 = vpow2.f32 %v16573_v49 }
0x11cd   :  { %v21026_v11 = vpop.eup %21025 }
0x11ce   :  { %v15172_v1 = vadd.f32 1.0, %v21026_v11  ;;  %v21028_v13 = vpop.eup %21027 }
0x11cf   :  { %v15173_v48 = vadd.f32 1.0, %v21028_v13 }
0x11d0   :  { %21029 = vrcp.f32 %v15172_v1 }
0x11da   :  { %v21030_v53 = vpop.eup %21029 }
0x11db   :  { %v15179_v9 = vmul.f32 %v21030_v53, %v15178_v3 }
0x11dd   :  { %v15180_v25 = vadd.f32 %v15179_v9, %v25070_v26  ;;  %v25072_v9 = vld [vmem:[#allocation34_spill] sm:$0xff] }
0x11df   :  { %21031 = vtanh.f32 %v15180_v25 }
0x11e0   :  { %21033 = vrcp.f32 %v15173_v48 }
0x11e9   :  { %v21032_v35 = vpop.eup %21031 }
0x11ea   :  { %v15182_v58 = vsub.f32 %v15016_v24, %v21032_v35  ;;  %v21034_v36 = vpop.eup %21033 }
0x11ec   :  { %v15183_v59 = vmul.f32 %v21034_v36, %v15182_v58 }
0x11ee   :  { %v15184_v37 = vadd.f32 %v21032_v35, %v15183_v59 }
0x11f0   :  { %16574 = vmatmul.mubr.msk.f32.vlgmr.msra.gmra.mrb[38].mxu1 %vm78_vm0, %v15184_v37  ;;  %18562 = vmatmul.mubr.msk.f32.vlgmr.msra.gmra.mrb[30].mxu0 %vm78_vm0, %v15184_v37 }
0x11f1   :  { %20381 = vmatpush1.bf16.msra.mxu0 %v24481_v27  ;;  %20388 = vmatpush3.bf16.msra.mxu1 %v24487_v14 }
0x11f2   :  { %20383 = vmatprep.subr.bf16.mxu0 %v24484_v7  ;;  %20389 = vmatprep.subr.bf16.mxu1 %v24922_v34 }
0x11f3   :  { %15423 = vmatprep.mubr.f32.mxu0 %v24921_v39  ;;  %18572 = vmatprep.mubr.msk.f32.mxu1 %vm21143_vm1, %v24921_v39 }
0x11f5   :  { %20385 = vmatpush1.bf16.msra.mxu0 %v24492_v30  ;;  %20391 = vmatpush3.bf16.msra.mxu1 %v24497_v32 }
0x11f6   :  { %20393 = vmatprep.subr.bf16.mxu0 %v24477_v23  ;;  %20400 = vmatprep.subr.bf16.mxu1 %v24922_v34 }
0x12c3   :  { %v15257_v55 = vpop.f32.mrb[38].mxu1  ;;  %v15328_v28 = vpop.f32.mrb[30].mxu0 }
0x12c4   :  { %v20534_v62 = vadd.f32 %v15257_v55, %v4429_v52  ;;  %v15259_v57 = vpop.f32.mrb[39].mxu1  ;;  %v18563_v4 = vpop.f32.mrb[31].mxu0  ;;  %v15346_v2 = vadd.f32 %v15328_v28, %v24530_v56 }
0x12c5   :  { %v20535_v61 = vadd.f32 %v15259_v57, %v4433_v8 }
0x12c6   :  { %v16576_v19 = vmul.f32 -1.442695, %v20534_v62 }
0x12c7   :  { %v16577_v44 = vmul.f32 -1.442695, %v20535_v61 }
0x12c8   :  { %21035 = vpow2.f32 %v16576_v19 }
0x12c9   :  { %21037 = vpow2.f32 %v16577_v44 }
0x12d2   :  { %v21036_v0 = vpop.eup %21035 }
0x12d3   :  { %v15340_v60 = vadd.f32 1.0, %v21036_v0  ;;  %v21038_v40 = vpop.eup %21037 }
0x12d4   :  { %v15341_v5 = vadd.f32 1.0, %v21038_v40 }
0x12d5   :  { %21039 = vrcp.f32 %v15340_v60  ;;  %v25073_v60 = vld [vmem:[#allocation25_spill] sm:$0xff] }
0x12df   :  { %v21040_v47 = vpop.eup %21039 }
0x12e0   :  { %v15347_v42 = vmul.f32 %v21040_v47, %v15346_v2 }
0x12e2   :  { %v15348_v15 = vadd.f32 %v15347_v42, %v25071_v46 }
0x12e4   :  { %21041 = vtanh.f32 %v15348_v15 }
0x12e5   :  { %21043 = vrcp.f32 %v15341_v5 }
0x12ee   :  { %v21042_v18 = vpop.eup %21041 }
0x12ef   :  { %v15350_v54 = vsub.f32 %v15184_v37, %v21042_v18  ;;  %v21044_v33 = vpop.eup %21043 }
0x12f1   :  { %v15351_v6 = vmul.f32 %v21044_v33, %v15350_v54 }
0x12f3   :  { %v15352_v24 = vadd.f32 %v21042_v18, %v15351_v6 }
0x12f5   :  { %16578 = vmatmul.mubr.msk.f32.vlgmr.msra.gmra.mrb[16].mxu0 %vm78_vm0, %v15352_v24  ;;  %18573 = vmatmul.mubr.msk.f32.vlgmr.msra.gmra.mrb[148].mxu1 %vm78_vm0, %v15352_v24 }
0x12f6   :  { %20395 = vmatpush1.bf16.msra.mxu0 %v24481_v27  ;;  %20402 = vmatpush3.bf16.msra.mxu1 %v24487_v14 }
0x12f7   :  { %20397 = vmatprep.subr.bf16.mxu0 %v24484_v7  ;;  %20403 = vmatprep.subr.bf16.mxu1 %v24922_v34 }
0x12f8   :  { %15591 = vmatprep.mubr.f32.mxu0 %v24921_v39  ;;  %18583 = vmatprep.mubr.msk.f32.mxu1 %vm21143_vm1, %v24921_v39 }
0x12fa   :  { %20399 = vmatpush1.bf16.msra.mxu0 %v24492_v30  ;;  %20405 = vmatpush3.bf16.msra.mxu1 %v24497_v32 }
0x12fb   :  { %20407 = vmatprep.subr.bf16.mxu0 %v24477_v23  ;;  %20414 = vmatprep.subr.bf16.mxu1 %v24922_v34 }
0x13c8   :  { %v15425_v17 = vpop.f32.mrb[16].mxu0  ;;  %v15496_v45 = vpop.f32.mrb[148].mxu1 }
0x13c9   :  { %v20536_v10 = vadd.f32 %v15425_v17, %v4429_v52  ;;  %v15427_v43 = vpop.f32.mrb[17].mxu0  ;;  %v18574_v63 = vpop.f32.mrb[149].mxu1  ;;  %v15514_v13 = vadd.f32 %v15496_v45, %v24530_v56 }
0x13ca   :  { %v20537_v16 = vadd.f32 %v15427_v43, %v4433_v8 }
0x13cb   :  { %v16580_v20 = vmul.f32 -1.442695, %v20536_v10  ;;  %v25074_v10 = vld [vmem:[#allocation38_spill] sm:$0xff] }
0x13cc   :  { %v16581_v50 = vmul.f32 -1.442695, %v20537_v16 }
0x13cd   :  { %21045 = vpow2.f32 %v16580_v20 }
0x13ce   :  { %21047 = vpow2.f32 %v16581_v50 }
0x13d7   :  { %v21046_v49 = vpop.eup %21045 }
0x13d8   :  { %v15508_v11 = vadd.f32 1.0, %v21046_v49  ;;  %v21048_v1 = vpop.eup %21047  ;;  %v16025_v49 = vld [vmem:[#allocation4 + $0x240] sm:$0xff] }
0x13d9   :  { %v15509_v25 = vadd.f32 1.0, %v21048_v1  ;;  %v16027_v1 = vld [vmem:[#allocation4 + $0x270] sm:$0xff] }
0x13da   :  { %21049 = vrcp.f32 %v15508_v11  ;;  %v16026_v11 = vld [vmem:[#allocation4 + $0x258] sm:$0xff] }
0x13e4   :  { %v21050_v3 = vpop.eup %21049 }
0x13e5   :  { %v15515_v53 = vmul.f32 %v21050_v3, %v15514_v13  ;;  %v16034_v13 = vand.u32 4294901760, %v16025_v49  ;;  %v16037_v3 = vand.u32 4294901760, %v16026_v11 }
0x13e7   :  { %v15516_v26 = vadd.f32 %v15515_v53, %v25072_v9  ;;  %v16028_v53 = vld [vmem:[#allocation4 + $0x288] sm:$0xff]  ;;  %v16040_v9 = vand.u32 4294901760, %v16027_v1 }
0x13e9   :  { %21051 = vtanh.f32 %v15516_v26  ;;  %v16043_v26 = vand.u32 4294901760, %v16028_v53 }
0x13ea   :  { %21053 = vrcp.f32 %v15509_v25  ;;  %v24652_v25 = vpack.c.bf16 %v16037_v3, %v16034_v13 }
0x13f3   :  { %v21052_v48 = vpop.eup %21051 }
0x13f4   :  { %v15518_v35 = vsub.f32 %v15352_v24, %v21052_v48  ;;  %v21054_v58 = vpop.eup %21053 }
0x13f6   :  { %v15519_v36 = vmul.f32 %v21054_v58, %v15518_v35  ;;  %v24656_v35 = vsub.f32 %v16026_v11, %v16037_v3  ;;  %v24658_v58 = vsub.f32 %v16027_v1, %v16040_v9 }
0x13f8   :  { %v15520_v59 = vadd.f32 %v21052_v48, %v15519_v36  ;;  %v24654_v48 = vsub.f32 %v16025_v49, %v16034_v13  ;;  %v24660_v36 = vsub.f32 %v16028_v53, %v16043_v26 }
0x13fa   :  { %16582 = vmatmul.mubr.msk.f32.vlgmr.msra.gmra.mrb[20].mxu0 %vm78_vm0, %v15520_v59  ;;  %18584 = vmatmul.mubr.msk.f32.vlgmr.msra.gmra.mrb[150].mxu1 %vm78_vm0, %v15520_v59 }
0x13fb   :  { %20409 = vmatpush1.bf16.msra.mxu0 %v24481_v27  ;;  %20416 = vmatpush3.bf16.msra.mxu1 %v24487_v14 }
0x13fc   :  { %20411 = vmatprep.subr.bf16.mxu0 %v24484_v7  ;;  %20417 = vmatprep.subr.bf16.mxu1 %v24922_v34 }
0x13fd   :  { %15759 = vmatprep.mubr.f32.mxu0 %v24921_v39  ;;  %18594 = vmatprep.mubr.msk.f32.mxu1 %vm21143_vm1, %v24921_v39 }
0x13ff   :  { %20413 = vmatpush1.bf16.msra.mxu0 %v24492_v30  ;;  %20419 = vmatpush3.bf16.msra.mxu1 %v24497_v32 }
0x1400   :  { %20421 = vmatprep.subr.bf16.mxu0 %v24477_v23  ;;  %20428 = vmatprep.subr.bf16.mxu1 %v24922_v34 }
0x14cd   :  { %v15593_v37 = vpop.f32.mrb[20].mxu0  ;;  %v15664_v51 = vpop.f32.mrb[150].mxu1 }
0x14ce   :  { %v20540_v52 = vadd.f32 %v15593_v37, %v24570_v38  ;;  %v15595_v55 = vpop.f32.mrb[21].mxu0  ;;  %v18585_v28 = vpop.f32.mrb[151].mxu1  ;;  %v15682_v23 = vadd.f32 %v15664_v51, %v24530_v56  ;;  %v16115_v37 = vand.u32 4294901760, %v24654_v48  ;;  %v16122_v51 = vand.u32 4294901760, %v24656_v35 }
0x14cf   :  { %v20541_v57 = vadd.f32 %v15595_v55, %v24574_v22  ;;  %v16129_v28 = vand.u32 4294901760, %v24658_v58 }
0x14d0   :  { %v16584_v62 = vmul.f32 -1.442695, %v20540_v52  ;;  %v16116_v52 = vsub.f32 %v24654_v48, %v16115_v37  ;;  %v16123_v55 = vsub.f32 %v24656_v35, %v16122_v51 }
0x14d1   :  { %v16585_v4 = vmul.f32 -1.442695, %v20541_v57 }
0x14d2   :  { %21055 = vpow2.f32 %v16584_v62  ;;  %v16136_v62 = vand.u32 4294901760, %v24660_v36  ;;  %v16117_v57 = vand.u32 4294901760, %v16116_v52 }
0x14d3   :  { %21057 = vpow2.f32 %v16585_v4  ;;  %v16124_v4 = vand.u32 4294901760, %v16123_v55 }
0x14dc   :  { %v21056_v19 = vpop.eup %21055 }
0x14dd   :  { %v15676_v8 = vadd.f32 1.0, %v21056_v19  ;;  %v21058_v61 = vpop.eup %21057  ;;  %v16130_v19 = vsub.f32 %v24658_v58, %v16129_v28 }
0x14de   :  { %v15677_v2 = vadd.f32 1.0, %v21058_v61  ;;  %v20441_v61 = vpack.c.bf16 %v16124_v4, %v16117_v57 }
0x14df   :  { %21059 = vrcp.f32 %v15676_v8  ;;  %v16137_v8 = vsub.f32 %v24660_v36, %v16136_v62 }
0x14e9   :  { %v21060_v44 = vpop.eup %21059 }
0x14ea   :  { %v15683_v0 = vmul.f32 %v21060_v44, %v15682_v23  ;;  %v16131_v23 = vand.u32 4294901760, %v16130_v19  ;;  %v16138_v44 = vand.u32 4294901760, %v16137_v8 }
0x14ec   :  { %v15684_v40 = vadd.f32 %v15683_v0, %v25073_v60  ;;  %v20444_v0 = vpack.c.bf16 %v16138_v44, %v16131_v23  ;;  %v20447_v60 = vpack.c.bf16 %v24656_v35, %v24654_v48 }
0x14ee   :  { %21061 = vtanh.f32 %v15684_v40  ;;  %v20450_v40 = vpack.c.bf16 %v24660_v36, %v24658_v58 }
0x14ef   :  { %21063 = vrcp.f32 %v15677_v2  ;;  %v20459_v2 = vpack.c.bf16 %v16122_v51, %v16115_v37 }
0x14f8   :  { %v21062_v38 = vpop.eup %21061 }
0x14f9   :  { %v15686_v47 = vsub.f32 %v15520_v59, %v21062_v38  ;;  %v21064_v42 = vpop.eup %21063  ;;  %v24663_v59 = vpack.c.bf16 %v16043_v26, %v16040_v9 }
0x14fb   :  { %v15687_v46 = vmul.f32 %v21064_v42, %v15686_v47 }
0x14fd   :  { %v15688_v22 = vadd.f32 %v21062_v38, %v15687_v46  ;;  %v20462_v38 = vpack.c.bf16 %v16136_v62, %v16129_v28 }
0x14ff   :  { %16586 = vmatmul.mubr.msk.f32.vlgmr.msra.gmra.mrb[24].mxu0 %vm78_vm0, %v15688_v22  ;;  %18595 = vmatmul.mubr.msk.f32.vlgmr.msra.gmra.mrb[152].mxu1 %vm78_vm0, %v15688_v22 }
0x1500   :  { %20423 = vmatpush1.bf16.msra.mxu0 %v24481_v27  ;;  %20430 = vmatpush3.bf16.msra.mxu1 %v24487_v14 }
0x1501   :  { %20425 = vmatprep.subr.bf16.mxu0 %v24484_v7  ;;  %20431 = vmatprep.subr.bf16.mxu1 %v24922_v34 }
0x1502   :  { %15927 = vmatprep.mubr.f32.mxu0 %v24921_v39  ;;  %18605 = vmatprep.mubr.msk.f32.mxu1 %vm21143_vm1, %v24921_v39 }
0x1504   :  { %20427 = vmatpush1.bf16.msra.mxu0 %v24492_v30  ;;  %20433 = vmatpush3.bf16.msra.mxu1 %v24497_v32 }
0x1505   :  { %20434 = vmatprep.subr.bf16.mxu0 %v24922_v34 }
0x15d2   :  { %v15761_v15 = vpop.f32.mrb[24].mxu0  ;;  %v15832_v5 = vpop.f32.mrb[152].mxu1 }
0x15d3   :  { %v20544_v27 = vadd.f32 %v15761_v15, %v24547_v31  ;;  %v15763_v14 = vpop.f32.mrb[25].mxu0  ;;  %v18596_v18 = vpop.f32.mrb[153].mxu1  ;;  %v15850_v32 = vadd.f32 %v15832_v5, %v24530_v56 }
0x15d4   :  { %v20545_v54 = vadd.f32 %v15763_v14, %v24551_v21 }
0x15d5   :  { %v16588_v7 = vmul.f32 -1.442695, %v20544_v27 }
0x15d6   :  { %v16589_v33 = vmul.f32 -1.442695, %v20545_v54 }
0x15d7   :  { %21065 = vpow2.f32 %v16588_v7 }
0x15d8   :  { %21067 = vpow2.f32 %v16589_v33 }
0x15e1   :  { %v21066_v6 = vpop.eup %21065 }
0x15e2   :  { %v15844_v24 = vadd.f32 1.0, %v21066_v6  ;;  %v21068_v30 = vpop.eup %21067 }
0x15e3   :  { %v15845_v63 = vadd.f32 1.0, %v21068_v30 }
0x15e4   :  { %21069 = vrcp.f32 %v15844_v24 }
0x15ee   :  { %v21070_v17 = vpop.eup %21069 }
0x15ef   :  { %v15851_v45 = vmul.f32 %v21070_v17, %v15850_v32 }
0x15f1   :  { %v15852_v43 = vadd.f32 %v15851_v45, %v25074_v10 }
0x15f3   :  { %21071 = vtanh.f32 %v15852_v43 }
0x15f4   :  { %21073 = vrcp.f32 %v15845_v63 }
0x15fd   :  { %v21072_v31 = vpop.eup %21071 }
0x15fe   :  { %v15854_v20 = vsub.f32 %v15688_v22, %v21072_v31  ;;  %v21074_v16 = vpop.eup %21073 }
0x1600   :  { %v15855_v50 = vmul.f32 %v21074_v16, %v15854_v20 }
0x1602   :  { %v24644_v21 = vadd.f32 %v21072_v31, %v15855_v50 }
0x1604   :  { %16590 = vmatmul.mubr.msk.f32.vlgmr.msra.gmra.mrb[28].mxu0 %vm78_vm0, %v24644_v21  ;;  %18606 = vmatmul.mubr.msk.f32.vlgmr.msra.gmra.mrb[154].mxu1 %vm78_vm0, %v24644_v21 }
0x1605   :  { %18616 = vmatprep.mubr.msk.f32.mxu0 %vm21143_vm1, %v24921_v39  ;;  %20436 = vmatpush3.bf16.msra.mxu0 %v24652_v25 }
0x1606   :  { %20437 = vmatprep.subr.bf16.mxu0 %v24922_v34 }
0x1609   :  { %20439 = vmatpush3.bf16.msra.mxu0 %v24663_v59 }
0x160a   :  { %20440 = vmatprep.subr.bf16.mxu0 %v24922_v34 }
0x16d7   :  { %v15929_v47 = vpop.f32.mrb[28].mxu0  ;;  %v16000_v42 = vpop.f32.mrb[154].mxu1 }
0x16d8   :  { %v20548_v46 = vadd.f32 %v15929_v47, %v24523_v12  ;;  %v15931_v22 = vpop.f32.mrb[29].mxu0  ;;  %v18607_v15 = vpop.f32.mrb[155].mxu1  ;;  %v16018_v33 = vadd.f32 %v16000_v42, %v24530_v56 }
0x16d9   :  { %v20549_v27 = vadd.f32 %v15931_v22, %v24527_v29 }
0x16da   :  { %v16592_v5 = vmul.f32 -1.442695, %v20548_v46 }
0x16db   :  { %v16593_v14 = vmul.f32 -1.442695, %v20549_v27 }
0x16dc   :  { %21075 = vpow2.f32 %v16592_v5 }
0x16dd   :  { %21077 = vpow2.f32 %v16593_v14 }
0x16e6   :  { %v21076_v18 = vpop.eup %21075 }
0x16e7   :  { %v16012_v7 = vadd.f32 1.0, %v21076_v18  ;;  %v21078_v54 = vpop.eup %21077 }
0x16e8   :  { %v16013_v32 = vadd.f32 1.0, %v21078_v54 }
0x16e9   :  { %21079 = vrcp.f32 %v16012_v7 }
0x16f3   :  { %v21080_v6 = vpop.eup %21079 }
0x16f4   :  { %v16019_v24 = vmul.f32 %v21080_v6, %v16018_v33 }
0x16f6   :  { %v16020_v30 = vadd.f32 %v16019_v24, %v24520_v41  ;;  %v16029_v41 = vld [vmem:[#allocation4 + $0x2a5] ss:$0 sm:$0xff] }
0x16f8   :  { %21081 = vtanh.f32 %v16020_v30 }
0x16f9   :  { %21083 = vrcp.f32 %v16013_v32 }
0x1702   :  { %v21082_v12 = vpop.eup %21081 }
0x1703   :  { %v16022_v17 = vsub.f32 %v24644_v21, %v21082_v12  ;;  %v21084_v45 = vpop.eup %21083 }
0x1705   :  { %v16023_v29 = vmul.f32 %v21084_v45, %v16022_v17 }
0x1707   :  { %v16024_v10 = vadd.f32 %v21082_v12, %v16023_v29 }
0x1709   :  { %v16031_v43 = vsel %vm78_vm0, %v16024_v10, 0 }
0x170a   :  { %v16102_v63 = vand.u32 4294901760, %v16031_v43 }
0x170c   :  { %v16103_v31 = vsub.f32 %v16031_v43, %v16102_v63 }
0x170e   :  { %v16104_v20 = vand.u32 4294901760, %v16103_v31 }
0x1710   :  { %v16105_v16 = vsub.f32 %v16103_v31, %v16104_v20 }
0x1712   :  { %v16106_v56 = vand.u32 4294901760, %v16105_v16 }
0x1714   :  { %18617 = vmatmul.mubr.f32.vlgmr.msra.gmra.mrb[32].mxu0 %v16106_v56 }
0x1715   :  { %20442 = vmatpush3.bf16.msra.mxu0 %v20441_v61  ;;  %18627 = vmatprep.mubr.msk.f32.mxu0 %vm21143_vm1, %v24921_v39 }
0x1716   :  { %20443 = vmatprep.subr.bf16.mxu0 %v24922_v34 }
0x1719   :  { %20445 = vmatpush3.bf16.msra.mxu0 %v20444_v0 }
0x171a   :  { %20446 = vmatprep.subr.bf16.mxu0 %v24922_v34 }
0x171c   :  { %18628 = vmatmul.mubr.f32.vlgmr.msra.gmra.mrb[32].mxu0 %v16102_v63 }
0x171d   :  { %20448 = vmatpush3.bf16.msra.mxu0 %v20447_v60  ;;  %18638 = vmatprep.mubr.msk.f32.mxu0 %vm21143_vm1, %v24921_v39 }
0x171e   :  { %20449 = vmatprep.subr.bf16.mxu0 %v24922_v34 }
0x1721   :  { %20451 = vmatpush3.bf16.msra.mxu0 %v20450_v40 }
0x1722   :  { %20452 = vmatprep.subr.bf16.mxu0 %v24922_v34 }
0x1724   :  { %18639 = vmatmul.mubr.f32.vlgmr.msra.gmra.mrb[32].mxu0 %v16103_v31 }
0x1725   :  { %20454 = vmatpush3.bf16.msra.mxu0 %v24652_v25  ;;  %18649 = vmatprep.mubr.msk.f32.mxu0 %vm21143_vm1, %v24921_v39 }
0x1726   :  { %20455 = vmatprep.subr.bf16.mxu0 %v24922_v34 }
0x1729   :  { %20457 = vmatpush3.bf16.msra.mxu0 %v24663_v59 }
0x172a   :  { %20458 = vmatprep.subr.bf16.mxu0 %v24922_v34 }
0x172c   :  { %18650 = vmatmul.mubr.f32.vlgmr.msra.gmra.mrb[32].mxu0 %v16104_v20 }
0x172d   :  { %20460 = vmatpush3.bf16.msra.mxu0 %v20459_v2  ;;  %18660 = vmatprep.mubr.msk.f32.mxu0 %vm21143_vm1, %v24921_v39 }
0x172e   :  { %20461 = vmatprep.subr.bf16.mxu0 %v24922_v34 }
0x1731   :  { %20463 = vmatpush3.bf16.msra.mxu0 %v20462_v38 }
0x1732   :  { %20464 = vmatprep.subr.bf16.mxu0 %v24922_v34 }
0x1734   :  { %18661 = vmatmul.mubr.f32.vlgmr.msra.gmra.mrb[32].mxu0 %v16102_v63 }
0x1735   :  { %20466 = vmatpush3.bf16.msra.mxu0 %v24652_v25  ;;  %18671 = vmatprep.mubr.msk.f32.mxu0 %vm21143_vm1, %v24921_v39 }
0x1736   :  { %20467 = vmatprep.subr.bf16.mxu0 %v24922_v34 }
0x1739   :  { %20469 = vmatpush3.bf16.msra.mxu0 %v24663_v59 }
0x173c   :  { %18672 = vmatmul.mubr.f32.vlgmr.msra.gmra.mrb[32].mxu0 %v16102_v63 }
0x180f   :  { %v16514_v50 = vpop.f32.mrb[32].mxu0 }
0x1810   :  { %v20550_v21 = vadd.f32 %v16514_v50, %v16029_v41  ;;  %v18673_v49 = vpop.f32.mrb[33].mxu0 }
0x1812   :  { %16518 = vst [vmem:[#allocation7] sm:$0xff] %v20550_v21 }
0x1813   :  { %21123 = shalt.err (!%p21120_p12)
}
0x1814   :  { %s21124_s15 = scalar_lea.hbm %s24723_s2, 128 }
0x1815   :  { %p21125_p13 = scmp.ne.s32.totalorder %s24723_s2, %s21124_s15  ;;  %p21128_p0 = scmp.lt.u32.totalorder %s21124_s15, %s24723_s2 }
0x1817   :  { %p21130_p1 = pnand %p21128_p0, %p21125_p13 }
0x1819   :  { %21133 = shalt.err (!%p21130_p1)
}
0x181a   :  { %16528 = dma.vmem_to_hbm [thread:$0]  %s16526_s11, 128, %s24723_s2, [#allocation6]  }
0x181b   :  { %21136 = dma.done.wait [#allocation6], 128  }
0x181c   :  { %21137 = vsyncadd [#allocation6], 4294967168 }
0x181d   :  { %16532 = vsyncpa [#allocation5], 1 }
0x181e   :  { %16533 = vsyncpa [#allocation6], 1 }

</bundles_post_ra>
